<compile_context>
chip_gen: v7x
topology: tpu7x:2x2x1
jax: 0.10.0
libtpu: 0.0.40
codegen_flags: <defaults>
</compile_context>

<pallas_src>
import functools
import math

import jax
import jax.numpy as jnp
from jax.experimental import pallas as pl
from jax.experimental.pallas import tpu as pltpu

LANE = 128


def _round_up(x, m):
    return ((x + m - 1) // m) * m


def _pad2d(x, rows, cols):
    pr, pc = rows - x.shape[0], cols - x.shape[1]
    if pr == 0 and pc == 0:
        return x
    return jnp.pad(x, ((0, pr), (0, pc)))


def _pad_last(x, n):
    p = n - x.shape[-1]
    if p == 0:
        return x
    return jnp.pad(x, [(0, 0)] * (x.ndim - 1) + [(0, p)])


# ----------------------------------------------------------------------------
# One-time weight preparation (pad to lane-aligned shapes, cast to bf16, fuse)
# ----------------------------------------------------------------------------
def prep_linear(w, b, scale=1.0):
    """Pad K/N to multiples of 128, cast W to bf16, bias to f32 (1, Np)."""
    K, N = w.shape
    Kp, Np = _round_up(K, LANE), _round_up(N, LANE)
    wp = _pad2d(w * scale, Kp, Np).astype(jnp.bfloat16)
    bp = _pad_last(b * scale, Np).astype(jnp.float32).reshape(1, Np)
    return {"w": wp, "b": bp}


def prep_linear_fused(pieces):
    """Fuse several (w, b, scale) heads along N, each padded to a 128-lane slot."""
    K = pieces[0][0].shape[0]
    Kp = _round_up(K, LANE)
    ws, bs = [], []
    for w, b, scale in pieces:
        assert w.shape[0] == K
        Np = _round_up(w.shape[1], LANE)
        ws.append(_pad2d(w * scale, Kp, Np).astype(jnp.bfloat16))
        bs.append(_pad_last(b * scale, Np).astype(jnp.float32))
    return {"w": jnp.concatenate(ws, axis=1),
            "b": jnp.concatenate(bs).reshape(1, -1)}


def prep_norm(g, b):
    """Pad gamma/beta to 128 lanes with zeros (padded lanes stay zero)."""
    Np = _round_up(g.shape[0], LANE)
    return (_pad_last(g, Np).astype(jnp.float32).reshape(1, Np),
            _pad_last(b, Np).astype(jnp.float32).reshape(1, Np))


# ----------------------------------------------------------------------------
# Fused matmul kernels: bias + activation + residual + LayerNorm epilogue
# ----------------------------------------------------------------------------
def _epilogue(out, refs, idx, activation, has_residual, norm_n, norm_eps, o_dtype):
    if activation == "relu":
        out = jnp.maximum(out, 0.0)
    elif activation == "sigmoid":
        out = jax.nn.sigmoid(out)
    if has_residual:
        out = out + refs[idx][...].astype(jnp.float32)
        idx += 1
    if norm_n is not None:
        g_ref, bt_ref = refs[idx], refs[idx + 1]
        inv_n = 1.0 / norm_n
        mean = jnp.sum(out, axis=-1, keepdims=True) * inv_n
        var = jnp.sum(out * out, axis=-1, keepdims=True) * inv_n - mean * mean
        out = (out - mean) * jax.lax.rsqrt(var + norm_eps)
        out = out * g_ref[...] + bt_ref[...]
    return out.astype(o_dtype)


def _mm_kernel_1k(*refs, activation, has_residual, norm_n, norm_eps):
    # Single K tile: no accumulator scratch, dot + epilogue straight to output.
    a_ref, w_ref, b_ref = refs[0], refs[1], refs[2]
    o_ref = refs[-1]
    a = a_ref[...]
    if a.dtype != jnp.bfloat16:
        a = a.astype(jnp.bfloat16)
    out = jnp.dot(a, w_ref[...], preferred_element_type=jnp.float32) + b_ref[...]
    o_ref[...] = _epilogue(out, refs, 3, activation, has_residual,
                           norm_n, norm_eps, o_ref.dtype)


def _mm_kernel_acc(*refs, activation, has_residual, norm_n, norm_eps):
    # General K-reduction path with a VMEM f32 accumulator.
    a_ref, w_ref, b_ref = refs[0], refs[1], refs[2]
    o_ref, acc_ref = refs[-2], refs[-1]

    @pl.when(pl.program_id(2) == 0)
    def _init():
        acc_ref[...] = jnp.zeros_like(acc_ref)

    a = a_ref[...]
    if a.dtype != jnp.bfloat16:
        a = a.astype(jnp.bfloat16)
    acc_ref[...] += jnp.dot(a, w_ref[...], preferred_element_type=jnp.float32)

    @pl.when(pl.program_id(2) == pl.num_programs(2) - 1)
    def _finalize():
        out = acc_ref[...] + b_ref[...]
        o_ref[...] = _epilogue(out, refs, 3, activation, has_residual,
                               norm_n, norm_eps, o_ref.dtype)


def pallas_linear(x, pw, activation=None, residual=None,
                  norm=None, norm_n=None, norm_eps=1e-5,
                  out_dtype=jnp.float32):
    """x:(M,Kp) @ prepped weight (Kp,Np) + bias, with fused activation /
    residual-add / LayerNorm epilogue.  Returns (M, Np)."""
    M, K = x.shape
    Kp, Np = pw["w"].shape
    assert K == Kp, (K, Kp)

    # M tiling: multiples of 16 (bf16 sublane packing); give the i axis >= 2
    # parallel blocks when M allows so both v7x TensorCores get work.
    if M <= 256:
        Mp = _round_up(M, 16)
        TM = Mp // 2 if (Mp % 32 == 0 and Mp >= 64) else Mp
    else:
        TM = 256
        Mp = _round_up(M, TM)
    # N tiling: lane-dense, 256-aligned where possible (v6e/v7x MXU width).
    TN = 256 if Np % 256 == 0 else (128 if Np % 128 == 0 else Np)
    # K tiling: single tile whenever it fits (true for every matmul here).
    if Kp <= 512:
        TK = Kp
    else:
        TK = 512 if Kp % 512 == 0 else (256 if Kp % 256 == 0 else 128)

    has_residual = residual is not None
    if norm is not None:
        assert norm_n is not None
        assert TN == Np, "fused LayerNorm needs the whole row in one N tile"

    xp = x if Mp == M else jnp.pad(x, ((0, Mp - M), (0, 0)))
    inputs = [xp, pw["w"], pw["b"]]
    if has_residual:
        assert residual.shape == (M, Np)
        inputs.append(residual if Mp == M
                      else jnp.pad(residual, ((0, Mp - M), (0, 0))))
    if norm is not None:
        inputs += [norm[0], norm[1]]

    flops = 2 * Mp * Np * Kp
    bytes_accessed = (xp.dtype.itemsize * Mp * Kp + 2 * Kp * Np
                      + jnp.dtype(out_dtype).itemsize * Mp * Np + 4 * Np)
    if has_residual:
        bytes_accessed += 4 * Mp * Np
    transcendentals = Mp * Np if activation == "sigmoid" else 0
    cost = pl.CostEstimate(flops=flops, transcendentals=transcendentals,
                           bytes_accessed=bytes_accessed)

    kwargs = dict(activation=activation, has_residual=has_residual,
                  norm_n=norm_n if norm is not None else None,
                  norm_eps=norm_eps)

    if TK == Kp:                                   # fast path: no K reduction
        in_specs = [
            pl.BlockSpec((TM, Kp), lambda i, j: (i, 0)),
            pl.BlockSpec((Kp, TN), lambda i, j: (0, j)),
            pl.BlockSpec((1, TN), lambda i, j: (0, j)),
        ]
        if has_residual:
            in_specs.append(pl.BlockSpec((TM, TN), lambda i, j: (i, j)))
        if norm is not None:
            in_specs += [pl.BlockSpec((1, TN), lambda i, j: (0, j)),
                         pl.BlockSpec((1, TN), lambda i, j: (0, j))]
        out = pl.pallas_call(
            functools.partial(_mm_kernel_1k, **kwargs),
            out_shape=jax.ShapeDtypeStruct((Mp, Np), out_dtype),
            grid=(Mp // TM, Np // TN),
            in_specs=in_specs,
            out_specs=pl.BlockSpec((TM, TN), lambda i, j: (i, j)),
            compiler_params=pltpu.CompilerParams(
                dimension_semantics=("parallel", "parallel")),
            cost_estimate=cost,
        )(*inputs)
    else:                                          # general K-reduction path
        in_specs = [
            pl.BlockSpec((TM, TK), lambda i, j, k: (i, k)),
            pl.BlockSpec((TK, TN), lambda i, j, k: (k, j)),
            pl.BlockSpec((1, TN), lambda i, j, k: (0, j)),
        ]
        if has_residual:
            in_specs.append(pl.BlockSpec((TM, TN), lambda i, j, k: (i, j)))
        if norm is not None:
            in_specs += [pl.BlockSpec((1, TN), lambda i, j, k: (0, j)),
                         pl.BlockSpec((1, TN), lambda i, j, k: (0, j))]
        out = pl.pallas_call(
            functools.partial(_mm_kernel_acc, **kwargs),
            out_shape=jax.ShapeDtypeStruct((Mp, Np), out_dtype),
            grid=(Mp // TM, Np // TN, Kp // TK),
            in_specs=in_specs,
            out_specs=pl.BlockSpec((TM, TN), lambda i, j, k: (i, j)),
            scratch_shapes=[pltpu.VMEM((TM, TN), jnp.float32)],
            compiler_params=pltpu.CompilerParams(
                dimension_semantics=("parallel", "parallel", "arbitrary")),
            cost_estimate=cost,
        )(*inputs)
    return out[:M] if Mp != M else out


# ----------------------------------------------------------------------------
# Attention kernel: one grid step per batch element, heads split in-kernel.
# Softmax scale is already folded into the Q projection weights.
# ----------------------------------------------------------------------------
def _attention_kernel(q_ref, k_ref, v_ref, o_ref, *, nheads, dh, e_pad):
    q = q_ref[0]                                   # (Lq, Ep) bf16, pre-scaled
    k = k_ref[0]                                   # (Lk, Ep) bf16
    v = v_ref[0]                                   # (Lk, Ep) bf16
    outs = []
    for h in range(nheads):                        # static unroll; stays in VMEM
        lo = h * dh
        qh, kh, vh = q[:, lo:lo + dh], k[:, lo:lo + dh], v[:, lo:lo + dh]
        s = jax.lax.dot_general(qh, kh, (((1,), (1,)), ((), ())),
                                preferred_element_type=jnp.float32)
        m = jnp.max(s, axis=-1, keepdims=True)
        p = jnp.exp(s - m)
        # denominator via EUP vrcp (approx) -> off the VALU path
        p = p * pl.reciprocal(jnp.sum(p, axis=-1, keepdims=True), approx=True)
        outs.append(jnp.dot(p.astype(vh.dtype), vh,
                            preferred_element_type=jnp.float32))
    if e_pad > 0:                                  # keep padded lanes exactly 0
        outs.append(jnp.zeros((q.shape[0], e_pad), jnp.float32))
    o_ref[0] = jnp.concatenate(outs, axis=-1).astype(o_ref.dtype)


def pallas_attention(q, k, v, nheads, dh):
    """q:(B,Lq,Ep), k/v:(B,Lk,Ep) -> (B,Lq,Ep) bf16; no per-head HBM relayouts."""
    B, Lq, Ep = q.shape
    Lk = k.shape[1]
    kernel = functools.partial(_attention_kernel, nheads=nheads, dh=dh,
                               e_pad=Ep - nheads * dh)
    return pl.pallas_call(
        kernel,
        out_shape=jax.ShapeDtypeStruct((B, Lq, Ep), jnp.bfloat16),
        grid=(B,),
        in_specs=[pl.BlockSpec((1, Lq, Ep), lambda b: (b, 0, 0)),
                  pl.BlockSpec((1, Lk, Ep), lambda b: (b, 0, 0)),
                  pl.BlockSpec((1, Lk, Ep), lambda b: (b, 0, 0))],
        out_specs=pl.BlockSpec((1, Lq, Ep), lambda b: (b, 0, 0)),
        compiler_params=pltpu.CompilerParams(dimension_semantics=("parallel",)),
        cost_estimate=pl.CostEstimate(
            flops=4 * B * nheads * Lq * Lk * dh,
            transcendentals=B * nheads * Lq * Lk,
            bytes_accessed=2 * (B * Lq * Ep + 2 * B * Lk * Ep) + 2 * B * Lq * Ep),
    )(q.astype(jnp.bfloat16), k.astype(jnp.bfloat16), v.astype(jnp.bfloat16))


# ----------------------------------------------------------------------------
# Standalone row-tiled LayerNorm (only used for the final decoder norm)
# ----------------------------------------------------------------------------
def _ln_kernel(x_ref, g_ref, b_ref, o_ref, *, inv_n, eps):
    x = x_ref[...].astype(jnp.float32)
    mean = jnp.sum(x, axis=-1, keepdims=True) * inv_n
    var = jnp.sum(x * x, axis=-1, keepdims=True) * inv_n - mean * mean
    y = (x - mean) * jax.lax.rsqrt(var + eps)
    o_ref[...] = (y * g_ref[...] + b_ref[...]).astype(o_ref.dtype)


def pallas_layernorm(x, norm, n_valid, eps=1e-5):
    """x:(M,D) lane-dense with zero padded lanes; normalizes over n_valid lanes."""
    M, D = x.shape
    TM = min(256, _round_up(M, 8))
    Mp = _round_up(M, TM)
    xp = x if Mp == M else jnp.pad(x, ((0, Mp - M), (0, 0)))
    out = pl.pallas_call(
        functools.partial(_ln_kernel, inv_n=1.0 / n_valid, eps=eps),
        out_shape=jax.ShapeDtypeStruct((Mp, D), jnp.float32),
        grid=(Mp // TM,),
        in_specs=[pl.BlockSpec((TM, D), lambda i: (i, 0)),
                  pl.BlockSpec((1, D), lambda i: (0, 0)),
                  pl.BlockSpec((1, D), lambda i: (0, 0))],
        out_specs=pl.BlockSpec((TM, D), lambda i: (i, 0)),
        compiler_params=pltpu.CompilerParams(dimension_semantics=("parallel",)),
    )(xp, norm[0], norm[1])
    return out[:M] if Mp != M else out


# ----------------------------------------------------------------------------
# Conv as im2col + Pallas matmul
# ----------------------------------------------------------------------------
def conv2d_pallas(x_nhwc, pw, cout, stride, padding, activation=None, kh=3, kw=3):
    B, H, W, Cin = x_nhwc.shape
    xp = jnp.pad(x_nhwc, ((0, 0), (padding, padding), (padding, padding), (0, 0)))
    Hout = (H + 2 * padding - kh) // stride + 1
    Wout = (W + 2 * padding - kw) // stride + 1
    patches = [xp[:, i:i + stride * Hout:stride, j:j + stride * Wout:stride, :]
               for i in range(kh) for j in range(kw)]
    cols = jnp.concatenate(patches, axis=-1).reshape(B * Hout * Wout, kh * kw * Cin)
    cols = _pad_last(cols, pw["w"].shape[0])
    out = pallas_linear(cols, pw, activation=activation)
    # TODO(synk): stream the kh*kw shifted windows through the matmul K axis
    # (strided manual DMA) instead of materializing the im2col expansion in HBM.
    return out[:, :cout].reshape(B, Hout, Wout, cout)


# ----------------------------------------------------------------------------
# Model pieces (plain-JAX orchestration around the Pallas kernels)
# ----------------------------------------------------------------------------
def position_embedding_sine(B, H, W, num_pos_feats, temperature=10000.0):
    """DETR PositionEmbeddingSine (all-valid mask). Returns (B,H,W,2*num_pos_feats)."""
    y_embed = jnp.broadcast_to(
        jnp.arange(1, H + 1, dtype=jnp.float32)[None, :, None], (B, H, W))
    x_embed = jnp.broadcast_to(
        jnp.arange(1, W + 1, dtype=jnp.float32)[None, None, :], (B, H, W))
    eps, scale = 1e-6, 2.0 * math.pi
    y_embed = y_embed / (y_embed[:, -1:, :] + eps) * scale
    x_embed = x_embed / (x_embed[:, :, -1:] + eps) * scale
    dim_t = jnp.arange(num_pos_feats, dtype=jnp.float32)
    dim_t = temperature ** (2.0 * jnp.floor(dim_t / 2.0) / num_pos_feats)
    pos_x = x_embed[..., None] / dim_t
    pos_y = y_embed[..., None] / dim_t
    pos_x = jnp.stack([jnp.sin(pos_x[..., 0::2]), jnp.cos(pos_x[..., 1::2])],
                      axis=4).reshape(B, H, W, -1)
    pos_y = jnp.stack([jnp.sin(pos_y[..., 0::2]), jnp.cos(pos_y[..., 1::2])],
                      axis=4).reshape(B, H, W, -1)
    return jnp.concatenate([pos_y, pos_x], axis=3)


def self_attention_block(x, pos, p, norm, nheads, dh, n_valid):
    """Fused-QK self-attention with out-projection carrying residual + LayerNorm."""
    B, L, Ep = x.shape
    x2d = x.reshape(B * L, Ep)
    xq = (x + pos).reshape(B * L, Ep)
    qk = pallas_linear(xq, p["qk"], out_dtype=jnp.bfloat16)          # (B*L, 2Ep)
    v = pallas_linear(x2d, p["v"], out_dtype=jnp.bfloat16)           # (B*L, Ep)
    q = qk[:, :Ep].reshape(B, L, Ep)
    k = qk[:, Ep:].reshape(B, L, Ep)
    o = pallas_attention(q, k, v.reshape(B, L, Ep), nheads, dh)      # bf16
    out = pallas_linear(o.reshape(B * L, Ep), p["o"],
                        residual=x2d, norm=norm, norm_n=n_valid)
    return out.reshape(B, L, Ep)


def encoder_layer(src, pos, p, nheads, dh, E):
    B, L, Ep = src.shape
    src = self_attention_block(src, pos, p["sa"], p["norm1"], nheads, dh, E)
    s2 = src.reshape(B * L, Ep)
    h = pallas_linear(s2, p["ff1"], activation="relu", out_dtype=jnp.bfloat16)
    src = pallas_linear(h, p["ff2"], residual=s2, norm=p["norm2"], norm_n=E)
    return src.reshape(B, L, Ep)


def decoder_layer(tgt, query_pos, k_cross, v_cross, p, nheads, dh, E):
    B, Lq, Ep = tgt.shape
    tgt = self_attention_block(tgt, query_pos, p["sa"], p["norm1"], nheads, dh, E)
    t2 = tgt.reshape(B * Lq, Ep)
    q = pallas_linear((tgt + query_pos).reshape(B * Lq, Ep), p["q_cross"],
                      out_dtype=jnp.bfloat16).reshape(B, Lq, Ep)
    o = pallas_attention(q, k_cross, v_cross, nheads, dh)
    tgt = pallas_linear(o.reshape(B * Lq, Ep), p["o_cross"],
                        residual=t2, norm=p["norm2"], norm_n=E)
    h = pallas_linear(tgt, p["ff1"], activation="relu", out_dtype=jnp.bfloat16)
    tgt = pallas_linear(h, p["ff2"], residual=tgt, norm=p["norm3"], norm_n=E)
    return tgt.reshape(B, Lq, Ep)


# ----------------------------------------------------------------------------
# Parameter init (deterministic, synthetic — no checkpoint load)
# ----------------------------------------------------------------------------
def _lin(key, fan_in, fan_out, scale=0.05):
    kw, kb = jax.random.split(key)
    return (scale * jax.random.normal(kw, (fan_in, fan_out), jnp.float32),
            scale * jax.random.normal(kb, (fan_out,), jnp.float32))


def _mha(key, E):
    ks = jax.random.split(key, 4)
    wq, bq = _lin(ks[0], E, E)
    wk, bk = _lin(ks[1], E, E)
    wv, bv = _lin(ks[2], E, E)
    wo, bo = _lin(ks[3], E, E)
    return dict(wq=wq, bq=bq, wk=wk, bk=bk, wv=wv, bv=bv, wo=wo, bo=bo)


def init_params(key, cfg):
    E, FF = cfg["hidden_dim"], cfg["dim_feedforward"]
    ks = iter(jax.random.split(key, 64))
    p = {}
    p["bb1_w"] = 0.05 * jax.random.normal(next(ks), (3, 3, cfg["in_channels"], cfg["backbone_c1"]), jnp.float32)
    p["bb1_b"] = jnp.zeros((cfg["backbone_c1"],), jnp.float32)
    p["bb2_w"] = 0.05 * jax.random.normal(next(ks), (3, 3, cfg["backbone_c1"], cfg["backbone_c2"]), jnp.float32)
    p["bb2_b"] = jnp.zeros((cfg["backbone_c2"],), jnp.float32)
    p["proj_w"], p["proj_b"] = _lin(next(ks), cfg["backbone_c2"], E)
    p["encoder"] = []
    for _ in range(cfg["num_encoder_layers"]):
        w1, b1 = _lin(next(ks), E, FF)
        w2, b2 = _lin(next(ks), FF, E)
        p["encoder"].append(dict(
            self_attn=_mha(next(ks), E),
            norm1_g=jnp.ones((E,)), norm1_b=jnp.zeros((E,)),
            norm2_g=jnp.ones((E,)), norm2_b=jnp.zeros((E,)),
            ff_w1=w1, ff_b1=b1, ff_w2=w2, ff_b2=b2))
    p["decoder"] = []
    for _ in range(cfg["num_decoder_layers"]):
        w1, b1 = _lin(next(ks), E, FF)
        w2, b2 = _lin(next(ks), FF, E)
        p["decoder"].append(dict(
            self_attn=_mha(next(ks), E), cross_attn=_mha(next(ks), E),
            norm1_g=jnp.ones((E,)), norm1_b=jnp.zeros((E,)),
            norm2_g=jnp.ones((E,)), norm2_b=jnp.zeros((E,)),
            norm3_g=jnp.ones((E,)), norm3_b=jnp.zeros((E,)),
            ff_w1=w1, ff_b1=b1, ff_w2=w2, ff_b2=b2))
    p["dec_norm_g"] = jnp.ones((E,))
    p["dec_norm_b"] = jnp.zeros((E,))
    p["query_embed"] = 0.05 * jax.random.normal(next(ks), (cfg["num_queries"], E), jnp.float32)
    p["class_w"], p["class_b"] = _lin(next(ks), E, cfg["num_classes"] + 1)
    p["bbox_w1"], p["bbox_b1"] = _lin(next(ks), E, E)
    p["bbox_w2"], p["bbox_b2"] = _lin(next(ks), E, E)
    p["bbox_w3"], p["bbox_b3"] = _lin(next(ks), E, 4)
    return p


def _prep_self_attn(p, scale):
    return {
        # fused Q/K projection; softmax scale folded into the Q half
        "qk": prep_linear_fused([(p["wq"], p["bq"], scale), (p["wk"], p["bk"], 1.0)]),
        "v": prep_linear(p["wv"], p["bv"]),
        "o": prep_linear(p["wo"], p["bo"]),
    }


def prepare_params(params, cfg):
    """One-time: pad/cast/fuse every weight.  Nothing here runs per forward."""
    E = cfg["hidden_dim"]
    scale = 1.0 / math.sqrt(E // cfg["nheads"])
    Ep = _round_up(E, LANE)
    prep = {}
    prep["bb1"] = prep_linear(params["bb1_w"].reshape(-1, cfg["backbone_c1"]), params["bb1_b"])
    prep["bb2"] = prep_linear(params["bb2_w"].reshape(-1, cfg["backbone_c2"]), params["bb2_b"])
    prep["proj"] = prep_linear(params["proj_w"], params["proj_b"])
    prep["encoder"] = []
    for lp in params["encoder"]:
        prep["encoder"].append({
            "sa": _prep_self_attn(lp["self_attn"], scale),
            "norm1": prep_norm(lp["norm1_g"], lp["norm1_b"]),
            "norm2": prep_norm(lp["norm2_g"], lp["norm2_b"]),
            "ff1": prep_linear(lp["ff_w1"], lp["ff_b1"]),
            "ff2": prep_linear(lp["ff_w2"], lp["ff_b2"]),
        })
    prep["decoder"] = []
    for lp in params["decoder"]:
        prep["decoder"].append({
            "sa": _prep_self_attn(lp["self_attn"], scale),
            "q_cross": prep_linear(lp["cross_attn"]["wq"], lp["cross_attn"]["bq"], scale=scale),
            "o_cross": prep_linear(lp["cross_attn"]["wo"], lp["cross_attn"]["bo"]),
            "norm1": prep_norm(lp["norm1_g"], lp["norm1_b"]),
            "norm2": prep_norm(lp["norm2_g"], lp["norm2_b"]),
            "norm3": prep_norm(lp["norm3_g"], lp["norm3_b"]),
            "ff1": prep_linear(lp["ff_w1"], lp["ff_b1"]),
            "ff2": prep_linear(lp["ff_w2"], lp["ff_b2"]),
        })
    # cross-attention K / V for ALL decoder layers fused into two wide matmuls
    prep["dec_k_all"] = prep_linear_fused(
        [(lp["cross_attn"]["wk"], lp["cross_attn"]["bk"], 1.0) for lp in params["decoder"]])
    prep["dec_v_all"] = prep_linear_fused(
        [(lp["cross_attn"]["wv"], lp["cross_attn"]["bv"], 1.0) for lp in params["decoder"]])
    prep["dec_norm"] = prep_norm(params["dec_norm_g"], params["dec_norm_b"])
    prep["query_embed"] = _pad_last(params["query_embed"], Ep).astype(jnp.float32)
    # class head and bbox-MLP layer 1 fused into one lane-dense matmul
    prep["head"] = prep_linear_fused(
        [(params["class_w"], params["class_b"], 1.0),
         (params["bbox_w1"], params["bbox_b1"], 1.0)])
    prep["bbox2"] = prep_linear(params["bbox_w2"], params["bbox_b2"])
    prep["bbox3"] = prep_linear(params["bbox_w3"], params["bbox_b3"])
    return prep


# ----------------------------------------------------------------------------
# Full forward (eval-mode DETRModel.forward semantics)
# ----------------------------------------------------------------------------
def detr_forward(prep, images_nchw, cfg):
    E, NQ, NH = cfg["hidden_dim"], cfg["num_queries"], cfg["nheads"]
    dh = E // NH
    Ep = _round_up(E, LANE)
    x = jnp.transpose(images_nchw.astype(jnp.float32), (0, 2, 3, 1))   # NCHW -> NHWC

    # backbone: two 3x3 stride-2 conv+relu stages
    x = conv2d_pallas(x, prep["bb1"], cfg["backbone_c1"], stride=2, padding=1, activation="relu")
    x = conv2d_pallas(x, prep["bb2"], cfg["backbone_c2"], stride=2, padding=1, activation="relu")
    B, H, W, Cb = x.shape
    L = H * W

    # 1x1 projection conv (= matmul over tokens); output is the lane-dense
    # (B, L, 128) token slab with zeros in the padded lanes.
    xk = _pad_last(x.reshape(B * L, Cb), prep["proj"]["w"].shape[0])
    src = pallas_linear(xk, prep["proj"]).reshape(B, L, Ep)

    # sine position embedding (parameter-free trig; kept as JAX glue)
    pos = position_embedding_sine(B, H, W, E // 2).reshape(B, L, E)
    pos = _pad_last(pos, Ep)

    # transformer encoder
    memory = src
    for enc in prep["encoder"]:
        memory = encoder_layer(memory, pos, enc, NH, dh, E)

    # decoder cross-attention K / V for every layer, precomputed once
    nlayers = len(prep["decoder"])
    mem2d = memory.reshape(B * L, Ep)
    memk2d = (memory + pos).reshape(B * L, Ep)
    k_all = pallas_linear(memk2d, prep["dec_k_all"], out_dtype=jnp.bfloat16)
    v_all = pallas_linear(mem2d, prep["dec_v_all"], out_dtype=jnp.bfloat16)
    k_layers = [k_all[:, l * Ep:(l + 1) * Ep].reshape(B, L, Ep) for l in range(nlayers)]
    v_layers = [v_all[:, l * Ep:(l + 1) * Ep].reshape(B, L, Ep) for l in range(nlayers)]

    # transformer decoder
    query_pos = jnp.broadcast_to(prep["query_embed"][None], (B, NQ, Ep))
    output = jnp.zeros((B, NQ, Ep), jnp.float32)
    for l, dec in enumerate(prep["decoder"]):
        output = decoder_layer(output, query_pos, k_layers[l], v_layers[l], dec, NH, dh, E)
    # only the last layer's normalized output is needed at eval time
    hs_last = pallas_layernorm(output.reshape(B * NQ, Ep), prep["dec_norm"], n_valid=E)

    # prediction heads: class head + bbox-MLP layer 1 fused into one matmul
    ncls = cfg["num_classes"] + 1
    head_out = pallas_linear(hs_last, prep["head"])               # (B*NQ, 2*Ep)
    logits = head_out[:, :ncls].reshape(B, NQ, ncls)
    bx = jnp.maximum(head_out[:, Ep:], 0.0)                       # bbox layer-1 relu
    bx = pallas_linear(bx, prep["bbox2"], activation="relu", out_dtype=jnp.bfloat16)
    boxes = pallas_linear(bx, prep["bbox3"], activation="sigmoid")[:, :4]
    boxes = boxes.reshape(B, NQ, 4)

    # TODO(synk): training-mode aux_outputs + HungarianMatcher/compute_loss are
    # training-only loss machinery (no forward-tensor semantics here); omitted.
    return {"pred_logits": logits, "pred_boxes": boxes}


# ----------------------------------------------------------------------------
if __name__ == "__main__":
    cfg = dict(
        in_channels=3, backbone_c1=8, backbone_c2=16,
        hidden_dim=32, nheads=4, dim_feedforward=64,
        num_encoder_layers=1, num_decoder_layers=2,
        num_queries=8, num_classes=4,
    )
    key = jax.random.PRNGKey(0)
    k_param, k_img = jax.random.split(key)
    params = init_params(k_param, cfg)
    prep = prepare_params(params, cfg)            # one-time weight pad/cast/fusion
    images = jax.random.normal(k_img, (2, 3, 32, 32), jnp.float32)   # NCHW, like PyTorch

    fwd = jax.jit(functools.partial(detr_forward, cfg=cfg))
    out = fwd(prep, images)
    jax.block_until_ready(out)

    assert out["pred_logits"].shape == (2, cfg["num_queries"], cfg["num_classes"] + 1)
    assert out["pred_boxes"].shape == (2, cfg["num_queries"], 4)
    assert bool(jnp.all(jnp.isfinite(out["pred_logits"])))
    assert bool(jnp.all((out["pred_boxes"] >= 0.0) & (out["pred_boxes"] <= 1.0)))
    print("KERNEL_OK")
</pallas_src>

<mosaic_0001>
module attributes {stable_mosaic.version = 11 : i64} {
  func.func @_mm_kernel_1k(%arg0: i32, %arg1: i32, %arg2: memref<256x128xf32, #tpu.memory_space<vmem>>, %arg3: memref<128x128xbf16, #tpu.memory_space<vmem>>, %arg4: memref<1x128xf32, #tpu.memory_space<vmem>>, %arg5: memref<256x128xf32, #tpu.memory_space<vmem>>) attributes {dimension_semantics = [#tpu.dimension_semantics<parallel>, #tpu.dimension_semantics<parallel>], iteration_bounds = array<i64: 2, 1>, scalar_prefetch = 0 : i64, scratch_operands = 0 : i64, tpu.core_type = #tpu.core_type<tc>, window_params = [{transform_indices = @transform_0, window_bounds = array<i64: 256, 128>}, {transform_indices = @transform_1, window_bounds = array<i64: 128, 128>}, {transform_indices = @transform_2, window_bounds = array<i64: 1, 128>}, {transform_indices = @transform_3, window_bounds = array<i64: 256, 128>}]} {
    %c0 = arith.constant 0 : index
    %c0_0 = arith.constant 0 : index
    %0 = vector.load %arg2[%c0, %c0_0] : memref<256x128xf32, #tpu.memory_space<vmem>>, vector<256x128xf32>
    %1 = arith.truncf %0 : vector<256x128xf32> to vector<256x128xbf16>
    %c0_1 = arith.constant 0 : index
    %c0_2 = arith.constant 0 : index
    %2 = vector.load %arg3[%c0_1, %c0_2] : memref<128x128xbf16, #tpu.memory_space<vmem>>, vector<128x128xbf16>
    %cst = arith.constant dense<0.000000e+00> : vector<256x128xf32>
    %3 = tpu.matmul %1, %2, %cst {dimension_numbers = #tpu.dot_dimension_numbers<[1], [0], [0], [1], [0, 0, 1, 1], [], []>} : vector<256x128xbf16>, vector<128x128xbf16>, vector<256x128xf32> -> vector<256x128xf32>
    %c0_3 = arith.constant 0 : index
    %c0_4 = arith.constant 0 : index
    %4 = vector.load %arg4[%c0_3, %c0_4] : memref<1x128xf32, #tpu.memory_space<vmem>>, vector<1x128xf32>
    %5 = vector.broadcast %4 : vector<1x128xf32> to vector<256x128xf32>
    %6 = arith.addf %3, %5 : vector<256x128xf32>
    %cst_5 = arith.constant 0.000000e+00 : f32
    %7 = vector.broadcast %cst_5 : f32 to vector<256x128xf32>
    %8 = arith.maximumf %6, %7 : vector<256x128xf32>
    %c0_6 = arith.constant 0 : index
    %c0_7 = arith.constant 0 : index
    %9 = vector.load %arg5[%c0_6, %c0_7] : memref<256x128xf32, #tpu.memory_space<vmem>>, vector<256x128xf32>
    tpu.vector_store %arg5[%c0_6, %c0_7], %8 {strides = array<i32>} : memref<256x128xf32, #tpu.memory_space<vmem>>, vector<256x128xf32>,
    return
  }
  func.func @transform_0(%arg0: i32, %arg1: i32) -> (i32, i32) {
    %c0_i32 = arith.constant 0 : i32
    %c0_i32_0 = arith.constant 0 : i32
    return %arg0, %c0_i32 : i32, i32
  }
  func.func @transform_1(%arg0: i32, %arg1: i32) -> (i32, i32) {
    %c0_i32 = arith.constant 0 : i32
    %c0_i32_0 = arith.constant 0 : i32
    return %c0_i32, %arg1 : i32, i32
  }
  func.func @transform_2(%arg0: i32, %arg1: i32) -> (i32, i32) {
    %c0_i32 = arith.constant 0 : i32
    %c0_i32_0 = arith.constant 0 : i32
    return %c0_i32, %arg1 : i32, i32
  }
  func.func @transform_3(%arg0: i32, %arg1: i32) -> (i32, i32) {
    %c0_i32 = arith.constant 0 : i32
    return %arg0, %arg1 : i32, i32
  }
}

module attributes {stable_mosaic.version = 11 : i64} {
  func.func @_mm_kernel_1k(%arg0: i32, %arg1: i32, %arg2: memref<64x128xf32, #tpu.memory_space<vmem>>, %arg3: memref<128x128xbf16, #tpu.memory_space<vmem>>, %arg4: memref<1x128xf32, #tpu.memory_space<vmem>>, %arg5: memref<64x128xf32, #tpu.memory_space<vmem>>) attributes {dimension_semantics = [#tpu.dimension_semantics<parallel>, #tpu.dimension_semantics<parallel>], iteration_bounds = array<i64: 2, 1>, scalar_prefetch = 0 : i64, scratch_operands = 0 : i64, tpu.core_type = #tpu.core_type<tc>, window_params = [{transform_indices = @transform_0, window_bounds = array<i64: 64, 128>}, {transform_indices = @transform_1, window_bounds = array<i64: 128, 128>}, {transform_indices = @transform_2, window_bounds = array<i64: 1, 128>}, {transform_indices = @transform_3, window_bounds = array<i64: 64, 128>}]} {
    %c0 = arith.constant 0 : index
    %c0_0 = arith.constant 0 : index
    %0 = vector.load %arg2[%c0, %c0_0] : memref<64x128xf32, #tpu.memory_space<vmem>>, vector<64x128xf32>
    %1 = arith.truncf %0 : vector<64x128xf32> to vector<64x128xbf16>
    %c0_1 = arith.constant 0 : index
    %c0_2 = arith.constant 0 : index
    %2 = vector.load %arg3[%c0_1, %c0_2] : memref<128x128xbf16, #tpu.memory_space<vmem>>, vector<128x128xbf16>
    %cst = arith.constant dense<0.000000e+00> : vector<64x128xf32>
    %3 = tpu.matmul %1, %2, %cst {dimension_numbers = #tpu.dot_dimension_numbers<[1], [0], [0], [1], [0, 0, 1, 1], [], []>} : vector<64x128xbf16>, vector<128x128xbf16>, vector<64x128xf32> -> vector<64x128xf32>
    %c0_3 = arith.constant 0 : index
    %c0_4 = arith.constant 0 : index
    %4 = vector.load %arg4[%c0_3, %c0_4] : memref<1x128xf32, #tpu.memory_space<vmem>>, vector<1x128xf32>
    %5 = vector.broadcast %4 : vector<1x128xf32> to vector<64x128xf32>
    %6 = arith.addf %3, %5 : vector<64x128xf32>
    %cst_5 = arith.constant 0.000000e+00 : f32
    %7 = vector.broadcast %cst_5 : f32 to vector<64x128xf32>
    %8 = arith.maximumf %6, %7 : vector<64x128xf32>
    %c0_6 = arith.constant 0 : index
    %c0_7 = arith.constant 0 : index
    %9 = vector.load %arg5[%c0_6, %c0_7] : memref<64x128xf32, #tpu.memory_space<vmem>>, vector<64x128xf32>
    tpu.vector_store %arg5[%c0_6, %c0_7], %8 {strides = array<i32>} : memref<64x128xf32, #tpu.memory_space<vmem>>, vector<64x128xf32>,
    return
  }
  func.func @transform_0(%arg0: i32, %arg1: i32) -> (i32, i32) {
    %c0_i32 = arith.constant 0 : i32
    %c0_i32_0 = arith.constant 0 : i32
    return %arg0, %c0_i32 : i32, i32
  }
  func.func @transform_1(%arg0: i32, %arg1: i32) -> (i32, i32) {
    %c0_i32 = arith.constant 0 : i32
    %c0_i32_0 = arith.constant 0 : i32
    return %c0_i32, %arg1 : i32, i32
  }
  func.func @transform_2(%arg0: i32, %arg1: i32) -> (i32, i32) {
    %c0_i32 = arith.constant 0 : i32
    %c0_i32_0 = arith.constant 0 : i32
    return %c0_i32, %arg1 : i32, i32
  }
  func.func @transform_3(%arg0: i32, %arg1: i32) -> (i32, i32) {
    %c0_i32 = arith.constant 0 : i32
    return %arg0, %arg1 : i32, i32
  }
}

module attributes {stable_mosaic.version = 11 : i64} {
  func.func @_mm_kernel_1k(%arg0: i32, %arg1: i32, %arg2: memref<64x128xf32, #tpu.memory_space<vmem>>, %arg3: memref<128x128xbf16, #tpu.memory_space<vmem>>, %arg4: memref<1x128xf32, #tpu.memory_space<vmem>>, %arg5: memref<64x128xf32, #tpu.memory_space<vmem>>) attributes {dimension_semantics = [#tpu.dimension_semantics<parallel>, #tpu.dimension_semantics<parallel>], iteration_bounds = array<i64: 2, 1>, scalar_prefetch = 0 : i64, scratch_operands = 0 : i64, tpu.core_type = #tpu.core_type<tc>, window_params = [{transform_indices = @transform_0, window_bounds = array<i64: 64, 128>}, {transform_indices = @transform_1, window_bounds = array<i64: 128, 128>}, {transform_indices = @transform_2, window_bounds = array<i64: 1, 128>}, {transform_indices = @transform_3, window_bounds = array<i64: 64, 128>}]} {
    %c0 = arith.constant 0 : index
    %c0_0 = arith.constant 0 : index
    %0 = vector.load %arg2[%c0, %c0_0] : memref<64x128xf32, #tpu.memory_space<vmem>>, vector<64x128xf32>
    %1 = arith.truncf %0 : vector<64x128xf32> to vector<64x128xbf16>
    %c0_1 = arith.constant 0 : index
    %c0_2 = arith.constant 0 : index
    %2 = vector.load %arg3[%c0_1, %c0_2] : memref<128x128xbf16, #tpu.memory_space<vmem>>, vector<128x128xbf16>
    %cst = arith.constant dense<0.000000e+00> : vector<64x128xf32>
    %3 = tpu.matmul %1, %2, %cst {dimension_numbers = #tpu.dot_dimension_numbers<[1], [0], [0], [1], [0, 0, 1, 1], [], []>} : vector<64x128xbf16>, vector<128x128xbf16>, vector<64x128xf32> -> vector<64x128xf32>
    %c0_3 = arith.constant 0 : index
    %c0_4 = arith.constant 0 : index
    %4 = vector.load %arg4[%c0_3, %c0_4] : memref<1x128xf32, #tpu.memory_space<vmem>>, vector<1x128xf32>
    %5 = vector.broadcast %4 : vector<1x128xf32> to vector<64x128xf32>
    %6 = arith.addf %3, %5 : vector<64x128xf32>
    %c0_5 = arith.constant 0 : index
    %c0_6 = arith.constant 0 : index
    %7 = vector.load %arg5[%c0_5, %c0_6] : memref<64x128xf32, #tpu.memory_space<vmem>>, vector<64x128xf32>
    tpu.vector_store %arg5[%c0_5, %c0_6], %6 {strides = array<i32>} : memref<64x128xf32, #tpu.memory_space<vmem>>, vector<64x128xf32>,
    return
  }
  func.func @transform_0(%arg0: i32, %arg1: i32) -> (i32, i32) {
    %c0_i32 = arith.constant 0 : i32
    %c0_i32_0 = arith.constant 0 : i32
    return %arg0, %c0_i32 : i32, i32
  }
  func.func @transform_1(%arg0: i32, %arg1: i32) -> (i32, i32) {
    %c0_i32 = arith.constant 0 : i32
    %c0_i32_0 = arith.constant 0 : i32
    return %c0_i32, %arg1 : i32, i32
  }
  func.func @transform_2(%arg0: i32, %arg1: i32) -> (i32, i32) {
    %c0_i32 = arith.constant 0 : i32
    %c0_i32_0 = arith.constant 0 : i32
    return %c0_i32, %arg1 : i32, i32
  }
  func.func @transform_3(%arg0: i32, %arg1: i32) -> (i32, i32) {
    %c0_i32 = arith.constant 0 : i32
    return %arg0, %arg1 : i32, i32
  }
}

module attributes {stable_mosaic.version = 11 : i64} {
  func.func @_mm_kernel_1k(%arg0: i32, %arg1: i32, %arg2: memref<64x128xf32, #tpu.memory_space<vmem>>, %arg3: memref<128x256xbf16, #tpu.memory_space<vmem>>, %arg4: memref<1x256xf32, #tpu.memory_space<vmem>>, %arg5: memref<64x256xbf16, #tpu.memory_space<vmem>>) attributes {dimension_semantics = [#tpu.dimension_semantics<parallel>, #tpu.dimension_semantics<parallel>], iteration_bounds = array<i64: 2, 1>, scalar_prefetch = 0 : i64, scratch_operands = 0 : i64, tpu.core_type = #tpu.core_type<tc>, window_params = [{transform_indices = @transform_0, window_bounds = array<i64: 64, 128>}, {transform_indices = @transform_1, window_bounds = array<i64: 128, 256>}, {transform_indices = @transform_2, window_bounds = array<i64: 1, 256>}, {transform_indices = @transform_3, window_bounds = array<i64: 64, 256>}]} {
    %c0 = arith.constant 0 : index
    %c0_0 = arith.constant 0 : index
    %0 = vector.load %arg2[%c0, %c0_0] : memref<64x128xf32, #tpu.memory_space<vmem>>, vector<64x128xf32>
    %1 = arith.truncf %0 : vector<64x128xf32> to vector<64x128xbf16>
    %c0_1 = arith.constant 0 : index
    %c0_2 = arith.constant 0 : index
    %2 = vector.load %arg3[%c0_1, %c0_2] : memref<128x256xbf16, #tpu.memory_space<vmem>>, vector<128x256xbf16>
    %cst = arith.constant dense<0.000000e+00> : vector<64x256xf32>
    %3 = tpu.matmul %1, %2, %cst {dimension_numbers = #tpu.dot_dimension_numbers<[1], [0], [0], [1], [0, 0, 1, 1], [], []>} : vector<64x128xbf16>, vector<128x256xbf16>, vector<64x256xf32> -> vector<64x256xf32>
    %c0_3 = arith.constant 0 : index
    %c0_4 = arith.constant 0 : index
    %4 = vector.load %arg4[%c0_3, %c0_4] : memref<1x256xf32, #tpu.memory_space<vmem>>, vector<1x256xf32>
    %5 = vector.broadcast %4 : vector<1x256xf32> to vector<64x256xf32>
    %6 = arith.addf %3, %5 : vector<64x256xf32>
    %7 = arith.truncf %6 : vector<64x256xf32> to vector<64x256xbf16>
    %c0_5 = arith.constant 0 : index
    %c0_6 = arith.constant 0 : index
    %8 = vector.load %arg5[%c0_5, %c0_6] : memref<64x256xbf16, #tpu.memory_space<vmem>>, vector<64x256xbf16>
    tpu.vector_store %arg5[%c0_5, %c0_6], %7 {strides = array<i32>} : memref<64x256xbf16, #tpu.memory_space<vmem>>, vector<64x256xbf16>,
    return
  }
  func.func @transform_0(%arg0: i32, %arg1: i32) -> (i32, i32) {
    %c0_i32 = arith.constant 0 : i32
    %c0_i32_0 = arith.constant 0 : i32
    return %arg0, %c0_i32 : i32, i32
  }
  func.func @transform_1(%arg0: i32, %arg1: i32) -> (i32, i32) {
    %c0_i32 = arith.constant 0 : i32
    %c0_i32_0 = arith.constant 0 : i32
    return %c0_i32, %arg1 : i32, i32
  }
  func.func @transform_2(%arg0: i32, %arg1: i32) -> (i32, i32) {
    %c0_i32 = arith.constant 0 : i32
    %c0_i32_0 = arith.constant 0 : i32
    return %c0_i32, %arg1 : i32, i32
  }
  func.func @transform_3(%arg0: i32, %arg1: i32) -> (i32, i32) {
    %c0_i32 = arith.constant 0 : i32
    return %arg0, %arg1 : i32, i32
  }
}

module attributes {stable_mosaic.version = 11 : i64} {
  func.func @_mm_kernel_1k(%arg0: i32, %arg1: i32, %arg2: memref<64x128xf32, #tpu.memory_space<vmem>>, %arg3: memref<128x128xbf16, #tpu.memory_space<vmem>>, %arg4: memref<1x128xf32, #tpu.memory_space<vmem>>, %arg5: memref<64x128xbf16, #tpu.memory_space<vmem>>) attributes {dimension_semantics = [#tpu.dimension_semantics<parallel>, #tpu.dimension_semantics<parallel>], iteration_bounds = array<i64: 2, 1>, scalar_prefetch = 0 : i64, scratch_operands = 0 : i64, tpu.core_type = #tpu.core_type<tc>, window_params = [{transform_indices = @transform_0, window_bounds = array<i64: 64, 128>}, {transform_indices = @transform_1, window_bounds = array<i64: 128, 128>}, {transform_indices = @transform_2, window_bounds = array<i64: 1, 128>}, {transform_indices = @transform_3, window_bounds = array<i64: 64, 128>}]} {
    %c0 = arith.constant 0 : index
    %c0_0 = arith.constant 0 : index
    %0 = vector.load %arg2[%c0, %c0_0] : memref<64x128xf32, #tpu.memory_space<vmem>>, vector<64x128xf32>
    %1 = arith.truncf %0 : vector<64x128xf32> to vector<64x128xbf16>
    %c0_1 = arith.constant 0 : index
    %c0_2 = arith.constant 0 : index
    %2 = vector.load %arg3[%c0_1, %c0_2] : memref<128x128xbf16, #tpu.memory_space<vmem>>, vector<128x128xbf16>
    %cst = arith.constant dense<0.000000e+00> : vector<64x128xf32>
    %3 = tpu.matmul %1, %2, %cst {dimension_numbers = #tpu.dot_dimension_numbers<[1], [0], [0], [1], [0, 0, 1, 1], [], []>} : vector<64x128xbf16>, vector<128x128xbf16>, vector<64x128xf32> -> vector<64x128xf32>
    %c0_3 = arith.constant 0 : index
    %c0_4 = arith.constant 0 : index
    %4 = vector.load %arg4[%c0_3, %c0_4] : memref<1x128xf32, #tpu.memory_space<vmem>>, vector<1x128xf32>
    %5 = vector.broadcast %4 : vector<1x128xf32> to vector<64x128xf32>
    %6 = arith.addf %3, %5 : vector<64x128xf32>
    %7 = arith.truncf %6 : vector<64x128xf32> to vector<64x128xbf16>
    %c0_5 = arith.constant 0 : index
    %c0_6 = arith.constant 0 : index
    %8 = vector.load %arg5[%c0_5, %c0_6] : memref<64x128xbf16, #tpu.memory_space<vmem>>, vector<64x128xbf16>
    tpu.vector_store %arg5[%c0_5, %c0_6], %7 {strides = array<i32>} : memref<64x128xbf16, #tpu.memory_space<vmem>>, vector<64x128xbf16>,
    return
  }
  func.func @transform_0(%arg0: i32, %arg1: i32) -> (i32, i32) {
    %c0_i32 = arith.constant 0 : i32
    %c0_i32_0 = arith.constant 0 : i32
    return %arg0, %c0_i32 : i32, i32
  }
  func.func @transform_1(%arg0: i32, %arg1: i32) -> (i32, i32) {
    %c0_i32 = arith.constant 0 : i32
    %c0_i32_0 = arith.constant 0 : i32
    return %c0_i32, %arg1 : i32, i32
  }
  func.func @transform_2(%arg0: i32, %arg1: i32) -> (i32, i32) {
    %c0_i32 = arith.constant 0 : i32
    %c0_i32_0 = arith.constant 0 : i32
    return %c0_i32, %arg1 : i32, i32
  }
  func.func @transform_3(%arg0: i32, %arg1: i32) -> (i32, i32) {
    %c0_i32 = arith.constant 0 : i32
    return %arg0, %arg1 : i32, i32
  }
}

module attributes {stable_mosaic.version = 11 : i64} {
  func.func @_attention_kernel(%arg0: i32, %arg1: memref<1x64x128xbf16, #tpu.memory_space<vmem>>, %arg2: memref<1x64x128xbf16, #tpu.memory_space<vmem>>, %arg3: memref<1x64x128xbf16, #tpu.memory_space<vmem>>, %arg4: memref<1x64x128xbf16, #tpu.memory_space<vmem>>) attributes {dimension_semantics = [#tpu.dimension_semantics<parallel>], iteration_bounds = array<i64: 2>, scalar_prefetch = 0 : i64, scratch_operands = 0 : i64, tpu.core_type = #tpu.core_type<tc>, window_params = [{transform_indices = @transform_0, window_bounds = array<i64: 1, 64, 128>}, {transform_indices = @transform_1, window_bounds = array<i64: 1, 64, 128>}, {transform_indices = @transform_2, window_bounds = array<i64: 1, 64, 128>}, {transform_indices = @transform_3, window_bounds = array<i64: 1, 64, 128>}]} {
    %c0 = arith.constant 0 : index
    %c0_0 = arith.constant 0 : index
    %c0_1 = arith.constant 0 : index
    %0 = vector.load %arg1[%c0, %c0_0, %c0_1] : memref<1x64x128xbf16, #tpu.memory_space<vmem>>, vector<1x64x128xbf16>
    %1 = vector.shape_cast %0 : vector<1x64x128xbf16> to vector<64x128xbf16>
    %c0_2 = arith.constant 0 : index
    %c0_3 = arith.constant 0 : index
    %c0_4 = arith.constant 0 : index
    %2 = vector.load %arg2[%c0_2, %c0_3, %c0_4] : memref<1x64x128xbf16, #tpu.memory_space<vmem>>, vector<1x64x128xbf16>
    %3 = vector.shape_cast %2 : vector<1x64x128xbf16> to vector<64x128xbf16>
    %c0_5 = arith.constant 0 : index
    %c0_6 = arith.constant 0 : index
    %c0_7 = arith.constant 0 : index
    %4 = vector.load %arg3[%c0_5, %c0_6, %c0_7] : memref<1x64x128xbf16, #tpu.memory_space<vmem>>, vector<1x64x128xbf16>
    %5 = vector.shape_cast %4 : vector<1x64x128xbf16> to vector<64x128xbf16>
    %6 = vector.extract_strided_slice %1 {offsets = [0, 0], sizes = [64, 8], strides = [1, 1]} : vector<64x128xbf16> to vector<64x8xbf16>
    %7 = vector.extract_strided_slice %3 {offsets = [0, 0], sizes = [64, 8], strides = [1, 1]} : vector<64x128xbf16> to vector<64x8xbf16>
    %8 = vector.extract_strided_slice %5 {offsets = [0, 0], sizes = [64, 8], strides = [1, 1]} : vector<64x128xbf16> to vector<64x8xbf16>
    %cst = arith.constant dense<0.000000e+00> : vector<64x64xf32>
    %9 = tpu.matmul %6, %7, %cst {dimension_numbers = #tpu.dot_dimension_numbers<[1], [1], [0], [0], [0, 0, 1, 0], [], []>} : vector<64x8xbf16>, vector<64x8xbf16>, vector<64x64xf32> -> vector<64x64xf32>
    %cst_8 = arith.constant dense<0xFF800000> : vector<64xf32>
    %10 = vector.multi_reduction <maximumf>, %9, %cst_8 [1] : vector<64x64xf32> to vector<64xf32>
    %11 = vector.shape_cast %10 : vector<64xf32> to vector<64x1xf32>
    %12 = vector.broadcast %11 : vector<64x1xf32> to vector<64x64xf32>
    %13 = arith.subf %9, %12 : vector<64x64xf32>
    %14 = math.exp %13 : vector<64x64xf32>
    %cst_9 = arith.constant dense<0.000000e+00> : vector<64xf32>
    %15 = vector.multi_reduction <add>, %14, %cst_9 [1] : vector<64x64xf32> to vector<64xf32>
    %16 = vector.shape_cast %15 : vector<64xf32> to vector<64x1xf32>
    %17 = tpu.reciprocal %16 {approx = true} : vector<64x1xf32> -> vector<64x1xf32>
    %18 = vector.broadcast %17 : vector<64x1xf32> to vector<64x64xf32>
    %19 = arith.mulf %14, %18 : vector<64x64xf32>
    %20 = arith.truncf %19 : vector<64x64xf32> to vector<64x64xbf16>
    %cst_10 = arith.constant dense<0.000000e+00> : vector<64x8xf32>
    %21 = tpu.matmul %20, %8, %cst_10 {dimension_numbers = #tpu.dot_dimension_numbers<[1], [0], [0], [1], [0, 0, 1, 1], [], []>} : vector<64x64xbf16>, vector<64x8xbf16>, vector<64x8xf32> -> vector<64x8xf32>
    %22 = vector.extract_strided_slice %1 {offsets = [0, 8], sizes = [64, 8], strides = [1, 1]} : vector<64x128xbf16> to vector<64x8xbf16>
    %23 = vector.extract_strided_slice %3 {offsets = [0, 8], sizes = [64, 8], strides = [1, 1]} : vector<64x128xbf16> to vector<64x8xbf16>
    %24 = vector.extract_strided_slice %5 {offsets = [0, 8], sizes = [64, 8], strides = [1, 1]} : vector<64x128xbf16> to vector<64x8xbf16>
    %cst_11 = arith.constant dense<0.000000e+00> : vector<64x64xf32>
    %25 = tpu.matmul %22, %23, %cst_11 {dimension_numbers = #tpu.dot_dimension_numbers<[1], [1], [0], [0], [0, 0, 1, 0], [], []>} : vector<64x8xbf16>, vector<64x8xbf16>, vector<64x64xf32> -> vector<64x64xf32>
    %cst_12 = arith.constant dense<0xFF800000> : vector<64xf32>
    %26 = vector.multi_reduction <maximumf>, %25, %cst_12 [1] : vector<64x64xf32> to vector<64xf32>
    %27 = vector.shape_cast %26 : vector<64xf32> to vector<64x1xf32>
    %28 = vector.broadcast %27 : vector<64x1xf32> to vector<64x64xf32>
    %29 = arith.subf %25, %28 : vector<64x64xf32>
    %30 = math.exp %29 : vector<64x64xf32>
    %cst_13 = arith.constant dense<0.000000e+00> : vector<64xf32>
    %31 = vector.multi_reduction <add>, %30, %cst_13 [1] : vector<64x64xf32> to vector<64xf32>
    %32 = vector.shape_cast %31 : vector<64xf32> to vector<64x1xf32>
    %33 = tpu.reciprocal %32 {approx = true} : vector<64x1xf32> -> vector<64x1xf32>
    %34 = vector.broadcast %33 : vector<64x1xf32> to vector<64x64xf32>
    %35 = arith.mulf %30, %34 : vector<64x64xf32>
    %36 = arith.truncf %35 : vector<64x64xf32> to vector<64x64xbf16>
    %cst_14 = arith.constant dense<0.000000e+00> : vector<64x8xf32>
    %37 = tpu.matmul %36, %24, %cst_14 {dimension_numbers = #tpu.dot_dimension_numbers<[1], [0], [0], [1], [0, 0, 1, 1], [], []>} : vector<64x64xbf16>, vector<64x8xbf16>, vector<64x8xf32> -> vector<64x8xf32>
    %38 = vector.extract_strided_slice %1 {offsets = [0, 16], sizes = [64, 8], strides = [1, 1]} : vector<64x128xbf16> to vector<64x8xbf16>
    %39 = vector.extract_strided_slice %3 {offsets = [0, 16], sizes = [64, 8], strides = [1, 1]} : vector<64x128xbf16> to vector<64x8xbf16>
    %40 = vector.extract_strided_slice %5 {offsets = [0, 16], sizes = [64, 8], strides = [1, 1]} : vector<64x128xbf16> to vector<64x8xbf16>
    %cst_15 = arith.constant dense<0.000000e+00> : vector<64x64xf32>
    %41 = tpu.matmul %38, %39, %cst_15 {dimension_numbers = #tpu.dot_dimension_numbers<[1], [1], [0], [0], [0, 0, 1, 0], [], []>} : vector<64x8xbf16>, vector<64x8xbf16>, vector<64x64xf32> -> vector<64x64xf32>
    %cst_16 = arith.constant dense<0xFF800000> : vector<64xf32>
    %42 = vector.multi_reduction <maximumf>, %41, %cst_16 [1] : vector<64x64xf32> to vector<64xf32>
    %43 = vector.shape_cast %42 : vector<64xf32> to vector<64x1xf32>
    %44 = vector.broadcast %43 : vector<64x1xf32> to vector<64x64xf32>
    %45 = arith.subf %41, %44 : vector<64x64xf32>
    %46 = math.exp %45 : vector<64x64xf32>
    %cst_17 = arith.constant dense<0.000000e+00> : vector<64xf32>
    %47 = vector.multi_reduction <add>, %46, %cst_17 [1] : vector<64x64xf32> to vector<64xf32>
    %48 = vector.shape_cast %47 : vector<64xf32> to vector<64x1xf32>
    %49 = tpu.reciprocal %48 {approx = true} : vector<64x1xf32> -> vector<64x1xf32>
    %50 = vector.broadcast %49 : vector<64x1xf32> to vector<64x64xf32>
    %51 = arith.mulf %46, %50 : vector<64x64xf32>
    %52 = arith.truncf %51 : vector<64x64xf32> to vector<64x64xbf16>
    %cst_18 = arith.constant dense<0.000000e+00> : vector<64x8xf32>
    %53 = tpu.matmul %52, %40, %cst_18 {dimension_numbers = #tpu.dot_dimension_numbers<[1], [0], [0], [1], [0, 0, 1, 1], [], []>} : vector<64x64xbf16>, vector<64x8xbf16>, vector<64x8xf32> -> vector<64x8xf32>
    %54 = vector.extract_strided_slice %1 {offsets = [0, 24], sizes = [64, 8], strides = [1, 1]} : vector<64x128xbf16> to vector<64x8xbf16>
    %55 = vector.extract_strided_slice %3 {offsets = [0, 24], sizes = [64, 8], strides = [1, 1]} : vector<64x128xbf16> to vector<64x8xbf16>
    %56 = vector.extract_strided_slice %5 {offsets = [0, 24], sizes = [64, 8], strides = [1, 1]} : vector<64x128xbf16> to vector<64x8xbf16>
    %cst_19 = arith.constant dense<0.000000e+00> : vector<64x64xf32>
    %57 = tpu.matmul %54, %55, %cst_19 {dimension_numbers = #tpu.dot_dimension_numbers<[1], [1], [0], [0], [0, 0, 1, 0], [], []>} : vector<64x8xbf16>, vector<64x8xbf16>, vector<64x64xf32> -> vector<64x64xf32>
    %cst_20 = arith.constant dense<0xFF800000> : vector<64xf32>
    %58 = vector.multi_reduction <maximumf>, %57, %cst_20 [1] : vector<64x64xf32> to vector<64xf32>
    %59 = vector.shape_cast %58 : vector<64xf32> to vector<64x1xf32>
    %60 = vector.broadcast %59 : vector<64x1xf32> to vector<64x64xf32>
    %61 = arith.subf %57, %60 : vector<64x64xf32>
    %62 = math.exp %61 : vector<64x64xf32>
    %cst_21 = arith.constant dense<0.000000e+00> : vector<64xf32>
    %63 = vector.multi_reduction <add>, %62, %cst_21 [1] : vector<64x64xf32> to vector<64xf32>
    %64 = vector.shape_cast %63 : vector<64xf32> to vector<64x1xf32>
    %65 = tpu.reciprocal %64 {approx = true} : vector<64x1xf32> -> vector<64x1xf32>
    %66 = vector.broadcast %65 : vector<64x1xf32> to vector<64x64xf32>
    %67 = arith.mulf %62, %66 : vector<64x64xf32>
    %68 = arith.truncf %67 : vector<64x64xf32> to vector<64x64xbf16>
    %cst_22 = arith.constant dense<0.000000e+00> : vector<64x8xf32>
    %69 = tpu.matmul %68, %56, %cst_22 {dimension_numbers = #tpu.dot_dimension_numbers<[1], [0], [0], [1], [0, 0, 1, 1], [], []>} : vector<64x64xbf16>, vector<64x8xbf16>, vector<64x8xf32> -> vector<64x8xf32>
    %cst_23 = arith.constant 0.000000e+00 : f32
    %70 = vector.broadcast %cst_23 : f32 to vector<64x96xf32>
    %71 = tpu.concatenate %21, %37, %53, %69, %70 in 1 : vector<64x8xf32>, vector<64x8xf32>, vector<64x8xf32>, vector<64x8xf32>, vector<64x96xf32> -> vector<64x128xf32>
    %72 = arith.truncf %71 : vector<64x128xf32> to vector<64x128xbf16>
    %c0_24 = arith.constant 0 : index
    %c0_25 = arith.constant 0 : index
    %c0_26 = arith.constant 0 : index
    %73 = vector.load %arg4[%c0_24, %c0_25, %c0_26] : memref<1x64x128xbf16, #tpu.memory_space<vmem>>, vector<1x64x128xbf16>
    %74 = vector.shape_cast %73 : vector<1x64x128xbf16> to vector<64x128xbf16>
    %75 = vector.shape_cast %72 : vector<64x128xbf16> to vector<1x64x128xbf16>
    tpu.vector_store %arg4[%c0_24, %c0_25, %c0_26], %75 {strides = array<i32>} : memref<1x64x128xbf16, #tpu.memory_space<vmem>>, vector<1x64x128xbf16>,
    return
  }
  func.func @transform_0(%arg0: i32) -> (i32, i32, i32) {
    %c0_i32 = arith.constant 0 : i32
    %c0_i32_0 = arith.constant 0 : i32
    %c0_i32_1 = arith.constant 0 : i32
    return %arg0, %c0_i32, %c0_i32_0 : i32, i32, i32
  }
  func.func @transform_1(%arg0: i32) -> (i32, i32, i32) {
    %c0_i32 = arith.constant 0 : i32
    %c0_i32_0 = arith.constant 0 : i32
    %c0_i32_1 = arith.constant 0 : i32
    return %arg0, %c0_i32, %c0_i32_0 : i32, i32, i32
  }
  func.func @transform_2(%arg0: i32) -> (i32, i32, i32) {
    %c0_i32 = arith.constant 0 : i32
    %c0_i32_0 = arith.constant 0 : i32
    %c0_i32_1 = arith.constant 0 : i32
    return %arg0, %c0_i32, %c0_i32_0 : i32, i32, i32
  }
  func.func @transform_3(%arg0: i32) -> (i32, i32, i32) {
    %c0_i32 = arith.constant 0 : i32
    %c0_i32_0 = arith.constant 0 : i32
    %c0_i32_1 = arith.constant 0 : i32
    return %arg0, %c0_i32, %c0_i32_0 : i32, i32, i32
  }
}

module attributes {stable_mosaic.version = 11 : i64} {
  func.func @_mm_kernel_1k(%arg0: i32, %arg1: i32, %arg2: memref<64x128xbf16, #tpu.memory_space<vmem>>, %arg3: memref<128x128xbf16, #tpu.memory_space<vmem>>, %arg4: memref<1x128xf32, #tpu.memory_space<vmem>>, %arg5: memref<64x128xf32, #tpu.memory_space<vmem>>, %arg6: memref<1x128xf32, #tpu.memory_space<vmem>>, %arg7: memref<1x128xf32, #tpu.memory_space<vmem>>, %arg8: memref<64x128xf32, #tpu.memory_space<vmem>>) attributes {dimension_semantics = [#tpu.dimension_semantics<parallel>, #tpu.dimension_semantics<parallel>], iteration_bounds = array<i64: 2, 1>, scalar_prefetch = 0 : i64, scratch_operands = 0 : i64, tpu.core_type = #tpu.core_type<tc>, window_params = [{transform_indices = @transform_0, window_bounds = array<i64: 64, 128>}, {transform_indices = @transform_1, window_bounds = array<i64: 128, 128>}, {transform_indices = @transform_2, window_bounds = array<i64: 1, 128>}, {transform_indices = @transform_3, window_bounds = array<i64: 64, 128>}, {transform_indices = @transform_4, window_bounds = array<i64: 1, 128>}, {transform_indices = @transform_5, window_bounds = array<i64: 1, 128>}, {transform_indices = @transform_6, window_bounds = array<i64: 64, 128>}]} {
    %c0 = arith.constant 0 : index
    %c0_0 = arith.constant 0 : index
    %0 = vector.load %arg2[%c0, %c0_0] : memref<64x128xbf16, #tpu.memory_space<vmem>>, vector<64x128xbf16>
    %c0_1 = arith.constant 0 : index
    %c0_2 = arith.constant 0 : index
    %1 = vector.load %arg3[%c0_1, %c0_2] : memref<128x128xbf16, #tpu.memory_space<vmem>>, vector<128x128xbf16>
    %cst = arith.constant dense<0.000000e+00> : vector<64x128xf32>
    %2 = tpu.matmul %0, %1, %cst {dimension_numbers = #tpu.dot_dimension_numbers<[1], [0], [0], [1], [0, 0, 1, 1], [], []>} : vector<64x128xbf16>, vector<128x128xbf16>, vector<64x128xf32> -> vector<64x128xf32>
    %c0_3 = arith.constant 0 : index
    %c0_4 = arith.constant 0 : index
    %3 = vector.load %arg4[%c0_3, %c0_4] : memref<1x128xf32, #tpu.memory_space<vmem>>, vector<1x128xf32>
    %4 = vector.broadcast %3 : vector<1x128xf32> to vector<64x128xf32>
    %5 = arith.addf %2, %4 : vector<64x128xf32>
    %c0_5 = arith.constant 0 : index
    %c0_6 = arith.constant 0 : index
    %6 = vector.load %arg5[%c0_5, %c0_6] : memref<64x128xf32, #tpu.memory_space<vmem>>, vector<64x128xf32>
    %7 = arith.addf %5, %6 : vector<64x128xf32>
    %cst_7 = arith.constant dense<0.000000e+00> : vector<64xf32>
    %8 = vector.multi_reduction <add>, %7, %cst_7 [1] : vector<64x128xf32> to vector<64xf32>
    %9 = vector.shape_cast %8 : vector<64xf32> to vector<64x1xf32>
    %cst_8 = arith.constant 3.125000e-02 : f32
    %10 = vector.broadcast %cst_8 : f32 to vector<64x1xf32>
    %11 = arith.mulf %9, %10 : vector<64x1xf32>
    %12 = arith.mulf %7, %7 : vector<64x128xf32>
    %cst_9 = arith.constant dense<0.000000e+00> : vector<64xf32>
    %13 = vector.multi_reduction <add>, %12, %cst_9 [1] : vector<64x128xf32> to vector<64xf32>
    %14 = vector.shape_cast %13 : vector<64xf32> to vector<64x1xf32>
    %cst_10 = arith.constant 3.125000e-02 : f32
    %15 = vector.broadcast %cst_10 : f32 to vector<64x1xf32>
    %16 = arith.mulf %14, %15 : vector<64x1xf32>
    %17 = arith.mulf %11, %11 : vector<64x1xf32>
    %18 = arith.subf %16, %17 : vector<64x1xf32>
    %19 = vector.broadcast %11 : vector<64x1xf32> to vector<64x128xf32>
    %20 = arith.subf %7, %19 : vector<64x128xf32>
    %cst_11 = arith.constant 9.99999974E-6 : f32
    %21 = vector.broadcast %cst_11 : f32 to vector<64x1xf32>
    %22 = arith.addf %18, %21 : vector<64x1xf32>
    %23 = math.rsqrt %22 : vector<64x1xf32>
    %24 = vector.broadcast %23 : vector<64x1xf32> to vector<64x128xf32>
    %25 = arith.mulf %20, %24 : vector<64x128xf32>
    %c0_12 = arith.constant 0 : index
    %c0_13 = arith.constant 0 : index
    %26 = vector.load %arg6[%c0_12, %c0_13] : memref<1x128xf32, #tpu.memory_space<vmem>>, vector<1x128xf32>
    %27 = vector.broadcast %26 : vector<1x128xf32> to vector<64x128xf32>
    %28 = arith.mulf %25, %27 : vector<64x128xf32>
    %c0_14 = arith.constant 0 : index
    %c0_15 = arith.constant 0 : index
    %29 = vector.load %arg7[%c0_14, %c0_15] : memref<1x128xf32, #tpu.memory_space<vmem>>, vector<1x128xf32>
    %30 = vector.broadcast %29 : vector<1x128xf32> to vector<64x128xf32>
    %31 = arith.addf %28, %30 : vector<64x128xf32>
    %c0_16 = arith.constant 0 : index
    %c0_17 = arith.constant 0 : index
    %32 = vector.load %arg8[%c0_16, %c0_17] : memref<64x128xf32, #tpu.memory_space<vmem>>, vector<64x128xf32>
    tpu.vector_store %arg8[%c0_16, %c0_17], %31 {strides = array<i32>} : memref<64x128xf32, #tpu.memory_space<vmem>>, vector<64x128xf32>,
    return
  }
  func.func @transform_0(%arg0: i32, %arg1: i32) -> (i32, i32) {
    %c0_i32 = arith.constant 0 : i32
    %c0_i32_0 = arith.constant 0 : i32
    return %arg0, %c0_i32 : i32, i32
  }
  func.func @transform_1(%arg0: i32, %arg1: i32) -> (i32, i32) {
    %c0_i32 = arith.constant 0 : i32
    %c0_i32_0 = arith.constant 0 : i32
    return %c0_i32, %arg1 : i32, i32
  }
  func.func @transform_2(%arg0: i32, %arg1: i32) -> (i32, i32) {
    %c0_i32 = arith.constant 0 : i32
    %c0_i32_0 = arith.constant 0 : i32
    return %c0_i32, %arg1 : i32, i32
  }
  func.func @transform_3(%arg0: i32, %arg1: i32) -> (i32, i32) {
    %c0_i32 = arith.constant 0 : i32
    return %arg0, %arg1 : i32, i32
  }
  func.func @transform_4(%arg0: i32, %arg1: i32) -> (i32, i32) {
    %c0_i32 = arith.constant 0 : i32
    %c0_i32_0 = arith.constant 0 : i32
    return %c0_i32, %arg1 : i32, i32
  }
  func.func @transform_5(%arg0: i32, %arg1: i32) -> (i32, i32) {
    %c0_i32 = arith.constant 0 : i32
    %c0_i32_0 = arith.constant 0 : i32
    return %c0_i32, %arg1 : i32, i32
  }
  func.func @transform_6(%arg0: i32, %arg1: i32) -> (i32, i32) {
    %c0_i32 = arith.constant 0 : i32
    return %arg0, %arg1 : i32, i32
  }
}

module attributes {stable_mosaic.version = 11 : i64} {
  func.func @_mm_kernel_1k(%arg0: i32, %arg1: i32, %arg2: memref<64x128xf32, #tpu.memory_space<vmem>>, %arg3: memref<128x128xbf16, #tpu.memory_space<vmem>>, %arg4: memref<1x128xf32, #tpu.memory_space<vmem>>, %arg5: memref<64x128xbf16, #tpu.memory_space<vmem>>) attributes {dimension_semantics = [#tpu.dimension_semantics<parallel>, #tpu.dimension_semantics<parallel>], iteration_bounds = array<i64: 2, 1>, scalar_prefetch = 0 : i64, scratch_operands = 0 : i64, tpu.core_type = #tpu.core_type<tc>, window_params = [{transform_indices = @transform_0, window_bounds = array<i64: 64, 128>}, {transform_indices = @transform_1, window_bounds = array<i64: 128, 128>}, {transform_indices = @transform_2, window_bounds = array<i64: 1, 128>}, {transform_indices = @transform_3, window_bounds = array<i64: 64, 128>}]} {
    %c0 = arith.constant 0 : index
    %c0_0 = arith.constant 0 : index
    %0 = vector.load %arg2[%c0, %c0_0] : memref<64x128xf32, #tpu.memory_space<vmem>>, vector<64x128xf32>
    %1 = arith.truncf %0 : vector<64x128xf32> to vector<64x128xbf16>
    %c0_1 = arith.constant 0 : index
    %c0_2 = arith.constant 0 : index
    %2 = vector.load %arg3[%c0_1, %c0_2] : memref<128x128xbf16, #tpu.memory_space<vmem>>, vector<128x128xbf16>
    %cst = arith.constant dense<0.000000e+00> : vector<64x128xf32>
    %3 = tpu.matmul %1, %2, %cst {dimension_numbers = #tpu.dot_dimension_numbers<[1], [0], [0], [1], [0, 0, 1, 1], [], []>} : vector<64x128xbf16>, vector<128x128xbf16>, vector<64x128xf32> -> vector<64x128xf32>
    %c0_3 = arith.constant 0 : index
    %c0_4 = arith.constant 0 : index
    %4 = vector.load %arg4[%c0_3, %c0_4] : memref<1x128xf32, #tpu.memory_space<vmem>>, vector<1x128xf32>
    %5 = vector.broadcast %4 : vector<1x128xf32> to vector<64x128xf32>
    %6 = arith.addf %3, %5 : vector<64x128xf32>
    %cst_5 = arith.constant 0.000000e+00 : f32
    %7 = vector.broadcast %cst_5 : f32 to vector<64x128xf32>
    %8 = arith.maximumf %6, %7 : vector<64x128xf32>
    %9 = arith.truncf %8 : vector<64x128xf32> to vector<64x128xbf16>
    %c0_6 = arith.constant 0 : index
    %c0_7 = arith.constant 0 : index
    %10 = vector.load %arg5[%c0_6, %c0_7] : memref<64x128xbf16, #tpu.memory_space<vmem>>, vector<64x128xbf16>
    tpu.vector_store %arg5[%c0_6, %c0_7], %9 {strides = array<i32>} : memref<64x128xbf16, #tpu.memory_space<vmem>>, vector<64x128xbf16>,
    return
  }
  func.func @transform_0(%arg0: i32, %arg1: i32) -> (i32, i32) {
    %c0_i32 = arith.constant 0 : i32
    %c0_i32_0 = arith.constant 0 : i32
    return %arg0, %c0_i32 : i32, i32
  }
  func.func @transform_1(%arg0: i32, %arg1: i32) -> (i32, i32) {
    %c0_i32 = arith.constant 0 : i32
    %c0_i32_0 = arith.constant 0 : i32
    return %c0_i32, %arg1 : i32, i32
  }
  func.func @transform_2(%arg0: i32, %arg1: i32) -> (i32, i32) {
    %c0_i32 = arith.constant 0 : i32
    %c0_i32_0 = arith.constant 0 : i32
    return %c0_i32, %arg1 : i32, i32
  }
  func.func @transform_3(%arg0: i32, %arg1: i32) -> (i32, i32) {
    %c0_i32 = arith.constant 0 : i32
    return %arg0, %arg1 : i32, i32
  }
}

module attributes {stable_mosaic.version = 11 : i64} {
  func.func @_mm_kernel_1k(%arg0: i32, %arg1: i32, %arg2: memref<16x128xf32, #tpu.memory_space<vmem>>, %arg3: memref<128x256xbf16, #tpu.memory_space<vmem>>, %arg4: memref<1x256xf32, #tpu.memory_space<vmem>>, %arg5: memref<16x256xbf16, #tpu.memory_space<vmem>>) attributes {dimension_semantics = [#tpu.dimension_semantics<parallel>, #tpu.dimension_semantics<parallel>], iteration_bounds = array<i64: 1, 1>, scalar_prefetch = 0 : i64, scratch_operands = 0 : i64, tpu.core_type = #tpu.core_type<tc>, window_params = [{transform_indices = @transform_0, window_bounds = array<i64: 16, 128>}, {transform_indices = @transform_1, window_bounds = array<i64: 128, 256>}, {transform_indices = @transform_2, window_bounds = array<i64: 1, 256>}, {transform_indices = @transform_3, window_bounds = array<i64: 16, 256>}]} {
    %c0 = arith.constant 0 : index
    %c0_0 = arith.constant 0 : index
    %0 = vector.load %arg2[%c0, %c0_0] : memref<16x128xf32, #tpu.memory_space<vmem>>, vector<16x128xf32>
    %1 = arith.truncf %0 : vector<16x128xf32> to vector<16x128xbf16>
    %c0_1 = arith.constant 0 : index
    %c0_2 = arith.constant 0 : index
    %2 = vector.load %arg3[%c0_1, %c0_2] : memref<128x256xbf16, #tpu.memory_space<vmem>>, vector<128x256xbf16>
    %cst = arith.constant dense<0.000000e+00> : vector<16x256xf32>
    %3 = tpu.matmul %1, %2, %cst {dimension_numbers = #tpu.dot_dimension_numbers<[1], [0], [0], [1], [0, 0, 1, 1], [], []>} : vector<16x128xbf16>, vector<128x256xbf16>, vector<16x256xf32> -> vector<16x256xf32>
    %c0_3 = arith.constant 0 : index
    %c0_4 = arith.constant 0 : index
    %4 = vector.load %arg4[%c0_3, %c0_4] : memref<1x256xf32, #tpu.memory_space<vmem>>, vector<1x256xf32>
    %5 = vector.broadcast %4 : vector<1x256xf32> to vector<16x256xf32>
    %6 = arith.addf %3, %5 : vector<16x256xf32>
    %7 = arith.truncf %6 : vector<16x256xf32> to vector<16x256xbf16>
    %c0_5 = arith.constant 0 : index
    %c0_6 = arith.constant 0 : index
    %8 = vector.load %arg5[%c0_5, %c0_6] : memref<16x256xbf16, #tpu.memory_space<vmem>>, vector<16x256xbf16>
    tpu.vector_store %arg5[%c0_5, %c0_6], %7 {strides = array<i32>} : memref<16x256xbf16, #tpu.memory_space<vmem>>, vector<16x256xbf16>,
    return
  }
  func.func @transform_0(%arg0: i32, %arg1: i32) -> (i32, i32) {
    %c0_i32 = arith.constant 0 : i32
    %c0_i32_0 = arith.constant 0 : i32
    return %arg0, %c0_i32 : i32, i32
  }
  func.func @transform_1(%arg0: i32, %arg1: i32) -> (i32, i32) {
    %c0_i32 = arith.constant 0 : i32
    %c0_i32_0 = arith.constant 0 : i32
    return %c0_i32, %arg1 : i32, i32
  }
  func.func @transform_2(%arg0: i32, %arg1: i32) -> (i32, i32) {
    %c0_i32 = arith.constant 0 : i32
    %c0_i32_0 = arith.constant 0 : i32
    return %c0_i32, %arg1 : i32, i32
  }
  func.func @transform_3(%arg0: i32, %arg1: i32) -> (i32, i32) {
    %c0_i32 = arith.constant 0 : i32
    return %arg0, %arg1 : i32, i32
  }
}

module attributes {stable_mosaic.version = 11 : i64} {
  func.func @_mm_kernel_1k(%arg0: i32, %arg1: i32, %arg2: memref<16x128xf32, #tpu.memory_space<vmem>>, %arg3: memref<128x128xbf16, #tpu.memory_space<vmem>>, %arg4: memref<1x128xf32, #tpu.memory_space<vmem>>, %arg5: memref<16x128xbf16, #tpu.memory_space<vmem>>) attributes {dimension_semantics = [#tpu.dimension_semantics<parallel>, #tpu.dimension_semantics<parallel>], iteration_bounds = array<i64: 1, 1>, scalar_prefetch = 0 : i64, scratch_operands = 0 : i64, tpu.core_type = #tpu.core_type<tc>, window_params = [{transform_indices = @transform_0, window_bounds = array<i64: 16, 128>}, {transform_indices = @transform_1, window_bounds = array<i64: 128, 128>}, {transform_indices = @transform_2, window_bounds = array<i64: 1, 128>}, {transform_indices = @transform_3, window_bounds = array<i64: 16, 128>}]} {
    %c0 = arith.constant 0 : index
    %c0_0 = arith.constant 0 : index
    %0 = vector.load %arg2[%c0, %c0_0] : memref<16x128xf32, #tpu.memory_space<vmem>>, vector<16x128xf32>
    %1 = arith.truncf %0 : vector<16x128xf32> to vector<16x128xbf16>
    %c0_1 = arith.constant 0 : index
    %c0_2 = arith.constant 0 : index
    %2 = vector.load %arg3[%c0_1, %c0_2] : memref<128x128xbf16, #tpu.memory_space<vmem>>, vector<128x128xbf16>
    %cst = arith.constant dense<0.000000e+00> : vector<16x128xf32>
    %3 = tpu.matmul %1, %2, %cst {dimension_numbers = #tpu.dot_dimension_numbers<[1], [0], [0], [1], [0, 0, 1, 1], [], []>} : vector<16x128xbf16>, vector<128x128xbf16>, vector<16x128xf32> -> vector<16x128xf32>
    %c0_3 = arith.constant 0 : index
    %c0_4 = arith.constant 0 : index
    %4 = vector.load %arg4[%c0_3, %c0_4] : memref<1x128xf32, #tpu.memory_space<vmem>>, vector<1x128xf32>
    %5 = vector.broadcast %4 : vector<1x128xf32> to vector<16x128xf32>
    %6 = arith.addf %3, %5 : vector<16x128xf32>
    %7 = arith.truncf %6 : vector<16x128xf32> to vector<16x128xbf16>
    %c0_5 = arith.constant 0 : index
    %c0_6 = arith.constant 0 : index
    %8 = vector.load %arg5[%c0_5, %c0_6] : memref<16x128xbf16, #tpu.memory_space<vmem>>, vector<16x128xbf16>
    tpu.vector_store %arg5[%c0_5, %c0_6], %7 {strides = array<i32>} : memref<16x128xbf16, #tpu.memory_space<vmem>>, vector<16x128xbf16>,
    return
  }
  func.func @transform_0(%arg0: i32, %arg1: i32) -> (i32, i32) {
    %c0_i32 = arith.constant 0 : i32
    %c0_i32_0 = arith.constant 0 : i32
    return %arg0, %c0_i32 : i32, i32
  }
  func.func @transform_1(%arg0: i32, %arg1: i32) -> (i32, i32) {
    %c0_i32 = arith.constant 0 : i32
    %c0_i32_0 = arith.constant 0 : i32
    return %c0_i32, %arg1 : i32, i32
  }
  func.func @transform_2(%arg0: i32, %arg1: i32) -> (i32, i32) {
    %c0_i32 = arith.constant 0 : i32
    %c0_i32_0 = arith.constant 0 : i32
    return %c0_i32, %arg1 : i32, i32
  }
  func.func @transform_3(%arg0: i32, %arg1: i32) -> (i32, i32) {
    %c0_i32 = arith.constant 0 : i32
    return %arg0, %arg1 : i32, i32
  }
}

module attributes {stable_mosaic.version = 11 : i64} {
  func.func @_attention_kernel(%arg0: i32, %arg1: memref<1x8x128xbf16, #tpu.memory_space<vmem>>, %arg2: memref<1x8x128xbf16, #tpu.memory_space<vmem>>, %arg3: memref<1x8x128xbf16, #tpu.memory_space<vmem>>, %arg4: memref<1x8x128xbf16, #tpu.memory_space<vmem>>) attributes {dimension_semantics = [#tpu.dimension_semantics<parallel>], iteration_bounds = array<i64: 2>, scalar_prefetch = 0 : i64, scratch_operands = 0 : i64, tpu.core_type = #tpu.core_type<tc>, window_params = [{transform_indices = @transform_0, window_bounds = array<i64: 1, 8, 128>}, {transform_indices = @transform_1, window_bounds = array<i64: 1, 8, 128>}, {transform_indices = @transform_2, window_bounds = array<i64: 1, 8, 128>}, {transform_indices = @transform_3, window_bounds = array<i64: 1, 8, 128>}]} {
    %c0 = arith.constant 0 : index
    %c0_0 = arith.constant 0 : index
    %c0_1 = arith.constant 0 : index
    %0 = vector.load %arg1[%c0, %c0_0, %c0_1] : memref<1x8x128xbf16, #tpu.memory_space<vmem>>, vector<1x8x128xbf16>
    %1 = vector.shape_cast %0 : vector<1x8x128xbf16> to vector<8x128xbf16>
    %c0_2 = arith.constant 0 : index
    %c0_3 = arith.constant 0 : index
    %c0_4 = arith.constant 0 : index
    %2 = vector.load %arg2[%c0_2, %c0_3, %c0_4] : memref<1x8x128xbf16, #tpu.memory_space<vmem>>, vector<1x8x128xbf16>
    %3 = vector.shape_cast %2 : vector<1x8x128xbf16> to vector<8x128xbf16>
    %c0_5 = arith.constant 0 : index
    %c0_6 = arith.constant 0 : index
    %c0_7 = arith.constant 0 : index
    %4 = vector.load %arg3[%c0_5, %c0_6, %c0_7] : memref<1x8x128xbf16, #tpu.memory_space<vmem>>, vector<1x8x128xbf16>
    %5 = vector.shape_cast %4 : vector<1x8x128xbf16> to vector<8x128xbf16>
    %6 = vector.extract_strided_slice %1 {offsets = [0, 0], sizes = [8, 8], strides = [1, 1]} : vector<8x128xbf16> to vector<8x8xbf16>
    %7 = vector.extract_strided_slice %3 {offsets = [0, 0], sizes = [8, 8], strides = [1, 1]} : vector<8x128xbf16> to vector<8x8xbf16>
    %8 = vector.extract_strided_slice %5 {offsets = [0, 0], sizes = [8, 8], strides = [1, 1]} : vector<8x128xbf16> to vector<8x8xbf16>
    %cst = arith.constant dense<0.000000e+00> : vector<8x8xf32>
    %9 = tpu.matmul %6, %7, %cst {dimension_numbers = #tpu.dot_dimension_numbers<[1], [1], [0], [0], [0, 0, 1, 0], [], []>} : vector<8x8xbf16>, vector<8x8xbf16>, vector<8x8xf32> -> vector<8x8xf32>
    %cst_8 = arith.constant dense<0xFF800000> : vector<8xf32>
    %10 = vector.multi_reduction <maximumf>, %9, %cst_8 [1] : vector<8x8xf32> to vector<8xf32>
    %11 = vector.shape_cast %10 : vector<8xf32> to vector<8x1xf32>
    %12 = vector.broadcast %11 : vector<8x1xf32> to vector<8x8xf32>
    %13 = arith.subf %9, %12 : vector<8x8xf32>
    %14 = math.exp %13 : vector<8x8xf32>
    %cst_9 = arith.constant dense<0.000000e+00> : vector<8xf32>
    %15 = vector.multi_reduction <add>, %14, %cst_9 [1] : vector<8x8xf32> to vector<8xf32>
    %16 = vector.shape_cast %15 : vector<8xf32> to vector<8x1xf32>
    %17 = tpu.reciprocal %16 {approx = true} : vector<8x1xf32> -> vector<8x1xf32>
    %18 = vector.broadcast %17 : vector<8x1xf32> to vector<8x8xf32>
    %19 = arith.mulf %14, %18 : vector<8x8xf32>
    %20 = arith.truncf %19 : vector<8x8xf32> to vector<8x8xbf16>
    %cst_10 = arith.constant dense<0.000000e+00> : vector<8x8xf32>
    %21 = tpu.matmul %20, %8, %cst_10 {dimension_numbers = #tpu.dot_dimension_numbers<[1], [0], [0], [1], [0, 0, 1, 1], [], []>} : vector<8x8xbf16>, vector<8x8xbf16>, vector<8x8xf32> -> vector<8x8xf32>
    %22 = vector.extract_strided_slice %1 {offsets = [0, 8], sizes = [8, 8], strides = [1, 1]} : vector<8x128xbf16> to vector<8x8xbf16>
    %23 = vector.extract_strided_slice %3 {offsets = [0, 8], sizes = [8, 8], strides = [1, 1]} : vector<8x128xbf16> to vector<8x8xbf16>
    %24 = vector.extract_strided_slice %5 {offsets = [0, 8], sizes = [8, 8], strides = [1, 1]} : vector<8x128xbf16> to vector<8x8xbf16>
    %cst_11 = arith.constant dense<0.000000e+00> : vector<8x8xf32>
    %25 = tpu.matmul %22, %23, %cst_11 {dimension_numbers = #tpu.dot_dimension_numbers<[1], [1], [0], [0], [0, 0, 1, 0], [], []>} : vector<8x8xbf16>, vector<8x8xbf16>, vector<8x8xf32> -> vector<8x8xf32>
    %cst_12 = arith.constant dense<0xFF800000> : vector<8xf32>
    %26 = vector.multi_reduction <maximumf>, %25, %cst_12 [1] : vector<8x8xf32> to vector<8xf32>
    %27 = vector.shape_cast %26 : vector<8xf32> to vector<8x1xf32>
    %28 = vector.broadcast %27 : vector<8x1xf32> to vector<8x8xf32>
    %29 = arith.subf %25, %28 : vector<8x8xf32>
    %30 = math.exp %29 : vector<8x8xf32>
    %cst_13 = arith.constant dense<0.000000e+00> : vector<8xf32>
    %31 = vector.multi_reduction <add>, %30, %cst_13 [1] : vector<8x8xf32> to vector<8xf32>
    %32 = vector.shape_cast %31 : vector<8xf32> to vector<8x1xf32>
    %33 = tpu.reciprocal %32 {approx = true} : vector<8x1xf32> -> vector<8x1xf32>
    %34 = vector.broadcast %33 : vector<8x1xf32> to vector<8x8xf32>
    %35 = arith.mulf %30, %34 : vector<8x8xf32>
    %36 = arith.truncf %35 : vector<8x8xf32> to vector<8x8xbf16>
    %cst_14 = arith.constant dense<0.000000e+00> : vector<8x8xf32>
    %37 = tpu.matmul %36, %24, %cst_14 {dimension_numbers = #tpu.dot_dimension_numbers<[1], [0], [0], [1], [0, 0, 1, 1], [], []>} : vector<8x8xbf16>, vector<8x8xbf16>, vector<8x8xf32> -> vector<8x8xf32>
    %38 = vector.extract_strided_slice %1 {offsets = [0, 16], sizes = [8, 8], strides = [1, 1]} : vector<8x128xbf16> to vector<8x8xbf16>
    %39 = vector.extract_strided_slice %3 {offsets = [0, 16], sizes = [8, 8], strides = [1, 1]} : vector<8x128xbf16> to vector<8x8xbf16>
    %40 = vector.extract_strided_slice %5 {offsets = [0, 16], sizes = [8, 8], strides = [1, 1]} : vector<8x128xbf16> to vector<8x8xbf16>
    %cst_15 = arith.constant dense<0.000000e+00> : vector<8x8xf32>
    %41 = tpu.matmul %38, %39, %cst_15 {dimension_numbers = #tpu.dot_dimension_numbers<[1], [1], [0], [0], [0, 0, 1, 0], [], []>} : vector<8x8xbf16>, vector<8x8xbf16>, vector<8x8xf32> -> vector<8x8xf32>
    %cst_16 = arith.constant dense<0xFF800000> : vector<8xf32>
    %42 = vector.multi_reduction <maximumf>, %41, %cst_16 [1] : vector<8x8xf32> to vector<8xf32>
    %43 = vector.shape_cast %42 : vector<8xf32> to vector<8x1xf32>
    %44 = vector.broadcast %43 : vector<8x1xf32> to vector<8x8xf32>
    %45 = arith.subf %41, %44 : vector<8x8xf32>
    %46 = math.exp %45 : vector<8x8xf32>
    %cst_17 = arith.constant dense<0.000000e+00> : vector<8xf32>
    %47 = vector.multi_reduction <add>, %46, %cst_17 [1] : vector<8x8xf32> to vector<8xf32>
    %48 = vector.shape_cast %47 : vector<8xf32> to vector<8x1xf32>
    %49 = tpu.reciprocal %48 {approx = true} : vector<8x1xf32> -> vector<8x1xf32>
    %50 = vector.broadcast %49 : vector<8x1xf32> to vector<8x8xf32>
    %51 = arith.mulf %46, %50 : vector<8x8xf32>
    %52 = arith.truncf %51 : vector<8x8xf32> to vector<8x8xbf16>
    %cst_18 = arith.constant dense<0.000000e+00> : vector<8x8xf32>
    %53 = tpu.matmul %52, %40, %cst_18 {dimension_numbers = #tpu.dot_dimension_numbers<[1], [0], [0], [1], [0, 0, 1, 1], [], []>} : vector<8x8xbf16>, vector<8x8xbf16>, vector<8x8xf32> -> vector<8x8xf32>
    %54 = vector.extract_strided_slice %1 {offsets = [0, 24], sizes = [8, 8], strides = [1, 1]} : vector<8x128xbf16> to vector<8x8xbf16>
    %55 = vector.extract_strided_slice %3 {offsets = [0, 24], sizes = [8, 8], strides = [1, 1]} : vector<8x128xbf16> to vector<8x8xbf16>
    %56 = vector.extract_strided_slice %5 {offsets = [0, 24], sizes = [8, 8], strides = [1, 1]} : vector<8x128xbf16> to vector<8x8xbf16>
    %cst_19 = arith.constant dense<0.000000e+00> : vector<8x8xf32>
    %57 = tpu.matmul %54, %55, %cst_19 {dimension_numbers = #tpu.dot_dimension_numbers<[1], [1], [0], [0], [0, 0, 1, 0], [], []>} : vector<8x8xbf16>, vector<8x8xbf16>, vector<8x8xf32> -> vector<8x8xf32>
    %cst_20 = arith.constant dense<0xFF800000> : vector<8xf32>
    %58 = vector.multi_reduction <maximumf>, %57, %cst_20 [1] : vector<8x8xf32> to vector<8xf32>
    %59 = vector.shape_cast %58 : vector<8xf32> to vector<8x1xf32>
    %60 = vector.broadcast %59 : vector<8x1xf32> to vector<8x8xf32>
    %61 = arith.subf %57, %60 : vector<8x8xf32>
    %62 = math.exp %61 : vector<8x8xf32>
    %cst_21 = arith.constant dense<0.000000e+00> : vector<8xf32>
    %63 = vector.multi_reduction <add>, %62, %cst_21 [1] : vector<8x8xf32> to vector<8xf32>
    %64 = vector.shape_cast %63 : vector<8xf32> to vector<8x1xf32>
    %65 = tpu.reciprocal %64 {approx = true} : vector<8x1xf32> -> vector<8x1xf32>
    %66 = vector.broadcast %65 : vector<8x1xf32> to vector<8x8xf32>
    %67 = arith.mulf %62, %66 : vector<8x8xf32>
    %68 = arith.truncf %67 : vector<8x8xf32> to vector<8x8xbf16>
    %cst_22 = arith.constant dense<0.000000e+00> : vector<8x8xf32>
    %69 = tpu.matmul %68, %56, %cst_22 {dimension_numbers = #tpu.dot_dimension_numbers<[1], [0], [0], [1], [0, 0, 1, 1], [], []>} : vector<8x8xbf16>, vector<8x8xbf16>, vector<8x8xf32> -> vector<8x8xf32>
    %cst_23 = arith.constant 0.000000e+00 : f32
    %70 = vector.broadcast %cst_23 : f32 to vector<8x96xf32>
    %71 = tpu.concatenate %21, %37, %53, %69, %70 in 1 : vector<8x8xf32>, vector<8x8xf32>, vector<8x8xf32>, vector<8x8xf32>, vector<8x96xf32> -> vector<8x128xf32>
    %72 = arith.truncf %71 : vector<8x128xf32> to vector<8x128xbf16>
    %c0_24 = arith.constant 0 : index
    %c0_25 = arith.constant 0 : index
    %c0_26 = arith.constant 0 : index
    %73 = vector.load %arg4[%c0_24, %c0_25, %c0_26] : memref<1x8x128xbf16, #tpu.memory_space<vmem>>, vector<1x8x128xbf16>
    %74 = vector.shape_cast %73 : vector<1x8x128xbf16> to vector<8x128xbf16>
    %75 = vector.shape_cast %72 : vector<8x128xbf16> to vector<1x8x128xbf16>
    tpu.vector_store %arg4[%c0_24, %c0_25, %c0_26], %75 {strides = array<i32>} : memref<1x8x128xbf16, #tpu.memory_space<vmem>>, vector<1x8x128xbf16>,
    return
  }
  func.func @transform_0(%arg0: i32) -> (i32, i32, i32) {
    %c0_i32 = arith.constant 0 : i32
    %c0_i32_0 = arith.constant 0 : i32
    %c0_i32_1 = arith.constant 0 : i32
    return %arg0, %c0_i32, %c0_i32_0 : i32, i32, i32
  }
  func.func @transform_1(%arg0: i32) -> (i32, i32, i32) {
    %c0_i32 = arith.constant 0 : i32
    %c0_i32_0 = arith.constant 0 : i32
    %c0_i32_1 = arith.constant 0 : i32
    return %arg0, %c0_i32, %c0_i32_0 : i32, i32, i32
  }
  func.func @transform_2(%arg0: i32) -> (i32, i32, i32) {
    %c0_i32 = arith.constant 0 : i32
    %c0_i32_0 = arith.constant 0 : i32
    %c0_i32_1 = arith.constant 0 : i32
    return %arg0, %c0_i32, %c0_i32_0 : i32, i32, i32
  }
  func.func @transform_3(%arg0: i32) -> (i32, i32, i32) {
    %c0_i32 = arith.constant 0 : i32
    %c0_i32_0 = arith.constant 0 : i32
    %c0_i32_1 = arith.constant 0 : i32
    return %arg0, %c0_i32, %c0_i32_0 : i32, i32, i32
  }
}

module attributes {stable_mosaic.version = 11 : i64} {
  func.func @_mm_kernel_1k(%arg0: i32, %arg1: i32, %arg2: memref<16x128xbf16, #tpu.memory_space<vmem>>, %arg3: memref<128x128xbf16, #tpu.memory_space<vmem>>, %arg4: memref<1x128xf32, #tpu.memory_space<vmem>>, %arg5: memref<16x128xf32, #tpu.memory_space<vmem>>, %arg6: memref<1x128xf32, #tpu.memory_space<vmem>>, %arg7: memref<1x128xf32, #tpu.memory_space<vmem>>, %arg8: memref<16x128xf32, #tpu.memory_space<vmem>>) attributes {dimension_semantics = [#tpu.dimension_semantics<parallel>, #tpu.dimension_semantics<parallel>], iteration_bounds = array<i64: 1, 1>, scalar_prefetch = 0 : i64, scratch_operands = 0 : i64, tpu.core_type = #tpu.core_type<tc>, window_params = [{transform_indices = @transform_0, window_bounds = array<i64: 16, 128>}, {transform_indices = @transform_1, window_bounds = array<i64: 128, 128>}, {transform_indices = @transform_2, window_bounds = array<i64: 1, 128>}, {transform_indices = @transform_3, window_bounds = array<i64: 16, 128>}, {transform_indices = @transform_4, window_bounds = array<i64: 1, 128>}, {transform_indices = @transform_5, window_bounds = array<i64: 1, 128>}, {transform_indices = @transform_6, window_bounds = array<i64: 16, 128>}]} {
    %c0 = arith.constant 0 : index
    %c0_0 = arith.constant 0 : index
    %0 = vector.load %arg2[%c0, %c0_0] : memref<16x128xbf16, #tpu.memory_space<vmem>>, vector<16x128xbf16>
    %c0_1 = arith.constant 0 : index
    %c0_2 = arith.constant 0 : index
    %1 = vector.load %arg3[%c0_1, %c0_2] : memref<128x128xbf16, #tpu.memory_space<vmem>>, vector<128x128xbf16>
    %cst = arith.constant dense<0.000000e+00> : vector<16x128xf32>
    %2 = tpu.matmul %0, %1, %cst {dimension_numbers = #tpu.dot_dimension_numbers<[1], [0], [0], [1], [0, 0, 1, 1], [], []>} : vector<16x128xbf16>, vector<128x128xbf16>, vector<16x128xf32> -> vector<16x128xf32>
    %c0_3 = arith.constant 0 : index
    %c0_4 = arith.constant 0 : index
    %3 = vector.load %arg4[%c0_3, %c0_4] : memref<1x128xf32, #tpu.memory_space<vmem>>, vector<1x128xf32>
    %4 = vector.broadcast %3 : vector<1x128xf32> to vector<16x128xf32>
    %5 = arith.addf %2, %4 : vector<16x128xf32>
    %c0_5 = arith.constant 0 : index
    %c0_6 = arith.constant 0 : index
    %6 = vector.load %arg5[%c0_5, %c0_6] : memref<16x128xf32, #tpu.memory_space<vmem>>, vector<16x128xf32>
    %7 = arith.addf %5, %6 : vector<16x128xf32>
    %cst_7 = arith.constant dense<0.000000e+00> : vector<16xf32>
    %8 = vector.multi_reduction <add>, %7, %cst_7 [1] : vector<16x128xf32> to vector<16xf32>
    %9 = vector.shape_cast %8 : vector<16xf32> to vector<16x1xf32>
    %cst_8 = arith.constant 3.125000e-02 : f32
    %10 = vector.broadcast %cst_8 : f32 to vector<16x1xf32>
    %11 = arith.mulf %9, %10 : vector<16x1xf32>
    %12 = arith.mulf %7, %7 : vector<16x128xf32>
    %cst_9 = arith.constant dense<0.000000e+00> : vector<16xf32>
    %13 = vector.multi_reduction <add>, %12, %cst_9 [1] : vector<16x128xf32> to vector<16xf32>
    %14 = vector.shape_cast %13 : vector<16xf32> to vector<16x1xf32>
    %cst_10 = arith.constant 3.125000e-02 : f32
    %15 = vector.broadcast %cst_10 : f32 to vector<16x1xf32>
    %16 = arith.mulf %14, %15 : vector<16x1xf32>
    %17 = arith.mulf %11, %11 : vector<16x1xf32>
    %18 = arith.subf %16, %17 : vector<16x1xf32>
    %19 = vector.broadcast %11 : vector<16x1xf32> to vector<16x128xf32>
    %20 = arith.subf %7, %19 : vector<16x128xf32>
    %cst_11 = arith.constant 9.99999974E-6 : f32
    %21 = vector.broadcast %cst_11 : f32 to vector<16x1xf32>
    %22 = arith.addf %18, %21 : vector<16x1xf32>
    %23 = math.rsqrt %22 : vector<16x1xf32>
    %24 = vector.broadcast %23 : vector<16x1xf32> to vector<16x128xf32>
    %25 = arith.mulf %20, %24 : vector<16x128xf32>
    %c0_12 = arith.constant 0 : index
    %c0_13 = arith.constant 0 : index
    %26 = vector.load %arg6[%c0_12, %c0_13] : memref<1x128xf32, #tpu.memory_space<vmem>>, vector<1x128xf32>
    %27 = vector.broadcast %26 : vector<1x128xf32> to vector<16x128xf32>
    %28 = arith.mulf %25, %27 : vector<16x128xf32>
    %c0_14 = arith.constant 0 : index
    %c0_15 = arith.constant 0 : index
    %29 = vector.load %arg7[%c0_14, %c0_15] : memref<1x128xf32, #tpu.memory_space<vmem>>, vector<1x128xf32>
    %30 = vector.broadcast %29 : vector<1x128xf32> to vector<16x128xf32>
    %31 = arith.addf %28, %30 : vector<16x128xf32>
    %c0_16 = arith.constant 0 : index
    %c0_17 = arith.constant 0 : index
    %32 = vector.load %arg8[%c0_16, %c0_17] : memref<16x128xf32, #tpu.memory_space<vmem>>, vector<16x128xf32>
    tpu.vector_store %arg8[%c0_16, %c0_17], %31 {strides = array<i32>} : memref<16x128xf32, #tpu.memory_space<vmem>>, vector<16x128xf32>,
    return
  }
  func.func @transform_0(%arg0: i32, %arg1: i32) -> (i32, i32) {
    %c0_i32 = arith.constant 0 : i32
    %c0_i32_0 = arith.constant 0 : i32
    return %arg0, %c0_i32 : i32, i32
  }
  func.func @transform_1(%arg0: i32, %arg1: i32) -> (i32, i32) {
    %c0_i32 = arith.constant 0 : i32
    %c0_i32_0 = arith.constant 0 : i32
    return %c0_i32, %arg1 : i32, i32
  }
  func.func @transform_2(%arg0: i32, %arg1: i32) -> (i32, i32) {
    %c0_i32 = arith.constant 0 : i32
    %c0_i32_0 = arith.constant 0 : i32
    return %c0_i32, %arg1 : i32, i32
  }
  func.func @transform_3(%arg0: i32, %arg1: i32) -> (i32, i32) {
    %c0_i32 = arith.constant 0 : i32
    return %arg0, %arg1 : i32, i32
  }
  func.func @transform_4(%arg0: i32, %arg1: i32) -> (i32, i32) {
    %c0_i32 = arith.constant 0 : i32
    %c0_i32_0 = arith.constant 0 : i32
    return %c0_i32, %arg1 : i32, i32
  }
  func.func @transform_5(%arg0: i32, %arg1: i32) -> (i32, i32) {
    %c0_i32 = arith.constant 0 : i32
    %c0_i32_0 = arith.constant 0 : i32
    return %c0_i32, %arg1 : i32, i32
  }
  func.func @transform_6(%arg0: i32, %arg1: i32) -> (i32, i32) {
    %c0_i32 = arith.constant 0 : i32
    return %arg0, %arg1 : i32, i32
  }
}

module attributes {stable_mosaic.version = 11 : i64} {
  func.func @_attention_kernel(%arg0: i32, %arg1: memref<1x8x128xbf16, #tpu.memory_space<vmem>>, %arg2: memref<1x64x128xbf16, #tpu.memory_space<vmem>>, %arg3: memref<1x64x128xbf16, #tpu.memory_space<vmem>>, %arg4: memref<1x8x128xbf16, #tpu.memory_space<vmem>>) attributes {dimension_semantics = [#tpu.dimension_semantics<parallel>], iteration_bounds = array<i64: 2>, scalar_prefetch = 0 : i64, scratch_operands = 0 : i64, tpu.core_type = #tpu.core_type<tc>, window_params = [{transform_indices = @transform_0, window_bounds = array<i64: 1, 8, 128>}, {transform_indices = @transform_1, window_bounds = array<i64: 1, 64, 128>}, {transform_indices = @transform_2, window_bounds = array<i64: 1, 64, 128>}, {transform_indices = @transform_3, window_bounds = array<i64: 1, 8, 128>}]} {
    %c0 = arith.constant 0 : index
    %c0_0 = arith.constant 0 : index
    %c0_1 = arith.constant 0 : index
    %0 = vector.load %arg1[%c0, %c0_0, %c0_1] : memref<1x8x128xbf16, #tpu.memory_space<vmem>>, vector<1x8x128xbf16>
    %1 = vector.shape_cast %0 : vector<1x8x128xbf16> to vector<8x128xbf16>
    %c0_2 = arith.constant 0 : index
    %c0_3 = arith.constant 0 : index
    %c0_4 = arith.constant 0 : index
    %2 = vector.load %arg2[%c0_2, %c0_3, %c0_4] : memref<1x64x128xbf16, #tpu.memory_space<vmem>>, vector<1x64x128xbf16>
    %3 = vector.shape_cast %2 : vector<1x64x128xbf16> to vector<64x128xbf16>
    %c0_5 = arith.constant 0 : index
    %c0_6 = arith.constant 0 : index
    %c0_7 = arith.constant 0 : index
    %4 = vector.load %arg3[%c0_5, %c0_6, %c0_7] : memref<1x64x128xbf16, #tpu.memory_space<vmem>>, vector<1x64x128xbf16>
    %5 = vector.shape_cast %4 : vector<1x64x128xbf16> to vector<64x128xbf16>
    %6 = vector.extract_strided_slice %1 {offsets = [0, 0], sizes = [8, 8], strides = [1, 1]} : vector<8x128xbf16> to vector<8x8xbf16>
    %7 = vector.extract_strided_slice %3 {offsets = [0, 0], sizes = [64, 8], strides = [1, 1]} : vector<64x128xbf16> to vector<64x8xbf16>
    %8 = vector.extract_strided_slice %5 {offsets = [0, 0], sizes = [64, 8], strides = [1, 1]} : vector<64x128xbf16> to vector<64x8xbf16>
    %cst = arith.constant dense<0.000000e+00> : vector<8x64xf32>
    %9 = tpu.matmul %6, %7, %cst {dimension_numbers = #tpu.dot_dimension_numbers<[1], [1], [0], [0], [0, 0, 1, 0], [], []>} : vector<8x8xbf16>, vector<64x8xbf16>, vector<8x64xf32> -> vector<8x64xf32>
    %cst_8 = arith.constant dense<0xFF800000> : vector<8xf32>
    %10 = vector.multi_reduction <maximumf>, %9, %cst_8 [1] : vector<8x64xf32> to vector<8xf32>
    %11 = vector.shape_cast %10 : vector<8xf32> to vector<8x1xf32>
    %12 = vector.broadcast %11 : vector<8x1xf32> to vector<8x64xf32>
    %13 = arith.subf %9, %12 : vector<8x64xf32>
    %14 = math.exp %13 : vector<8x64xf32>
    %cst_9 = arith.constant dense<0.000000e+00> : vector<8xf32>
    %15 = vector.multi_reduction <add>, %14, %cst_9 [1] : vector<8x64xf32> to vector<8xf32>
    %16 = vector.shape_cast %15 : vector<8xf32> to vector<8x1xf32>
    %17 = tpu.reciprocal %16 {approx = true} : vector<8x1xf32> -> vector<8x1xf32>
    %18 = vector.broadcast %17 : vector<8x1xf32> to vector<8x64xf32>
    %19 = arith.mulf %14, %18 : vector<8x64xf32>
    %20 = arith.truncf %19 : vector<8x64xf32> to vector<8x64xbf16>
    %cst_10 = arith.constant dense<0.000000e+00> : vector<8x8xf32>
    %21 = tpu.matmul %20, %8, %cst_10 {dimension_numbers = #tpu.dot_dimension_numbers<[1], [0], [0], [1], [0, 0, 1, 1], [], []>} : vector<8x64xbf16>, vector<64x8xbf16>, vector<8x8xf32> -> vector<8x8xf32>
    %22 = vector.extract_strided_slice %1 {offsets = [0, 8], sizes = [8, 8], strides = [1, 1]} : vector<8x128xbf16> to vector<8x8xbf16>
    %23 = vector.extract_strided_slice %3 {offsets = [0, 8], sizes = [64, 8], strides = [1, 1]} : vector<64x128xbf16> to vector<64x8xbf16>
    %24 = vector.extract_strided_slice %5 {offsets = [0, 8], sizes = [64, 8], strides = [1, 1]} : vector<64x128xbf16> to vector<64x8xbf16>
    %cst_11 = arith.constant dense<0.000000e+00> : vector<8x64xf32>
    %25 = tpu.matmul %22, %23, %cst_11 {dimension_numbers = #tpu.dot_dimension_numbers<[1], [1], [0], [0], [0, 0, 1, 0], [], []>} : vector<8x8xbf16>, vector<64x8xbf16>, vector<8x64xf32> -> vector<8x64xf32>
    %cst_12 = arith.constant dense<0xFF800000> : vector<8xf32>
    %26 = vector.multi_reduction <maximumf>, %25, %cst_12 [1] : vector<8x64xf32> to vector<8xf32>
    %27 = vector.shape_cast %26 : vector<8xf32> to vector<8x1xf32>
    %28 = vector.broadcast %27 : vector<8x1xf32> to vector<8x64xf32>
    %29 = arith.subf %25, %28 : vector<8x64xf32>
    %30 = math.exp %29 : vector<8x64xf32>
    %cst_13 = arith.constant dense<0.000000e+00> : vector<8xf32>
    %31 = vector.multi_reduction <add>, %30, %cst_13 [1] : vector<8x64xf32> to vector<8xf32>
    %32 = vector.shape_cast %31 : vector<8xf32> to vector<8x1xf32>
    %33 = tpu.reciprocal %32 {approx = true} : vector<8x1xf32> -> vector<8x1xf32>
    %34 = vector.broadcast %33 : vector<8x1xf32> to vector<8x64xf32>
    %35 = arith.mulf %30, %34 : vector<8x64xf32>
    %36 = arith.truncf %35 : vector<8x64xf32> to vector<8x64xbf16>
    %cst_14 = arith.constant dense<0.000000e+00> : vector<8x8xf32>
    %37 = tpu.matmul %36, %24, %cst_14 {dimension_numbers = #tpu.dot_dimension_numbers<[1], [0], [0], [1], [0, 0, 1, 1], [], []>} : vector<8x64xbf16>, vector<64x8xbf16>, vector<8x8xf32> -> vector<8x8xf32>
    %38 = vector.extract_strided_slice %1 {offsets = [0, 16], sizes = [8, 8], strides = [1, 1]} : vector<8x128xbf16> to vector<8x8xbf16>
    %39 = vector.extract_strided_slice %3 {offsets = [0, 16], sizes = [64, 8], strides = [1, 1]} : vector<64x128xbf16> to vector<64x8xbf16>
    %40 = vector.extract_strided_slice %5 {offsets = [0, 16], sizes = [64, 8], strides = [1, 1]} : vector<64x128xbf16> to vector<64x8xbf16>
    %cst_15 = arith.constant dense<0.000000e+00> : vector<8x64xf32>
    %41 = tpu.matmul %38, %39, %cst_15 {dimension_numbers = #tpu.dot_dimension_numbers<[1], [1], [0], [0], [0, 0, 1, 0], [], []>} : vector<8x8xbf16>, vector<64x8xbf16>, vector<8x64xf32> -> vector<8x64xf32>
    %cst_16 = arith.constant dense<0xFF800000> : vector<8xf32>
    %42 = vector.multi_reduction <maximumf>, %41, %cst_16 [1] : vector<8x64xf32> to vector<8xf32>
    %43 = vector.shape_cast %42 : vector<8xf32> to vector<8x1xf32>
    %44 = vector.broadcast %43 : vector<8x1xf32> to vector<8x64xf32>
    %45 = arith.subf %41, %44 : vector<8x64xf32>
    %46 = math.exp %45 : vector<8x64xf32>
    %cst_17 = arith.constant dense<0.000000e+00> : vector<8xf32>
    %47 = vector.multi_reduction <add>, %46, %cst_17 [1] : vector<8x64xf32> to vector<8xf32>
    %48 = vector.shape_cast %47 : vector<8xf32> to vector<8x1xf32>
    %49 = tpu.reciprocal %48 {approx = true} : vector<8x1xf32> -> vector<8x1xf32>
    %50 = vector.broadcast %49 : vector<8x1xf32> to vector<8x64xf32>
    %51 = arith.mulf %46, %50 : vector<8x64xf32>
    %52 = arith.truncf %51 : vector<8x64xf32> to vector<8x64xbf16>
    %cst_18 = arith.constant dense<0.000000e+00> : vector<8x8xf32>
    %53 = tpu.matmul %52, %40, %cst_18 {dimension_numbers = #tpu.dot_dimension_numbers<[1], [0], [0], [1], [0, 0, 1, 1], [], []>} : vector<8x64xbf16>, vector<64x8xbf16>, vector<8x8xf32> -> vector<8x8xf32>
    %54 = vector.extract_strided_slice %1 {offsets = [0, 24], sizes = [8, 8], strides = [1, 1]} : vector<8x128xbf16> to vector<8x8xbf16>
    %55 = vector.extract_strided_slice %3 {offsets = [0, 24], sizes = [64, 8], strides = [1, 1]} : vector<64x128xbf16> to vector<64x8xbf16>
    %56 = vector.extract_strided_slice %5 {offsets = [0, 24], sizes = [64, 8], strides = [1, 1]} : vector<64x128xbf16> to vector<64x8xbf16>
    %cst_19 = arith.constant dense<0.000000e+00> : vector<8x64xf32>
    %57 = tpu.matmul %54, %55, %cst_19 {dimension_numbers = #tpu.dot_dimension_numbers<[1], [1], [0], [0], [0, 0, 1, 0], [], []>} : vector<8x8xbf16>, vector<64x8xbf16>, vector<8x64xf32> -> vector<8x64xf32>
    %cst_20 = arith.constant dense<0xFF800000> : vector<8xf32>
    %58 = vector.multi_reduction <maximumf>, %57, %cst_20 [1] : vector<8x64xf32> to vector<8xf32>
    %59 = vector.shape_cast %58 : vector<8xf32> to vector<8x1xf32>
    %60 = vector.broadcast %59 : vector<8x1xf32> to vector<8x64xf32>
    %61 = arith.subf %57, %60 : vector<8x64xf32>
    %62 = math.exp %61 : vector<8x64xf32>
    %cst_21 = arith.constant dense<0.000000e+00> : vector<8xf32>
    %63 = vector.multi_reduction <add>, %62, %cst_21 [1] : vector<8x64xf32> to vector<8xf32>
    %64 = vector.shape_cast %63 : vector<8xf32> to vector<8x1xf32>
    %65 = tpu.reciprocal %64 {approx = true} : vector<8x1xf32> -> vector<8x1xf32>
    %66 = vector.broadcast %65 : vector<8x1xf32> to vector<8x64xf32>
    %67 = arith.mulf %62, %66 : vector<8x64xf32>
    %68 = arith.truncf %67 : vector<8x64xf32> to vector<8x64xbf16>
    %cst_22 = arith.constant dense<0.000000e+00> : vector<8x8xf32>
    %69 = tpu.matmul %68, %56, %cst_22 {dimension_numbers = #tpu.dot_dimension_numbers<[1], [0], [0], [1], [0, 0, 1, 1], [], []>} : vector<8x64xbf16>, vector<64x8xbf16>, vector<8x8xf32> -> vector<8x8xf32>
    %cst_23 = arith.constant 0.000000e+00 : f32
    %70 = vector.broadcast %cst_23 : f32 to vector<8x96xf32>
    %71 = tpu.concatenate %21, %37, %53, %69, %70 in 1 : vector<8x8xf32>, vector<8x8xf32>, vector<8x8xf32>, vector<8x8xf32>, vector<8x96xf32> -> vector<8x128xf32>
    %72 = arith.truncf %71 : vector<8x128xf32> to vector<8x128xbf16>
    %c0_24 = arith.constant 0 : index
    %c0_25 = arith.constant 0 : index
    %c0_26 = arith.constant 0 : index
    %73 = vector.load %arg4[%c0_24, %c0_25, %c0_26] : memref<1x8x128xbf16, #tpu.memory_space<vmem>>, vector<1x8x128xbf16>
    %74 = vector.shape_cast %73 : vector<1x8x128xbf16> to vector<8x128xbf16>
    %75 = vector.shape_cast %72 : vector<8x128xbf16> to vector<1x8x128xbf16>
    tpu.vector_store %arg4[%c0_24, %c0_25, %c0_26], %75 {strides = array<i32>} : memref<1x8x128xbf16, #tpu.memory_space<vmem>>, vector<1x8x128xbf16>,
    return
  }
  func.func @transform_0(%arg0: i32) -> (i32, i32, i32) {
    %c0_i32 = arith.constant 0 : i32
    %c0_i32_0 = arith.constant 0 : i32
    %c0_i32_1 = arith.constant 0 : i32
    return %arg0, %c0_i32, %c0_i32_0 : i32, i32, i32
  }
  func.func @transform_1(%arg0: i32) -> (i32, i32, i32) {
    %c0_i32 = arith.constant 0 : i32
    %c0_i32_0 = arith.constant 0 : i32
    %c0_i32_1 = arith.constant 0 : i32
    return %arg0, %c0_i32, %c0_i32_0 : i32, i32, i32
  }
  func.func @transform_2(%arg0: i32) -> (i32, i32, i32) {
    %c0_i32 = arith.constant 0 : i32
    %c0_i32_0 = arith.constant 0 : i32
    %c0_i32_1 = arith.constant 0 : i32
    return %arg0, %c0_i32, %c0_i32_0 : i32, i32, i32
  }
  func.func @transform_3(%arg0: i32) -> (i32, i32, i32) {
    %c0_i32 = arith.constant 0 : i32
    %c0_i32_0 = arith.constant 0 : i32
    %c0_i32_1 = arith.constant 0 : i32
    return %arg0, %c0_i32, %c0_i32_0 : i32, i32, i32
  }
}

module attributes {stable_mosaic.version = 11 : i64} {
  func.func @_mm_kernel_1k(%arg0: i32, %arg1: i32, %arg2: memref<16x128xf32, #tpu.memory_space<vmem>>, %arg3: memref<128x128xbf16, #tpu.memory_space<vmem>>, %arg4: memref<1x128xf32, #tpu.memory_space<vmem>>, %arg5: memref<16x128xbf16, #tpu.memory_space<vmem>>) attributes {dimension_semantics = [#tpu.dimension_semantics<parallel>, #tpu.dimension_semantics<parallel>], iteration_bounds = array<i64: 1, 1>, scalar_prefetch = 0 : i64, scratch_operands = 0 : i64, tpu.core_type = #tpu.core_type<tc>, window_params = [{transform_indices = @transform_0, window_bounds = array<i64: 16, 128>}, {transform_indices = @transform_1, window_bounds = array<i64: 128, 128>}, {transform_indices = @transform_2, window_bounds = array<i64: 1, 128>}, {transform_indices = @transform_3, window_bounds = array<i64: 16, 128>}]} {
    %c0 = arith.constant 0 : index
    %c0_0 = arith.constant 0 : index
    %0 = vector.load %arg2[%c0, %c0_0] : memref<16x128xf32, #tpu.memory_space<vmem>>, vector<16x128xf32>
    %1 = arith.truncf %0 : vector<16x128xf32> to vector<16x128xbf16>
    %c0_1 = arith.constant 0 : index
    %c0_2 = arith.constant 0 : index
    %2 = vector.load %arg3[%c0_1, %c0_2] : memref<128x128xbf16, #tpu.memory_space<vmem>>, vector<128x128xbf16>
    %cst = arith.constant dense<0.000000e+00> : vector<16x128xf32>
    %3 = tpu.matmul %1, %2, %cst {dimension_numbers = #tpu.dot_dimension_numbers<[1], [0], [0], [1], [0, 0, 1, 1], [], []>} : vector<16x128xbf16>, vector<128x128xbf16>, vector<16x128xf32> -> vector<16x128xf32>
    %c0_3 = arith.constant 0 : index
    %c0_4 = arith.constant 0 : index
    %4 = vector.load %arg4[%c0_3, %c0_4] : memref<1x128xf32, #tpu.memory_space<vmem>>, vector<1x128xf32>
    %5 = vector.broadcast %4 : vector<1x128xf32> to vector<16x128xf32>
    %6 = arith.addf %3, %5 : vector<16x128xf32>
    %cst_5 = arith.constant 0.000000e+00 : f32
    %7 = vector.broadcast %cst_5 : f32 to vector<16x128xf32>
    %8 = arith.maximumf %6, %7 : vector<16x128xf32>
    %9 = arith.truncf %8 : vector<16x128xf32> to vector<16x128xbf16>
    %c0_6 = arith.constant 0 : index
    %c0_7 = arith.constant 0 : index
    %10 = vector.load %arg5[%c0_6, %c0_7] : memref<16x128xbf16, #tpu.memory_space<vmem>>, vector<16x128xbf16>
    tpu.vector_store %arg5[%c0_6, %c0_7], %9 {strides = array<i32>} : memref<16x128xbf16, #tpu.memory_space<vmem>>, vector<16x128xbf16>,
    return
  }
  func.func @transform_0(%arg0: i32, %arg1: i32) -> (i32, i32) {
    %c0_i32 = arith.constant 0 : i32
    %c0_i32_0 = arith.constant 0 : i32
    return %arg0, %c0_i32 : i32, i32
  }
  func.func @transform_1(%arg0: i32, %arg1: i32) -> (i32, i32) {
    %c0_i32 = arith.constant 0 : i32
    %c0_i32_0 = arith.constant 0 : i32
    return %c0_i32, %arg1 : i32, i32
  }
  func.func @transform_2(%arg0: i32, %arg1: i32) -> (i32, i32) {
    %c0_i32 = arith.constant 0 : i32
    %c0_i32_0 = arith.constant 0 : i32
    return %c0_i32, %arg1 : i32, i32
  }
  func.func @transform_3(%arg0: i32, %arg1: i32) -> (i32, i32) {
    %c0_i32 = arith.constant 0 : i32
    return %arg0, %arg1 : i32, i32
  }
}

module attributes {stable_mosaic.version = 11 : i64} {
  func.func @_ln_kernel(%arg0: i32, %arg1: memref<16x128xf32, #tpu.memory_space<vmem>>, %arg2: memref<1x128xf32, #tpu.memory_space<vmem>>, %arg3: memref<1x128xf32, #tpu.memory_space<vmem>>, %arg4: memref<16x128xf32, #tpu.memory_space<vmem>>) attributes {dimension_semantics = [#tpu.dimension_semantics<parallel>], iteration_bounds = array<i64: 1>, scalar_prefetch = 0 : i64, scratch_operands = 0 : i64, tpu.core_type = #tpu.core_type<tc>, window_params = [{transform_indices = @transform_0, window_bounds = array<i64: 16, 128>}, {pipeline_mode = #tpu.pipeline_mode<synchronous>, transform_indices = @transform_1, window_bounds = array<i64: 1, 128>}, {pipeline_mode = #tpu.pipeline_mode<synchronous>, transform_indices = @transform_2, window_bounds = array<i64: 1, 128>}, {transform_indices = @transform_3, window_bounds = array<i64: 16, 128>}]} {
    %c0 = arith.constant 0 : index
    %c0_0 = arith.constant 0 : index
    %0 = vector.load %arg1[%c0, %c0_0] : memref<16x128xf32, #tpu.memory_space<vmem>>, vector<16x128xf32>
    %cst = arith.constant dense<0.000000e+00> : vector<16xf32>
    %1 = vector.multi_reduction <add>, %0, %cst [1] : vector<16x128xf32> to vector<16xf32>
    %2 = vector.shape_cast %1 : vector<16xf32> to vector<16x1xf32>
    %cst_1 = arith.constant 3.125000e-02 : f32
    %3 = vector.broadcast %cst_1 : f32 to vector<16x1xf32>
    %4 = arith.mulf %2, %3 : vector<16x1xf32>
    %5 = arith.mulf %0, %0 : vector<16x128xf32>
    %cst_2 = arith.constant dense<0.000000e+00> : vector<16xf32>
    %6 = vector.multi_reduction <add>, %5, %cst_2 [1] : vector<16x128xf32> to vector<16xf32>
    %7 = vector.shape_cast %6 : vector<16xf32> to vector<16x1xf32>
    %cst_3 = arith.constant 3.125000e-02 : f32
    %8 = vector.broadcast %cst_3 : f32 to vector<16x1xf32>
    %9 = arith.mulf %7, %8 : vector<16x1xf32>
    %10 = arith.mulf %4, %4 : vector<16x1xf32>
    %11 = arith.subf %9, %10 : vector<16x1xf32>
    %12 = vector.broadcast %4 : vector<16x1xf32> to vector<16x128xf32>
    %13 = arith.subf %0, %12 : vector<16x128xf32>
    %cst_4 = arith.constant 9.99999974E-6 : f32
    %14 = vector.broadcast %cst_4 : f32 to vector<16x1xf32>
    %15 = arith.addf %11, %14 : vector<16x1xf32>
    %16 = math.rsqrt %15 : vector<16x1xf32>
    %17 = vector.broadcast %16 : vector<16x1xf32> to vector<16x128xf32>
    %18 = arith.mulf %13, %17 : vector<16x128xf32>
    %c0_5 = arith.constant 0 : index
    %c0_6 = arith.constant 0 : index
    %19 = vector.load %arg2[%c0_5, %c0_6] : memref<1x128xf32, #tpu.memory_space<vmem>>, vector<1x128xf32>
    %20 = vector.broadcast %19 : vector<1x128xf32> to vector<16x128xf32>
    %21 = arith.mulf %18, %20 : vector<16x128xf32>
    %c0_7 = arith.constant 0 : index
    %c0_8 = arith.constant 0 : index
    %22 = vector.load %arg3[%c0_7, %c0_8] : memref<1x128xf32, #tpu.memory_space<vmem>>, vector<1x128xf32>
    %23 = vector.broadcast %22 : vector<1x128xf32> to vector<16x128xf32>
    %24 = arith.addf %21, %23 : vector<16x128xf32>
    %c0_9 = arith.constant 0 : index
    %c0_10 = arith.constant 0 : index
    %25 = vector.load %arg4[%c0_9, %c0_10] : memref<16x128xf32, #tpu.memory_space<vmem>>, vector<16x128xf32>
    tpu.vector_store %arg4[%c0_9, %c0_10], %24 {strides = array<i32>} : memref<16x128xf32, #tpu.memory_space<vmem>>, vector<16x128xf32>,
    return
  }
  func.func @transform_0(%arg0: i32) -> (i32, i32) {
    %c0_i32 = arith.constant 0 : i32
    %c0_i32_0 = arith.constant 0 : i32
    return %arg0, %c0_i32 : i32, i32
  }
  func.func @transform_1(%arg0: i32) -> (i32, i32) {
    %c0_i32 = arith.constant 0 : i32
    %c0_i32_0 = arith.constant 0 : i32
    %c0_i32_1 = arith.constant 0 : i32
    return %c0_i32, %c0_i32_0 : i32, i32
  }
  func.func @transform_2(%arg0: i32) -> (i32, i32) {
    %c0_i32 = arith.constant 0 : i32
    %c0_i32_0 = arith.constant 0 : i32
    %c0_i32_1 = arith.constant 0 : i32
    return %c0_i32, %c0_i32_0 : i32, i32
  }
  func.func @transform_3(%arg0: i32) -> (i32, i32) {
    %c0_i32 = arith.constant 0 : i32
    %c0_i32_0 = arith.constant 0 : i32
    return %arg0, %c0_i32 : i32, i32
  }
}

module attributes {stable_mosaic.version = 11 : i64} {
  func.func @_mm_kernel_1k(%arg0: i32, %arg1: i32, %arg2: memref<16x128xf32, #tpu.memory_space<vmem>>, %arg3: memref<128x256xbf16, #tpu.memory_space<vmem>>, %arg4: memref<1x256xf32, #tpu.memory_space<vmem>>, %arg5: memref<16x256xf32, #tpu.memory_space<vmem>>) attributes {dimension_semantics = [#tpu.dimension_semantics<parallel>, #tpu.dimension_semantics<parallel>], iteration_bounds = array<i64: 1, 1>, scalar_prefetch = 0 : i64, scratch_operands = 0 : i64, tpu.core_type = #tpu.core_type<tc>, window_params = [{transform_indices = @transform_0, window_bounds = array<i64: 16, 128>}, {transform_indices = @transform_1, window_bounds = array<i64: 128, 256>}, {transform_indices = @transform_2, window_bounds = array<i64: 1, 256>}, {transform_indices = @transform_3, window_bounds = array<i64: 16, 256>}]} {
    %c0 = arith.constant 0 : index
    %c0_0 = arith.constant 0 : index
    %0 = vector.load %arg2[%c0, %c0_0] : memref<16x128xf32, #tpu.memory_space<vmem>>, vector<16x128xf32>
    %1 = arith.truncf %0 : vector<16x128xf32> to vector<16x128xbf16>
    %c0_1 = arith.constant 0 : index
    %c0_2 = arith.constant 0 : index
    %2 = vector.load %arg3[%c0_1, %c0_2] : memref<128x256xbf16, #tpu.memory_space<vmem>>, vector<128x256xbf16>
    %cst = arith.constant dense<0.000000e+00> : vector<16x256xf32>
    %3 = tpu.matmul %1, %2, %cst {dimension_numbers = #tpu.dot_dimension_numbers<[1], [0], [0], [1], [0, 0, 1, 1], [], []>} : vector<16x128xbf16>, vector<128x256xbf16>, vector<16x256xf32> -> vector<16x256xf32>
    %c0_3 = arith.constant 0 : index
    %c0_4 = arith.constant 0 : index
    %4 = vector.load %arg4[%c0_3, %c0_4] : memref<1x256xf32, #tpu.memory_space<vmem>>, vector<1x256xf32>
    %5 = vector.broadcast %4 : vector<1x256xf32> to vector<16x256xf32>
    %6 = arith.addf %3, %5 : vector<16x256xf32>
    %c0_5 = arith.constant 0 : index
    %c0_6 = arith.constant 0 : index
    %7 = vector.load %arg5[%c0_5, %c0_6] : memref<16x256xf32, #tpu.memory_space<vmem>>, vector<16x256xf32>
    tpu.vector_store %arg5[%c0_5, %c0_6], %6 {strides = array<i32>} : memref<16x256xf32, #tpu.memory_space<vmem>>, vector<16x256xf32>,
    return
  }
  func.func @transform_0(%arg0: i32, %arg1: i32) -> (i32, i32) {
    %c0_i32 = arith.constant 0 : i32
    %c0_i32_0 = arith.constant 0 : i32
    return %arg0, %c0_i32 : i32, i32
  }
  func.func @transform_1(%arg0: i32, %arg1: i32) -> (i32, i32) {
    %c0_i32 = arith.constant 0 : i32
    %c0_i32_0 = arith.constant 0 : i32
    return %c0_i32, %arg1 : i32, i32
  }
  func.func @transform_2(%arg0: i32, %arg1: i32) -> (i32, i32) {
    %c0_i32 = arith.constant 0 : i32
    %c0_i32_0 = arith.constant 0 : i32
    return %c0_i32, %arg1 : i32, i32
  }
  func.func @transform_3(%arg0: i32, %arg1: i32) -> (i32, i32) {
    %c0_i32 = arith.constant 0 : i32
    return %arg0, %arg1 : i32, i32
  }
}

module attributes {stable_mosaic.version = 11 : i64} {
  func.func @_mm_kernel_1k(%arg0: i32, %arg1: i32, %arg2: memref<16x128xbf16, #tpu.memory_space<vmem>>, %arg3: memref<128x128xbf16, #tpu.memory_space<vmem>>, %arg4: memref<1x128xf32, #tpu.memory_space<vmem>>, %arg5: memref<16x128xf32, #tpu.memory_space<vmem>>) attributes {dimension_semantics = [#tpu.dimension_semantics<parallel>, #tpu.dimension_semantics<parallel>], iteration_bounds = array<i64: 1, 1>, scalar_prefetch = 0 : i64, scratch_operands = 0 : i64, tpu.core_type = #tpu.core_type<tc>, window_params = [{transform_indices = @transform_0, window_bounds = array<i64: 16, 128>}, {transform_indices = @transform_1, window_bounds = array<i64: 128, 128>}, {transform_indices = @transform_2, window_bounds = array<i64: 1, 128>}, {transform_indices = @transform_3, window_bounds = array<i64: 16, 128>}]} {
    %c0 = arith.constant 0 : index
    %c0_0 = arith.constant 0 : index
    %0 = vector.load %arg2[%c0, %c0_0] : memref<16x128xbf16, #tpu.memory_space<vmem>>, vector<16x128xbf16>
    %c0_1 = arith.constant 0 : index
    %c0_2 = arith.constant 0 : index
    %1 = vector.load %arg3[%c0_1, %c0_2] : memref<128x128xbf16, #tpu.memory_space<vmem>>, vector<128x128xbf16>
    %cst = arith.constant dense<0.000000e+00> : vector<16x128xf32>
    %2 = tpu.matmul %0, %1, %cst {dimension_numbers = #tpu.dot_dimension_numbers<[1], [0], [0], [1], [0, 0, 1, 1], [], []>} : vector<16x128xbf16>, vector<128x128xbf16>, vector<16x128xf32> -> vector<16x128xf32>
    %c0_3 = arith.constant 0 : index
    %c0_4 = arith.constant 0 : index
    %3 = vector.load %arg4[%c0_3, %c0_4] : memref<1x128xf32, #tpu.memory_space<vmem>>, vector<1x128xf32>
    %4 = vector.broadcast %3 : vector<1x128xf32> to vector<16x128xf32>
    %5 = arith.addf %2, %4 : vector<16x128xf32>
    %6 = arith.negf %5 : vector<16x128xf32>
    %7 = math.exp %6 : vector<16x128xf32>
    %cst_5 = arith.constant 1.000000e+00 : f32
    %8 = vector.broadcast %cst_5 : f32 to vector<16x128xf32>
    %9 = arith.addf %8, %7 : vector<16x128xf32>
    %10 = arith.divf %8, %9 : vector<16x128xf32>
    %c0_6 = arith.constant 0 : index
    %c0_7 = arith.constant 0 : index
    %11 = vector.load %arg5[%c0_6, %c0_7] : memref<16x128xf32, #tpu.memory_space<vmem>>, vector<16x128xf32>
    tpu.vector_store %arg5[%c0_6, %c0_7], %10 {strides = array<i32>} : memref<16x128xf32, #tpu.memory_space<vmem>>, vector<16x128xf32>,
    return
  }
  func.func @transform_0(%arg0: i32, %arg1: i32) -> (i32, i32) {
    %c0_i32 = arith.constant 0 : i32
    %c0_i32_0 = arith.constant 0 : i32
    return %arg0, %c0_i32 : i32, i32
  }
  func.func @transform_1(%arg0: i32, %arg1: i32) -> (i32, i32) {
    %c0_i32 = arith.constant 0 : i32
    %c0_i32_0 = arith.constant 0 : i32
    return %c0_i32, %arg1 : i32, i32
  }
  func.func @transform_2(%arg0: i32, %arg1: i32) -> (i32, i32) {
    %c0_i32 = arith.constant 0 : i32
    %c0_i32_0 = arith.constant 0 : i32
    return %c0_i32, %arg1 : i32, i32
  }
  func.func @transform_3(%arg0: i32, %arg1: i32) -> (i32, i32) {
    %c0_i32 = arith.constant 0 : i32
    return %arg0, %arg1 : i32, i32
  }
}

</mosaic_0001>

<bundles_post_ra>
// kernel: detr_forward.33
= control target key start
LH: loop header
LB: loop body
LE: loop exit
PB: predicated region body
PF: predicated region fallthrough
CT: control target
= control target key end

     0   :  { %s858_s12 = smov 0   ;;  %s860_s13 = smov 0   ;;  %s1027_s0 = inlined_call_operand.vmem [shape: f32[512,128], index: 0, kind: input, shape index: {}]   ;;  %s1028_s1 = inlined_call_operand.vmem [shape: bf16[128,128], index: 1, kind: input, shape index: {}]   ;;  %s1029_s2 = inlined_call_operand.vmem [shape: f32[1,128], index: 2, kind: input, shape index: {}]   ;;  %s1030_s3 = inlined_call_operand.vmem [shape: f32[512,128], index: 3, kind: output, shape index: {}]  }
   0x1   :  { %s862_s14 = smov 0  }
   0x2 LB: > { %s25_s15 = sadd.s32 1, %s832_s13  ;;  %p678_p0 = scmp.ge.s32.totalorder %s836_s14, 1  ;;  %s836_s14 = sphi %s862_s14, %s13_s14   ;;  %s832_s13 = sphi %s860_s13, %s1032_s13   ;;  %s828_s12 = sphi %s858_s12, %s1031_s12  }
   0x3   : > { %p27_p1 = scmp.ge.s32.totalorder %s25_s15, 2  ;;  %p169_p2 = scmp.lt.s32.totalorder %s836_s14, 3 }
   0x5   : > { %s1034_s15 = smov (%p27_p1, %s25_s15), 0  ;;  %p170_p3 = pnand %p678_p0, %p169_p2 }
   0x6   : > { %v806_v0 = vld [vmem:[%s1028_s1] sm:$0xff] (!%p170_p3)   ;;  %s679_s18 = sshll.u32 (!%p170_p3), %s828_s12, 5  ;;  %v807_v1 = vld [vmem:[%s1028_s1 + $0x8] sm:$0xff] (!%p170_p3)   ;;  %v808_v2 = vld [vmem:[%s1028_s1 + $0x10] sm:$0xff] (!%p170_p3)  }
   0x7   : > { %173 = sbr.rel (%p170_p3) target bundleno = 284 (0x11c), region = 32  ;;  %p204_p4 = scmp.lt.s32.totalorder (!%p170_p3), %s679_s18, 63  ;;  %718 = vmatprep.subr.bf16.mxu0 (!%p170_p3), %v806_v0  ;;  %766 = vmatprep.subr.bf16.mxu1 (!%p170_p3), %v806_v0  ;;  %v809_v3 = vld [vmem:[%s1028_s1 + $0x18] sm:$0xff] (!%p170_p3)   ;;  %v810_v10 = vld [vmem:[%s1028_s1 + $0x20] sm:$0xff] (!%p170_p3)   ;;  %v811_v11 = vld [vmem:[%s1028_s1 + $0x28] sm:$0xff] (!%p170_p3)  }
   0x8   : > { %719 = vmatpush3.bf16.msra.mxu0 (!%p170_p3), %v806_v0  ;;  %774 = vmatpush3.bf16.msra.mxu1 (!%p170_p3), %v806_v0  ;;  %v812_v12 = vld [vmem:[%s1028_s1 + $0x30] sm:$0xff] (!%p170_p3)   ;;  %v813_v13 = vld [vmem:[%s1028_s1 + $0x38] sm:$0xff] (!%p170_p3)   ;;  %v945_v56 = vld [vmem:[%s1029_s2] ss:$0 sm:$0xff] (!%p170_p3) }
   0x9   : > { %720 = vmatprep.subr.bf16.mxu0 (!%p170_p3), %v807_v1  ;;  %767 = vmatprep.subr.bf16.mxu1 (!%p170_p3), %v807_v1 }
   0xc   : > { %721 = vmatpush3.bf16.msra.mxu0 (!%p170_p3), %v807_v1  ;;  %775 = vmatpush3.bf16.msra.mxu1 (!%p170_p3), %v807_v1 }
   0xd   : > { %722 = vmatprep.subr.bf16.mxu0 (!%p170_p3), %v808_v2  ;;  %768 = vmatprep.subr.bf16.mxu1 (!%p170_p3), %v808_v2 }
   0xe   : > { %s1036_s18 = smov (!%p204_p4, %s679_s18), 63 }
   0xf   : > { %s680_s23 = sshll.u32 %s1036_s18, 3 }
  0x10   : > { %s893_s26 = scalar_lea.vmem %s1027_s0, %s680_s23  ;;  %723 = vmatpush3.bf16.msra.mxu0 %v808_v2  ;;  %776 = vmatpush3.bf16.msra.mxu1 %v808_v2  ;;  %s954_s17 = scalar_lea.vmem %s1030_s3, %s680_s23 }
  0x11   : > { %v226_v4 = vld [vmem:[%s893_s26] sm:$0xff]  ;;  %v227_v5 = vld [vmem:[%s893_s26 + $0x8] sm:$0xff]  ;;  %724 = vmatprep.subr.bf16.mxu0 %v809_v3  ;;  %769 = vmatprep.subr.bf16.mxu1 %v809_v3  ;;  %v228_v14 = vld [vmem:[%s893_s26 + $0x10] sm:$0xff] }
  0x12   : > { %v242_v6 = vld [vmem:[%s893_s26 + $0x80] sm:$0xff]  ;;  %v258_v7 = vpack.c.bf16 %v227_v5, %v226_v4  ;;  %v243_v8 = vld [vmem:[%s893_s26 + $0x88] sm:$0xff]  ;;  %v229_v15 = vld [vmem:[%s893_s26 + $0x18] sm:$0xff] }
  0x13   : > { %v266_v9 = vpack.c.bf16 %v243_v8, %v242_v6  ;;  %v244_v16 = vld [vmem:[%s893_s26 + $0x90] sm:$0xff]  ;;  %v245_v17 = vld [vmem:[%s893_s26 + $0x98] sm:$0xff]  ;;  %v230_v18 = vld [vmem:[%s893_s26 + $0x20] sm:$0xff]  ;;  %v259_v22 = vpack.c.bf16 %v229_v15, %v228_v14 }
  0x14   : > { %734 = vmatprep.mubr.bf16.mxu0 %v258_v7  ;;  %725 = vmatpush3.bf16.msra.mxu0 %v809_v3  ;;  %v231_v19 = vld [vmem:[%s893_s26 + $0x28] sm:$0xff]  ;;  %v246_v20 = vld [vmem:[%s893_s26 + $0xa0] sm:$0xff]  ;;  %v267_v23 = vpack.c.bf16 %v245_v17, %v244_v16  ;;  %v232_v26 = vld [vmem:[%s893_s26 + $0x30] sm:$0xff] }
  0x15   : > { %750 = vmatprep.mubr.bf16.mxu1 %v266_v9  ;;  %777 = vmatpush3.bf16.msra.mxu1 %v809_v3  ;;  %v247_v21 = vld [vmem:[%s893_s26 + $0xa8] sm:$0xff]  ;;  %v260_v24 = vpack.c.bf16 %v231_v19, %v230_v18  ;;  %v233_v27 = vld [vmem:[%s893_s26 + $0x38] sm:$0xff]  ;;  %v248_v28 = vld [vmem:[%s893_s26 + $0xb0] sm:$0xff] }
  0x16   : > { %726 = vmatprep.subr.bf16.mxu0 %v810_v10  ;;  %770 = vmatprep.subr.bf16.mxu1 %v810_v10  ;;  %v268_v25 = vpack.c.bf16 %v247_v21, %v246_v20  ;;  %v249_v29 = vld [vmem:[%s893_s26 + $0xb8] sm:$0xff]  ;;  %v234_v30 = vld [vmem:[%s893_s26 + $0x40] sm:$0xff]  ;;  %v235_v31 = vld [vmem:[%s893_s26 + $0x48] sm:$0xff]  ;;  %v261_v34 = vpack.c.bf16 %v233_v27, %v232_v26 }
  0x17   : > { %v250_v32 = vld [vmem:[%s893_s26 + $0xc0] sm:$0xff]  ;;  %v251_v33 = vld [vmem:[%s893_s26 + $0xc8] sm:$0xff]  ;;  %v269_v35 = vpack.c.bf16 %v249_v29, %v248_v28  ;;  %v262_v36 = vpack.c.bf16 %v235_v31, %v234_v30  ;;  %v236_v38 = vld [vmem:[%s893_s26 + $0x50] sm:$0xff] }
  0x18   : > { %727 = vmatpush3.bf16.msra.mxu0 %v810_v10  ;;  %v270_v37 = vpack.c.bf16 %v251_v33, %v250_v32  ;;  %v237_v39 = vld [vmem:[%s893_s26 + $0x58] sm:$0xff]  ;;  %v252_v40 = vld [vmem:[%s893_s26 + $0xd0] sm:$0xff]  ;;  %v238_v42 = vld [vmem:[%s893_s26 + $0x60] sm:$0xff] }
  0x19   : > { %778 = vmatpush3.bf16.msra.mxu1 %v810_v10  ;;  %728 = vmatprep.subr.bf16.mxu0 %v811_v11  ;;  %v253_v41 = vld [vmem:[%s893_s26 + $0xd8] sm:$0xff]  ;;  %v239_v43 = vld [vmem:[%s893_s26 + $0x68] sm:$0xff]  ;;  %v254_v44 = vld [vmem:[%s893_s26 + $0xe0] sm:$0xff]  ;;  %v263_v46 = vpack.c.bf16 %v237_v39, %v236_v38 }
  0x1a   : > { %771 = vmatprep.subr.bf16.mxu1 %v811_v11  ;;  %v255_v45 = vld [vmem:[%s893_s26 + $0xe8] sm:$0xff]  ;;  %v271_v47 = vpack.c.bf16 %v253_v41, %v252_v40  ;;  %v264_v48 = vpack.c.bf16 %v239_v43, %v238_v42  ;;  %v240_v50 = vld [vmem:[%s893_s26 + $0x70] sm:$0xff]  ;;  %v241_v51 = vld [vmem:[%s893_s26 + $0x78] sm:$0xff] }
  0x1b   : > { %v272_v49 = vpack.c.bf16 %v255_v45, %v254_v44  ;;  %v256_v52 = vld [vmem:[%s893_s26 + $0xf0] sm:$0xff]  ;;  %v257_v53 = vld [vmem:[%s893_s26 + $0xf8] sm:$0xff]  ;;  %v265_v54 = vpack.c.bf16 %v241_v51, %v240_v50 }
  0x1c   : > { %729 = vmatpush3.bf16.msra.mxu0 %v811_v11  ;;  %v273_v55 = vpack.c.bf16 %v257_v53, %v256_v52 }
  0x1d   : > { %779 = vmatpush3.bf16.msra.mxu1 %v811_v11  ;;  %730 = vmatprep.subr.bf16.mxu0 %v812_v12 }
  0x1e   : > { %772 = vmatprep.subr.bf16.mxu1 %v812_v12 }
  0x20   : > { %731 = vmatpush3.bf16.msra.mxu0 %v812_v12 }
  0x21   : > { %780 = vmatpush3.bf16.msra.mxu1 %v812_v12  ;;  %732 = vmatprep.subr.bf16.mxu0 %v813_v13 }
  0x22   : > { %773 = vmatprep.subr.bf16.mxu1 %v813_v13 }
  0x24   : > { %733 = vmatpush3.bf16.msra.mxu0 %v813_v13 }
  0x25   : > { %781 = vmatpush3.bf16.msra.mxu1 %v813_v13 }
  0x27   : > { %735 = vmatmul.mubr.bf16.vlgmr.msra.gmra.mrb[0].mxu0 %v259_v22 }
  0x28   : > { %751 = vmatmul.mubr.bf16.vlgmr.msra.gmra.mrb[0].mxu1 %v267_v23  ;;  %738 = vmatprep.mubr.bf16.mxu0 %v260_v24 }
  0x29   : > { %754 = vmatprep.mubr.bf16.mxu1 %v268_v25 }
  0x2f   : > { %739 = vmatmul.mubr.bf16.gmra.mrb[4].mxu0 %v261_v34 }
  0x30   : > { %755 = vmatmul.mubr.bf16.gmra.mrb[4].mxu1 %v269_v35  ;;  %742 = vmatprep.mubr.bf16.mxu0 %v262_v36 }
  0x31   : > { %758 = vmatprep.mubr.bf16.mxu1 %v270_v37 }
  0x37   : > { %743 = vmatmul.mubr.bf16.gmra.mrb[8].mxu0 %v263_v46 }
  0x38   : > { %759 = vmatmul.mubr.bf16.gmra.mrb[8].mxu1 %v271_v47  ;;  %746 = vmatprep.mubr.bf16.mxu0 %v264_v48 }
  0x39   : > { %762 = vmatprep.mubr.bf16.mxu1 %v272_v49 }
  0x3f   : > { %747 = vmatmul.mubr.bf16.gmra.mrb[12].mxu0 %v265_v54 }
  0x40   : > { %763 = vmatmul.mubr.bf16.gmra.mrb[12].mxu1 %v273_v55 }
  0xfa   : > { %v736_v57 = vpop.f32.mrb[0].mxu0 }
  0xfb   : > { %v752_v58 = vpop.f32.mrb[0].mxu1  ;;  %v388_v59 = vadd.f32 %v736_v57, %v945_v56  ;;  %v379_v61 = vpop.f32.mrb[1].mxu0 }
  0xfc   : > { %v452_v60 = vadd.f32 %v752_v58, %v945_v56  ;;  %v443_v62 = vpop.f32.mrb[1].mxu1  ;;  %v380_v63 = vadd.f32 %v945_v56, %v379_v61  ;;  %v737_v1 = vpop.f32.mrb[2].mxu0 }
  0xfd   : > { %v444_v0 = vadd.f32 %v945_v56, %v443_v62  ;;  %v753_v2 = vpop.f32.mrb[2].mxu1  ;;  %v508_v3 = vmax.f32 %v388_v59, 0.0  ;;  %v391_v5 = vadd.f32 %v737_v1, %v945_v56  ;;  %v382_v7 = vpop.f32.mrb[3].mxu0 }
  0xfe   : > { %v524_v4 = vmax.f32 %v452_v60, 0.0  ;;  %v455_v6 = vadd.f32 %v753_v2, %v945_v56  ;;  %v446_v8 = vpop.f32.mrb[3].mxu1  ;;  %v506_v9 = vmax.f32 %v380_v63, 0.0  ;;  %v383_v11 = vadd.f32 %v945_v56, %v382_v7 }
  0xff   : > { %v522_v10 = vmax.f32 %v444_v0, 0.0  ;;  %v447_v12 = vadd.f32 %v945_v56, %v446_v8  ;;  %540 = vst [vmem:[%s954_s17 + $0x10] sm:$0xff] %v508_v3  ;;  %v509_v13 = vmax.f32 %v391_v5, 0.0 }
 0x100   : > { %556 = vst [vmem:[%s954_s17 + $0x90] sm:$0xff] %v524_v4  ;;  %v525_v14 = vmax.f32 %v455_v6, 0.0  ;;  %538 = vst [vmem:[%s954_s17] sm:$0xff] %v506_v9  ;;  %v507_v15 = vmax.f32 %v383_v11, 0.0 }
 0x101   : > { %554 = vst [vmem:[%s954_s17 + $0x80] sm:$0xff] %v522_v10  ;;  %v523_v16 = vmax.f32 %v447_v12, 0.0  ;;  %541 = vst [vmem:[%s954_s17 + $0x18] sm:$0xff] %v509_v13 }
 0x102   : > { %557 = vst [vmem:[%s954_s17 + $0x98] sm:$0xff] %v525_v14  ;;  %539 = vst [vmem:[%s954_s17 + $0x8] sm:$0xff] %v507_v15  ;;  %v740_v17 = vpop.f32.mrb[4].mxu0 }
 0x103   : > { %555 = vst [vmem:[%s954_s17 + $0x88] sm:$0xff] %v523_v16  ;;  %v756_v18 = vpop.f32.mrb[4].mxu1  ;;  %v404_v19 = vadd.f32 %v740_v17, %v945_v56  ;;  %v395_v21 = vpop.f32.mrb[5].mxu0 }
 0x104   : > { %v468_v20 = vadd.f32 %v756_v18, %v945_v56  ;;  %v459_v22 = vpop.f32.mrb[5].mxu1  ;;  %v396_v23 = vadd.f32 %v945_v56, %v395_v21  ;;  %v741_v25 = vpop.f32.mrb[6].mxu0 }
 0x105   : > { %v460_v24 = vadd.f32 %v945_v56, %v459_v22  ;;  %v757_v26 = vpop.f32.mrb[6].mxu1  ;;  %v512_v27 = vmax.f32 %v404_v19, 0.0  ;;  %v407_v29 = vadd.f32 %v741_v25, %v945_v56  ;;  %v398_v31 = vpop.f32.mrb[7].mxu0 }
 0x106   : > { %v528_v28 = vmax.f32 %v468_v20, 0.0  ;;  %v471_v30 = vadd.f32 %v757_v26, %v945_v56  ;;  %v462_v32 = vpop.f32.mrb[7].mxu1  ;;  %v510_v33 = vmax.f32 %v396_v23, 0.0  ;;  %v399_v35 = vadd.f32 %v945_v56, %v398_v31 }
 0x107   : > { %v526_v34 = vmax.f32 %v460_v24, 0.0  ;;  %v463_v36 = vadd.f32 %v945_v56, %v462_v32  ;;  %544 = vst [vmem:[%s954_s17 + $0x30] sm:$0xff] %v512_v27  ;;  %v513_v37 = vmax.f32 %v407_v29, 0.0 }
 0x108   : > { %560 = vst [vmem:[%s954_s17 + $0xb0] sm:$0xff] %v528_v28  ;;  %v529_v38 = vmax.f32 %v471_v30, 0.0  ;;  %542 = vst [vmem:[%s954_s17 + $0x20] sm:$0xff] %v510_v33  ;;  %v511_v39 = vmax.f32 %v399_v35, 0.0 }
 0x109   : > { %558 = vst [vmem:[%s954_s17 + $0xa0] sm:$0xff] %v526_v34  ;;  %v527_v40 = vmax.f32 %v463_v36, 0.0  ;;  %545 = vst [vmem:[%s954_s17 + $0x38] sm:$0xff] %v513_v37 }
 0x10a   : > { %561 = vst [vmem:[%s954_s17 + $0xb8] sm:$0xff] %v529_v38  ;;  %543 = vst [vmem:[%s954_s17 + $0x28] sm:$0xff] %v511_v39  ;;  %v744_v41 = vpop.f32.mrb[8].mxu0 }
 0x10b   : > { %559 = vst [vmem:[%s954_s17 + $0xa8] sm:$0xff] %v527_v40  ;;  %v760_v42 = vpop.f32.mrb[8].mxu1  ;;  %v420_v43 = vadd.f32 %v744_v41, %v945_v56  ;;  %v411_v45 = vpop.f32.mrb[9].mxu0 }
 0x10c   : > { %v484_v44 = vadd.f32 %v760_v42, %v945_v56  ;;  %v475_v46 = vpop.f32.mrb[9].mxu1  ;;  %v412_v47 = vadd.f32 %v945_v56, %v411_v45  ;;  %v745_v49 = vpop.f32.mrb[10].mxu0 }
 0x10d   : > { %v476_v48 = vadd.f32 %v945_v56, %v475_v46  ;;  %v761_v50 = vpop.f32.mrb[10].mxu1  ;;  %v516_v51 = vmax.f32 %v420_v43, 0.0  ;;  %v423_v53 = vadd.f32 %v745_v49, %v945_v56  ;;  %v414_v55 = vpop.f32.mrb[11].mxu0 }
 0x10e   : > { %v532_v52 = vmax.f32 %v484_v44, 0.0  ;;  %v487_v54 = vadd.f32 %v761_v50, %v945_v56  ;;  %v478_v57 = vpop.f32.mrb[11].mxu1  ;;  %v514_v58 = vmax.f32 %v412_v47, 0.0  ;;  %v415_v60 = vadd.f32 %v945_v56, %v414_v55 }
 0x10f   : > { %v530_v59 = vmax.f32 %v476_v48, 0.0  ;;  %v479_v61 = vadd.f32 %v945_v56, %v478_v57  ;;  %548 = vst [vmem:[%s954_s17 + $0x50] sm:$0xff] %v516_v51  ;;  %v517_v62 = vmax.f32 %v423_v53, 0.0 }
 0x110   : > { %564 = vst [vmem:[%s954_s17 + $0xd0] sm:$0xff] %v532_v52  ;;  %v533_v63 = vmax.f32 %v487_v54, 0.0  ;;  %546 = vst [vmem:[%s954_s17 + $0x40] sm:$0xff] %v514_v58  ;;  %v515_v0 = vmax.f32 %v415_v60, 0.0 }
 0x111   : > { %562 = vst [vmem:[%s954_s17 + $0xc0] sm:$0xff] %v530_v59  ;;  %v531_v1 = vmax.f32 %v479_v61, 0.0  ;;  %549 = vst [vmem:[%s954_s17 + $0x58] sm:$0xff] %v517_v62 }
 0x112   : > { %565 = vst [vmem:[%s954_s17 + $0xd8] sm:$0xff] %v533_v63  ;;  %547 = vst [vmem:[%s954_s17 + $0x48] sm:$0xff] %v515_v0  ;;  %v748_v2 = vpop.f32.mrb[12].mxu0 }
 0x113   : > { %563 = vst [vmem:[%s954_s17 + $0xc8] sm:$0xff] %v531_v1  ;;  %v764_v3 = vpop.f32.mrb[12].mxu1  ;;  %v436_v4 = vadd.f32 %v748_v2, %v945_v56  ;;  %v427_v6 = vpop.f32.mrb[13].mxu0 }
 0x114   : > { %v500_v5 = vadd.f32 %v764_v3, %v945_v56  ;;  %v491_v7 = vpop.f32.mrb[13].mxu1  ;;  %v428_v8 = vadd.f32 %v945_v56, %v427_v6  ;;  %v749_v10 = vpop.f32.mrb[14].mxu0 }
 0x115   : > { %v492_v9 = vadd.f32 %v945_v56, %v491_v7  ;;  %v765_v11 = vpop.f32.mrb[14].mxu1  ;;  %v520_v12 = vmax.f32 %v436_v4, 0.0  ;;  %v439_v14 = vadd.f32 %v749_v10, %v945_v56  ;;  %v430_v16 = vpop.f32.mrb[15].mxu0 }
 0x116   : > { %v536_v13 = vmax.f32 %v500_v5, 0.0  ;;  %v503_v15 = vadd.f32 %v765_v11, %v945_v56  ;;  %v494_v17 = vpop.f32.mrb[15].mxu1  ;;  %v518_v18 = vmax.f32 %v428_v8, 0.0  ;;  %v431_v20 = vadd.f32 %v945_v56, %v430_v16 }
 0x117   : > { %v534_v19 = vmax.f32 %v492_v9, 0.0  ;;  %v495_v21 = vadd.f32 %v945_v56, %v494_v17  ;;  %552 = vst [vmem:[%s954_s17 + $0x70] sm:$0xff] %v520_v12  ;;  %v521_v22 = vmax.f32 %v439_v14, 0.0 }
 0x118   : > { %568 = vst [vmem:[%s954_s17 + $0xf0] sm:$0xff] %v536_v13  ;;  %v537_v23 = vmax.f32 %v503_v15, 0.0  ;;  %550 = vst [vmem:[%s954_s17 + $0x60] sm:$0xff] %v518_v18  ;;  %v519_v24 = vmax.f32 %v431_v20, 0.0 }
 0x119   : > { %566 = vst [vmem:[%s954_s17 + $0xe0] sm:$0xff] %v534_v19  ;;  %v535_v25 = vmax.f32 %v495_v21, 0.0  ;;  %553 = vst [vmem:[%s954_s17 + $0x78] sm:$0xff] %v521_v22 }
 0x11a   : > { %569 = vst [vmem:[%s954_s17 + $0xf8] sm:$0xff] %v537_v23  ;;  %551 = vst [vmem:[%s954_s17 + $0x68] sm:$0xff] %v519_v24 }
 0x11b   : > { %567 = vst [vmem:[%s954_s17 + $0xe8] sm:$0xff] %v535_v25 }
 0x11c PF: > { %s13_s14 = sadd.s32 1, %s836_s14   ;;  %s1031_s12 = smov %s832_s13 }
 0x11d   : > { %p10_p5 = scmp.ge.s32.totalorder %s13_s14, 4   ;;  %s1032_s13 = smov %s1034_s15 }
 0x11f   :  { %12 = sbr.rel (!%p10_p5) target bundleno = 2 (0x2), region = 68 }

// kernel: detr_forward.34
= control target key start
LH: loop header
LB: loop body
LE: loop exit
PB: predicated region body
PF: predicated region fallthrough
CT: control target
= control target key end

     0   :  { %s642_s12 = smov 0   ;;  %s644_s13 = smov 0   ;;  %s719_s0 = inlined_call_operand.vmem [shape: f32[128,128], index: 0, kind: input, shape index: {}]   ;;  %s720_s1 = inlined_call_operand.vmem [shape: bf16[128,128], index: 1, kind: input, shape index: {}]   ;;  %s721_s2 = inlined_call_operand.vmem [shape: f32[1,128], index: 2, kind: input, shape index: {}]   ;;  %s722_s3 = inlined_call_operand.vmem [shape: f32[128,128], index: 3, kind: output, shape index: {}]  }
   0x1   :  { %s646_s14 = smov 0  }
   0x2 LB: > { %s25_s15 = sadd.s32 1, %s616_s13  ;;  %p498_p0 = scmp.ge.s32.totalorder %s620_s14, 1  ;;  %s620_s14 = sphi %s646_s14, %s13_s14   ;;  %s616_s13 = sphi %s644_s13, %s724_s13   ;;  %s612_s12 = sphi %s642_s12, %s723_s12  }
   0x3   : > { %p27_p1 = scmp.ge.s32.totalorder %s25_s15, 2  ;;  %p169_p2 = scmp.lt.s32.totalorder %s620_s14, 3 }
   0x5   : > { %s726_s15 = smov (%p27_p1, %s25_s15), 0  ;;  %p170_p3 = pnand %p498_p0, %p169_p2 }
   0x6   : > { %v590_v0 = vld [vmem:[%s720_s1] sm:$0xff] (!%p170_p3)   ;;  %s499_s18 = sshll.u32 (!%p170_p3), %s612_s12, 3  ;;  %v591_v1 = vld [vmem:[%s720_s1 + $0x8] sm:$0xff] (!%p170_p3)   ;;  %v592_v2 = vld [vmem:[%s720_s1 + $0x10] sm:$0xff] (!%p170_p3)  }
   0x7   : > { %173 = sbr.rel (%p170_p3) target bundleno = 260 (0x104), region = 32  ;;  %p204_p4 = scmp.lt.s32.totalorder (!%p170_p3), %s499_s18, 15  ;;  %526 = vmatprep.subr.bf16.mxu0 (!%p170_p3), %v590_v0  ;;  %550 = vmatprep.subr.bf16.mxu1 (!%p170_p3), %v590_v0  ;;  %v593_v3 = vld [vmem:[%s720_s1 + $0x18] sm:$0xff] (!%p170_p3)   ;;  %v594_v10 = vld [vmem:[%s720_s1 + $0x20] sm:$0xff] (!%p170_p3)   ;;  %v595_v11 = vld [vmem:[%s720_s1 + $0x28] sm:$0xff] (!%p170_p3)  }
   0x8   : > { %527 = vmatpush3.bf16.msra.mxu0 (!%p170_p3), %v590_v0  ;;  %558 = vmatpush3.bf16.msra.mxu1 (!%p170_p3), %v590_v0  ;;  %v596_v12 = vld [vmem:[%s720_s1 + $0x30] sm:$0xff] (!%p170_p3)   ;;  %v597_v13 = vld [vmem:[%s720_s1 + $0x38] sm:$0xff] (!%p170_p3)   ;;  %v503_v20 = vld [vmem:[%s721_s2] ss:$0 sm:$0xff] (!%p170_p3) }
   0x9   : > { %528 = vmatprep.subr.bf16.mxu0 (!%p170_p3), %v591_v1  ;;  %551 = vmatprep.subr.bf16.mxu1 (!%p170_p3), %v591_v1 }
   0xc   : > { %529 = vmatpush3.bf16.msra.mxu0 (!%p170_p3), %v591_v1  ;;  %559 = vmatpush3.bf16.msra.mxu1 (!%p170_p3), %v591_v1 }
   0xd   : > { %530 = vmatprep.subr.bf16.mxu0 (!%p170_p3), %v592_v2  ;;  %552 = vmatprep.subr.bf16.mxu1 (!%p170_p3), %v592_v2 }
   0xe   : > { %s728_s18 = smov (!%p204_p4, %s499_s18), 15 }
   0xf   : > { %s500_s23 = sshll.u32 %s728_s18, 3 }
  0x10   : > { %s677_s26 = scalar_lea.vmem %s719_s0, %s500_s23  ;;  %531 = vmatpush3.bf16.msra.mxu0 %v592_v2  ;;  %560 = vmatpush3.bf16.msra.mxu1 %v592_v2  ;;  %s223_s17 = scalar_lea.vmem %s722_s3, %s500_s23 }
  0x11   : > { %v226_v4 = vld [vmem:[%s677_s26] sm:$0xff]  ;;  %v227_v5 = vld [vmem:[%s677_s26 + $0x8] sm:$0xff]  ;;  %532 = vmatprep.subr.bf16.mxu0 %v593_v3  ;;  %553 = vmatprep.subr.bf16.mxu1 %v593_v3  ;;  %v228_v14 = vld [vmem:[%s677_s26 + $0x10] sm:$0xff] }
  0x12   : > { %v230_v6 = vld [vmem:[%s677_s26 + $0x20] sm:$0xff]  ;;  %v234_v7 = vpack.c.bf16 %v227_v5, %v226_v4  ;;  %v231_v8 = vld [vmem:[%s677_s26 + $0x28] sm:$0xff]  ;;  %v229_v15 = vld [vmem:[%s677_s26 + $0x18] sm:$0xff] }
  0x13   : > { %v236_v9 = vpack.c.bf16 %v231_v8, %v230_v6  ;;  %v232_v16 = vld [vmem:[%s677_s26 + $0x30] sm:$0xff]  ;;  %v233_v17 = vld [vmem:[%s677_s26 + $0x38] sm:$0xff]  ;;  %v235_v18 = vpack.c.bf16 %v229_v15, %v228_v14 }
  0x14   : > { %542 = vmatprep.mubr.bf16.mxu0 %v234_v7  ;;  %533 = vmatpush3.bf16.msra.mxu0 %v593_v3  ;;  %v237_v19 = vpack.c.bf16 %v233_v17, %v232_v16 }
  0x15   : > { %546 = vmatprep.mubr.bf16.mxu1 %v236_v9  ;;  %561 = vmatpush3.bf16.msra.mxu1 %v593_v3 }
  0x16   : > { %534 = vmatprep.subr.bf16.mxu0 %v594_v10  ;;  %554 = vmatprep.subr.bf16.mxu1 %v594_v10 }
  0x18   : > { %535 = vmatpush3.bf16.msra.mxu0 %v594_v10 }
  0x19   : > { %562 = vmatpush3.bf16.msra.mxu1 %v594_v10  ;;  %536 = vmatprep.subr.bf16.mxu0 %v595_v11 }
  0x1a   : > { %555 = vmatprep.subr.bf16.mxu1 %v595_v11 }
  0x1c   : > { %537 = vmatpush3.bf16.msra.mxu0 %v595_v11 }
  0x1d   : > { %563 = vmatpush3.bf16.msra.mxu1 %v595_v11  ;;  %538 = vmatprep.subr.bf16.mxu0 %v596_v12 }
  0x1e   : > { %556 = vmatprep.subr.bf16.mxu1 %v596_v12 }
  0x20   : > { %539 = vmatpush3.bf16.msra.mxu0 %v596_v12 }
  0x21   : > { %564 = vmatpush3.bf16.msra.mxu1 %v596_v12  ;;  %540 = vmatprep.subr.bf16.mxu0 %v597_v13 }
  0x22   : > { %557 = vmatprep.subr.bf16.mxu1 %v597_v13 }
  0x24   : > { %541 = vmatpush3.bf16.msra.mxu0 %v597_v13 }
  0x25   : > { %565 = vmatpush3.bf16.msra.mxu1 %v597_v13 }
  0x27   : > { %543 = vmatmul.mubr.bf16.vlgmr.msra.gmra.mrb[0].mxu0 %v235_v18 }
  0x28   : > { %547 = vmatmul.mubr.bf16.vlgmr.msra.gmra.mrb[0].mxu1 %v237_v19 }
  0xfa   : > { %v544_v21 = vpop.f32.mrb[0].mxu0 }
  0xfb   : > { %v548_v22 = vpop.f32.mrb[0].mxu1  ;;  %v352_v23 = vadd.f32 %v544_v21, %v503_v20  ;;  %v343_v25 = vpop.f32.mrb[1].mxu0 }
  0xfc   : > { %v368_v24 = vadd.f32 %v548_v22, %v503_v20  ;;  %v359_v26 = vpop.f32.mrb[1].mxu1  ;;  %v344_v27 = vadd.f32 %v503_v20, %v343_v25  ;;  %v545_v29 = vpop.f32.mrb[2].mxu0 }
  0xfd   : > { %v360_v28 = vadd.f32 %v503_v20, %v359_v26  ;;  %v549_v30 = vpop.f32.mrb[2].mxu1  ;;  %v376_v31 = vmax.f32 %v352_v23, 0.0  ;;  %v355_v33 = vadd.f32 %v545_v29, %v503_v20  ;;  %v346_v35 = vpop.f32.mrb[3].mxu0 }
  0xfe   : > { %v380_v32 = vmax.f32 %v368_v24, 0.0  ;;  %v371_v34 = vadd.f32 %v549_v30, %v503_v20  ;;  %v362_v36 = vpop.f32.mrb[3].mxu1  ;;  %v374_v37 = vmax.f32 %v344_v27, 0.0  ;;  %v347_v39 = vadd.f32 %v503_v20, %v346_v35 }
  0xff   : > { %v378_v38 = vmax.f32 %v360_v28, 0.0  ;;  %v363_v40 = vadd.f32 %v503_v20, %v362_v36  ;;  %384 = vst [vmem:[%s223_s17 + $0x10] sm:$0xff] %v376_v31  ;;  %v377_v41 = vmax.f32 %v355_v33, 0.0 }
 0x100   : > { %388 = vst [vmem:[%s223_s17 + $0x30] sm:$0xff] %v380_v32  ;;  %v381_v42 = vmax.f32 %v371_v34, 0.0  ;;  %382 = vst [vmem:[%s223_s17] sm:$0xff] %v374_v37  ;;  %v375_v43 = vmax.f32 %v347_v39, 0.0 }
 0x101   : > { %386 = vst [vmem:[%s223_s17 + $0x20] sm:$0xff] %v378_v38  ;;  %v379_v44 = vmax.f32 %v363_v40, 0.0  ;;  %385 = vst [vmem:[%s223_s17 + $0x18] sm:$0xff] %v377_v41 }
 0x102   : > { %389 = vst [vmem:[%s223_s17 + $0x38] sm:$0xff] %v381_v42  ;;  %383 = vst [vmem:[%s223_s17 + $0x8] sm:$0xff] %v375_v43 }
 0x103   : > { %387 = vst [vmem:[%s223_s17 + $0x28] sm:$0xff] %v379_v44 }
 0x104 PF: > { %s13_s14 = sadd.s32 1, %s620_s14   ;;  %s723_s12 = smov %s616_s13 }
 0x105   : > { %p10_p5 = scmp.ge.s32.totalorder %s13_s14, 4   ;;  %s724_s13 = smov %s726_s15 }
 0x107   :  { %12 = sbr.rel (!%p10_p5) target bundleno = 2 (0x2), region = 68 }

// kernel: detr_forward.35
= control target key start
LH: loop header
LB: loop body
LE: loop exit
PB: predicated region body
PF: predicated region fallthrough
CT: control target
= control target key end

     0   :  { %s634_s12 = smov 0   ;;  %s636_s13 = smov 0   ;;  %s711_s0 = inlined_call_operand.vmem [shape: f32[128,128], index: 0, kind: input, shape index: {}]   ;;  %s712_s1 = inlined_call_operand.vmem [shape: bf16[128,128], index: 1, kind: input, shape index: {}]   ;;  %s713_s2 = inlined_call_operand.vmem [shape: f32[1,128], index: 2, kind: input, shape index: {}]   ;;  %s714_s3 = inlined_call_operand.vmem [shape: f32[128,128], index: 3, kind: output, shape index: {}]  }
   0x1   :  { %s638_s14 = smov 0  }
   0x2 LB: > { %s25_s15 = sadd.s32 1, %s608_s13  ;;  %p490_p0 = scmp.ge.s32.totalorder %s612_s14, 1  ;;  %s612_s14 = sphi %s638_s14, %s13_s14   ;;  %s608_s13 = sphi %s636_s13, %s716_s13   ;;  %s604_s12 = sphi %s634_s12, %s715_s12  }
   0x3   : > { %p27_p1 = scmp.ge.s32.totalorder %s25_s15, 2  ;;  %p169_p2 = scmp.lt.s32.totalorder %s612_s14, 3 }
   0x5   : > { %s718_s15 = smov (%p27_p1, %s25_s15), 0  ;;  %p170_p3 = pnand %p490_p0, %p169_p2 }
   0x6   : > { %v582_v0 = vld [vmem:[%s712_s1] sm:$0xff] (!%p170_p3)   ;;  %s491_s18 = sshll.u32 (!%p170_p3), %s604_s12, 3  ;;  %v583_v1 = vld [vmem:[%s712_s1 + $0x8] sm:$0xff] (!%p170_p3)   ;;  %v584_v2 = vld [vmem:[%s712_s1 + $0x10] sm:$0xff] (!%p170_p3)  }
   0x7   : > { %173 = sbr.rel (%p170_p3) target bundleno = 258 (0x102), region = 32  ;;  %p204_p4 = scmp.lt.s32.totalorder (!%p170_p3), %s491_s18, 15  ;;  %518 = vmatprep.subr.bf16.mxu0 (!%p170_p3), %v582_v0  ;;  %542 = vmatprep.subr.bf16.mxu1 (!%p170_p3), %v582_v0  ;;  %v585_v3 = vld [vmem:[%s712_s1 + $0x18] sm:$0xff] (!%p170_p3)   ;;  %v586_v10 = vld [vmem:[%s712_s1 + $0x20] sm:$0xff] (!%p170_p3)   ;;  %v587_v11 = vld [vmem:[%s712_s1 + $0x28] sm:$0xff] (!%p170_p3)  }
   0x8   : > { %519 = vmatpush3.bf16.msra.mxu0 (!%p170_p3), %v582_v0  ;;  %550 = vmatpush3.bf16.msra.mxu1 (!%p170_p3), %v582_v0  ;;  %v588_v12 = vld [vmem:[%s712_s1 + $0x30] sm:$0xff] (!%p170_p3)   ;;  %v589_v13 = vld [vmem:[%s712_s1 + $0x38] sm:$0xff] (!%p170_p3)   ;;  %v495_v20 = vld [vmem:[%s713_s2] ss:$0 sm:$0xff] (!%p170_p3) }
   0x9   : > { %520 = vmatprep.subr.bf16.mxu0 (!%p170_p3), %v583_v1  ;;  %543 = vmatprep.subr.bf16.mxu1 (!%p170_p3), %v583_v1 }
   0xc   : > { %521 = vmatpush3.bf16.msra.mxu0 (!%p170_p3), %v583_v1  ;;  %551 = vmatpush3.bf16.msra.mxu1 (!%p170_p3), %v583_v1 }
   0xd   : > { %522 = vmatprep.subr.bf16.mxu0 (!%p170_p3), %v584_v2  ;;  %544 = vmatprep.subr.bf16.mxu1 (!%p170_p3), %v584_v2 }
   0xe   : > { %s720_s18 = smov (!%p204_p4, %s491_s18), 15 }
   0xf   : > { %s492_s23 = sshll.u32 %s720_s18, 3 }
  0x10   : > { %s669_s26 = scalar_lea.vmem %s711_s0, %s492_s23  ;;  %523 = vmatpush3.bf16.msra.mxu0 %v584_v2  ;;  %552 = vmatpush3.bf16.msra.mxu1 %v584_v2  ;;  %s223_s17 = scalar_lea.vmem %s714_s3, %s492_s23 }
  0x11   : > { %v226_v4 = vld [vmem:[%s669_s26] sm:$0xff]  ;;  %v227_v5 = vld [vmem:[%s669_s26 + $0x8] sm:$0xff]  ;;  %524 = vmatprep.subr.bf16.mxu0 %v585_v3  ;;  %545 = vmatprep.subr.bf16.mxu1 %v585_v3  ;;  %v228_v14 = vld [vmem:[%s669_s26 + $0x10] sm:$0xff] }
  0x12   : > { %v230_v6 = vld [vmem:[%s669_s26 + $0x20] sm:$0xff]  ;;  %v234_v7 = vpack.c.bf16 %v227_v5, %v226_v4  ;;  %v231_v8 = vld [vmem:[%s669_s26 + $0x28] sm:$0xff]  ;;  %v229_v15 = vld [vmem:[%s669_s26 + $0x18] sm:$0xff] }
  0x13   : > { %v236_v9 = vpack.c.bf16 %v231_v8, %v230_v6  ;;  %v232_v16 = vld [vmem:[%s669_s26 + $0x30] sm:$0xff]  ;;  %v233_v17 = vld [vmem:[%s669_s26 + $0x38] sm:$0xff]  ;;  %v235_v18 = vpack.c.bf16 %v229_v15, %v228_v14 }
  0x14   : > { %534 = vmatprep.mubr.bf16.mxu0 %v234_v7  ;;  %525 = vmatpush3.bf16.msra.mxu0 %v585_v3  ;;  %v237_v19 = vpack.c.bf16 %v233_v17, %v232_v16 }
  0x15   : > { %538 = vmatprep.mubr.bf16.mxu1 %v236_v9  ;;  %553 = vmatpush3.bf16.msra.mxu1 %v585_v3 }
  0x16   : > { %526 = vmatprep.subr.bf16.mxu0 %v586_v10  ;;  %546 = vmatprep.subr.bf16.mxu1 %v586_v10 }
  0x18   : > { %527 = vmatpush3.bf16.msra.mxu0 %v586_v10 }
  0x19   : > { %554 = vmatpush3.bf16.msra.mxu1 %v586_v10  ;;  %528 = vmatprep.subr.bf16.mxu0 %v587_v11 }
  0x1a   : > { %547 = vmatprep.subr.bf16.mxu1 %v587_v11 }
  0x1c   : > { %529 = vmatpush3.bf16.msra.mxu0 %v587_v11 }
  0x1d   : > { %555 = vmatpush3.bf16.msra.mxu1 %v587_v11  ;;  %530 = vmatprep.subr.bf16.mxu0 %v588_v12 }
  0x1e   : > { %548 = vmatprep.subr.bf16.mxu1 %v588_v12 }
  0x20   : > { %531 = vmatpush3.bf16.msra.mxu0 %v588_v12 }
  0x21   : > { %556 = vmatpush3.bf16.msra.mxu1 %v588_v12  ;;  %532 = vmatprep.subr.bf16.mxu0 %v589_v13 }
  0x22   : > { %549 = vmatprep.subr.bf16.mxu1 %v589_v13 }
  0x24   : > { %533 = vmatpush3.bf16.msra.mxu0 %v589_v13 }
  0x25   : > { %557 = vmatpush3.bf16.msra.mxu1 %v589_v13 }
  0x27   : > { %535 = vmatmul.mubr.bf16.vlgmr.msra.gmra.mrb[0].mxu0 %v235_v18 }
  0x28   : > { %539 = vmatmul.mubr.bf16.vlgmr.msra.gmra.mrb[0].mxu1 %v237_v19 }
  0xfa   : > { %v536_v21 = vpop.f32.mrb[0].mxu0 }
  0xfb   : > { %v540_v22 = vpop.f32.mrb[0].mxu1  ;;  %v352_v23 = vadd.f32 %v536_v21, %v495_v20  ;;  %v343_v25 = vpop.f32.mrb[1].mxu0 }
  0xfc   : > { %v368_v24 = vadd.f32 %v540_v22, %v495_v20  ;;  %v359_v26 = vpop.f32.mrb[1].mxu1  ;;  %v344_v27 = vadd.f32 %v495_v20, %v343_v25  ;;  %v537_v29 = vpop.f32.mrb[2].mxu0 }
  0xfd   : > { %v360_v28 = vadd.f32 %v495_v20, %v359_v26  ;;  %v541_v30 = vpop.f32.mrb[2].mxu1  ;;  %376 = vst [vmem:[%s223_s17 + $0x10] sm:$0xff] %v352_v23  ;;  %v355_v31 = vadd.f32 %v537_v29, %v495_v20  ;;  %v346_v33 = vpop.f32.mrb[3].mxu0 }
  0xfe   : > { %380 = vst [vmem:[%s223_s17 + $0x30] sm:$0xff] %v368_v24  ;;  %v371_v32 = vadd.f32 %v541_v30, %v495_v20  ;;  %v362_v34 = vpop.f32.mrb[3].mxu1  ;;  %374 = vst [vmem:[%s223_s17] sm:$0xff] %v344_v27  ;;  %v347_v35 = vadd.f32 %v495_v20, %v346_v33 }
  0xff   : > { %378 = vst [vmem:[%s223_s17 + $0x20] sm:$0xff] %v360_v28  ;;  %v363_v36 = vadd.f32 %v495_v20, %v362_v34  ;;  %377 = vst [vmem:[%s223_s17 + $0x18] sm:$0xff] %v355_v31 }
 0x100   : > { %381 = vst [vmem:[%s223_s17 + $0x38] sm:$0xff] %v371_v32  ;;  %375 = vst [vmem:[%s223_s17 + $0x8] sm:$0xff] %v347_v35 }
 0x101   : > { %379 = vst [vmem:[%s223_s17 + $0x28] sm:$0xff] %v363_v36 }
 0x102 PF: > { %s13_s14 = sadd.s32 1, %s612_s14   ;;  %s715_s12 = smov %s608_s13 }
 0x103   : > { %p10_p5 = scmp.ge.s32.totalorder %s13_s14, 4   ;;  %s716_s13 = smov %s718_s15 }
 0x105   :  { %12 = sbr.rel (!%p10_p5) target bundleno = 2 (0x2), region = 68 }

// kernel: detr_forward.36
= control target key start
LH: loop header
LB: loop body
LE: loop exit
PB: predicated region body
PF: predicated region fallthrough
CT: control target
= control target key end

     0   :  { %s758_s12 = smov 0   ;;  %s760_s13 = smov 0   ;;  %s866_s0 = inlined_call_operand.vmem [shape: f32[128,128], index: 0, kind: input, shape index: {}]   ;;  %s867_s1 = inlined_call_operand.vmem [shape: bf16[128,256], index: 1, kind: input, shape index: {}]   ;;  %s868_s2 = inlined_call_operand.vmem [shape: f32[1,256], index: 2, kind: input, shape index: {}]   ;;  %s869_s3 = inlined_call_operand.vmem [shape: bf16[128,256], index: 3, kind: output, shape index: {}]  }
   0x1   :  { %s762_s14 = smov 0  }
   0x2 LB: > { %s25_s15 = sadd.s32 1, %s731_s13  ;;  %p607_p0 = scmp.ge.s32.totalorder %s735_s14, 1  ;;  %s735_s14 = sphi %s762_s14, %s13_s14   ;;  %s731_s13 = sphi %s760_s13, %s871_s13   ;;  %s727_s12 = sphi %s758_s12, %s870_s12  }
   0x3   : > { %p27_p1 = scmp.ge.s32.totalorder %s25_s15, 2  ;;  %p173_p2 = scmp.lt.s32.totalorder %s735_s14, 3 }
   0x5   : > { %s873_s15 = smov (%p27_p1, %s25_s15), 0  ;;  %p174_p3 = pnand %p607_p0, %p173_p2 }
   0x6   : > { %v689_v0 = vld [vmem:[%s867_s1 + $0x4] ss:$8 sps:$4 sm:$0xff] (!%p174_p3)   ;;  %v691_v1 = vld [vmem:[%s867_s1] ss:$8 sps:$4 sm:$0xff] (!%p174_p3)   ;;  %v737_v2 = vmov (!%p174_p3), 0   ;;  %s608_s30 = sshll.u32 (!%p174_p3), %s727_s12, 3  ;;  %v271_v29 = vlaneseq (!%p174_p3) }
   0x7   : > { %177 = sbr.rel (%p174_p3) target bundleno = 268 (0x10c), region = 32  ;;  %393 = vmatprep.mubr.bf16.mxu0 (!%p174_p3), %v737_v2  ;;  %413 = vmatprep.mubr.bf16.mxu1 (!%p174_p3), %v737_v2  ;;  %v692_v3 = vld [vmem:[%s867_s1 + $0x14] ss:$8 sps:$4 sm:$0xff] (!%p174_p3)   ;;  %v694_v4 = vld [vmem:[%s867_s1 + $0x10] ss:$8 sps:$4 sm:$0xff] (!%p174_p3)   ;;  %p212_p4 = scmp.lt.s32.totalorder (!%p174_p3), %s608_s30, 15 }
   0x8   : > { %361 = vmatprep.subr.bf16.mxu0 (!%p174_p3), %v689_v0  ;;  %648 = vmatprep.subr.bf16.mxu1 (!%p174_p3), %v689_v0  ;;  %v695_v5 = vld [vmem:[%s867_s1 + $0x24] ss:$8 sps:$4 sm:$0xff] (!%p174_p3)   ;;  %v697_v6 = vld [vmem:[%s867_s1 + $0x20] ss:$8 sps:$4 sm:$0xff] (!%p174_p3)   ;;  %v698_v7 = vld [vmem:[%s867_s1 + $0x34] ss:$8 sps:$4 sm:$0xff] (!%p174_p3)  }
   0x9   : > { %362 = vmatpush1.bf16.msra.mxu0 (!%p174_p3), %v691_v1  ;;  %656 = vmatpush1.bf16.msra.mxu1 (!%p174_p3), %v691_v1  ;;  %v700_v8 = vld [vmem:[%s867_s1 + $0x30] ss:$8 sps:$4 sm:$0xff] (!%p174_p3)   ;;  %v701_v9 = vld [vmem:[%s867_s1 + $0x44] ss:$8 sps:$4 sm:$0xff] (!%p174_p3)   ;;  %v703_v10 = vld [vmem:[%s867_s1 + $0x40] ss:$8 sps:$4 sm:$0xff] (!%p174_p3)  }
   0xa   : > { %363 = vmatprep.subr.bf16.mxu0 (!%p174_p3), %v692_v3  ;;  %649 = vmatprep.subr.bf16.mxu1 (!%p174_p3), %v692_v3  ;;  %v704_v11 = vld [vmem:[%s867_s1 + $0x54] ss:$8 sps:$4 sm:$0xff] (!%p174_p3)   ;;  %v706_v12 = vld [vmem:[%s867_s1 + $0x50] ss:$8 sps:$4 sm:$0xff] (!%p174_p3)   ;;  %v707_v13 = vld [vmem:[%s867_s1 + $0x64] ss:$8 sps:$4 sm:$0xff] (!%p174_p3)  }
   0xb   : > { %v709_v14 = vld [vmem:[%s867_s1 + $0x60] ss:$8 sps:$4 sm:$0xff] (!%p174_p3)   ;;  %v710_v15 = vld [vmem:[%s867_s1 + $0x74] ss:$8 sps:$4 sm:$0xff] (!%p174_p3)   ;;  %v712_v16 = vld [vmem:[%s867_s1 + $0x70] ss:$8 sps:$4 sm:$0xff] (!%p174_p3)  }
   0xc   : > { %v272_v30 = vshrl.u32 (!%p174_p3), %v271_v29, 7  ;;  %v269_v32 = vld [vmem:[%s868_s2] sm:$0x3] (!%p174_p3) }
   0xd   : > { %364 = vmatpush1.bf16.msra.mxu0 (!%p174_p3), %v694_v4  ;;  %657 = vmatpush1.bf16.msra.mxu1 (!%p174_p3), %v694_v4 }
   0xe   : > { %365 = vmatprep.subr.bf16.mxu0 %v695_v5  ;;  %650 = vmatprep.subr.bf16.mxu1 %v695_v5  ;;  %s875_s30 = smov (!%p212_p4, %s608_s30), 15  ;;  %v273_v31 = vsub.s32 0, %v272_v30  ;;  %v277_v33 = vsub.s32 1, %v272_v30 }
   0xf   : > { %s609_s19 = sshll.u32 %s875_s30, 3 }
  0x10   : > { %s215_s24 = scalar_lea.vmem %s866_s0, %s609_s19  ;;  %v274_v34 = vrot.slane %v269_v32, %v273_v31  ;;  %v278_v35 = vrot.slane %v269_v32, %v277_v33  ;;  %s847_s7 = scalar_lea.vmem %s869_s3, %s609_s19 }
  0x11   : > { %366 = vmatpush1.bf16.msra.mxu0 %v697_v6  ;;  %658 = vmatpush1.bf16.msra.mxu1 %v697_v6  ;;  %v241_v17 = vld [vmem:[%s215_s24] sm:$0xff]  ;;  %v242_v18 = vld [vmem:[%s215_s24 + $0x8] sm:$0xff]  ;;  %v243_v23 = vld [vmem:[%s215_s24 + $0x10] sm:$0xff] }
  0x12   : > { %367 = vmatprep.subr.bf16.mxu0 %v698_v7  ;;  %651 = vmatprep.subr.bf16.mxu1 %v698_v7  ;;  %v245_v19 = vld [vmem:[%s215_s24 + $0x20] sm:$0xff]  ;;  %v246_v20 = vld [vmem:[%s215_s24 + $0x28] sm:$0xff]  ;;  %v249_v21 = vpack.c.bf16 %v242_v18, %v241_v17  ;;  %v244_v24 = vld [vmem:[%s215_s24 + $0x18] sm:$0xff] }
  0x13   : > { %v251_v22 = vpack.c.bf16 %v246_v20, %v245_v19  ;;  %v247_v25 = vld [vmem:[%s215_s24 + $0x30] sm:$0xff]  ;;  %v248_v26 = vld [vmem:[%s215_s24 + $0x38] sm:$0xff]  ;;  %v250_v27 = vpack.c.bf16 %v244_v24, %v243_v23 }
  0x14   : > { %v252_v28 = vpack.c.bf16 %v248_v26, %v247_v25 }
  0x15   : > { %368 = vmatpush1.bf16.msra.mxu0 %v700_v8  ;;  %659 = vmatpush1.bf16.msra.mxu1 %v700_v8 }
  0x16   : > { %369 = vmatprep.subr.bf16.mxu0 %v701_v9  ;;  %652 = vmatprep.subr.bf16.mxu1 %v701_v9 }
  0x19   : > { %370 = vmatpush1.bf16.msra.mxu0 %v703_v10  ;;  %660 = vmatpush1.bf16.msra.mxu1 %v703_v10 }
  0x1a   : > { %371 = vmatprep.subr.bf16.mxu0 %v704_v11  ;;  %653 = vmatprep.subr.bf16.mxu1 %v704_v11 }
  0x1d   : > { %372 = vmatpush1.bf16.msra.mxu0 %v706_v12  ;;  %661 = vmatpush1.bf16.msra.mxu1 %v706_v12 }
  0x1e   : > { %373 = vmatprep.subr.bf16.mxu0 %v707_v13  ;;  %654 = vmatprep.subr.bf16.mxu1 %v707_v13 }
  0x21   : > { %374 = vmatpush1.bf16.msra.mxu0 %v709_v14  ;;  %662 = vmatpush1.bf16.msra.mxu1 %v709_v14 }
  0x22   : > { %375 = vmatprep.subr.bf16.mxu0 %v710_v15  ;;  %655 = vmatprep.subr.bf16.mxu1 %v710_v15 }
  0x25   : > { %376 = vmatpush1.bf16.msra.mxu0 %v712_v16  ;;  %663 = vmatpush1.bf16.msra.mxu1 %v712_v16 }
  0x28   : > { %394 = vmatmul.mubr.bf16.vlgmr.msra.gmra.mrb[0].mxu0 %v249_v21  ;;  %414 = vmatmul.mubr.bf16.vlgmr.msra.gmra.mrb[0].mxu1 %v251_v22 }
  0x29   : > { %403 = vmatprep.mubr.bf16.mxu0 %v737_v2  ;;  %423 = vmatprep.mubr.bf16.mxu1 %v737_v2 }
  0x30   : > { %404 = vmatmul.mubr.bf16.gmra.mrb[4].mxu0 %v250_v27  ;;  %424 = vmatmul.mubr.bf16.gmra.mrb[4].mxu1 %v252_v28 }
  0xfb   : > { %v395_v36 = vpop.f32.mrb[0].mxu0  ;;  %v415_v37 = vpop.f32.mrb[0].mxu1 }
  0xfc   : > { %v396_v38 = vadd.f32 %v395_v36, %v274_v34  ;;  %v416_v39 = vadd.f32 %v415_v37, %v274_v34  ;;  %v397_v40 = vpop.f32.mrb[1].mxu0  ;;  %v417_v41 = vpop.f32.mrb[1].mxu1 }
  0xfd   : > { %v398_v42 = vadd.f32 %v397_v40, %v278_v35  ;;  %v418_v43 = vadd.f32 %v417_v41, %v278_v35  ;;  %v399_v44 = vpop.f32.mrb[2].mxu0  ;;  %v419_v45 = vpop.f32.mrb[2].mxu1 }
  0xfe   : > { %v400_v46 = vadd.f32 %v399_v44, %v274_v34  ;;  %v420_v47 = vadd.f32 %v419_v45, %v274_v34  ;;  %v401_v48 = vpop.f32.mrb[3].mxu0  ;;  %v421_v49 = vpop.f32.mrb[3].mxu1 }
  0xff   : > { %v640_v50 = vpack.c.bf16 %v398_v42, %v396_v38  ;;  %v644_v51 = vpack.c.bf16 %v418_v43, %v416_v39  ;;  %v402_v52 = vadd.f32 %v401_v48, %v278_v35  ;;  %v422_v53 = vadd.f32 %v421_v49, %v278_v35 }
 0x101   : > { %482 = vst [vmem:[%s847_s7] sm:$0xff] %v640_v50  ;;  %486 = vst [vmem:[%s847_s7 + $0x20] sm:$0xff] %v644_v51  ;;  %v641_v54 = vpack.c.bf16 %v402_v52, %v400_v46  ;;  %v645_v55 = vpack.c.bf16 %v422_v53, %v420_v47 }
 0x103   : > { %483 = vst [vmem:[%s847_s7 + $0x8] sm:$0xff] %v641_v54  ;;  %487 = vst [vmem:[%s847_s7 + $0x28] sm:$0xff] %v645_v55  ;;  %v405_v56 = vpop.f32.mrb[4].mxu0  ;;  %v425_v57 = vpop.f32.mrb[4].mxu1 }
 0x104   : > { %v406_v58 = vadd.f32 %v405_v56, %v274_v34  ;;  %v426_v59 = vadd.f32 %v425_v57, %v274_v34  ;;  %v407_v60 = vpop.f32.mrb[5].mxu0  ;;  %v427_v61 = vpop.f32.mrb[5].mxu1 }
 0x105   : > { %v408_v62 = vadd.f32 %v407_v60, %v278_v35  ;;  %v428_v63 = vadd.f32 %v427_v61, %v278_v35  ;;  %v409_v0 = vpop.f32.mrb[6].mxu0  ;;  %v429_v1 = vpop.f32.mrb[6].mxu1 }
 0x106   : > { %v410_v2 = vadd.f32 %v409_v0, %v274_v34  ;;  %v430_v3 = vadd.f32 %v429_v1, %v274_v34  ;;  %v411_v4 = vpop.f32.mrb[7].mxu0  ;;  %v431_v5 = vpop.f32.mrb[7].mxu1 }
 0x107   : > { %v642_v6 = vpack.c.bf16 %v408_v62, %v406_v58  ;;  %v646_v7 = vpack.c.bf16 %v428_v63, %v426_v59  ;;  %v412_v8 = vadd.f32 %v411_v4, %v278_v35  ;;  %v432_v9 = vadd.f32 %v431_v5, %v278_v35 }
 0x109   : > { %484 = vst [vmem:[%s847_s7 + $0x10] sm:$0xff] %v642_v6  ;;  %488 = vst [vmem:[%s847_s7 + $0x30] sm:$0xff] %v646_v7  ;;  %v643_v10 = vpack.c.bf16 %v412_v8, %v410_v2  ;;  %v647_v11 = vpack.c.bf16 %v432_v9, %v430_v3 }
 0x10b   : > { %485 = vst [vmem:[%s847_s7 + $0x18] sm:$0xff] %v643_v10  ;;  %489 = vst [vmem:[%s847_s7 + $0x38] sm:$0xff] %v647_v11 }
 0x10c PF: > { %s13_s14 = sadd.s32 1, %s735_s14   ;;  %s870_s12 = smov %s731_s13 }
 0x10d   : > { %p10_p5 = scmp.ge.s32.totalorder %s13_s14, 4   ;;  %s871_s13 = smov %s873_s15 }
 0x10f   :  { %12 = sbr.rel (!%p10_p5) target bundleno = 2 (0x2), region = 68 }

// kernel: detr_forward.37
= control target key start
LH: loop header
LB: loop body
LE: loop exit
PB: predicated region body
PF: predicated region fallthrough
CT: control target
= control target key end

     0   :  { %s705_s12 = smov 0   ;;  %s707_s13 = smov 0   ;;  %s779_s0 = inlined_call_operand.vmem [shape: f32[128,128], index: 0, kind: input, shape index: {}]   ;;  %s780_s1 = inlined_call_operand.vmem [shape: bf16[128,128], index: 1, kind: input, shape index: {}]   ;;  %s781_s2 = inlined_call_operand.vmem [shape: f32[1,128], index: 2, kind: input, shape index: {}]   ;;  %s782_s3 = inlined_call_operand.vmem [shape: bf16[128,128], index: 3, kind: output, shape index: {}]  }
   0x1   :  { %s709_s14 = smov 0  }
   0x2 LB: > { %s25_s15 = sadd.s32 1, %s679_s13  ;;  %p522_p0 = scmp.ge.s32.totalorder %s683_s14, 1  ;;  %s683_s14 = sphi %s709_s14, %s13_s14   ;;  %s679_s13 = sphi %s707_s13, %s784_s13   ;;  %s675_s12 = sphi %s705_s12, %s783_s12  }
   0x3   : > { %p27_p1 = scmp.ge.s32.totalorder %s25_s15, 2  ;;  %p169_p2 = scmp.lt.s32.totalorder %s683_s14, 3 }
   0x5   : > { %s786_s15 = smov (%p27_p1, %s25_s15), 0  ;;  %p170_p3 = pnand %p522_p0, %p169_p2 }
   0x6   : > { %v653_v0 = vld [vmem:[%s780_s1] sm:$0xff] (!%p170_p3)   ;;  %s523_s18 = sshll.u32 (!%p170_p3), %s675_s12, 3  ;;  %v654_v1 = vld [vmem:[%s780_s1 + $0x8] sm:$0xff] (!%p170_p3)   ;;  %v655_v2 = vld [vmem:[%s780_s1 + $0x10] sm:$0xff] (!%p170_p3)  }
   0x7   : > { %173 = sbr.rel (%p170_p3) target bundleno = 260 (0x104), region = 32  ;;  %p204_p4 = scmp.lt.s32.totalorder (!%p170_p3), %s523_s18, 15  ;;  %589 = vmatprep.subr.bf16.mxu0 (!%p170_p3), %v653_v0  ;;  %613 = vmatprep.subr.bf16.mxu1 (!%p170_p3), %v653_v0  ;;  %v656_v3 = vld [vmem:[%s780_s1 + $0x18] sm:$0xff] (!%p170_p3)   ;;  %v657_v10 = vld [vmem:[%s780_s1 + $0x20] sm:$0xff] (!%p170_p3)   ;;  %v658_v11 = vld [vmem:[%s780_s1 + $0x28] sm:$0xff] (!%p170_p3)  }
   0x8   : > { %590 = vmatpush3.bf16.msra.mxu0 (!%p170_p3), %v653_v0  ;;  %621 = vmatpush3.bf16.msra.mxu1 (!%p170_p3), %v653_v0  ;;  %v659_v12 = vld [vmem:[%s780_s1 + $0x30] sm:$0xff] (!%p170_p3)   ;;  %v660_v13 = vld [vmem:[%s780_s1 + $0x38] sm:$0xff] (!%p170_p3)   ;;  %v527_v21 = vld [vmem:[%s781_s2] ss:$0 sm:$0xff] (!%p170_p3) }
   0x9   : > { %591 = vmatprep.subr.bf16.mxu0 (!%p170_p3), %v654_v1  ;;  %614 = vmatprep.subr.bf16.mxu1 (!%p170_p3), %v654_v1 }
   0xc   : > { %592 = vmatpush3.bf16.msra.mxu0 (!%p170_p3), %v654_v1  ;;  %622 = vmatpush3.bf16.msra.mxu1 (!%p170_p3), %v654_v1 }
   0xd   : > { %593 = vmatprep.subr.bf16.mxu0 (!%p170_p3), %v655_v2  ;;  %615 = vmatprep.subr.bf16.mxu1 (!%p170_p3), %v655_v2 }
   0xe   : > { %s788_s18 = smov (!%p204_p4, %s523_s18), 15 }
   0xf   : > { %s524_s23 = sshll.u32 %s788_s18, 3  ;;  %s526_s12 = sshll.u32 %s788_s18, 2 }
  0x10   : > { %s738_s26 = scalar_lea.vmem %s779_s0, %s524_s23  ;;  %594 = vmatpush3.bf16.msra.mxu0 %v655_v2  ;;  %623 = vmatpush3.bf16.msra.mxu1 %v655_v2  ;;  %s223_s19 = scalar_lea.vmem %s782_s3, %s526_s12 }
  0x11   : > { %v226_v4 = vld [vmem:[%s738_s26] sm:$0xff]  ;;  %v227_v5 = vld [vmem:[%s738_s26 + $0x8] sm:$0xff]  ;;  %595 = vmatprep.subr.bf16.mxu0 %v656_v3  ;;  %616 = vmatprep.subr.bf16.mxu1 %v656_v3  ;;  %v228_v14 = vld [vmem:[%s738_s26 + $0x10] sm:$0xff] }
  0x12   : > { %v230_v6 = vld [vmem:[%s738_s26 + $0x20] sm:$0xff]  ;;  %v234_v7 = vpack.c.bf16 %v227_v5, %v226_v4  ;;  %v231_v8 = vld [vmem:[%s738_s26 + $0x28] sm:$0xff]  ;;  %v229_v15 = vld [vmem:[%s738_s26 + $0x18] sm:$0xff] }
  0x13   : > { %v236_v9 = vpack.c.bf16 %v231_v8, %v230_v6  ;;  %v232_v16 = vld [vmem:[%s738_s26 + $0x30] sm:$0xff]  ;;  %v233_v17 = vld [vmem:[%s738_s26 + $0x38] sm:$0xff]  ;;  %v235_v18 = vpack.c.bf16 %v229_v15, %v228_v14 }
  0x14   : > { %605 = vmatprep.mubr.bf16.mxu0 %v234_v7  ;;  %596 = vmatpush3.bf16.msra.mxu0 %v656_v3  ;;  %v237_v19 = vpack.c.bf16 %v233_v17, %v232_v16 }
  0x15   : > { %609 = vmatprep.mubr.bf16.mxu1 %v236_v9  ;;  %624 = vmatpush3.bf16.msra.mxu1 %v656_v3 }
  0x16   : > { %597 = vmatprep.subr.bf16.mxu0 %v657_v10  ;;  %617 = vmatprep.subr.bf16.mxu1 %v657_v10 }
  0x18   : > { %598 = vmatpush3.bf16.msra.mxu0 %v657_v10 }
  0x19   : > { %625 = vmatpush3.bf16.msra.mxu1 %v657_v10  ;;  %599 = vmatprep.subr.bf16.mxu0 %v658_v11 }
  0x1a   : > { %618 = vmatprep.subr.bf16.mxu1 %v658_v11 }
  0x1c   : > { %600 = vmatpush3.bf16.msra.mxu0 %v658_v11 }
  0x1d   : > { %626 = vmatpush3.bf16.msra.mxu1 %v658_v11  ;;  %601 = vmatprep.subr.bf16.mxu0 %v659_v12 }
  0x1e   : > { %619 = vmatprep.subr.bf16.mxu1 %v659_v12 }
  0x20   : > { %602 = vmatpush3.bf16.msra.mxu0 %v659_v12 }
  0x21   : > { %627 = vmatpush3.bf16.msra.mxu1 %v659_v12  ;;  %603 = vmatprep.subr.bf16.mxu0 %v660_v13 }
  0x22   : > { %620 = vmatprep.subr.bf16.mxu1 %v660_v13 }
  0x24   : > { %604 = vmatpush3.bf16.msra.mxu0 %v660_v13 }
  0x25   : > { %628 = vmatpush3.bf16.msra.mxu1 %v660_v13 }
  0x27   : > { %606 = vmatmul.mubr.bf16.vlgmr.msra.gmra.mrb[0].mxu0 %v235_v18 }
  0x28   : > { %610 = vmatmul.mubr.bf16.vlgmr.msra.gmra.mrb[0].mxu1 %v237_v19 }
  0xfa   : > { %v607_v20 = vpop.f32.mrb[0].mxu0 }
  0xfb   : > { %v611_v22 = vpop.f32.mrb[0].mxu1  ;;  %v343_v23 = vpop.f32.mrb[1].mxu0  ;;  %v352_v27 = vadd.f32 %v607_v20, %v527_v21 }
  0xfc   : > { %v359_v24 = vpop.f32.mrb[1].mxu1  ;;  %v608_v25 = vpop.f32.mrb[2].mxu0  ;;  %v368_v28 = vadd.f32 %v611_v22, %v527_v21  ;;  %v344_v33 = vadd.f32 %v527_v21, %v343_v23 }
  0xfd   : > { %v612_v26 = vpop.f32.mrb[2].mxu1  ;;  %v355_v29 = vadd.f32 %v608_v25, %v527_v21  ;;  %v346_v31 = vpop.f32.mrb[3].mxu0  ;;  %v360_v34 = vadd.f32 %v527_v21, %v359_v24 }
  0xfe   : > { %v371_v30 = vadd.f32 %v612_v26, %v527_v21  ;;  %v362_v32 = vpop.f32.mrb[3].mxu1  ;;  %v347_v35 = vadd.f32 %v527_v21, %v346_v31 }
  0xff   : > { %v363_v36 = vadd.f32 %v527_v21, %v362_v32  ;;  %v562_v37 = vpack.c.bf16 %v355_v29, %v352_v27 }
 0x100   : > { %v572_v38 = vpack.c.bf16 %v371_v30, %v368_v28  ;;  %v557_v39 = vpack.c.bf16 %v347_v35, %v344_v33 }
 0x101   : > { %v567_v40 = vpack.c.bf16 %v363_v36, %v360_v34  ;;  %574 = vst [vmem:[%s223_s19 + $0x8] sm:$0xff] %v562_v37  }
 0x102   : > { %576 = vst [vmem:[%s223_s19 + $0x18] sm:$0xff] %v572_v38   ;;  %558 = vst [vmem:[%s223_s19] sm:$0xff] %v557_v39  }
 0x103   : > { %575 = vst [vmem:[%s223_s19 + $0x10] sm:$0xff] %v567_v40  }
 0x104 PF: > { %s13_s14 = sadd.s32 1, %s683_s14   ;;  %s783_s12 = smov %s679_s13 }
 0x105   : > { %p10_p5 = scmp.ge.s32.totalorder %s13_s14, 4   ;;  %s784_s13 = smov %s786_s15 }
 0x107   :  { %12 = sbr.rel (!%p10_p5) target bundleno = 2 (0x2), region = 68 }

// kernel: detr_forward.38
= control target key start
LH: loop header
LB: loop body
LE: loop exit
PB: predicated region body
PF: predicated region fallthrough
CT: control target
= control target key end

     0   :  { %s2230_s12 = smov 0   ;;  %s2747_s0 = inlined_call_operand.vmem [shape: bf16[2,64,128], index: 0, kind: input, shape index: {}]   ;;  %s2748_s1 = inlined_call_operand.vmem [shape: bf16[2,64,128], index: 1, kind: input, shape index: {}]   ;;  %s2749_s2 = inlined_call_operand.vmem [shape: bf16[2,64,128], index: 2, kind: input, shape index: {}]   ;;  %s2750_s3 = inlined_call_operand.vmem [shape: bf16[2,64,128], index: 3, kind: output, shape index: {}]  }
   0x1 LB: > { %s1668_s13 = sadd.s32 4294967295, %s2202_s12   ;;  %p1672_p0 = scmp.ge.s32.totalorder %s2202_s12, 1  ;;  %s2202_s12 = sphi %s2230_s12, %s13_s12  }
   0x2   : > { %p157_p1 = scmp.lt.s32.totalorder %s2202_s12, 3 }
   0x4   : > { %p158_p2 = pnand %p1672_p0, %p157_p1 }
   0x5   : > { %p191_p3 = scmp.lt.s32.totalorder (!%p158_p2), %s1668_s13, 1  ;;  %vm276_vm0 = vcmask (!%p158_p2), 64512   ;;  %vm366_vm1 = vcmask (!%p158_p2), 523264   ;;  %s2204_s24 = smov (!%p158_p2), 120   ;;  %vm1522_vm2 = vcmask (!%p158_p2), 130048   ;;  %vm1531_vm3 = vcmask (!%p158_p2), 195584  }
   0x6   : > { %161 = sbr.rel (%p158_p2) target bundleno = 2815 (0xaff), region = 32  ;;  %s2205_s25 = smov (!%p158_p2), 112   ;;  %vm1540_vm4 = vcmask (!%p158_p2), 261120  }
   0x7   : > { %s2206_s26 = smov (!%p158_p2), 104   ;;  %s2207_s27 = smov (!%p158_p2), 8  }
   0x8   : > { %s2208_s28 = smov (!%p158_p2), 16   ;;  %s2209_s29 = smov (!%p158_p2), 24  }
   0xd   : > { %s2752_s13 = smov (!%p191_p3, %s1668_s13), 1 }
   0xe   : > { %s2238_s14 = sshll.u32 %s2752_s13, 5 }
   0xf   : > { %s200_s17 = scalar_lea.vmem %s2748_s1, %s2238_s14  ;;  %s195_s20 = scalar_lea.vmem %s2747_s0, %s2238_s14 }
  0x10   : > { %v2244_v0 = vld [vmem:[%s200_s17] sm:$0xff]   ;;  %v2246_v1 = vld [vmem:[%s200_s17 + $0x8] sm:$0xff]   ;;  %v2264_v5 = vld [vmem:[%s200_s17 + $0x10] sm:$0xff]   ;;  %s2328_s23 = scalar_lea.vmem %s2749_s2, %s2238_s14  ;;  %s2712_s5 = scalar_lea.vmem %s2750_s3, %s2238_s14 }
  0x11   : > { %1962 = vmatprep.subr.msk.bf16.mxu0 %vm276_vm0, %v2244_v0  ;;  %v290_v2 = vsel %vm276_vm0, %v2244_v0, 0  ;;  %v2258_v3 = vld [vmem:[%s195_s20] sm:$0xff]   ;;  %v293_v4 = vsel %vm276_vm0, %v2246_v1, 0  ;;  %v296_v6 = vsel %vm276_vm0, %v2264_v5, 0  ;;  %v2270_v7 = vld [vmem:[%s200_s17 + $0x18] sm:$0xff]   ;;  %v2276_v9 = vld [vmem:[%s195_s20 + $0x8] sm:$0xff]  }
  0x12   : > { %1835 = vmatpush3.bf16.xpose.msra.mxu0 %v290_v2  ;;  %1842 = vmatprep.mubr.msk.bf16.mxu0 %vm276_vm0, %v2258_v3  ;;  %v299_v8 = vsel %vm276_vm0, %v2270_v7, 0  ;;  %v2278_v10 = vld [vmem:[%s195_s20 + $0x10] sm:$0xff]   ;;  %v2284_v11 = vld [vmem:[%s195_s20 + $0x18] sm:$0xff]   ;;  %v2333_v58 = vld [vmem:[%s2328_s23] sm:$0xff]  }
  0x13   : > { %1963 = vmatprep.subr.msk.bf16.mxu0 %vm276_vm0, %v2246_v1  ;;  %1850 = vmatprep.subr.bf16.mxu1 %v2333_v58  ;;  %v2338_v59 = vld [vmem:[%s2328_s23 + $0x8] sm:$0xff]   ;;  %v2343_v60 = vld [vmem:[%s2328_s23 + $0x10] sm:$0xff]   ;;  %v2350_v61 = vld [vmem:[%s2328_s23 + $0x18] sm:$0xff]  }
  0x14   : > { %1851 = vmatpush3.bf16.msra.mxu1 %v2333_v58 }
  0x15   : > { %1852 = vmatprep.subr.bf16.mxu1 %v2338_v59 }
  0x18   : > { %1853 = vmatpush3.bf16.msra.mxu1 %v2338_v59 }
  0x19   : > { %1854 = vmatprep.subr.bf16.mxu1 %v2343_v60 }
  0x1a   : > { %1837 = vmatpush3.bf16.xpose.msra.mxu0 %v293_v4 }
  0x1b   : > { %1964 = vmatprep.subr.msk.bf16.mxu0 %vm276_vm0, %v2264_v5 }
  0x1c   : > { %1855 = vmatpush3.bf16.msra.mxu1 %v2343_v60 }
  0x1d   : > { %1856 = vmatprep.subr.bf16.mxu1 %v2350_v61 }
  0x20   : > { %1857 = vmatpush3.bf16.msra.mxu1 %v2350_v61 }
  0x22   : > { %1839 = vmatpush3.bf16.xpose.msra.mxu0 %v296_v6 }
  0x23   : > { %1965 = vmatprep.subr.msk.bf16.mxu0 %vm276_vm0, %v2270_v7 }
  0x2a   : > { %1841 = vmatpush3.bf16.xpose.msra.mxu0 %v299_v8 }
  0x31   : > { %1843 = vmatmul.mubr.msk.bf16.vlgmr.msra.gmra.mrb[0].mxu0 %vm276_vm0, %v2276_v9 }
  0x32   : > { %1846 = vmatprep.mubr.msk.bf16.mxu0 %vm276_vm0, %v2278_v10 }
  0x39   : > { %1847 = vmatmul.mubr.msk.bf16.gmra.mrb[4].mxu0 %vm276_vm0, %v2284_v11 }
 0x104   : > { %v1844_v12 = vpop.f32.mrb[0].mxu0 }
 0x105   : > { %v335_v13 = vpop.f32.mrb[1].mxu0  ;;  %v373_v14 = vsel %vm366_vm1, %v1844_v12, -inf }
 0x106   : > { %374 = vmax.xlane.f32.xlu1 %v373_v14  ;;  %v1845_v15 = vpop.f32.mrb[2].mxu0  ;;  %v367_v16 = vsel %vm366_vm1, %v335_v13, -inf }
 0x107   : > { %368 = vmax.xlane.f32.xlu0 %v367_v16  ;;  %v338_v17 = vpop.f32.mrb[3].mxu0  ;;  %v376_v18 = vsel %vm366_vm1, %v1845_v15, -inf }
 0x108   : > { %v370_v19 = vsel %vm366_vm1, %v338_v17, -inf }
 0x10a   : > { %377 = vmax.xlane.f32.xlu1 %v376_v18 }
 0x10b   : > { %371 = vmax.xlane.f32.xlu0 %v370_v19 }
 0x10c   : > { %v1848_v20 = vpop.f32.mrb[4].mxu0 }
 0x10d   : > { %v351_v21 = vpop.f32.mrb[5].mxu0  ;;  %v385_v26 = vsel %vm366_vm1, %v1848_v20, -inf }
 0x10e   : > { %v2292_v22 = vpop.f32.mrb[6].mxu0  ;;  %v379_v23 = vsel %vm366_vm1, %v351_v21, -inf }
 0x10f   : > { %380 = vmax.xlane.f32.xlu0 %v379_v23  ;;  %v2295_v24 = vpop.f32.mrb[7].mxu0  ;;  %v388_v27 = vsel %vm366_vm1, %v2292_v22, -inf }
 0x110   : > { %v382_v25 = vsel %vm366_vm1, %v2295_v24, -inf }
 0x111   : > { %383 = vmax.xlane.f32.xlu1 %v382_v25 }
 0x113   : > { %386 = vmax.xlane.f32.xlu0 %v385_v26 }
 0x115   : > { %389 = vmax.xlane.f32.xlu1 %v388_v27 }
 0x193   : > { %v375_v28 = vpop.xlane.xlu1 %374 }
 0x194   : > { %v393_v29 = vsub.f32 %v1844_v12, %v375_v28  ;;  %v369_v30 = vpop.xlane.xlu0 %368 }
 0x195   : > { %v391_v31 = vsub.f32 %v335_v13, %v369_v30 }
 0x196   : > { %v403_v32 = vmul.f32 1.442695, %v393_v29 }
 0x197   : > { %v399_v33 = vmul.f32 1.442695, %v391_v31  ;;  %v378_v34 = vpop.xlane.xlu1 %377 }
 0x198   : > { %2064 = vpow2.f32 %v403_v32  ;;  %v394_v35 = vsub.f32 %v1845_v15, %v378_v34  ;;  %v372_v36 = vpop.xlane.xlu0 %371 }
 0x199   : > { %v392_v37 = vsub.f32 %v338_v17, %v372_v36  ;;  %2066 = vpow2.f32 %v399_v33 }
 0x19a   : > { %v405_v38 = vmul.f32 1.442695, %v394_v35 }
 0x19b   : > { %v401_v39 = vmul.f32 1.442695, %v392_v37 }
 0x19c   : > { %2068 = vpow2.f32 %v405_v38  ;;  %v381_v40 = vpop.xlane.xlu0 %380 }
 0x19d   : > { %v395_v41 = vsub.f32 %v351_v21, %v381_v40  ;;  %2070 = vpow2.f32 %v401_v39 }
 0x19e   : > { %v384_v62 = vpop.xlane.xlu1 %383 }
 0x19f   : > { %v407_v42 = vmul.f32 1.442695, %v395_v41  ;;  %v396_v4 = vsub.f32 %v2295_v24, %v384_v62 }
 0x1a0   : > { %v387_v43 = vpop.xlane.xlu0 %386 }
 0x1a1   : > { %v397_v44 = vsub.f32 %v1848_v20, %v387_v43  ;;  %2072 = vpow2.f32 %v407_v42  ;;  %v409_v8 = vmul.f32 1.442695, %v396_v4 }
 0x1a2   : > { %v2302_v45 = vpop.eup %2064  ;;  %v390_v63 = vpop.xlane.xlu1 %389 }
 0x1a3   : > { %v411_v46 = vmul.f32 1.442695, %v397_v44  ;;  %v421_v47 = vsel %vm366_vm1, %v2302_v45, 0.0  ;;  %v2306_v48 = vpop.eup %2066  ;;  %v398_v2 = vsub.f32 %v2292_v22, %v390_v63 }
 0x1a4   : > { %422 = vadd.xlane.f32.xlu0 %v421_v47  ;;  %v415_v50 = vsel %vm366_vm1, %v2306_v48, 0.0 }
 0x1a5   : > { %2074 = vpow2.f32 %v411_v46  ;;  %v413_v6 = vmul.f32 1.442695, %v398_v2 }
 0x1a6   : > { %v2308_v49 = vpop.eup %2068 }
 0x1a7   : > { %v424_v51 = vsel %vm366_vm1, %v2308_v49, 0.0  ;;  %v2314_v52 = vpop.eup %2070  ;;  %2076 = vpow2.f32 %v413_v6 }
 0x1a8   : > { %416 = vadd.xlane.f32.xlu0 %v415_v50  ;;  %425 = vadd.xlane.f32.xlu1 %v424_v51  ;;  %v418_v53 = vsel %vm366_vm1, %v2314_v52, 0.0  ;;  %2078 = vpow2.f32 %v409_v8 }
 0x1ab   : > { %v2318_v54 = vpop.eup %2072 }
 0x1ac   : > { %419 = vadd.xlane.f32.xlu1 %v418_v53  ;;  %v427_v57 = vsel %vm366_vm1, %v2318_v54, 0.0 }
 0x1af   : > { %v2320_v55 = vpop.eup %2074 }
 0x1b0   : > { %v433_v56 = vsel %vm366_vm1, %v2320_v55, 0.0 }
 0x1b1   : > { %434 = vadd.xlane.f32.xlu0 %v433_v56  ;;  %v2077_v12 = vpop.eup %2076 }
 0x1b2   : > { %v436_v13 = vsel %vm366_vm1, %v2077_v12, 0.0  ;;  %v2079_v14 = vpop.eup %2078 }
 0x1b3   : > { %v430_v15 = vsel %vm366_vm1, %v2079_v14, 0.0 }
 0x1b5   : > { %428 = vadd.xlane.f32.xlu0 %v427_v57 }
 0x1bd   : > { %570 = vrot.lane.b32.xlu1 %v2246_v1, %s2204_s24 }
 0x1c1   : > { %572 = vrot.lane.b32.xlu1 %v2264_v5, %s2204_s24 }
 0x1cb   : > { %568 = vrot.lane.b32.xlu0 %v2244_v0, %s2204_s24 }
 0x1cf   : > { %560 = vrot.lane.b32.xlu0 %v2258_v3, %s2204_s24 }
 0x1d3   : > { %564 = vrot.lane.b32.xlu0 %v2278_v10, %s2204_s24 }
 0x1e5   : > { %437 = vadd.xlane.f32.xlu1 %v436_v13 }
 0x1e9   : > { %431 = vadd.xlane.f32.xlu1 %v430_v15 }
 0x1fa   : > { %574 = vrot.lane.b32.xlu1 %v2270_v7, %s2204_s24 }
 0x1fe   : > { %562 = vrot.lane.b32.xlu1 %v2276_v9, %s2204_s24 }
 0x202   : > { %566 = vrot.lane.b32.xlu1 %v2284_v11, %s2204_s24 }
 0x231   : > { %v423_v16 = vpop.xlane.xlu0 %422 }
 0x235   : > { %v417_v17 = vpop.xlane.xlu0 %416  ;;  %v426_v18 = vpop.xlane.xlu1 %425 }
 0x236   : > { %2080 = vrcp.f32 %v426_v18 }
 0x237   : > { %2082 = vrcp.f32 %v417_v17 }
 0x238   : > { %2084 = vrcp.f32 %v423_v16 }
 0x239   : > { %v420_v19 = vpop.xlane.xlu1 %419 }
 0x23a   : > { %2086 = vrcp.f32 %v420_v19 }
 0x23d   : > { %v571_v34 = vpop.permute.xlu1 %570 }
 0x23e   : > { %v435_v20 = vpop.xlane.xlu0 %434  ;;  %v592_v35 = vsel %vm276_vm0, %v571_v34, 0 }
 0x240   : > { %v2081_v21 = vpop.eup %2080 }
 0x241   : > { %v2083_v22 = vpop.eup %2082  ;;  %v450_v26 = vmul.f32 %v2081_v21, %v2308_v49  ;;  %v573_v36 = vpop.permute.xlu1 %572 }
 0x242   : > { %v429_v23 = vpop.xlane.xlu0 %428  ;;  %v2085_v24 = vpop.eup %2084  ;;  %v447_v27 = vmul.f32 %v2083_v22, %v2306_v48  ;;  %v595_v37 = vsel %vm276_vm0, %v573_v36, 0 }
 0x243   : > { %v449_v30 = vmul.f32 %v2085_v24, %v2302_v45 }
 0x244   : > { %v2087_v25 = vpop.eup %2086 }
 0x245   : > { %v448_v28 = vmul.f32 %v2087_v25, %v2314_v52  ;;  %v456_v33 = vpack.c.bf16 %v450_v26, %v449_v30 }
 0x246   : > { %v569_v29 = vpop.permute.xlu0 %568 }
 0x247   : > { %v455_v31 = vpack.c.bf16 %v448_v28, %v447_v27  ;;  %1966 = vmatprep.subr.msk.bf16.mxu1 %vm276_vm0, %v569_v29  ;;  %v589_v32 = vsel %vm276_vm0, %v569_v29, 0 }
 0x249   : > { %1858 = vmatprep.mubr.msk.bf16.mxu1 %vm366_vm1, %v455_v31 }
 0x24a   : > { %1859 = vmatmul.mubr.msk.bf16.vlgmr.msra.gmra.mrb[0].mxu1 %vm366_vm1, %v456_v33  ;;  %v561_v52 = vpop.permute.xlu0 %560 }
 0x24b   : > { %1867 = vmatpush3.bf16.xpose.msra.mxu1 %v589_v32 }
 0x24c   : > { %1967 = vmatprep.subr.msk.bf16.mxu1 %vm276_vm0, %v571_v34 }
 0x24e   : > { %v565_v56 = vpop.permute.xlu0 %564 }
 0x253   : > { %1869 = vmatpush3.bf16.xpose.msra.mxu1 %v592_v35 }
 0x254   : > { %1968 = vmatprep.subr.msk.bf16.mxu1 %vm276_vm0, %v573_v36 }
 0x25b   : > { %1871 = vmatpush3.bf16.xpose.msra.mxu1 %v595_v37 }
 0x272   : > { %v438_v38 = vpop.xlane.xlu1 %437 }
 0x273   : > { %2088 = vrcp.f32 %v438_v38 }
 0x274   : > { %2090 = vrcp.f32 %v429_v23 }
 0x275   : > { %2092 = vrcp.f32 %v435_v20 }
 0x276   : > { %v432_v39 = vpop.xlane.xlu1 %431 }
 0x277   : > { %2094 = vrcp.f32 %v432_v39 }
 0x27a   : > { %v575_v40 = vpop.permute.xlu1 %574 }
 0x27b   : > { %v598_v41 = vsel %vm276_vm0, %v575_v40, 0  ;;  %1969 = vmatprep.subr.msk.bf16.mxu1 %vm276_vm0, %v575_v40 }
 0x27c   : > { %1873 = vmatpush3.bf16.xpose.msra.mxu1 %v598_v41 }
 0x27d   : > { %v2089_v42 = vpop.eup %2088 }
 0x27e   : > { %v2091_v43 = vpop.eup %2090  ;;  %v454_v46 = vmul.f32 %v2089_v42, %v2077_v12  ;;  %v563_v53 = vpop.permute.xlu1 %562 }
 0x27f   : > { %v2093_v44 = vpop.eup %2092  ;;  %v451_v47 = vmul.f32 %v2091_v43, %v2318_v54 }
 0x280   : > { %v453_v49 = vmul.f32 %v2093_v44, %v2320_v55 }
 0x281   : > { %v2095_v45 = vpop.eup %2094 }
 0x282   : > { %v452_v48 = vmul.f32 %v2095_v45, %v2079_v14  ;;  %v458_v51 = vpack.c.bf16 %v454_v46, %v453_v49  ;;  %v567_v57 = vpop.permute.xlu1 %566 }
 0x284   : > { %v457_v50 = vpack.c.bf16 %v452_v48, %v451_v47 }
 0x286   : > { %1862 = vmatprep.mubr.msk.bf16.mxu1 %vm366_vm1, %v457_v50 }
 0x287   : > { %1863 = vmatmul.mubr.msk.bf16.gmra.mrb[4].mxu1 %vm366_vm1, %v458_v51 }
 0x288   : > { %1874 = vmatprep.mubr.msk.bf16.mxu1 %vm276_vm0, %v561_v52 }
 0x28f   : > { %1875 = vmatmul.mubr.msk.bf16.vlgmr.msra.gmra.mrb[8].mxu1 %vm276_vm0, %v563_v53 }
 0x290   : > { %1878 = vmatprep.mubr.msk.bf16.mxu1 %vm276_vm0, %v565_v56 }
 0x297   : > { %1879 = vmatmul.mubr.msk.bf16.gmra.mrb[12].mxu1 %vm276_vm0, %v567_v57 }
 0x31d   : > { %v2394_v54 = vpop.f32.mrb[0].mxu1 }
 0x31e   : > { %v2396_v55 = vpop.f32.mrb[1].mxu1 }
 0x31f   : > { %v2398_v62 = vpop.f32.mrb[2].mxu1 }
 0x320   : > { %v2400_v63 = vpop.f32.mrb[3].mxu1 }
 0x35a   : > { %v2402_v2 = vpop.f32.mrb[4].mxu1 }
 0x35b   : > { %v2404_v4 = vpop.f32.mrb[5].mxu1 }
 0x35c   : > { %v2406_v6 = vpop.f32.mrb[6].mxu1 }
 0x35d   : > { %v2408_v8 = vpop.f32.mrb[7].mxu1 }
 0x362   : > { %v1876_v12 = vpop.f32.mrb[8].mxu1 }
 0x363   : > { %v634_v13 = vpop.f32.mrb[9].mxu1  ;;  %v671_v14 = vsel %vm366_vm1, %v1876_v12, -inf }
 0x364   : > { %672 = vmax.xlane.f32.xlu0 %v671_v14  ;;  %v1877_v15 = vpop.f32.mrb[10].mxu1  ;;  %v665_v18 = vsel %vm366_vm1, %v634_v13, -inf }
 0x365   : > { %v637_v16 = vpop.f32.mrb[11].mxu1  ;;  %v674_v20 = vsel %vm366_vm1, %v1877_v15, -inf }
 0x366   : > { %v668_v17 = vsel %vm366_vm1, %v637_v16, -inf }
 0x367   : > { %669 = vmax.xlane.f32.xlu1 %v668_v17 }
 0x368   : > { %666 = vmax.xlane.f32.xlu0 %v665_v18 }
 0x36a   : > { %v1880_v19 = vpop.f32.mrb[12].mxu1 }
 0x36b   : > { %v650_v21 = vpop.f32.mrb[13].mxu1  ;;  %v683_v23 = vsel %vm366_vm1, %v1880_v19, -inf }
 0x36c   : > { %675 = vmax.xlane.f32.xlu0 %v674_v20  ;;  %v2414_v22 = vpop.f32.mrb[14].mxu1  ;;  %v677_v25 = vsel %vm366_vm1, %v650_v21, -inf }
 0x36d   : > { %v2417_v24 = vpop.f32.mrb[15].mxu1  ;;  %v686_v26 = vsel %vm366_vm1, %v2414_v22, -inf }
 0x36e   : > { %v680_v27 = vsel %vm366_vm1, %v2417_v24, -inf }
 0x370   : > { %684 = vmax.xlane.f32.xlu0 %v683_v23 }
 0x374   : > { %678 = vmax.xlane.f32.xlu0 %v677_v25 }
 0x378   : > { %759 = vrot.lane.b32.xlu1 %v2338_v59, %s2204_s24 }
 0x37c   : > { %761 = vrot.lane.b32.xlu1 %v2343_v60, %s2204_s24 }
 0x38a   : > { %757 = vrot.lane.b32.xlu0 %v2333_v58, %s2204_s24 }
 0x3a0   : > { %687 = vmax.xlane.f32.xlu1 %v686_v26 }
 0x3a4   : > { %681 = vmax.xlane.f32.xlu1 %v680_v27 }
 0x3b5   : > { %763 = vrot.lane.b32.xlu1 %v2350_v61, %s2204_s24 }
 0x3f1   : > { %v673_v28 = vpop.xlane.xlu0 %672 }
 0x3f2   : > { %v691_v29 = vsub.f32 %v1876_v12, %v673_v28 }
 0x3f4   : > { %v701_v30 = vmul.f32 1.442695, %v691_v29  ;;  %v670_v31 = vpop.xlane.xlu1 %669 }
 0x3f5   : > { %v667_v32 = vpop.xlane.xlu0 %666  ;;  %v690_v34 = vsub.f32 %v637_v16, %v670_v31 }
 0x3f6   : > { %2096 = vpow2.f32 %v701_v30  ;;  %v689_v33 = vsub.f32 %v634_v13, %v667_v32 }
 0x3f7   : > { %v699_v38 = vmul.f32 1.442695, %v690_v34 }
 0x3f8   : > { %v697_v35 = vmul.f32 1.442695, %v689_v33  ;;  %v760_v49 = vpop.permute.xlu1 %759 }
 0x3f9   : > { %v676_v36 = vpop.xlane.xlu0 %675 }
 0x3fa   : > { %2098 = vpow2.f32 %v697_v35  ;;  %v692_v37 = vsub.f32 %v1877_v15, %v676_v36 }
 0x3fc   : > { %v703_v39 = vmul.f32 1.442695, %v692_v37  ;;  %v762_v57 = vpop.permute.xlu1 %761 }
 0x3fd   : > { %v685_v40 = vpop.xlane.xlu0 %684 }
 0x3fe   : > { %2100 = vpow2.f32 %v703_v39  ;;  %v695_v41 = vsub.f32 %v1880_v19, %v685_v40 }
 0x3ff   : > { %2102 = vpow2.f32 %v699_v38 }
 0x400   : > { %v2432_v42 = vpop.eup %2096  ;;  %v709_v43 = vmul.f32 1.442695, %v695_v41 }
 0x401   : > { %v679_v44 = vpop.xlane.xlu0 %678  ;;  %v719_v45 = vsel %vm366_vm1, %v2432_v42, 0.0 }
 0x402   : > { %2104 = vpow2.f32 %v709_v43  ;;  %v693_v46 = vsub.f32 %v650_v21, %v679_v44  ;;  %720 = vadd.xlane.f32.xlu0 %v719_v45 }
 0x404   : > { %v2436_v47 = vpop.eup %2098  ;;  %v705_v48 = vmul.f32 1.442695, %v693_v46 }
 0x405   : > { %v758_v50 = vpop.permute.xlu0 %757  ;;  %v713_v51 = vsel %vm366_vm1, %v2436_v47, 0.0 }
 0x406   : > { %2106 = vpow2.f32 %v705_v48  ;;  %714 = vadd.xlane.f32.xlu0 %v713_v51  ;;  %1882 = vmatprep.subr.bf16.mxu0 %v758_v50 }
 0x407   : > { %1883 = vmatpush3.bf16.msra.mxu0 %v758_v50 }
 0x408   : > { %v2101_v52 = vpop.eup %2100  ;;  %1884 = vmatprep.subr.bf16.mxu0 %v760_v49 }
 0x409   : > { %v722_v53 = vsel %vm366_vm1, %v2101_v52, 0.0  ;;  %v2103_v56 = vpop.eup %2102 }
 0x40a   : > { %723 = vadd.xlane.f32.xlu1 %v722_v53  ;;  %v716_v14 = vsel %vm366_vm1, %v2103_v56, 0.0 }
 0x40b   : > { %1885 = vmatpush3.bf16.msra.mxu0 %v760_v49 }
 0x40c   : > { %v2441_v12 = vpop.eup %2104  ;;  %1886 = vmatprep.subr.bf16.mxu0 %v762_v57 }
 0x40d   : > { %v731_v13 = vsel %vm366_vm1, %v2441_v12, 0.0 }
 0x40e   : > { %732 = vadd.xlane.f32.xlu0 %v731_v13  ;;  %717 = vadd.xlane.f32.xlu1 %v716_v14 }
 0x40f   : > { %1887 = vmatpush3.bf16.msra.mxu0 %v762_v57 }
 0x410   : > { %v2446_v15 = vpop.eup %2106 }
 0x411   : > { %v725_v16 = vsel %vm366_vm1, %v2446_v15, 0.0 }
 0x412   : > { %726 = vadd.xlane.f32.xlu0 %v725_v16 }
 0x41f   : > { %856 = vrot.lane.b32.xlu1 %v2246_v1, %s2205_s25 }
 0x423   : > { %858 = vrot.lane.b32.xlu1 %v2264_v5, %s2205_s25 }
 0x42d   : > { %v688_v17 = vpop.xlane.xlu1 %687 }
 0x42e   : > { %v696_v18 = vsub.f32 %v2414_v22, %v688_v17 }
 0x430   : > { %v711_v19 = vmul.f32 1.442695, %v696_v18 }
 0x431   : > { %v682_v20 = vpop.xlane.xlu1 %681 }
 0x432   : > { %2108 = vpow2.f32 %v711_v19  ;;  %v694_v21 = vsub.f32 %v2417_v24, %v682_v20 }
 0x434   : > { %v707_v23 = vmul.f32 1.442695, %v694_v21 }
 0x435   : > { %v764_v25 = vpop.permute.xlu1 %763 }
 0x436   : > { %1888 = vmatprep.subr.bf16.mxu0 %v764_v25  ;;  %2110 = vpow2.f32 %v707_v23 }
 0x437   : > { %1889 = vmatpush3.bf16.msra.mxu0 %v764_v25 }
 0x43c   : > { %v2109_v26 = vpop.eup %2108 }
 0x43d   : > { %v734_v27 = vsel %vm366_vm1, %v2109_v26, 0.0 }
 0x43e   : > { %735 = vadd.xlane.f32.xlu0 %v734_v27 }
 0x440   : > { %v2111_v28 = vpop.eup %2110 }
 0x441   : > { %v728_v29 = vsel %vm366_vm1, %v2111_v28, 0.0 }
 0x447   : > { %729 = vadd.xlane.f32.xlu1 %v728_v29 }
 0x454   : > { %854 = vrot.lane.b32.xlu0 %v2244_v0, %s2205_s25 }
 0x458   : > { %860 = vrot.lane.b32.xlu1 %v2270_v7, %s2205_s25  ;;  %846 = vrot.lane.b32.xlu0 %v2258_v3, %s2205_s25 }
 0x45c   : > { %848 = vrot.lane.b32.xlu1 %v2276_v9, %s2205_s25  ;;  %850 = vrot.lane.b32.xlu0 %v2278_v10, %s2205_s25 }
 0x460   : > { %852 = vrot.lane.b32.xlu1 %v2284_v11, %s2205_s25 }
 0x48f   : > { %v721_v22 = vpop.xlane.xlu0 %720 }
 0x493   : > { %v715_v30 = vpop.xlane.xlu0 %714 }
 0x497   : > { %v724_v24 = vpop.xlane.xlu1 %723 }
 0x498   : > { %2112 = vrcp.f32 %v724_v24 }
 0x499   : > { %2114 = vrcp.f32 %v715_v30 }
 0x49a   : > { %2116 = vrcp.f32 %v721_v22 }
 0x49b   : > { %v718_v31 = vpop.xlane.xlu1 %717  ;;  %v733_v43 = vpop.xlane.xlu0 %732 }
 0x49c   : > { %2118 = vrcp.f32 %v718_v31 }
 0x49f   : > { %v727_v44 = vpop.xlane.xlu0 %726  ;;  %v857_v45 = vpop.permute.xlu1 %856 }
 0x4a2   : > { %v2113_v32 = vpop.eup %2112 }
 0x4a3   : > { %v2115_v33 = vpop.eup %2114  ;;  %v748_v36 = vmul.f32 %v2113_v32, %v2101_v52  ;;  %v859_v49 = vpop.permute.xlu1 %858 }
 0x4a4   : > { %v2117_v34 = vpop.eup %2116  ;;  %v745_v37 = vmul.f32 %v2115_v33, %v2436_v47  ;;  %v878_v47 = vsel %vm276_vm0, %v857_v45, 0  ;;  %v881_v14 = vsel %vm276_vm0, %v859_v49, 0 }
 0x4a5   : > { %v747_v39 = vmul.f32 %v2117_v34, %v2432_v42 }
 0x4a6   : > { %v2119_v35 = vpop.eup %2118 }
 0x4a7   : > { %v746_v38 = vmul.f32 %v2119_v35, %v2103_v56  ;;  %v754_v41 = vpack.c.bf16 %v748_v36, %v747_v39 }
 0x4a9   : > { %v753_v40 = vpack.c.bf16 %v746_v38, %v745_v37 }
 0x4ab   : > { %1890 = vmatprep.mubr.msk.bf16.mxu0 %vm366_vm1, %v753_v40 }
 0x4ac   : > { %1891 = vmatmul.mubr.msk.bf16.vlgmr.msra.gmra.mrb[8].mxu0 %vm366_vm1, %v754_v41 }
 0x4cb   : > { %v736_v46 = vpop.xlane.xlu0 %735 }
 0x4cc   : > { %2120 = vrcp.f32 %v736_v46 }
 0x4cd   : > { %2122 = vrcp.f32 %v727_v44 }
 0x4ce   : > { %2124 = vrcp.f32 %v733_v43 }
 0x4cf   : > { %v855_v48 = vpop.permute.xlu0 %854 }
 0x4d0   : > { %v875_v50 = vsel %vm276_vm0, %v855_v48, 0  ;;  %1970 = vmatprep.subr.msk.bf16.mxu0 %vm276_vm0, %v855_v48 }
 0x4d1   : > { %1899 = vmatpush3.bf16.xpose.msra.mxu0 %v875_v50 }
 0x4d2   : > { %1971 = vmatprep.subr.msk.bf16.mxu0 %vm276_vm0, %v857_v45 }
 0x4d3   : > { %v847_v21 = vpop.permute.xlu0 %846 }
 0x4d4   : > { %v730_v42 = vpop.xlane.xlu1 %729 }
 0x4d5   : > { %2126 = vrcp.f32 %v730_v42 }
 0x4d6   : > { %v2121_v51 = vpop.eup %2120 }
 0x4d7   : > { %v2123_v52 = vpop.eup %2122  ;;  %v752_v57 = vmul.f32 %v2121_v51, %v2109_v26 }
 0x4d8   : > { %v2125_v53 = vpop.eup %2124  ;;  %v861_v13 = vpop.permute.xlu1 %860  ;;  %v749_v16 = vmul.f32 %v2123_v52, %v2446_v15 }
 0x4d9   : > { %1901 = vmatpush3.bf16.xpose.msra.mxu0 %v878_v47  ;;  %v751_v18 = vmul.f32 %v2125_v53, %v2441_v12  ;;  %v884_v23 = vsel %vm276_vm0, %v861_v13, 0  ;;  %v851_v15 = vpop.permute.xlu0 %850 }
 0x4da   : > { %1972 = vmatprep.subr.msk.bf16.mxu0 %vm276_vm0, %v859_v49 }
 0x4db   : > { %v756_v20 = vpack.c.bf16 %v752_v57, %v751_v18 }
 0x4dc   : > { %v849_v25 = vpop.permute.xlu1 %848 }
 0x4df   : > { %v2127_v56 = vpop.eup %2126 }
 0x4e0   : > { %v750_v17 = vmul.f32 %v2127_v56, %v2111_v28  ;;  %v853_v12 = vpop.permute.xlu1 %852 }
 0x4e1   : > { %1903 = vmatpush3.bf16.xpose.msra.mxu0 %v881_v14 }
 0x4e2   : > { %v755_v19 = vpack.c.bf16 %v750_v17, %v749_v16  ;;  %1973 = vmatprep.subr.msk.bf16.mxu0 %vm276_vm0, %v861_v13 }
 0x4e4   : > { %1894 = vmatprep.mubr.msk.bf16.mxu0 %vm366_vm1, %v755_v19 }
 0x4e5   : > { %1895 = vmatmul.mubr.msk.bf16.gmra.mrb[12].mxu0 %vm366_vm1, %v756_v20 }
 0x4e6   : > { %1906 = vmatprep.mubr.msk.bf16.mxu0 %vm276_vm0, %v847_v21 }
 0x4e9   : > { %1905 = vmatpush3.bf16.xpose.msra.mxu0 %v884_v23 }
 0x4f0   : > { %1907 = vmatmul.mubr.msk.bf16.vlgmr.msra.gmra.mrb[16].mxu0 %vm276_vm0, %v849_v25 }
 0x4f1   : > { %1910 = vmatprep.mubr.msk.bf16.mxu0 %vm276_vm0, %v851_v15 }
 0x4f8   : > { %1911 = vmatmul.mubr.msk.bf16.gmra.mrb[20].mxu0 %vm276_vm0, %v853_v12 }
 0x57f   : > { %v2490_v26 = vpop.f32.mrb[8].mxu0 }
 0x580   : > { %v2492_v27 = vpop.f32.mrb[9].mxu0 }
 0x581   : > { %v2494_v28 = vpop.f32.mrb[10].mxu0 }
 0x582   : > { %v1997_v29 = vpack.i.bf16 %v2494_v28, %v2490_v26  ;;  %v2498_v22 = vpop.f32.mrb[11].mxu0 }
 0x583   : > { %v1992_v24 = vpack.i.bf16 %v2498_v22, %v2492_v27 }
 0x5b8   : > { %v2502_v30 = vpop.f32.mrb[12].mxu0 }
 0x5b9   : > { %v2504_v31 = vpop.f32.mrb[13].mxu0 }
 0x5ba   : > { %v2506_v32 = vpop.f32.mrb[14].mxu0 }
 0x5bb   : > { %v2007_v33 = vpack.i.bf16 %v2506_v32, %v2502_v30  ;;  %v2510_v34 = vpop.f32.mrb[15].mxu0 }
 0x5bc   : > { %v2002_v35 = vpack.i.bf16 %v2510_v34, %v2504_v31  ;;  %v2195_v34 = vld [vmem:[%s2328_s23 + $0x18] sm:$0xff]  }
 0x5c3   : > { %v1908_v36 = vpop.f32.mrb[16].mxu0 }
 0x5c4   : > { %v920_v37 = vpop.f32.mrb[17].mxu0  ;;  %v957_v38 = vsel %vm366_vm1, %v1908_v36, -inf }
 0x5c5   : > { %958 = vmax.xlane.f32.xlu0 %v957_v38  ;;  %v1909_v39 = vpop.f32.mrb[18].mxu0  ;;  %v951_v43 = vsel %vm366_vm1, %v920_v37, -inf }
 0x5c6   : > { %v923_v40 = vpop.f32.mrb[19].mxu0  ;;  %v960_v45 = vsel %vm366_vm1, %v1909_v39, -inf }
 0x5c7   : > { %v954_v41 = vsel %vm366_vm1, %v923_v40, -inf }
 0x5c8   : > { %955 = vmax.xlane.f32.xlu1 %v954_v41 }
 0x5c9   : > { %952 = vmax.xlane.f32.xlu0 %v951_v43 }
 0x5cb   : > { %v1912_v44 = vpop.f32.mrb[20].mxu0 }
 0x5cc   : > { %v936_v46 = vpop.f32.mrb[21].mxu0  ;;  %v969_v49 = vsel %vm366_vm1, %v1912_v44, -inf }
 0x5cd   : > { %961 = vmax.xlane.f32.xlu0 %v960_v45  ;;  %v2518_v48 = vpop.f32.mrb[22].mxu0  ;;  %v963_v42 = vsel %vm366_vm1, %v936_v46, -inf }
 0x5ce   : > { %v2521_v50 = vpop.f32.mrb[23].mxu0  ;;  %v972_v47 = vsel %vm366_vm1, %v2518_v48, -inf }
 0x5cf   : > { %v966_v51 = vsel %vm366_vm1, %v2521_v50, -inf }
 0x5d1   : > { %970 = vmax.xlane.f32.xlu0 %v969_v49 }
 0x5d5   : > { %964 = vmax.xlane.f32.xlu0 %v963_v42 }
 0x5d9   : > { %1045 = vrot.lane.b32.xlu1 %v2338_v59, %s2205_s25 }
 0x5dd   : > { %1047 = vrot.lane.b32.xlu1 %v2343_v60, %s2205_s25 }
 0x5eb   : > { %1043 = vrot.lane.b32.xlu0 %v2333_v58, %s2205_s25 }
 0x601   : > { %973 = vmax.xlane.f32.xlu1 %v972_v47 }
 0x605   : > { %967 = vmax.xlane.f32.xlu1 %v966_v51 }
 0x616   : > { %1049 = vrot.lane.b32.xlu1 %v2350_v61, %s2205_s25 }
 0x652   : > { %v959_v52 = vpop.xlane.xlu0 %958 }
 0x653   : > { %v977_v53 = vsub.f32 %v1908_v36, %v959_v52 }
 0x655   : > { %v987_v59 = vmul.f32 1.442695, %v977_v53  ;;  %v956_v56 = vpop.xlane.xlu1 %955 }
 0x656   : > { %v953_v57 = vpop.xlane.xlu0 %952  ;;  %v976_v13 = vsub.f32 %v923_v40, %v956_v56 }
 0x657   : > { %2128 = vpow2.f32 %v987_v59  ;;  %v975_v60 = vsub.f32 %v920_v37, %v953_v57 }
 0x658   : > { %v985_v17 = vmul.f32 1.442695, %v976_v13 }
 0x659   : > { %v983_v58 = vmul.f32 1.442695, %v975_v60  ;;  %v1046_v37 = vpop.permute.xlu1 %1045 }
 0x65a   : > { %v962_v14 = vpop.xlane.xlu0 %961 }
 0x65b   : > { %2130 = vpow2.f32 %v983_v58  ;;  %v978_v16 = vsub.f32 %v1909_v39, %v962_v14 }
 0x65d   : > { %v989_v18 = vmul.f32 1.442695, %v978_v16 }
 0x65e   : > { %v971_v19 = vpop.xlane.xlu0 %970 }
 0x65f   : > { %2132 = vpow2.f32 %v989_v18  ;;  %v981_v20 = vsub.f32 %v1912_v44, %v971_v19  ;;  %v1048_v44 = vpop.permute.xlu1 %1047 }
 0x660   : > { %2134 = vpow2.f32 %v985_v17 }
 0x661   : > { %v2536_v21 = vpop.eup %2128  ;;  %v995_v61 = vmul.f32 1.442695, %v981_v20 }
 0x662   : > { %v965_v23 = vpop.xlane.xlu0 %964  ;;  %v1005_v25 = vsel %vm366_vm1, %v2536_v21, 0.0 }
 0x663   : > { %2136 = vpow2.f32 %v995_v61  ;;  %v979_v15 = vsub.f32 %v936_v46, %v965_v23  ;;  %1006 = vadd.xlane.f32.xlu0 %v1005_v25 }
 0x665   : > { %v2540_v12 = vpop.eup %2130  ;;  %v991_v36 = vmul.f32 1.442695, %v979_v15 }
 0x666   : > { %v1044_v38 = vpop.permute.xlu0 %1043  ;;  %v999_v39 = vsel %vm366_vm1, %v2540_v12, 0.0 }
 0x667   : > { %2138 = vpow2.f32 %v991_v36  ;;  %1000 = vadd.xlane.f32.xlu0 %v999_v39  ;;  %1914 = vmatprep.subr.bf16.mxu1 %v1044_v38 }
 0x668   : > { %1915 = vmatpush3.bf16.msra.mxu1 %v1044_v38 }
 0x669   : > { %v2133_v40 = vpop.eup %2132  ;;  %1916 = vmatprep.subr.bf16.mxu1 %v1046_v37 }
 0x66a   : > { %v1008_v41 = vsel %vm366_vm1, %v2133_v40, 0.0  ;;  %v2135_v43 = vpop.eup %2134 }
 0x66b   : > { %1009 = vadd.xlane.f32.xlu1 %v1008_v41  ;;  %v1002_v49 = vsel %vm366_vm1, %v2135_v43, 0.0 }
 0x66c   : > { %1917 = vmatpush3.bf16.msra.mxu1 %v1046_v37 }
 0x66d   : > { %v2545_v45 = vpop.eup %2136  ;;  %1918 = vmatprep.subr.bf16.mxu1 %v1048_v44 }
 0x66e   : > { %v1017_v46 = vsel %vm366_vm1, %v2545_v45, 0.0 }
 0x66f   : > { %1018 = vadd.xlane.f32.xlu0 %v1017_v46  ;;  %1003 = vadd.xlane.f32.xlu1 %v1002_v49 }
 0x670   : > { %1919 = vmatpush3.bf16.msra.mxu1 %v1048_v44 }
 0x671   : > { %v2550_v42 = vpop.eup %2138 }
 0x672   : > { %v1011_v47 = vsel %vm366_vm1, %v2550_v42, 0.0 }
 0x673   : > { %1012 = vadd.xlane.f32.xlu0 %v1011_v47 }
 0x680   : > { %1142 = vrot.lane.b32.xlu1 %v2246_v1, %s2206_s26 }
 0x684   : > { %1144 = vrot.lane.b32.xlu1 %v2264_v5, %s2206_s26 }
 0x68e   : > { %v974_v51 = vpop.xlane.xlu1 %973 }
 0x68f   : > { %v982_v52 = vsub.f32 %v2518_v48, %v974_v51 }
 0x691   : > { %v997_v53 = vmul.f32 1.442695, %v982_v52 }
 0x692   : > { %v968_v59 = vpop.xlane.xlu1 %967 }
 0x693   : > { %2140 = vpow2.f32 %v997_v53  ;;  %v980_v56 = vsub.f32 %v2521_v50, %v968_v59 }
 0x695   : > { %v993_v57 = vmul.f32 1.442695, %v980_v56 }
 0x696   : > { %v1050_v60 = vpop.permute.xlu1 %1049 }
 0x697   : > { %1920 = vmatprep.subr.bf16.mxu1 %v1050_v60  ;;  %2142 = vpow2.f32 %v993_v57 }
 0x698   : > { %1921 = vmatpush3.bf16.msra.mxu1 %v1050_v60 }
 0x69d   : > { %v2141_v13 = vpop.eup %2140 }
 0x69e   : > { %v1020_v58 = vsel %vm366_vm1, %v2141_v13, 0.0 }
 0x69f   : > { %1021 = vadd.xlane.f32.xlu0 %v1020_v58 }
 0x6a1   : > { %v2143_v1 = vpop.eup %2142 }
 0x6a2   : > { %v1014_v5 = vsel %vm366_vm1, %v2143_v1, 0.0 }
 0x6a8   : > { %1015 = vadd.xlane.f32.xlu1 %v1014_v5 }
 0x6b5   : > { %1140 = vrot.lane.b32.xlu0 %v2244_v0, %s2206_s26 }
 0x6b9   : > { %1146 = vrot.lane.b32.xlu1 %v2270_v7, %s2206_s26  ;;  %1132 = vrot.lane.b32.xlu0 %v2258_v3, %s2206_s26 }
 0x6bd   : > { %1134 = vrot.lane.b32.xlu1 %v2276_v9, %s2206_s26  ;;  %1136 = vrot.lane.b32.xlu0 %v2278_v10, %s2206_s26 }
 0x6c1   : > { %1138 = vrot.lane.b32.xlu1 %v2284_v11, %s2206_s26 }
 0x6f0   : > { %v1007_v48 = vpop.xlane.xlu0 %1006 }
 0x6f4   : > { %v1001_v14 = vpop.xlane.xlu0 %1000 }
 0x6f8   : > { %v1010_v50 = vpop.xlane.xlu1 %1009 }
 0x6f9   : > { %2144 = vrcp.f32 %v1010_v50 }
 0x6fa   : > { %2146 = vrcp.f32 %v1001_v14 }
 0x6fb   : > { %2148 = vrcp.f32 %v1007_v48 }
 0x6fc   : > { %v1004_v0 = vpop.xlane.xlu1 %1003  ;;  %v1019_v61 = vpop.xlane.xlu0 %1018 }
 0x6fd   : > { %2150 = vrcp.f32 %v1004_v0 }
 0x700   : > { %v1013_v23 = vpop.xlane.xlu0 %1012  ;;  %v1143_v25 = vpop.permute.xlu1 %1142 }
 0x703   : > { %v2145_v7 = vpop.eup %2144 }
 0x704   : > { %v2147_v16 = vpop.eup %2146  ;;  %v1034_v18 = vmul.f32 %v2145_v7, %v2133_v40  ;;  %v1145_v37 = vpop.permute.xlu1 %1144 }
 0x705   : > { %v2149_v3 = vpop.eup %2148  ;;  %v1031_v9 = vmul.f32 %v2147_v16, %v2540_v12  ;;  %v1164_v12 = vsel %vm276_vm0, %v1143_v25, 0  ;;  %v1167_v49 = vsel %vm276_vm0, %v1145_v37, 0 }
 0x706   : > { %v1033_v10 = vmul.f32 %v2149_v3, %v2536_v21 }
 0x707   : > { %v2151_v17 = vpop.eup %2150 }
 0x708   : > { %v1032_v19 = vmul.f32 %v2151_v17, %v2135_v43  ;;  %v1040_v11 = vpack.c.bf16 %v1034_v18, %v1033_v10 }
 0x70a   : > { %v1039_v20 = vpack.c.bf16 %v1032_v19, %v1031_v9 }
 0x70c   : > { %1922 = vmatprep.mubr.msk.bf16.mxu1 %vm366_vm1, %v1039_v20 }
 0x70d   : > { %1923 = vmatmul.mubr.msk.bf16.vlgmr.msra.gmra.mrb[16].mxu1 %vm366_vm1, %v1040_v11 }
 0x72c   : > { %v1022_v15 = vpop.xlane.xlu0 %1021 }
 0x72d   : > { %2152 = vrcp.f32 %v1022_v15 }
 0x72e   : > { %2154 = vrcp.f32 %v1013_v23 }
 0x72f   : > { %2156 = vrcp.f32 %v1019_v61 }
 0x730   : > { %v1141_v36 = vpop.permute.xlu0 %1140 }
 0x731   : > { %v1161_v38 = vsel %vm276_vm0, %v1141_v36, 0  ;;  %1974 = vmatprep.subr.msk.bf16.mxu1 %vm276_vm0, %v1141_v36 }
 0x732   : > { %1931 = vmatpush3.bf16.xpose.msra.mxu1 %v1161_v38 }
 0x733   : > { %1975 = vmatprep.subr.msk.bf16.mxu1 %vm276_vm0, %v1143_v25 }
 0x734   : > { %v1133_v56 = vpop.permute.xlu0 %1132 }
 0x735   : > { %v1016_v21 = vpop.xlane.xlu1 %1015 }
 0x736   : > { %2158 = vrcp.f32 %v1016_v21 }
 0x737   : > { %v2153_v39 = vpop.eup %2152 }
 0x738   : > { %v2155_v40 = vpop.eup %2154  ;;  %v1038_v44 = vmul.f32 %v2153_v39, %v2141_v13 }
 0x739   : > { %v2157_v41 = vpop.eup %2156  ;;  %v1147_v46 = vpop.permute.xlu1 %1146  ;;  %v1035_v47 = vmul.f32 %v2155_v40, %v2550_v42 }
 0x73a   : > { %1933 = vmatpush3.bf16.xpose.msra.mxu1 %v1164_v12  ;;  %v1037_v52 = vmul.f32 %v2157_v41, %v2545_v45  ;;  %v1170_v57 = vsel %vm276_vm0, %v1147_v46, 0  ;;  %v1137_v42 = vpop.permute.xlu0 %1136 }
 0x73b   : > { %1976 = vmatprep.subr.msk.bf16.mxu1 %vm276_vm0, %v1145_v37 }
 0x73c   : > { %v1042_v59 = vpack.c.bf16 %v1038_v44, %v1037_v52 }
 0x73d   : > { %v1135_v60 = vpop.permute.xlu1 %1134 }
 0x740   : > { %v2159_v43 = vpop.eup %2158 }
 0x741   : > { %v1036_v51 = vmul.f32 %v2159_v43, %v2143_v1  ;;  %v1139_v45 = vpop.permute.xlu1 %1138 }
 0x742   : > { %1935 = vmatpush3.bf16.xpose.msra.mxu1 %v1167_v49 }
 0x743   : > { %v1041_v53 = vpack.c.bf16 %v1036_v51, %v1035_v47  ;;  %1977 = vmatprep.subr.msk.bf16.mxu1 %vm276_vm0, %v1147_v46 }
 0x745   : > { %1926 = vmatprep.mubr.msk.bf16.mxu1 %vm366_vm1, %v1041_v53 }
 0x746   : > { %1927 = vmatmul.mubr.msk.bf16.gmra.mrb[20].mxu1 %vm366_vm1, %v1042_v59 }
 0x747   : > { %1938 = vmatprep.mubr.msk.bf16.mxu1 %vm276_vm0, %v1133_v56 }
 0x74a   : > { %1937 = vmatpush3.bf16.xpose.msra.mxu1 %v1170_v57 }
 0x751   : > { %1939 = vmatmul.mubr.msk.bf16.vlgmr.msra.gmra.mrb[24].mxu1 %vm276_vm0, %v1135_v60 }
 0x752   : > { %1942 = vmatprep.mubr.msk.bf16.mxu1 %vm276_vm0, %v1137_v42 }
 0x759   : > { %1943 = vmatmul.mubr.msk.bf16.gmra.mrb[28].mxu1 %vm276_vm0, %v1139_v45 }
 0x7e0   : > { %v2594_v13 = vpop.f32.mrb[16].mxu1 }
 0x7e1   : > { %v2596_v58 = vpop.f32.mrb[17].mxu1 }
 0x7e2   : > { %v2598_v1 = vpop.f32.mrb[18].mxu1 }
 0x7e3   : > { %v2017_v5 = vpack.i.bf16 %v2598_v1, %v2594_v13  ;;  %v2602_v48 = vpop.f32.mrb[19].mxu1 }
 0x7e4   : > { %v2012_v50 = vpack.i.bf16 %v2602_v48, %v2596_v58 }
 0x819   : > { %v2606_v14 = vpop.f32.mrb[20].mxu1 }
 0x81a   : > { %v2608_v0 = vpop.f32.mrb[21].mxu1 }
 0x81b   : > { %v2610_v7 = vpop.f32.mrb[22].mxu1 }
 0x81c   : > { %v2027_v16 = vpack.i.bf16 %v2610_v7, %v2606_v14  ;;  %v2614_v3 = vpop.f32.mrb[23].mxu1 }
 0x81d   : > { %v2022_v17 = vpack.i.bf16 %v2614_v3, %v2608_v0 }
 0x824   : > { %v1940_v18 = vpop.f32.mrb[24].mxu1 }
 0x825   : > { %v1206_v9 = vpop.f32.mrb[25].mxu1  ;;  %v1243_v61 = vsel %vm366_vm1, %v1940_v18, -inf }
 0x826   : > { %v1941_v19 = vpop.f32.mrb[26].mxu1  ;;  %v1237_v10 = vsel %vm366_vm1, %v1206_v9, -inf }
 0x827   : > { %1238 = vmax.xlane.f32.xlu0 %v1237_v10  ;;  %v1209_v20 = vpop.f32.mrb[27].mxu1  ;;  %v1246_v36 = vsel %vm366_vm1, %v1941_v19, -inf }
 0x828   : > { %v1240_v11 = vsel %vm366_vm1, %v1209_v20, -inf }
 0x829   : > { %1241 = vmax.xlane.f32.xlu1 %v1240_v11 }
 0x82b   : > { %1244 = vmax.xlane.f32.xlu0 %v1243_v61 }
 0x82c   : > { %v1944_v23 = vpop.f32.mrb[28].mxu1 }
 0x82d   : > { %v1222_v25 = vpop.f32.mrb[29].mxu1  ;;  %v1255_v39 = vsel %vm366_vm1, %v1944_v23, -inf }
 0x82e   : > { %v2621_v15 = vpop.f32.mrb[30].mxu1  ;;  %v1249_v21 = vsel %vm366_vm1, %v1222_v25, -inf }
 0x82f   : > { %1247 = vmax.xlane.f32.xlu0 %v1246_v36  ;;  %v2624_v37 = vpop.f32.mrb[31].mxu1  ;;  %v1258_v12 = vsel %vm366_vm1, %v2621_v15, -inf }
 0x830   : > { %v1252_v38 = vsel %vm366_vm1, %v2624_v37, -inf }
 0x831   : > { %1253 = vmax.xlane.f32.xlu1 %v1252_v38 }
 0x833   : > { %1250 = vmax.xlane.f32.xlu0 %v1249_v21 }
 0x835   : > { %1259 = vmax.xlane.f32.xlu1 %v1258_v12 }
 0x837   : > { %1256 = vmax.xlane.f32.xlu0 %v1255_v39 }
 0x8b4   : > { %v1239_v40 = vpop.xlane.xlu0 %1238 }
 0x8b5   : > { %v1261_v41 = vsub.f32 %v1206_v9, %v1239_v40  ;;  %v2192_v40 = vld [vmem:[%s2328_s23 + $0x8] sm:$0xff]  }
 0x8b6   : > { %v1242_v43 = vpop.xlane.xlu1 %1241 }
 0x8b7   : > { %v1269_v49 = vmul.f32 1.442695, %v1261_v41  ;;  %v1262_v47 = vsub.f32 %v1209_v20, %v1242_v43  ;;  %v2193_v41 = vld [vmem:[%s2328_s23 + $0x10] sm:$0xff]  }
 0x8b8   : > { %v1245_v44 = vpop.xlane.xlu0 %1244 }
 0x8b9   : > { %v1263_v46 = vsub.f32 %v1940_v18, %v1245_v44  ;;  %v1271_v59 = vmul.f32 1.442695, %v1262_v47  ;;  %v2194_v44 = vld [vmem:[%s2328_s23] sm:$0xff]  }
 0x8bb   : > { %v1273_v51 = vmul.f32 1.442695, %v1263_v46 }
 0x8bc   : > { %v1248_v52 = vpop.xlane.xlu0 %1247 }
 0x8bd   : > { %2160 = vpow2.f32 %v1273_v51  ;;  %v1264_v53 = vsub.f32 %v1941_v19, %v1248_v52 }
 0x8be   : > { %2162 = vpow2.f32 %v1269_v49  ;;  %v1254_v43 = vpop.xlane.xlu1 %1253 }
 0x8bf   : > { %v1275_v56 = vmul.f32 1.442695, %v1264_v53  ;;  %v1266_v47 = vsub.f32 %v2624_v37, %v1254_v43 }
 0x8c0   : > { %v1251_v57 = vpop.xlane.xlu0 %1250 }
 0x8c1   : > { %2164 = vpow2.f32 %v1275_v56  ;;  %v1265_v60 = vsub.f32 %v1222_v25, %v1251_v57  ;;  %v1279_v52 = vmul.f32 1.442695, %v1266_v47 }
 0x8c2   : > { %2166 = vpow2.f32 %v1271_v59  ;;  %v1260_v46 = vpop.xlane.xlu1 %1259 }
 0x8c3   : > { %v1277_v9 = vmul.f32 1.442695, %v1265_v60  ;;  %v1268_v49 = vsub.f32 %v2621_v15, %v1260_v46 }
 0x8c4   : > { %v1257_v42 = vpop.xlane.xlu0 %1256 }
 0x8c5   : > { %v1267_v45 = vsub.f32 %v1944_v23, %v1257_v42  ;;  %v1283_v51 = vmul.f32 1.442695, %v1268_v49 }
 0x8c7   : > { %v2632_v10 = vpop.eup %2160  ;;  %v1281_v11 = vmul.f32 1.442695, %v1267_v45 }
 0x8c8   : > { %v1291_v18 = vsel %vm366_vm1, %v2632_v10, 0.0  ;;  %v2163_v20 = vpop.eup %2162 }
 0x8c9   : > { %2168 = vpow2.f32 %v1281_v11  ;;  %1292 = vadd.xlane.f32.xlu0 %v1291_v18  ;;  %v1285_v61 = vsel %vm366_vm1, %v2163_v20, 0.0 }
 0x8ca   : > { %2170 = vpow2.f32 %v1277_v9 }
 0x8cb   : > { %v2636_v19 = vpop.eup %2164  ;;  %2172 = vpow2.f32 %v1283_v51 }
 0x8cc   : > { %v1294_v23 = vsel %vm366_vm1, %v2636_v19, 0.0  ;;  %v2167_v25 = vpop.eup %2166  ;;  %2174 = vpow2.f32 %v1279_v52 }
 0x8cd   : > { %1286 = vadd.xlane.f32.xlu0 %v1285_v61  ;;  %1295 = vadd.xlane.f32.xlu1 %v1294_v23  ;;  %v1288_v36 = vsel %vm366_vm1, %v2167_v25, 0.0 }
 0x8d1   : > { %1289 = vadd.xlane.f32.xlu1 %v1288_v36 }
 0x8d3   : > { %v2642_v38 = vpop.eup %2168 }
 0x8d4   : > { %v1303_v21 = vsel %vm366_vm1, %v2642_v38, 0.0  ;;  %v2646_v12 = vpop.eup %2170 }
 0x8d5   : > { %1304 = vadd.xlane.f32.xlu0 %v1303_v21  ;;  %v1297_v39 = vsel %vm366_vm1, %v2646_v12, 0.0  ;;  %v2173_v27 = vpop.eup %2172 }
 0x8d6   : > { %v1306_v22 = vsel %vm366_vm1, %v2173_v27, 0.0 }
 0x8d9   : > { %1298 = vadd.xlane.f32.xlu0 %v1297_v39 }
 0x8e2   : > { %1331 = vrot.lane.b32.xlu1 %v2192_v40, %s2206_s26 }
 0x8e6   : > { %1333 = vrot.lane.b32.xlu1 %v2193_v41, %s2206_s26 }
 0x8ef   : > { %1329 = vrot.lane.b32.xlu0 %v2194_v44, %s2206_s26 }
 0x8f3   : > { %1993 = vrot.lane.b32.xlu0 %v1992_v24, %s2207_s27  ;;  %v2175_v24 = vpop.eup %2174 }
 0x8f4   : > { %v1300_v31 = vsel %vm366_vm1, %v2175_v24, 0.0 }
 0x8f7   : > { %2003 = vrot.lane.b32.xlu0 %v2002_v35, %s2207_s27 }
 0x8fb   : > { %2013 = vrot.lane.b32.xlu0 %v2012_v50, %s2208_s28 }
 0x8ff   : > { %2023 = vrot.lane.b32.xlu0 %v2022_v17, %s2208_s28 }
 0x90a   : > { %1307 = vadd.xlane.f32.xlu1 %v1306_v22 }
 0x90e   : > { %1301 = vadd.xlane.f32.xlu1 %v1300_v31 }
 0x91f   : > { %1335 = vrot.lane.b32.xlu1 %v2195_v34, %s2206_s26 }
 0x923   : > { %1998 = vrot.lane.b32.xlu1 %v1997_v29, %s2207_s27 }
 0x927   : > { %2008 = vrot.lane.b32.xlu1 %v2007_v33, %s2207_s27 }
 0x92b   : > { %2018 = vrot.lane.b32.xlu1 %v2017_v5, %s2208_s28 }
 0x92f   : > { %2028 = vrot.lane.b32.xlu1 %v2027_v16, %s2208_s28 }
 0x956   : > { %v1293_v35 = vpop.xlane.xlu0 %1292 }
 0x95a   : > { %v1287_v58 = vpop.xlane.xlu0 %1286  ;;  %v1296_v48 = vpop.xlane.xlu1 %1295 }
 0x95b   : > { %2176 = vrcp.f32 %v1287_v58 }
 0x95e   : > { %v1290_v50 = vpop.xlane.xlu1 %1289 }
 0x95f   : > { %2178 = vrcp.f32 %v1290_v50 }
 0x960   : > { %2180 = vrcp.f32 %v1296_v48 }
 0x961   : > { %2182 = vrcp.f32 %v1293_v35 }
 0x962   : > { %v1305_v26 = vpop.xlane.xlu0 %1304  ;;  %v1332_v30 = vpop.permute.xlu1 %1331 }
 0x965   : > { %v2177_v29 = vpop.eup %2176 }
 0x966   : > { %v1299_v28 = vpop.xlane.xlu0 %1298  ;;  %v1317_v33 = vmul.f32 %v2177_v29, %v2163_v20  ;;  %v1334_v1 = vpop.permute.xlu1 %1333 }
 0x969   : > { %v2179_v0 = vpop.eup %2178 }
 0x96a   : > { %v1330_v32 = vpop.permute.xlu0 %1329  ;;  %v1318_v3 = vmul.f32 %v2179_v0, %v2167_v25  ;;  %v2181_v14 = vpop.eup %2180 }
 0x96b   : > { %1946 = vmatprep.subr.bf16.mxu0 %v1330_v32  ;;  %v2183_v16 = vpop.eup %2182  ;;  %v1320_v17 = vmul.f32 %v2181_v14, %v2636_v19 }
 0x96c   : > { %1947 = vmatpush3.bf16.msra.mxu0 %v1330_v32  ;;  %v1325_v13 = vpack.c.bf16 %v1318_v3, %v1317_v33  ;;  %v1319_v37 = vmul.f32 %v2183_v16, %v2632_v10 }
 0x96d   : > { %1948 = vmatprep.subr.bf16.mxu0 %v1332_v30 }
 0x96e   : > { %1954 = vmatprep.mubr.msk.bf16.mxu0 %vm366_vm1, %v1325_v13  ;;  %v1326_v53 = vpack.c.bf16 %v1320_v17, %v1319_v37  ;;  %v1994_v44 = vpop.permute.xlu0 %1993 }
 0x96f   : > { %v1996_v52 = vunpack.i.h.bf16 %v1994_v44 }
 0x970   : > { %1949 = vmatpush3.bf16.msra.mxu0 %v1332_v30 }
 0x971   : > { %1950 = vmatprep.subr.bf16.mxu0 %v1334_v1  ;;  %v1515_v50 = vsel %vm276_vm0, %v2400_v63, %v1996_v52 }
 0x972   : > { %v2004_v49 = vpop.permute.xlu0 %2003 }
 0x973   : > { %v2005_v0 = vunpack.i.l.bf16 %v2004_v49 }
 0x974   : > { %1951 = vmatpush3.bf16.msra.mxu0 %v1334_v1 }
 0x976   : > { %v2014_v51 = vpop.permute.xlu0 %2013 }
 0x977   : > { %v2015_v22 = vunpack.i.l.bf16 %v2014_v51  ;;  %v2016_v29 = vunpack.i.h.bf16 %v2014_v51 }
 0x979   : > { %v1524_v16 = vsel %vm1522_vm2, %v1515_v50, %v2016_v29 }
 0x97a   : > { %v2024_v34 = vpop.permute.xlu0 %2023 }
 0x997   : > { %v1308_v5 = vpop.xlane.xlu1 %1307 }
 0x998   : > { %2184 = vrcp.f32 %v1308_v5 }
 0x999   : > { %2186 = vrcp.f32 %v1299_v28  ;;  %v2006_v28 = vunpack.i.h.bf16 %v2004_v49 }
 0x99a   : > { %2188 = vrcp.f32 %v1305_v26 }
 0x99b   : > { %v1302_v7 = vpop.xlane.xlu1 %1301 }
 0x99c   : > { %2190 = vrcp.f32 %v1302_v7 }
 0x99f   : > { %v1336_v15 = vpop.permute.xlu1 %1335 }
 0x9a0   : > { %1952 = vmatprep.subr.bf16.mxu0 %v1336_v15 }
 0x9a1   : > { %1953 = vmatpush3.bf16.msra.mxu0 %v1336_v15 }
 0x9a2   : > { %v2185_v59 = vpop.eup %2184 }
 0x9a3   : > { %v2187_v56 = vpop.eup %2186  ;;  %v1324_v42 = vmul.f32 %v2185_v59, %v2173_v27  ;;  %v1999_v43 = vpop.permute.xlu1 %1998  ;;  %v1995_v27 = vunpack.i.l.bf16 %v1994_v44 }
 0x9a4   : > { %1955 = vmatmul.mubr.msk.bf16.vlgmr.msra.gmra.mrb[24].mxu0 %vm366_vm1, %v1326_v53  ;;  %v2189_v57 = vpop.eup %2188  ;;  %v1321_v45 = vmul.f32 %v2187_v56, %v2646_v12  ;;  %v2000_v35 = vunpack.i.l.bf16 %v1999_v43 }
 0x9a5   : > { %v1323_v11 = vmul.f32 %v2189_v57, %v2642_v38  ;;  %v1514_v26 = vsel %vm276_vm0, %v2396_v55, %v1995_v27 }
 0x9a6   : > { %v2191_v60 = vpop.eup %2190  ;;  %v1523_v30 = vsel %vm1522_vm2, %v1514_v26, %v2015_v22  ;;  %v1516_v3 = vsel %vm276_vm0, %v2394_v54, %v2000_v35 }
 0x9a7   : > { %v1322_v9 = vmul.f32 %v2191_v60, %v2175_v24  ;;  %v1328_v20 = vpack.c.bf16 %v1324_v42, %v1323_v11  ;;  %v2009_v46 = vpop.permute.xlu1 %2008  ;;  %v2001_v24 = vunpack.i.h.bf16 %v1999_v43 }
 0x9a8   : > { %v2011_v17 = vunpack.i.h.bf16 %v2009_v46  ;;  %v2010_v56 = vunpack.i.l.bf16 %v2009_v46 }
 0x9a9   : > { %v1327_v18 = vpack.c.bf16 %v1322_v9, %v1321_v45  ;;  %v1517_v32 = vsel %vm276_vm0, %v2398_v62, %v2001_v24 }
 0x9ab   : > { %1958 = vmatprep.mubr.msk.bf16.mxu0 %vm366_vm1, %v1327_v18  ;;  %v2019_v47 = vpop.permute.xlu1 %2018  ;;  %v2026_v18 = vunpack.i.h.bf16 %v2024_v34 }
 0x9ac   : > { %1959 = vmatmul.mubr.msk.bf16.gmra.mrb[28].mxu0 %vm366_vm1, %v1328_v20  ;;  %v2021_v58 = vunpack.i.h.bf16 %v2019_v47  ;;  %v2020_v48 = vunpack.i.l.bf16 %v2019_v47  ;;  %v2025_v20 = vunpack.i.l.bf16 %v2024_v34 }
 0x9ae   : > { %v1525_v55 = vsel %vm1522_vm2, %v1516_v3, %v2020_v48  ;;  %v1526_v5 = vsel %vm1522_vm2, %v1517_v32, %v2021_v58 }
 0x9af   : > { %v2029_v31 = vpop.permute.xlu1 %2028 }
 0x9b0   : > { %v2031_v45 = vunpack.i.h.bf16 %v2029_v31  ;;  %v2030_v9 = vunpack.i.l.bf16 %v2029_v31 }
 0xa77   : > { %v1956_v10 = vpop.f32.mrb[24].mxu0 }
 0xa78   : > { %v1387_v19 = vpop.f32.mrb[25].mxu0 }
 0xa79   : > { %v1957_v61 = vpop.f32.mrb[26].mxu0 }
 0xa7a   : > { %v2032_v23 = vpack.i.bf16 %v1957_v61, %v1956_v10  ;;  %v1390_v25 = vpop.f32.mrb[27].mxu0  ;;  %v1519_v10 = vsel %vm276_vm0, %v2408_v8, %v2006_v28 }
 0xa7b   : > { %v2037_v36 = vpack.i.bf16 %v1390_v25, %v1387_v19  ;;  %v1518_v19 = vsel %vm276_vm0, %v2404_v4, %v2005_v0  ;;  %v1520_v25 = vsel %vm276_vm0, %v2402_v2, %v2010_v56 }
 0xa7c   : > { %2033 = vrot.lane.b32.xlu1 %v2032_v23, %s2209_s29  ;;  %v1521_v23 = vsel %vm276_vm0, %v2406_v6, %v2011_v17  ;;  %v1527_v4 = vsel %vm1522_vm2, %v1518_v19, %v2025_v20 }
 0xa7d   : > { %2038 = vrot.lane.b32.xlu0 %v2037_v36, %s2209_s29 }
 0xa7f   : > { %v1960_v21 = vpop.f32.mrb[28].mxu0 }
 0xa80   : > { %v1403_v12 = vpop.f32.mrb[29].mxu0 }
 0xa81   : > { %v1961_v39 = vpop.f32.mrb[30].mxu0 }
 0xa82   : > { %v2047_v40 = vpack.i.bf16 %v1961_v39, %v1960_v21  ;;  %v1406_v38 = vpop.f32.mrb[31].mxu0  ;;  %v1529_v39 = vsel %vm1522_vm2, %v1520_v25, %v2030_v9 }
 0xa83   : > { %v2042_v41 = vpack.i.bf16 %v1406_v38, %v1403_v12 }
 0xa84   : > { %2048 = vrot.lane.b32.xlu1 %v2047_v40, %s2209_s29  ;;  %v1530_v40 = vsel %vm1522_vm2, %v1521_v23, %v2031_v45 }
 0xa85   : > { %2043 = vrot.lane.b32.xlu0 %v2042_v41, %s2209_s29  ;;  %v1528_v41 = vsel %vm1522_vm2, %v1519_v10, %v2026_v18 }
 0xaee   : > { %v2034_v33 = vpop.permute.xlu1 %2033 }
 0xaef   : > { %v2036_v13 = vunpack.i.h.bf16 %v2034_v33  ;;  %v2035_v63 = vunpack.i.l.bf16 %v2034_v33  ;;  %v2039_v1 = vpop.permute.xlu0 %2038 }
 0xaf0   : > { %v2041_v14 = vunpack.i.h.bf16 %v2039_v1  ;;  %v2040_v7 = vunpack.i.l.bf16 %v2039_v1 }
 0xaf1   : > { %v1534_v62 = vsel %vm1531_vm3, %v1525_v55, %v2035_v63  ;;  %v1535_v15 = vsel %vm1531_vm3, %v1526_v5, %v2036_v13 }
 0xaf2   : > { %v1543_v54 = vsel %vm1540_vm4, %v1534_v62, 0.0  ;;  %v1544_v37 = vsel %vm1540_vm4, %v1535_v15, 0.0  ;;  %v1533_v53 = vsel %vm1531_vm3, %v1524_v16, %v2041_v14  ;;  %v1532_v59 = vsel %vm1531_vm3, %v1523_v30, %v2040_v7 }
 0xaf3   : > { %v1755_v57 = vpack.c.bf16 %v1544_v37, %v1543_v54  ;;  %v1542_v60 = vsel %vm1540_vm4, %v1533_v53, 0.0  ;;  %v1541_v42 = vsel %vm1540_vm4, %v1532_v59, 0.0 }
 0xaf4   : > { %v1750_v11 = vpack.c.bf16 %v1542_v60, %v1541_v42 }
 0xaf5   : > { %1767 = vst [vmem:[%s2712_s5 + $0x8] sm:$0xff] %v1755_v57  }
 0xaf6   : > { %1751 = vst [vmem:[%s2712_s5] sm:$0xff] %v1750_v11   ;;  %v2049_v61 = vpop.permute.xlu1 %2048 }
 0xaf7   : > { %v2051_v36 = vunpack.i.h.bf16 %v2049_v61  ;;  %v2050_v21 = vunpack.i.l.bf16 %v2049_v61  ;;  %v2044_v12 = vpop.permute.xlu0 %2043 }
 0xaf8   : > { %v2046_v8 = vunpack.i.h.bf16 %v2044_v12  ;;  %v2045_v38 = vunpack.i.l.bf16 %v2044_v12 }
 0xaf9   : > { %v1538_v6 = vsel %vm1531_vm3, %v1529_v39, %v2050_v21  ;;  %v1539_v43 = vsel %vm1531_vm3, %v1530_v40, %v2051_v36 }
 0xafa   : > { %v1547_v2 = vsel %vm1540_vm4, %v1538_v6, 0.0  ;;  %v1548_v44 = vsel %vm1540_vm4, %v1539_v43, 0.0  ;;  %v1537_v46 = vsel %vm1531_vm3, %v1528_v41, %v2046_v8  ;;  %v1536_v49 = vsel %vm1531_vm3, %v1527_v4, %v2045_v38 }
 0xafb   : > { %v1765_v47 = vpack.c.bf16 %v1548_v44, %v1547_v2  ;;  %v1546_v51 = vsel %vm1540_vm4, %v1537_v46, 0.0  ;;  %v1545_v52 = vsel %vm1540_vm4, %v1536_v49, 0.0 }
 0xafc   : > { %v1760_v27 = vpack.c.bf16 %v1546_v51, %v1545_v52 }
 0xafd   : > { %1769 = vst [vmem:[%s2712_s5 + $0x18] sm:$0xff] %v1765_v47  }
 0xafe   : > { %1768 = vst [vmem:[%s2712_s5 + $0x10] sm:$0xff] %v1760_v27  }
 0xaff PF: > { %s13_s12 = sadd.s32 1, %s2202_s12  }
 0xb00   : > { %p10_p4 = scmp.ge.s32.totalorder %s13_s12, 4  }
 0xb02   :  { %12 = sbr.rel (!%p10_p4) target bundleno = 1 (0x1), region = 68 }

// kernel: detr_forward.39
= control target key start
LH: loop header
LB: loop body
LE: loop exit
PB: predicated region body
PF: predicated region fallthrough
CT: control target
= control target key end

     0   :  { %s1030_s21 = smov 0   ;;  %s1032_s22 = smov 0   ;;  %s1206_s0 = inlined_call_operand.vmem [shape: bf16[128,128], index: 0, kind: input, shape index: {}]   ;;  %s1207_s1 = inlined_call_operand.vmem [shape: bf16[128,128], index: 1, kind: input, shape index: {}]   ;;  %s1208_s2 = inlined_call_operand.vmem [shape: f32[1,128], index: 2, kind: input, shape index: {}]   ;;  %s1209_s3 = inlined_call_operand.vmem [shape: f32[128,128], index: 3, kind: input, shape index: {}]   ;;  %s1210_s4 = inlined_call_operand.vmem [shape: f32[1,128], index: 4, kind: input, shape index: {}]   ;;  %s1211_s5 = inlined_call_operand.vmem [shape: f32[1,128], index: 5, kind: input, shape index: {}]   ;;  %s1212_s6 = inlined_call_operand.vmem [shape: f32[128,128], index: 6, kind: output, shape index: {}]  }
   0x1   :  { %s1034_s23 = smov 0  }
   0x2 LB: > { %s28_s24 = sadd.s32 1, %s989_s22  ;;  %p843_p0 = scmp.ge.s32.totalorder %s993_s23, 1  ;;  %s993_s23 = sphi %s1034_s23, %s16_s23   ;;  %s989_s22 = sphi %s1032_s22, %s1214_s22   ;;  %s985_s21 = sphi %s1030_s21, %s1213_s21  }
   0x3   : > { %p30_p1 = scmp.ge.s32.totalorder %s28_s24, 2  ;;  %p276_p2 = scmp.lt.s32.totalorder %s993_s23, 3 }
   0x5   : > { %s1216_s24 = smov (%p30_p1, %s28_s24), 0  ;;  %p277_p3 = pnand %p843_p0, %p276_p2 }
   0x6   : > { %v943_v0 = vld [vmem:[%s1207_s1] sm:$0xff] (!%p277_p3)   ;;  %s844_s27 = sshll.u32 (!%p277_p3), %s985_s21, 3  ;;  %v944_v1 = vld [vmem:[%s1207_s1 + $0x8] sm:$0xff] (!%p277_p3)   ;;  %v945_v2 = vld [vmem:[%s1207_s1 + $0x10] sm:$0xff] (!%p277_p3)  }
   0x7   : > { %280 = sbr.rel (%p277_p3) target bundleno = 450 (0x1c2), region = 44  ;;  %p331_p4 = scmp.lt.s32.totalorder (!%p277_p3), %s844_s27, 15  ;;  %879 = vmatprep.subr.bf16.mxu0 (!%p277_p3), %v943_v0  ;;  %903 = vmatprep.subr.bf16.mxu1 (!%p277_p3), %v943_v0  ;;  %v946_v3 = vld [vmem:[%s1207_s1 + $0x18] sm:$0xff] (!%p277_p3)   ;;  %v947_v6 = vld [vmem:[%s1207_s1 + $0x20] sm:$0xff] (!%p277_p3)   ;;  %v948_v7 = vld [vmem:[%s1207_s1 + $0x28] sm:$0xff] (!%p277_p3)  }
   0x8   : > { %880 = vmatpush3.bf16.msra.mxu0 (!%p277_p3), %v943_v0  ;;  %911 = vmatpush3.bf16.msra.mxu1 (!%p277_p3), %v943_v0  ;;  %v949_v8 = vld [vmem:[%s1207_s1 + $0x30] sm:$0xff] (!%p277_p3)   ;;  %v950_v9 = vld [vmem:[%s1207_s1 + $0x38] sm:$0xff] (!%p277_p3)   ;;  %v850_v12 = vld [vmem:[%s1208_s2] ss:$0 sm:$0xff] (!%p277_p3) }
   0x9   : > { %881 = vmatprep.subr.bf16.mxu0 (!%p277_p3), %v944_v1  ;;  %904 = vmatprep.subr.bf16.mxu1 (!%p277_p3), %v944_v1 }
   0xc   : > { %882 = vmatpush3.bf16.msra.mxu0 (!%p277_p3), %v944_v1  ;;  %912 = vmatpush3.bf16.msra.mxu1 (!%p277_p3), %v944_v1 }
   0xd   : > { %883 = vmatprep.subr.bf16.mxu0 (!%p277_p3), %v945_v2  ;;  %905 = vmatprep.subr.bf16.mxu1 (!%p277_p3), %v945_v2 }
   0xe   : > { %s1218_s27 = smov (!%p331_p4, %s844_s27), 15 }
   0xf   : > { %s845_s8 = sshll.u32 %s1218_s27, 2  ;;  %s847_s25 = sshll.u32 %s1218_s27, 3 }
  0x10   : > { %s1063_s11 = scalar_lea.vmem %s1206_s0, %s845_s8  ;;  %884 = vmatpush3.bf16.msra.mxu0 %v945_v2  ;;  %913 = vmatpush3.bf16.msra.mxu1 %v945_v2  ;;  %s350_s29 = scalar_lea.vmem %s1209_s3, %s847_s25 }
  0x11   : > { %v951_v4 = vld [vmem:[%s1063_s11] sm:$0xff]   ;;  %v952_v5 = vld [vmem:[%s1063_s11 + $0x10] sm:$0xff]   ;;  %885 = vmatprep.subr.bf16.mxu0 %v946_v3  ;;  %906 = vmatprep.subr.bf16.mxu1 %v946_v3  ;;  %v953_v10 = vld [vmem:[%s1063_s11 + $0x8] sm:$0xff]   ;;  %s1175_s14 = scalar_lea.vmem %s1212_s6, %s847_s25 }
  0x12   : > { %895 = vmatprep.mubr.bf16.mxu0 %v951_v4  ;;  %899 = vmatprep.mubr.bf16.mxu1 %v952_v5  ;;  %v954_v11 = vld [vmem:[%s1063_s11 + $0x18] sm:$0xff]   ;;  %v538_v14 = vld [vmem:[%s350_s29 + $0x10] sm:$0xff]  ;;  %v536_v20 = vld [vmem:[%s350_s29] sm:$0xff] }
  0x13   : > { %v542_v16 = vld [vmem:[%s350_s29 + $0x30] sm:$0xff]  ;;  %v540_v22 = vld [vmem:[%s350_s29 + $0x20] sm:$0xff]  ;;  %v539_v26 = vld [vmem:[%s350_s29 + $0x18] sm:$0xff] }
  0x14   : > { %886 = vmatpush3.bf16.msra.mxu0 %v946_v3  ;;  %914 = vmatpush3.bf16.msra.mxu1 %v946_v3  ;;  %v543_v28 = vld [vmem:[%s350_s29 + $0x38] sm:$0xff]  ;;  %v537_v34 = vld [vmem:[%s350_s29 + $0x8] sm:$0xff] }
  0x15   : > { %887 = vmatprep.subr.bf16.mxu0 %v947_v6  ;;  %907 = vmatprep.subr.bf16.mxu1 %v947_v6  ;;  %v541_v36 = vld [vmem:[%s350_s29 + $0x28] sm:$0xff] }
  0x18   : > { %888 = vmatpush3.bf16.msra.mxu0 %v947_v6  ;;  %915 = vmatpush3.bf16.msra.mxu1 %v947_v6 }
  0x19   : > { %889 = vmatprep.subr.bf16.mxu0 %v948_v7  ;;  %908 = vmatprep.subr.bf16.mxu1 %v948_v7 }
  0x1c   : > { %890 = vmatpush3.bf16.msra.mxu0 %v948_v7  ;;  %916 = vmatpush3.bf16.msra.mxu1 %v948_v7 }
  0x1d   : > { %891 = vmatprep.subr.bf16.mxu0 %v949_v8  ;;  %909 = vmatprep.subr.bf16.mxu1 %v949_v8 }
  0x20   : > { %892 = vmatpush3.bf16.msra.mxu0 %v949_v8  ;;  %917 = vmatpush3.bf16.msra.mxu1 %v949_v8 }
  0x21   : > { %893 = vmatprep.subr.bf16.mxu0 %v950_v9  ;;  %910 = vmatprep.subr.bf16.mxu1 %v950_v9 }
  0x24   : > { %894 = vmatpush3.bf16.msra.mxu0 %v950_v9  ;;  %918 = vmatpush3.bf16.msra.mxu1 %v950_v9 }
  0x27   : > { %896 = vmatmul.mubr.bf16.vlgmr.msra.gmra.mrb[0].mxu0 %v953_v10  ;;  %900 = vmatmul.mubr.bf16.vlgmr.msra.gmra.mrb[0].mxu1 %v954_v11 }
  0xfa   : > { %v897_v13 = vpop.f32.mrb[0].mxu0  ;;  %v901_v15 = vpop.f32.mrb[0].mxu1 }
  0xfb   : > { %v514_v17 = vadd.f32 %v897_v13, %v850_v12  ;;  %v530_v18 = vadd.f32 %v901_v15, %v850_v12  ;;  %v505_v19 = vpop.f32.mrb[1].mxu0  ;;  %v521_v21 = vpop.f32.mrb[1].mxu1 }
  0xfc   : > { %v506_v23 = vadd.f32 %v850_v12, %v505_v19  ;;  %v522_v24 = vadd.f32 %v850_v12, %v521_v21  ;;  %v898_v25 = vpop.f32.mrb[2].mxu0  ;;  %v902_v27 = vpop.f32.mrb[2].mxu1 }
  0xfd   : > { %v1093_v29 = vadd.f32 %v538_v14, %v514_v17  ;;  %v1095_v30 = vadd.f32 %v542_v16, %v530_v18  ;;  %v517_v31 = vadd.f32 %v898_v25, %v850_v12  ;;  %v533_v32 = vadd.f32 %v902_v27, %v850_v12  ;;  %v508_v33 = vpop.f32.mrb[3].mxu0  ;;  %v524_v35 = vpop.f32.mrb[3].mxu1 }
  0xfe   : > { %v1097_v37 = vadd.f32 %v536_v20, %v506_v23  ;;  %v1099_v38 = vadd.f32 %v540_v22, %v522_v24  ;;  %v509_v39 = vadd.f32 %v850_v12, %v508_v33  ;;  %v525_v40 = vadd.f32 %v850_v12, %v524_v35 }
  0xff   : > { %v1101_v41 = vadd.f32 %v539_v26, %v517_v31  ;;  %v1103_v42 = vadd.f32 %v543_v28, %v533_v32  ;;  %564 = vadd.xlane.f32.xlu0 %v1095_v30  ;;  %556 = vadd.xlane.f32.xlu1 %v1093_v29  ;;  %v578_v45 = vmul.f32 %v1093_v29, %v1093_v29 }
 0x100   : > { %v1107_v43 = vadd.f32 %v537_v34, %v509_v39  ;;  %v1109_v44 = vadd.f32 %v541_v36, %v525_v40  ;;  %v576_v48 = vmul.f32 %v1097_v37, %v1097_v37  ;;  %v580_v50 = vmul.f32 %v1099_v38, %v1099_v38  ;;  %v863_v40 = vld [vmem:[%s1210_s4] ss:$0 sm:$0xff] }
 0x101   : > { %v579_v46 = vmul.f32 %v1101_v41, %v1101_v41  ;;  %v583_v51 = vmul.f32 %v1103_v42, %v1103_v42  ;;  %v582_v52 = vmul.f32 %v1095_v30, %v1095_v30 }
 0x102   : > { %v577_v47 = vmul.f32 %v1107_v43, %v1107_v43  ;;  %v581_v49 = vmul.f32 %v1109_v44, %v1109_v44 }
 0x103   : > { %558 = vadd.xlane.f32.xlu1 %v1101_v41  ;;  %552 = vadd.xlane.f32.xlu0 %v1097_v37 }
 0x107   : > { %566 = vadd.xlane.f32.xlu1 %v1103_v42  ;;  %560 = vadd.xlane.f32.xlu0 %v1099_v38 }
 0x10b   : > { %562 = vadd.xlane.f32.xlu1 %v1109_v44  ;;  %588 = vadd.xlane.f32.xlu0 %v578_v45 }
 0x10f   : > { %590 = vadd.xlane.f32.xlu1 %v579_v46  ;;  %554 = vadd.xlane.f32.xlu0 %v1107_v43 }
 0x113   : > { %586 = vadd.xlane.f32.xlu1 %v577_v47  ;;  %584 = vadd.xlane.f32.xlu0 %v576_v48 }
 0x117   : > { %594 = vadd.xlane.f32.xlu1 %v581_v49  ;;  %592 = vadd.xlane.f32.xlu0 %v580_v50 }
 0x11b   : > { %598 = vadd.xlane.f32.xlu1 %v583_v51  ;;  %596 = vadd.xlane.f32.xlu0 %v582_v52 }
 0x18c   : > { %v565_v53 = vpop.xlane.xlu0 %564  ;;  %v557_v54 = vpop.xlane.xlu1 %556 }
 0x18d   : > { %v570_v59 = vmul.f32 0.03125, %v557_v54  ;;  %v1149_v21 = vmul.f32 0.03125, %v565_v53 }
 0x18f   : > { %v610_v62 = vmul.f32 %v570_v59, %v570_v59  ;;  %v614_v35 = vmul.f32 %v1149_v21, %v1149_v21  ;;  %v626_v36 = vsub.f32 %v1093_v29, %v570_v59  ;;  %v864_v29 = vld [vmem:[%s1211_s5] ss:$0 sm:$0xff] }
 0x190   : > { %v559_v55 = vpop.xlane.xlu1 %558  ;;  %v553_v56 = vpop.xlane.xlu0 %552 }
 0x191   : > { %v1133_v63 = vmul.f32 0.03125, %v559_v55  ;;  %v1135_v2 = vmul.f32 0.03125, %v553_v56 }
 0x193   : > { %v611_v5 = vmul.f32 %v1133_v63, %v1133_v63  ;;  %v608_v10 = vmul.f32 %v1135_v2, %v1135_v2  ;;  %v627_v55 = vsub.f32 %v1101_v41, %v1133_v63 }
 0x194   : > { %v567_v57 = vpop.xlane.xlu1 %566  ;;  %v561_v58 = vpop.xlane.xlu0 %560 }
 0x195   : > { %v1143_v11 = vmul.f32 0.03125, %v561_v58  ;;  %v1151_v22 = vmul.f32 0.03125, %v567_v57 }
 0x197   : > { %v612_v23 = vmul.f32 %v1143_v11, %v1143_v11  ;;  %v615_v39 = vmul.f32 %v1151_v22, %v1151_v22 }
 0x198   : > { %v563_v60 = vpop.xlane.xlu1 %562  ;;  %v589_v61 = vpop.xlane.xlu0 %588 }
 0x199   : > { %v602_v0 = vmul.f32 0.03125, %v589_v61  ;;  %v1145_v12 = vmul.f32 0.03125, %v563_v60 }
 0x19b   : > { %v618_v1 = vsub.f32 %v602_v0, %v610_v62  ;;  %v613_v24 = vmul.f32 %v1145_v12, %v1145_v12  ;;  %v624_v0 = vsub.f32 %v1097_v37, %v1135_v2 }
 0x19c   : > { %v591_v3 = vpop.xlane.xlu1 %590  ;;  %v555_v4 = vpop.xlane.xlu0 %554 }
 0x19d   : > { %v634_v6 = vadd.f32 1e-05, %v618_v1  ;;  %v603_v7 = vmul.f32 0.03125, %v591_v3  ;;  %v1139_v8 = vmul.f32 0.03125, %v555_v4 }
 0x19f   : > { %955 = vrsqrt.f32 %v634_v6  ;;  %v619_v9 = vsub.f32 %v603_v7, %v611_v5  ;;  %v609_v16 = vmul.f32 %v1139_v8, %v1139_v8  ;;  %v625_v41 = vsub.f32 %v1107_v43, %v1139_v8 }
 0x1a0   : > { %v587_v13 = vpop.xlane.xlu1 %586  ;;  %v585_v14 = vpop.xlane.xlu0 %584  ;;  %v629_v6 = vsub.f32 %v1109_v44, %v1145_v12  ;;  %v628_v43 = vsub.f32 %v1099_v38, %v1143_v11 }
 0x1a1   : > { %v635_v15 = vadd.f32 1e-05, %v619_v9  ;;  %v601_v17 = vmul.f32 0.03125, %v587_v13  ;;  %v600_v18 = vmul.f32 0.03125, %v585_v14 }
 0x1a3   : > { %957 = vrsqrt.f32 %v635_v15  ;;  %v617_v19 = vsub.f32 %v601_v17, %v609_v16  ;;  %v616_v20 = vsub.f32 %v600_v18, %v608_v10  ;;  %v631_v15 = vsub.f32 %v1103_v42, %v1151_v22 }
 0x1a4   : > { %v595_v25 = vpop.xlane.xlu1 %594  ;;  %v593_v26 = vpop.xlane.xlu0 %592  ;;  %v630_v16 = vsub.f32 %v1095_v30, %v1149_v21 }
 0x1a5   : > { %v633_v27 = vadd.f32 1e-05, %v617_v19  ;;  %v632_v28 = vadd.f32 1e-05, %v616_v20  ;;  %v605_v31 = vmul.f32 0.03125, %v595_v25  ;;  %v604_v32 = vmul.f32 0.03125, %v593_v26 }
 0x1a7   : > { %959 = vrsqrt.f32 %v633_v27  ;;  %v621_v33 = vsub.f32 %v605_v31, %v613_v24  ;;  %v620_v34 = vsub.f32 %v604_v32, %v612_v23 }
 0x1a8   : > { %961 = vrsqrt.f32 %v632_v28  ;;  %v599_v45 = vpop.xlane.xlu1 %598  ;;  %v597_v46 = vpop.xlane.xlu0 %596 }
 0x1a9   : > { %v956_v47 = vpop.eup %955  ;;  %v637_v48 = vadd.f32 1e-05, %v621_v33  ;;  %v636_v49 = vadd.f32 1e-05, %v620_v34  ;;  %v607_v50 = vmul.f32 0.03125, %v599_v45  ;;  %v606_v51 = vmul.f32 0.03125, %v597_v46 }
 0x1aa   : > { %v650_v52 = vmul.f32 %v956_v47, %v626_v36 }
 0x1ab   : > { %963 = vrsqrt.f32 %v637_v48  ;;  %v623_v53 = vsub.f32 %v607_v50, %v615_v39  ;;  %v622_v54 = vsub.f32 %v606_v51, %v614_v35 }
 0x1ac   : > { %v665_v56 = vmul.f32 %v863_v40, %v650_v52  ;;  %965 = vrsqrt.f32 %v636_v49 }
 0x1ad   : > { %v958_v57 = vpop.eup %957  ;;  %v639_v58 = vadd.f32 1e-05, %v623_v53  ;;  %v638_v59 = vadd.f32 1e-05, %v622_v54 }
 0x1ae   : > { %v680_v60 = vadd.f32 %v864_v29, %v665_v56  ;;  %v651_v61 = vmul.f32 %v958_v57, %v627_v55 }
 0x1af   : > { %967 = vrsqrt.f32 %v639_v58 }
 0x1b0   : > { %688 = vst [vmem:[%s1175_s14 + $0x10] sm:$0xff] %v680_v60  ;;  %v666_v62 = vmul.f32 %v863_v40, %v651_v61  ;;  %969 = vrsqrt.f32 %v638_v59 }
 0x1b1   : > { %v960_v63 = vpop.eup %959 }
 0x1b2   : > { %v962_v1 = vpop.eup %961  ;;  %v681_v3 = vadd.f32 %v864_v29, %v666_v62  ;;  %v649_v4 = vmul.f32 %v960_v63, %v625_v41 }
 0x1b3   : > { %v648_v5 = vmul.f32 %v962_v1, %v624_v0 }
 0x1b4   : > { %689 = vst [vmem:[%s1175_s14 + $0x18] sm:$0xff] %v681_v3  ;;  %v664_v7 = vmul.f32 %v863_v40, %v649_v4 }
 0x1b5   : > { %v964_v9 = vpop.eup %963  ;;  %v663_v8 = vmul.f32 %v863_v40, %v648_v5 }
 0x1b6   : > { %v966_v10 = vpop.eup %965  ;;  %v679_v13 = vadd.f32 %v864_v29, %v664_v7  ;;  %v653_v37 = vmul.f32 %v964_v9, %v629_v6 }
 0x1b7   : > { %v678_v2 = vadd.f32 %v864_v29, %v663_v8  ;;  %v652_v14 = vmul.f32 %v966_v10, %v628_v43 }
 0x1b8   : > { %687 = vst [vmem:[%s1175_s14 + $0x8] sm:$0xff] %v679_v13  ;;  %v668_v44 = vmul.f32 %v863_v40, %v653_v37 }
 0x1b9   : > { %v968_v12 = vpop.eup %967  ;;  %686 = vst [vmem:[%s1175_s14] sm:$0xff] %v678_v2  ;;  %v667_v38 = vmul.f32 %v863_v40, %v652_v14 }
 0x1ba   : > { %v970_v11 = vpop.eup %969  ;;  %v683_v17 = vadd.f32 %v864_v29, %v668_v44  ;;  %v655_v18 = vmul.f32 %v968_v12, %v631_v15 }
 0x1bb   : > { %v682_v19 = vadd.f32 %v864_v29, %v667_v38  ;;  %v654_v20 = vmul.f32 %v970_v11, %v630_v16 }
 0x1bc   : > { %691 = vst [vmem:[%s1175_s14 + $0x28] sm:$0xff] %v683_v17  ;;  %v670_v23 = vmul.f32 %v863_v40, %v655_v18 }
 0x1bd   : > { %690 = vst [vmem:[%s1175_s14 + $0x20] sm:$0xff] %v682_v19  ;;  %v669_v24 = vmul.f32 %v863_v40, %v654_v20 }
 0x1be   : > { %v685_v42 = vadd.f32 %v864_v29, %v670_v23 }
 0x1bf   : > { %v684_v22 = vadd.f32 %v864_v29, %v669_v24 }
 0x1c0   : > { %693 = vst [vmem:[%s1175_s14 + $0x38] sm:$0xff] %v685_v42 }
 0x1c1   : > { %692 = vst [vmem:[%s1175_s14 + $0x30] sm:$0xff] %v684_v22 }
 0x1c2 PF: > { %s16_s23 = sadd.s32 1, %s993_s23   ;;  %s1213_s21 = smov %s989_s22 }
 0x1c3   : > { %p13_p5 = scmp.ge.s32.totalorder %s16_s23, 4   ;;  %s1214_s22 = smov %s1216_s24 }
 0x1c5   :  { %15 = sbr.rel (!%p13_p5) target bundleno = 2 (0x2), region = 89 }

// kernel: detr_forward.40
= control target key start
LH: loop header
LB: loop body
LE: loop exit
PB: predicated region body
PF: predicated region fallthrough
CT: control target
= control target key end

     0   :  { %s713_s12 = smov 0   ;;  %s715_s13 = smov 0   ;;  %s787_s0 = inlined_call_operand.vmem [shape: f32[128,128], index: 0, kind: input, shape index: {}]   ;;  %s788_s1 = inlined_call_operand.vmem [shape: bf16[128,128], index: 1, kind: input, shape index: {}]   ;;  %s789_s2 = inlined_call_operand.vmem [shape: f32[1,128], index: 2, kind: input, shape index: {}]   ;;  %s790_s3 = inlined_call_operand.vmem [shape: bf16[128,128], index: 3, kind: output, shape index: {}]  }
   0x1   :  { %s717_s14 = smov 0  }
   0x2 LB: > { %s25_s15 = sadd.s32 1, %s687_s13  ;;  %p530_p0 = scmp.ge.s32.totalorder %s691_s14, 1  ;;  %s691_s14 = sphi %s717_s14, %s13_s14   ;;  %s687_s13 = sphi %s715_s13, %s792_s13   ;;  %s683_s12 = sphi %s713_s12, %s791_s12  }
   0x3   : > { %p27_p1 = scmp.ge.s32.totalorder %s25_s15, 2  ;;  %p169_p2 = scmp.lt.s32.totalorder %s691_s14, 3 }
   0x5   : > { %s794_s15 = smov (%p27_p1, %s25_s15), 0  ;;  %p170_p3 = pnand %p530_p0, %p169_p2 }
   0x6   : > { %v661_v0 = vld [vmem:[%s788_s1] sm:$0xff] (!%p170_p3)   ;;  %s531_s18 = sshll.u32 (!%p170_p3), %s683_s12, 3  ;;  %v662_v1 = vld [vmem:[%s788_s1 + $0x8] sm:$0xff] (!%p170_p3)   ;;  %v663_v2 = vld [vmem:[%s788_s1 + $0x10] sm:$0xff] (!%p170_p3)  }
   0x7   : > { %173 = sbr.rel (%p170_p3) target bundleno = 262 (0x106), region = 32  ;;  %p204_p4 = scmp.lt.s32.totalorder (!%p170_p3), %s531_s18, 15  ;;  %597 = vmatprep.subr.bf16.mxu0 (!%p170_p3), %v661_v0  ;;  %621 = vmatprep.subr.bf16.mxu1 (!%p170_p3), %v661_v0  ;;  %v664_v3 = vld [vmem:[%s788_s1 + $0x18] sm:$0xff] (!%p170_p3)   ;;  %v665_v10 = vld [vmem:[%s788_s1 + $0x20] sm:$0xff] (!%p170_p3)   ;;  %v666_v11 = vld [vmem:[%s788_s1 + $0x28] sm:$0xff] (!%p170_p3)  }
   0x8   : > { %598 = vmatpush3.bf16.msra.mxu0 (!%p170_p3), %v661_v0  ;;  %629 = vmatpush3.bf16.msra.mxu1 (!%p170_p3), %v661_v0  ;;  %v667_v12 = vld [vmem:[%s788_s1 + $0x30] sm:$0xff] (!%p170_p3)   ;;  %v668_v13 = vld [vmem:[%s788_s1 + $0x38] sm:$0xff] (!%p170_p3)   ;;  %v535_v20 = vld [vmem:[%s789_s2] ss:$0 sm:$0xff] (!%p170_p3) }
   0x9   : > { %599 = vmatprep.subr.bf16.mxu0 (!%p170_p3), %v662_v1  ;;  %622 = vmatprep.subr.bf16.mxu1 (!%p170_p3), %v662_v1 }
   0xc   : > { %600 = vmatpush3.bf16.msra.mxu0 (!%p170_p3), %v662_v1  ;;  %630 = vmatpush3.bf16.msra.mxu1 (!%p170_p3), %v662_v1 }
   0xd   : > { %601 = vmatprep.subr.bf16.mxu0 (!%p170_p3), %v663_v2  ;;  %623 = vmatprep.subr.bf16.mxu1 (!%p170_p3), %v663_v2 }
   0xe   : > { %s796_s18 = smov (!%p204_p4, %s531_s18), 15 }
   0xf   : > { %s532_s23 = sshll.u32 %s796_s18, 3  ;;  %s534_s12 = sshll.u32 %s796_s18, 2 }
  0x10   : > { %s746_s26 = scalar_lea.vmem %s787_s0, %s532_s23  ;;  %602 = vmatpush3.bf16.msra.mxu0 %v663_v2  ;;  %631 = vmatpush3.bf16.msra.mxu1 %v663_v2  ;;  %s223_s19 = scalar_lea.vmem %s790_s3, %s534_s12 }
  0x11   : > { %v226_v4 = vld [vmem:[%s746_s26] sm:$0xff]  ;;  %v227_v5 = vld [vmem:[%s746_s26 + $0x8] sm:$0xff]  ;;  %603 = vmatprep.subr.bf16.mxu0 %v664_v3  ;;  %624 = vmatprep.subr.bf16.mxu1 %v664_v3  ;;  %v228_v14 = vld [vmem:[%s746_s26 + $0x10] sm:$0xff] }
  0x12   : > { %v230_v6 = vld [vmem:[%s746_s26 + $0x20] sm:$0xff]  ;;  %v234_v7 = vpack.c.bf16 %v227_v5, %v226_v4  ;;  %v231_v8 = vld [vmem:[%s746_s26 + $0x28] sm:$0xff]  ;;  %v229_v15 = vld [vmem:[%s746_s26 + $0x18] sm:$0xff] }
  0x13   : > { %v236_v9 = vpack.c.bf16 %v231_v8, %v230_v6  ;;  %v232_v16 = vld [vmem:[%s746_s26 + $0x30] sm:$0xff]  ;;  %v233_v17 = vld [vmem:[%s746_s26 + $0x38] sm:$0xff]  ;;  %v235_v18 = vpack.c.bf16 %v229_v15, %v228_v14 }
  0x14   : > { %613 = vmatprep.mubr.bf16.mxu0 %v234_v7  ;;  %604 = vmatpush3.bf16.msra.mxu0 %v664_v3  ;;  %v237_v19 = vpack.c.bf16 %v233_v17, %v232_v16 }
  0x15   : > { %617 = vmatprep.mubr.bf16.mxu1 %v236_v9  ;;  %632 = vmatpush3.bf16.msra.mxu1 %v664_v3 }
  0x16   : > { %605 = vmatprep.subr.bf16.mxu0 %v665_v10  ;;  %625 = vmatprep.subr.bf16.mxu1 %v665_v10 }
  0x18   : > { %606 = vmatpush3.bf16.msra.mxu0 %v665_v10 }
  0x19   : > { %633 = vmatpush3.bf16.msra.mxu1 %v665_v10  ;;  %607 = vmatprep.subr.bf16.mxu0 %v666_v11 }
  0x1a   : > { %626 = vmatprep.subr.bf16.mxu1 %v666_v11 }
  0x1c   : > { %608 = vmatpush3.bf16.msra.mxu0 %v666_v11 }
  0x1d   : > { %634 = vmatpush3.bf16.msra.mxu1 %v666_v11  ;;  %609 = vmatprep.subr.bf16.mxu0 %v667_v12 }
  0x1e   : > { %627 = vmatprep.subr.bf16.mxu1 %v667_v12 }
  0x20   : > { %610 = vmatpush3.bf16.msra.mxu0 %v667_v12 }
  0x21   : > { %635 = vmatpush3.bf16.msra.mxu1 %v667_v12  ;;  %611 = vmatprep.subr.bf16.mxu0 %v668_v13 }
  0x22   : > { %628 = vmatprep.subr.bf16.mxu1 %v668_v13 }
  0x24   : > { %612 = vmatpush3.bf16.msra.mxu0 %v668_v13 }
  0x25   : > { %636 = vmatpush3.bf16.msra.mxu1 %v668_v13 }
  0x27   : > { %614 = vmatmul.mubr.bf16.vlgmr.msra.gmra.mrb[0].mxu0 %v235_v18 }
  0x28   : > { %618 = vmatmul.mubr.bf16.vlgmr.msra.gmra.mrb[0].mxu1 %v237_v19 }
  0xfa   : > { %v615_v21 = vpop.f32.mrb[0].mxu0 }
  0xfb   : > { %v619_v22 = vpop.f32.mrb[0].mxu1  ;;  %v352_v23 = vadd.f32 %v615_v21, %v535_v20  ;;  %v343_v25 = vpop.f32.mrb[1].mxu0 }
  0xfc   : > { %v368_v24 = vadd.f32 %v619_v22, %v535_v20  ;;  %v359_v26 = vpop.f32.mrb[1].mxu1  ;;  %v344_v27 = vadd.f32 %v535_v20, %v343_v25  ;;  %v616_v29 = vpop.f32.mrb[2].mxu0 }
  0xfd   : > { %v360_v28 = vadd.f32 %v535_v20, %v359_v26  ;;  %v620_v30 = vpop.f32.mrb[2].mxu1  ;;  %v355_v31 = vadd.f32 %v616_v29, %v535_v20  ;;  %v346_v33 = vpop.f32.mrb[3].mxu0  ;;  %v376_v37 = vmax.f32 %v352_v23, 0.0 }
  0xfe   : > { %v371_v32 = vadd.f32 %v620_v30, %v535_v20  ;;  %v362_v34 = vpop.f32.mrb[3].mxu1  ;;  %v347_v35 = vadd.f32 %v535_v20, %v346_v33  ;;  %v380_v38 = vmax.f32 %v368_v24, 0.0  ;;  %v374_v41 = vmax.f32 %v344_v27, 0.0 }
  0xff   : > { %v363_v36 = vadd.f32 %v535_v20, %v362_v34  ;;  %v377_v39 = vmax.f32 %v355_v31, 0.0  ;;  %v378_v42 = vmax.f32 %v360_v28, 0.0 }
 0x100   : > { %v381_v40 = vmax.f32 %v371_v32, 0.0  ;;  %v375_v43 = vmax.f32 %v347_v35, 0.0 }
 0x101   : > { %v379_v44 = vmax.f32 %v363_v36, 0.0  ;;  %v570_v45 = vpack.c.bf16 %v377_v39, %v376_v37 }
 0x102   : > { %v580_v46 = vpack.c.bf16 %v381_v40, %v380_v38  ;;  %v565_v47 = vpack.c.bf16 %v375_v43, %v374_v41 }
 0x103   : > { %v575_v48 = vpack.c.bf16 %v379_v44, %v378_v42  ;;  %582 = vst [vmem:[%s223_s19 + $0x8] sm:$0xff] %v570_v45  }
 0x104   : > { %584 = vst [vmem:[%s223_s19 + $0x18] sm:$0xff] %v580_v46   ;;  %566 = vst [vmem:[%s223_s19] sm:$0xff] %v565_v47  }
 0x105   : > { %583 = vst [vmem:[%s223_s19 + $0x10] sm:$0xff] %v575_v48  }
 0x106 PF: > { %s13_s14 = sadd.s32 1, %s691_s14   ;;  %s791_s12 = smov %s687_s13 }
 0x107   : > { %p10_p5 = scmp.ge.s32.totalorder %s13_s14, 4   ;;  %s792_s13 = smov %s794_s15 }
 0x109   :  { %12 = sbr.rel (!%p10_p5) target bundleno = 2 (0x2), region = 68 }

// kernel: detr_forward.44
= control target key start
LH: loop header
LB: loop body
LE: loop exit
PB: predicated region body
PF: predicated region fallthrough
CT: control target
= control target key end

     0   :  { %v232_v1 = vmov 0   ;;  %v36_v20 = vlaneseq  ;;  %s316_s1 = inlined_call_operand.vmem [shape: bf16[128,256], index: 1, kind: input, shape index: {}]   ;;  %s317_s0 = inlined_call_operand.vmem [shape: f32[16,128], index: 0, kind: input, shape index: {}]   ;;  %s318_s2 = inlined_call_operand.vmem [shape: f32[1,256], index: 2, kind: input, shape index: {}]   ;;  %s319_s3 = inlined_call_operand.vmem [shape: bf16[16,256], index: 3, kind: output, shape index: {}]  }
   0x1   :  { %v208_v0 = vld [vmem:[%s316_s1 + $0x4] ss:$8 sps:$4 sm:$0xff]   ;;  %158 = vmatprep.mubr.bf16.mxu0 %v232_v1  ;;  %v210_v2 = vld [vmem:[%s316_s1] ss:$8 sps:$4 sm:$0xff]   ;;  %v211_v3 = vld [vmem:[%s316_s1 + $0x14] ss:$8 sps:$4 sm:$0xff]  }
   0x2   :  { %126 = vmatprep.subr.bf16.mxu0 %v208_v0  ;;  %v213_v4 = vld [vmem:[%s316_s1 + $0x10] ss:$8 sps:$4 sm:$0xff]   ;;  %v214_v5 = vld [vmem:[%s316_s1 + $0x24] ss:$8 sps:$4 sm:$0xff]   ;;  %v216_v6 = vld [vmem:[%s316_s1 + $0x20] ss:$8 sps:$4 sm:$0xff]  }
   0x3   :  { %127 = vmatpush1.bf16.msra.mxu0 %v210_v2  ;;  %v217_v7 = vld [vmem:[%s316_s1 + $0x34] ss:$8 sps:$4 sm:$0xff]   ;;  %v219_v8 = vld [vmem:[%s316_s1 + $0x30] ss:$8 sps:$4 sm:$0xff]   ;;  %v220_v9 = vld [vmem:[%s316_s1 + $0x44] ss:$8 sps:$4 sm:$0xff]  }
   0x4   :  { %128 = vmatprep.subr.bf16.mxu0 %v211_v3  ;;  %v222_v10 = vld [vmem:[%s316_s1 + $0x40] ss:$8 sps:$4 sm:$0xff]   ;;  %v223_v11 = vld [vmem:[%s316_s1 + $0x54] ss:$8 sps:$4 sm:$0xff]   ;;  %v225_v12 = vld [vmem:[%s316_s1 + $0x50] ss:$8 sps:$4 sm:$0xff]  }
   0x5   :  { %v226_v13 = vld [vmem:[%s316_s1 + $0x64] ss:$8 sps:$4 sm:$0xff]   ;;  %v228_v14 = vld [vmem:[%s316_s1 + $0x60] ss:$8 sps:$4 sm:$0xff]   ;;  %v229_v15 = vld [vmem:[%s316_s1 + $0x74] ss:$8 sps:$4 sm:$0xff]  }
   0x6   :  { %v231_v16 = vld [vmem:[%s316_s1 + $0x70] ss:$8 sps:$4 sm:$0xff]   ;;  %v15_v17 = vld [vmem:[%s317_s0] sm:$0xff]  ;;  %v16_v18 = vld [vmem:[%s317_s0 + $0x8] sm:$0xff]  ;;  %v37_v21 = vshrl.u32 %v36_v20, 7 }
   0x7   :  { %129 = vmatpush1.bf16.msra.mxu0 %v213_v4  ;;  %v17_v19 = vpack.c.bf16 %v16_v18, %v15_v17  ;;  %v34_v23 = vld [vmem:[%s318_s2] sm:$0x3] }
   0x8   :  { %130 = vmatprep.subr.bf16.mxu0 %v214_v5  ;;  %v38_v22 = vsub.s32 0, %v37_v21  ;;  %v42_v24 = vsub.s32 1, %v37_v21 }
   0xa   :  { %v39_v25 = vrot.slane %v34_v23, %v38_v22  ;;  %v43_v26 = vrot.slane %v34_v23, %v42_v24 }
   0xb   :  { %131 = vmatpush1.bf16.msra.mxu0 %v216_v6 }
   0xc   :  { %132 = vmatprep.subr.bf16.mxu0 %v217_v7 }
   0xf   :  { %133 = vmatpush1.bf16.msra.mxu0 %v219_v8 }
  0x10   :  { %134 = vmatprep.subr.bf16.mxu0 %v220_v9 }
  0x13   :  { %135 = vmatpush1.bf16.msra.mxu0 %v222_v10 }
  0x14   :  { %136 = vmatprep.subr.bf16.mxu0 %v223_v11 }
  0x17   :  { %137 = vmatpush1.bf16.msra.mxu0 %v225_v12 }
  0x18   :  { %138 = vmatprep.subr.bf16.mxu0 %v226_v13 }
  0x1b   :  { %139 = vmatpush1.bf16.msra.mxu0 %v228_v14 }
  0x1c   :  { %140 = vmatprep.subr.bf16.mxu0 %v229_v15 }
  0x1f   :  { %141 = vmatpush1.bf16.msra.mxu0 %v231_v16 }
  0x22   :  { %159 = vmatmul.mubr.bf16.vlgmr.msra.gmra.mrb[0].mxu0 %v17_v19 }
  0xf5   :  { %v160_v27 = vpop.f32.mrb[0].mxu0 }
  0xf6   :  { %v161_v28 = vadd.f32 %v160_v27, %v39_v25  ;;  %v162_v29 = vpop.f32.mrb[1].mxu0 }
  0xf7   :  { %v163_v30 = vadd.f32 %v162_v29, %v43_v26  ;;  %v164_v31 = vpop.f32.mrb[2].mxu0 }
  0xf8   :  { %v165_v32 = vadd.f32 %v164_v31, %v39_v25  ;;  %v166_v33 = vpop.f32.mrb[3].mxu0 }
  0xf9   :  { %v205_v34 = vpack.c.bf16 %v163_v30, %v161_v28  ;;  %v167_v35 = vadd.f32 %v166_v33, %v43_v26 }
  0xfb   :  { %181 = vst [vmem:[%s319_s3] sm:$0xff] %v205_v34  ;;  %v206_v36 = vpack.c.bf16 %v167_v35, %v165_v32 }
  0xfd   :  { %182 = vst [vmem:[%s319_s3 + $0x8] sm:$0xff] %v206_v36 }

// kernel: detr_forward.45
= control target key start
LH: loop header
LB: loop body
LE: loop exit
PB: predicated region body
PF: predicated region fallthrough
CT: control target
= control target key end

     0   :  { %v201_v0 = vmov 0.0   ;;  %vm202_vm0 = vmmov 0   ;;  %s259_s1 = inlined_call_operand.vmem [shape: bf16[128,128], index: 1, kind: input, shape index: {}]   ;;  %s260_s0 = inlined_call_operand.vmem [shape: f32[16,128], index: 0, kind: input, shape index: {}]   ;;  %s261_s2 = inlined_call_operand.vmem [shape: f32[1,128], index: 2, kind: input, shape index: {}]   ;;  %s262_s3 = inlined_call_operand.vmem [shape: bf16[16,128], index: 3, kind: output, shape index: {}]  }
   0x1   :  { %171 = vmatprep.subr.bf16.mxu0 %v201_v0  ;;  %v193_v1 = vld [vmem:[%s259_s1] sm:$0xff]   ;;  %187 = vmatprep.mubr.msk.bf16.mxu0 %vm202_vm0, %v201_v0  ;;  %v194_v2 = vld [vmem:[%s259_s1 + $0x8] sm:$0xff]   ;;  %v195_v3 = vld [vmem:[%s259_s1 + $0x10] sm:$0xff]  }
   0x2   :  { %172 = vmatpush3.bf16.msra.mxu0 %v193_v1  ;;  %v196_v4 = vld [vmem:[%s259_s1 + $0x18] sm:$0xff]   ;;  %v197_v5 = vld [vmem:[%s259_s1 + $0x20] sm:$0xff]   ;;  %v198_v6 = vld [vmem:[%s259_s1 + $0x28] sm:$0xff]  }
   0x3   :  { %173 = vmatprep.subr.bf16.mxu0 %v201_v0  ;;  %v199_v7 = vld [vmem:[%s259_s1 + $0x30] sm:$0xff]   ;;  %v200_v8 = vld [vmem:[%s259_s1 + $0x38] sm:$0xff]   ;;  %v15_v9 = vld [vmem:[%s260_s0] sm:$0xff] }
   0x4   :  { %v16_v10 = vld [vmem:[%s260_s0 + $0x8] sm:$0xff]  ;;  %v144_v12 = vld [vmem:[%s261_s2] ss:$0 sm:$0xff] }
   0x5   :  { %v17_v11 = vpack.c.bf16 %v16_v10, %v15_v9 }
   0x6   :  { %174 = vmatpush3.bf16.msra.mxu0 %v194_v2 }
   0x7   :  { %175 = vmatprep.subr.bf16.mxu0 %v201_v0 }
   0xa   :  { %176 = vmatpush3.bf16.msra.mxu0 %v195_v3 }
   0xb   :  { %177 = vmatprep.subr.bf16.mxu0 %v201_v0 }
   0xe   :  { %178 = vmatpush3.bf16.msra.mxu0 %v196_v4 }
   0xf   :  { %179 = vmatprep.subr.bf16.mxu0 %v201_v0 }
  0x12   :  { %180 = vmatpush3.bf16.msra.mxu0 %v197_v5 }
  0x13   :  { %181 = vmatprep.subr.bf16.mxu0 %v201_v0 }
  0x16   :  { %182 = vmatpush3.bf16.msra.mxu0 %v198_v6 }
  0x17   :  { %183 = vmatprep.subr.bf16.mxu0 %v201_v0 }
  0x1a   :  { %184 = vmatpush3.bf16.msra.mxu0 %v199_v7 }
  0x1b   :  { %185 = vmatprep.subr.bf16.mxu0 %v201_v0 }
  0x1e   :  { %186 = vmatpush3.bf16.msra.mxu0 %v200_v8 }
  0x21   :  { %188 = vmatmul.mubr.bf16.vlgmr.msra.gmra.mrb[0].mxu0 %v17_v11 }
  0xf4   :  { %v123_v13 = vpop.f32.mrb[0].mxu0 }
  0xf5   :  { %v189_v14 = vpop.f32.mrb[1].mxu0  ;;  %v124_v16 = vadd.f32 %v144_v12, %v123_v13 }
  0xf6   :  { %v126_v15 = vpop.f32.mrb[2].mxu0 }
  0xf7   :  { %v127_v17 = vadd.f32 %v144_v12, %v126_v15  ;;  %v190_v18 = vpop.f32.mrb[3].mxu0 }
  0xf9   :  { %v160_v19 = vpack.c.bf16 %v127_v17, %v124_v16 }
  0xfb   :  { %161 = vst [vmem:[%s262_s3] sm:$0xff] %v160_v19  }

// kernel: detr_forward.46
= control target key start
LH: loop header
LB: loop body
LE: loop exit
PB: predicated region body
PF: predicated region fallthrough
CT: control target
= control target key end

     0   :  { %s904_s12 = smov 0   ;;  %s999_s0 = inlined_call_operand.vmem [shape: bf16[2,8,128], index: 0, kind: input, shape index: {}]   ;;  %s1000_s1 = inlined_call_operand.vmem [shape: bf16[2,8,128], index: 1, kind: input, shape index: {}]   ;;  %s1001_s2 = inlined_call_operand.vmem [shape: bf16[2,8,128], index: 2, kind: input, shape index: {}]   ;;  %s1002_s3 = inlined_call_operand.vmem [shape: bf16[2,8,128], index: 3, kind: output, shape index: {}]  }
   0x1 LB: > { %s747_s13 = sadd.s32 4294967295, %s874_s12   ;;  %p751_p0 = scmp.ge.s32.totalorder %s874_s12, 1  ;;  %s874_s12 = sphi %s904_s12, %s13_s12  }
   0x2   : > { %p154_p1 = scmp.lt.s32.totalorder %s874_s12, 3 }
   0x4   : > { %p155_p2 = pnand %p751_p0, %p154_p1 }
   0x5   : > { %p184_p3 = scmp.lt.s32.totalorder (!%p155_p2), %s747_s13, 1  ;;  %v876_v0 = vmov (!%p155_p2), 0.0   ;;  %vm877_vm0 = vmmov (!%p155_p2), 0   ;;  %vm204_vm1 = vcmask (!%p155_p2), 64512   ;;  %s878_s21 = smov (!%p155_p2), 120   ;;  %vm266_vm2 = vcmask (!%p155_p2), 1043456  }
   0x6   : > { %158 = sbr.rel (%p155_p2) target bundleno = 1474 (0x5c2), region = 32  ;;  %785 = vmatprep.subr.bf16.mxu0 (!%p155_p2), %v876_v0  ;;  %787 = vmatprep.mubr.msk.bf16.mxu0 (!%p155_p2), %vm877_vm0, %v876_v0  ;;  %s879_s22 = smov (!%p155_p2), 112   ;;  %vm662_vm3 = vcmask (!%p155_p2), 130048   ;;  %vm664_vm4 = vcmask (!%p155_p2), 195584   ;;  %vm666_vm5 = vcmask (!%p155_p2), 261120  }
   0x7   : > { %791 = vmatprep.subr.bf16.mxu1 (!%p155_p2), %v876_v0  ;;  %793 = vmatprep.mubr.msk.bf16.mxu1 (!%p155_p2), %vm877_vm0, %v876_v0  ;;  %s880_s23 = smov (!%p155_p2), 104   ;;  %s881_s27 = smov (!%p155_p2), 8  }
   0x8   : > { %s882_s28 = smov (!%p155_p2), 16   ;;  %s883_s29 = smov (!%p155_p2), 24  }
   0xd   : > { %s1004_s13 = smov (!%p184_p3, %s747_s13), 1 }
   0xe   : > { %s918_s14 = sshll.u32 %s1004_s13, 2 }
   0xf   : > { %s191_s17 = scalar_lea.vmem %s1000_s1, %s918_s14  ;;  %s187_s20 = scalar_lea.vmem %s999_s0, %s918_s14 }
  0x10   : > { %v202_v1 = vld [vmem:[%s191_s17] sm:$0xf]  ;;  %s195_s26 = scalar_lea.vmem %s1001_s2, %s918_s14  ;;  %s199_s5 = scalar_lea.vmem %s1002_s3, %s918_s14 }
  0x11   : > { %v209_v2 = vsel %vm204_vm1, %v202_v1, 0  ;;  %v201_v3 = vld [vmem:[%s187_s20] sm:$0xf]  ;;  %v759_v9 = vcombine.low %v202_v1, %v202_v1 }
  0x12   : > { %786 = vmatpush3.bf16.xpose.msra.mxu0 %v209_v2  ;;  %v758_v10 = vcombine.low %v201_v3, %v201_v3  ;;  %v944_v16 = vld [vmem:[%s195_s26] sm:$0xf] }
  0x13   : > { %803 = vmatprep.subr.bf16.mxu0 %v876_v0  ;;  %318 = vrot.lane.b32.xlu1 %v759_v9, %s878_s21  ;;  %v268_v17 = vsel %vm266_vm2, %v944_v16, 0  ;;  %v761_v60 = vcombine.low %v944_v16, %v944_v16 }
  0x14   : > { %792 = vmatpush3.bf16.msra.mxu1 %v268_v17 }
  0x15   : > { %797 = vmatprep.subr.bf16.mxu1 %v876_v0 }
  0x17   : > { %313 = vrot.lane.b32.xlu1 %v758_v10, %s878_s21 }
  0x19   : > { %788 = vmatmul.mubr.msk.bf16.vlgmr.msra.gmra.mrb[0].mxu0 %vm204_vm1, %v201_v3 }
  0x1a   : > { %805 = vmatprep.mubr.msk.bf16.mxu0 %vm877_vm0, %v876_v0 }
  0x1b   : > { %429 = vrot.lane.b32.xlu1 %v758_v10, %s879_s22 }
  0x1f   : > { %541 = vrot.lane.b32.xlu1 %v759_v9, %s880_s23 }
  0x23   : > { %539 = vrot.lane.b32.xlu1 %v758_v10, %s880_s23 }
  0x85   : > { %v319_v20 = vpop.permute.xlu1 %318 }
  0x86   : > { %v324_v22 = vsel %vm204_vm1, %v319_v20, 0 }
  0x89   : > { %v314_v24 = vpop.permute.xlu1 %313 }
  0x8d   : > { %v430_v26 = vpop.permute.xlu1 %429 }
  0x91   : > { %v542_v28 = vpop.permute.xlu1 %541 }
  0x92   : > { %v547_v29 = vsel %vm204_vm1, %v542_v28, 0 }
  0x95   : > { %v540_v30 = vpop.permute.xlu1 %539 }
  0xec   : > { %v245_v4 = vpop.f32.mrb[0].mxu0 }
  0xed   : > { %v789_v5 = vpop.f32.mrb[1].mxu0  ;;  %v251_v6 = vsel %vm204_vm1, %v245_v4, -inf }
  0xee   : > { %252 = vmax.xlane.f32.xlu0 %v251_v6  ;;  %v248_v7 = vpop.f32.mrb[2].mxu0 }
  0xef   : > { %v790_v8 = vpop.f32.mrb[3].mxu0 }
 0x17b   : > { %v253_v11 = vpop.xlane.xlu0 %252 }
 0x17c   : > { %v254_v12 = vsub.f32 %v245_v4, %v253_v11 }
 0x17e   : > { %v255_v13 = vmul.f32 1.442695, %v254_v12 }
 0x180   : > { %852 = vpow2.f32 %v255_v13 }
 0x18a   : > { %v853_v14 = vpop.eup %852 }
 0x18b   : > { %v257_v15 = vsel %vm204_vm1, %v853_v14, 0.0 }
 0x18c   : > { %258 = vadd.xlane.f32.xlu0 %v257_v15 }
 0x1a2   : > { %431 = vrot.lane.b32.xlu0 %v759_v9, %s879_s22 }
 0x219   : > { %v259_v18 = vpop.xlane.xlu0 %258 }
 0x21a   : > { %854 = vrcp.f32 %v259_v18 }
 0x21d   : > { %v432_v25 = vpop.permute.xlu0 %431 }
 0x21e   : > { %v437_v27 = vsel %vm204_vm1, %v432_v25, 0 }
 0x224   : > { %v855_v19 = vpop.eup %854 }
 0x225   : > { %v261_v21 = vmul.f32 %v855_v19, %v853_v14 }
 0x227   : > { %v262_v23 = vpack.c.bf16 %v261_v21, %v261_v21 }
 0x229   : > { %794 = vmatmul.mubr.msk.bf16.vlgmr.msra.gmra.mrb[0].mxu1 %vm204_vm1, %v262_v23 }
 0x22a   : > { %798 = vmatpush3.bf16.xpose.msra.mxu1 %v324_v22  ;;  %799 = vmatprep.mubr.msk.bf16.mxu1 %vm877_vm0, %v876_v0 }
 0x22b   : > { %809 = vmatprep.subr.bf16.mxu1 %v876_v0 }
 0x231   : > { %800 = vmatmul.mubr.msk.bf16.vlgmr.msra.gmra.mrb[4].mxu1 %vm204_vm1, %v314_v24 }
 0x232   : > { %810 = vmatpush3.bf16.xpose.msra.mxu1 %v437_v27  ;;  %811 = vmatprep.mubr.msk.bf16.mxu1 %vm877_vm0, %v876_v0 }
 0x233   : > { %821 = vmatprep.subr.bf16.mxu1 %v876_v0 }
 0x239   : > { %812 = vmatmul.mubr.msk.bf16.vlgmr.msra.gmra.mrb[8].mxu1 %vm204_vm1, %v430_v26 }
 0x23a   : > { %822 = vmatpush3.bf16.xpose.msra.mxu1 %v547_v29  ;;  %823 = vmatprep.mubr.msk.bf16.mxu1 %vm877_vm0, %v876_v0 }
 0x241   : > { %824 = vmatmul.mubr.msk.bf16.vlgmr.msra.gmra.mrb[12].mxu1 %vm204_vm1, %v540_v30 }
 0x2fc   : > { %v965_v31 = vpop.f32.mrb[0].mxu1 }
 0x2fd   : > { %v795_v32 = vpop.f32.mrb[1].mxu1 }
 0x2fe   : > { %v307_v33 = vpop.f32.mrb[2].mxu1 }
 0x2ff   : > { %v796_v34 = vpop.f32.mrb[3].mxu1 }
 0x304   : > { %v360_v35 = vpop.f32.mrb[4].mxu1 }
 0x305   : > { %v801_v36 = vpop.f32.mrb[5].mxu1  ;;  %v366_v37 = vsel %vm204_vm1, %v360_v35, -inf }
 0x306   : > { %367 = vmax.xlane.f32.xlu1 %v366_v37  ;;  %v363_v38 = vpop.f32.mrb[6].mxu1 }
 0x307   : > { %v802_v39 = vpop.f32.mrb[7].mxu1 }
 0x30c   : > { %v473_v40 = vpop.f32.mrb[8].mxu1 }
 0x30d   : > { %v479_v41 = vsel %vm204_vm1, %v473_v40, -inf  ;;  %v813_v42 = vpop.f32.mrb[9].mxu1 }
 0x30e   : > { %480 = vmax.xlane.f32.xlu0 %v479_v41  ;;  %v476_v43 = vpop.f32.mrb[10].mxu1 }
 0x30f   : > { %v814_v44 = vpop.f32.mrb[11].mxu1 }
 0x314   : > { %v583_v45 = vpop.f32.mrb[12].mxu1 }
 0x315   : > { %v589_v46 = vsel %vm204_vm1, %v583_v45, -inf  ;;  %v825_v47 = vpop.f32.mrb[13].mxu1 }
 0x316   : > { %590 = vmax.xlane.f32.xlu1 %v589_v46  ;;  %v586_v48 = vpop.f32.mrb[14].mxu1 }
 0x317   : > { %v826_v49 = vpop.f32.mrb[15].mxu1 }
 0x393   : > { %v368_v50 = vpop.xlane.xlu1 %367 }
 0x394   : > { %v369_v51 = vsub.f32 %v360_v35, %v368_v50 }
 0x396   : > { %v370_v52 = vmul.f32 1.442695, %v369_v51 }
 0x398   : > { %856 = vpow2.f32 %v370_v52 }
 0x39b   : > { %v481_v53 = vpop.xlane.xlu0 %480 }
 0x39c   : > { %v482_v54 = vsub.f32 %v473_v40, %v481_v53 }
 0x39e   : > { %v483_v55 = vmul.f32 1.442695, %v482_v54 }
 0x3a0   : > { %858 = vpow2.f32 %v483_v55 }
 0x3a2   : > { %v857_v56 = vpop.eup %856 }
 0x3a3   : > { %v372_v57 = vsel %vm204_vm1, %v857_v56, 0.0  ;;  %v591_v61 = vpop.xlane.xlu1 %590 }
 0x3a4   : > { %373 = vadd.xlane.f32.xlu1 %v372_v57  ;;  %v592_v62 = vsub.f32 %v583_v45, %v591_v61 }
 0x3a6   : > { %v593_v63 = vmul.f32 1.442695, %v592_v62 }
 0x3a8   : > { %860 = vpow2.f32 %v593_v63 }
 0x3aa   : > { %v859_v58 = vpop.eup %858 }
 0x3ab   : > { %v485_v59 = vsel %vm204_vm1, %v859_v58, 0.0 }
 0x3ac   : > { %486 = vadd.xlane.f32.xlu0 %v485_v59 }
 0x3b2   : > { %v861_v1 = vpop.eup %860 }
 0x3b3   : > { %v595_v2 = vsel %vm204_vm1, %v861_v1, 0.0 }
 0x3b5   : > { %491 = vrot.lane.b32.xlu1 %v761_v60, %s879_s22 }
 0x3c2   : > { %381 = vrot.lane.b32.xlu0 %v761_v60, %s878_s21 }
 0x3d9   : > { %596 = vadd.xlane.f32.xlu1 %v595_v2 }
 0x3ea   : > { %601 = vrot.lane.b32.xlu1 %v761_v60, %s880_s23 }
 0x431   : > { %v374_v3 = vpop.xlane.xlu1 %373 }
 0x432   : > { %862 = vrcp.f32 %v374_v3 }
 0x435   : > { %v492_v9 = vpop.permute.xlu1 %491 }
 0x436   : > { %v497_v11 = vsel %vm266_vm2, %v492_v9, 0 }
 0x439   : > { %v487_v4 = vpop.xlane.xlu0 %486 }
 0x43a   : > { %864 = vrcp.f32 %v487_v4 }
 0x43c   : > { %v863_v5 = vpop.eup %862 }
 0x43d   : > { %v376_v6 = vmul.f32 %v863_v5, %v857_v56  ;;  %v382_v7 = vpop.permute.xlu0 %381 }
 0x43e   : > { %v387_v8 = vsel %vm266_vm2, %v382_v7, 0 }
 0x43f   : > { %804 = vmatpush3.bf16.msra.mxu0 %v387_v8  ;;  %v377_v10 = vpack.c.bf16 %v376_v6, %v376_v6 }
 0x440   : > { %815 = vmatprep.subr.bf16.mxu0 %v876_v0 }
 0x442   : > { %806 = vmatmul.mubr.msk.bf16.vlgmr.msra.gmra.mrb[4].mxu0 %vm204_vm1, %v377_v10 }
 0x443   : > { %816 = vmatpush3.bf16.msra.mxu0 %v497_v11  ;;  %817 = vmatprep.mubr.msk.bf16.mxu0 %vm877_vm0, %v876_v0 }
 0x444   : > { %v865_v12 = vpop.eup %864  ;;  %827 = vmatprep.subr.bf16.mxu0 %v876_v0 }
 0x445   : > { %v489_v13 = vmul.f32 %v865_v12, %v859_v58 }
 0x447   : > { %v490_v14 = vpack.c.bf16 %v489_v13, %v489_v13 }
 0x44a   : > { %818 = vmatmul.mubr.msk.bf16.vlgmr.msra.gmra.mrb[8].mxu0 %vm204_vm1, %v490_v14 }
 0x44b   : > { %829 = vmatprep.mubr.msk.bf16.mxu0 %vm877_vm0, %v876_v0 }
 0x466   : > { %v597_v15 = vpop.xlane.xlu1 %596 }
 0x467   : > { %866 = vrcp.f32 %v597_v15 }
 0x46a   : > { %v602_v16 = vpop.permute.xlu1 %601 }
 0x46b   : > { %v607_v17 = vsel %vm266_vm2, %v602_v16, 0 }
 0x46c   : > { %828 = vmatpush3.bf16.msra.mxu0 %v607_v17 }
 0x471   : > { %v867_v18 = vpop.eup %866 }
 0x472   : > { %v599_v19 = vmul.f32 %v867_v18, %v861_v1 }
 0x474   : > { %v600_v20 = vpack.c.bf16 %v599_v19, %v599_v19 }
 0x476   : > { %830 = vmatmul.mubr.msk.bf16.vlgmr.msra.gmra.mrb[12].mxu0 %vm204_vm1, %v600_v20 }
 0x515   : > { %v423_v21 = vpop.f32.mrb[4].mxu0 }
 0x516   : > { %650 = vrot.lane.b32.xlu0 %v423_v21, %s881_s27  ;;  %v807_v22 = vpop.f32.mrb[5].mxu0 }
 0x517   : > { %v426_v23 = vpop.f32.mrb[6].mxu0 }
 0x518   : > { %v808_v24 = vpop.f32.mrb[7].mxu0 }
 0x51d   : > { %v533_v25 = vpop.f32.mrb[8].mxu0 }
 0x51e   : > { %654 = vrot.lane.b32.xlu1 %v533_v25, %s882_s28  ;;  %v819_v0 = vpop.f32.mrb[9].mxu0 }
 0x51f   : > { %v536_v26 = vpop.f32.mrb[10].mxu0 }
 0x520   : > { %v820_v27 = vpop.f32.mrb[11].mxu0 }
 0x549   : > { %v643_v28 = vpop.f32.mrb[12].mxu0 }
 0x54a   : > { %658 = vrot.lane.b32.xlu0 %v643_v28, %s883_s29  ;;  %v831_v29 = vpop.f32.mrb[13].mxu0 }
 0x54b   : > { %v646_v30 = vpop.f32.mrb[14].mxu0 }
 0x54c   : > { %v832_v32 = vpop.f32.mrb[15].mxu0 }
 0x588   : > { %v651_v33 = vpop.permute.xlu0 %650 }
 0x589   : > { %v661_v35 = vsel %vm204_vm1, %v965_v31, %v651_v33 }
 0x590   : > { %v655_v34 = vpop.permute.xlu1 %654 }
 0x591   : > { %v663_v36 = vsel %vm662_vm3, %v661_v35, %v655_v34 }
 0x5bc   : > { %v659_v37 = vpop.permute.xlu0 %658 }
 0x5bd   : > { %v665_v38 = vsel %vm664_vm4, %v663_v36, %v659_v37 }
 0x5be   : > { %v667_v39 = vsel %vm666_vm5, %v665_v38, 0.0 }
 0x5bf   : > { %v668_v40 = vpack.c.bf16 %v667_v39, %v667_v39 }
 0x5c1   : > { %669 = vst [vmem:[%s199_s5] sm:$0xf] %v668_v40 }
 0x5c2 PF: > { %s13_s12 = sadd.s32 1, %s874_s12  }
 0x5c3   : > { %p10_p4 = scmp.ge.s32.totalorder %s13_s12, 4  }
 0x5c5   :  { %12 = sbr.rel (!%p10_p4) target bundleno = 1 (0x1), region = 68 }

// kernel: detr_forward.47
= control target key start
LH: loop header
LB: loop body
LE: loop exit
PB: predicated region body
PF: predicated region fallthrough
CT: control target
= control target key end

     0   :  { %v254_v0 = vmov 0.0   ;;  %vm255_vm0 = vmmov 0   ;;  %s339_s1 = inlined_call_operand.vmem [shape: bf16[128,128], index: 1, kind: input, shape index: {}]   ;;  %s340_s0 = inlined_call_operand.vmem [shape: bf16[16,128], index: 0, kind: input, shape index: {}]   ;;  %s341_s2 = inlined_call_operand.vmem [shape: f32[1,128], index: 2, kind: input, shape index: {}]   ;;  %s342_s3 = inlined_call_operand.vmem [shape: f32[16,128], index: 3, kind: input, shape index: {}]   ;;  %s343_s4 = inlined_call_operand.vmem [shape: f32[1,128], index: 4, kind: input, shape index: {}]   ;;  %s344_s5 = inlined_call_operand.vmem [shape: f32[1,128], index: 5, kind: input, shape index: {}]   ;;  %s345_s6 = inlined_call_operand.vmem [shape: f32[16,128], index: 6, kind: output, shape index: {}]  }
   0x1   :  { %219 = vmatprep.subr.bf16.mxu0 %v254_v0  ;;  %v241_v1 = vld [vmem:[%s339_s1] sm:$0xff]   ;;  %235 = vmatprep.mubr.msk.bf16.mxu0 %vm255_vm0, %v254_v0  ;;  %v242_v2 = vld [vmem:[%s339_s1 + $0x8] sm:$0xff]   ;;  %v243_v3 = vld [vmem:[%s339_s1 + $0x10] sm:$0xff]  }
   0x2   :  { %220 = vmatpush3.bf16.msra.mxu0 %v241_v1  ;;  %v244_v4 = vld [vmem:[%s339_s1 + $0x18] sm:$0xff]   ;;  %v245_v5 = vld [vmem:[%s339_s1 + $0x20] sm:$0xff]   ;;  %v246_v6 = vld [vmem:[%s339_s1 + $0x28] sm:$0xff]  }
   0x3   :  { %221 = vmatprep.subr.bf16.mxu0 %v254_v0  ;;  %v247_v7 = vld [vmem:[%s339_s1 + $0x30] sm:$0xff]   ;;  %v248_v8 = vld [vmem:[%s339_s1 + $0x38] sm:$0xff]   ;;  %v249_v9 = vld [vmem:[%s340_s0] sm:$0xff]  }
   0x4   :  { %v198_v10 = vld [vmem:[%s341_s2] ss:$0 sm:$0xff]  ;;  %v145_v16 = vld [vmem:[%s342_s3 + $0x8] sm:$0xff] }
   0x5   :  { %v144_v12 = vld [vmem:[%s342_s3] sm:$0xff] }
   0x6   :  { %222 = vmatpush3.bf16.msra.mxu0 %v242_v2  ;;  %v208_v39 = vld [vmem:[%s343_s4] ss:$0 sm:$0xff] }
   0x7   :  { %223 = vmatprep.subr.bf16.mxu0 %v254_v0  ;;  %v209_v41 = vld [vmem:[%s344_s5] ss:$0 sm:$0xff] }
   0xa   :  { %224 = vmatpush3.bf16.msra.mxu0 %v243_v3 }
   0xb   :  { %225 = vmatprep.subr.bf16.mxu0 %v254_v0 }
   0xe   :  { %226 = vmatpush3.bf16.msra.mxu0 %v244_v4 }
   0xf   :  { %227 = vmatprep.subr.bf16.mxu0 %v254_v0 }
  0x12   :  { %228 = vmatpush3.bf16.msra.mxu0 %v245_v5 }
  0x13   :  { %229 = vmatprep.subr.bf16.mxu0 %v254_v0 }
  0x16   :  { %230 = vmatpush3.bf16.msra.mxu0 %v246_v6 }
  0x17   :  { %231 = vmatprep.subr.bf16.mxu0 %v254_v0 }
  0x1a   :  { %232 = vmatpush3.bf16.msra.mxu0 %v247_v7 }
  0x1b   :  { %233 = vmatprep.subr.bf16.mxu0 %v254_v0 }
  0x1e   :  { %234 = vmatpush3.bf16.msra.mxu0 %v248_v8 }
  0x21   :  { %236 = vmatmul.mubr.bf16.vlgmr.msra.gmra.mrb[0].mxu0 %v249_v9 }
  0xf4   :  { %v137_v11 = vpop.f32.mrb[0].mxu0 }
  0xf5   :  { %v138_v13 = vadd.f32 %v198_v10, %v137_v11  ;;  %v237_v14 = vpop.f32.mrb[1].mxu0 }
  0xf6   :  { %v140_v15 = vpop.f32.mrb[2].mxu0 }
  0xf7   :  { %v146_v17 = vadd.f32 %v144_v12, %v138_v13  ;;  %v141_v18 = vadd.f32 %v198_v10, %v140_v15  ;;  %v238_v19 = vpop.f32.mrb[3].mxu0 }
  0xf9   :  { %v147_v20 = vadd.f32 %v145_v16, %v141_v18  ;;  %148 = vadd.xlane.f32.xlu0 %v146_v17  ;;  %v154_v21 = vmul.f32 %v146_v17, %v146_v17 }
  0xfb   :  { %156 = vadd.xlane.f32.xlu1 %v154_v21  ;;  %v155_v22 = vmul.f32 %v147_v20, %v147_v20 }
  0xfd   :  { %150 = vadd.xlane.f32.xlu0 %v147_v20 }
  0xff   :  { %158 = vadd.xlane.f32.xlu1 %v155_v22 }
 0x186   :  { %v149_v23 = vpop.xlane.xlu0 %148 }
 0x187   :  { %v152_v24 = vmul.f32 0.03125, %v149_v23 }
 0x188   :  { %v157_v25 = vpop.xlane.xlu1 %156 }
 0x189   :  { %v162_v26 = vmul.f32 %v152_v24, %v152_v24  ;;  %v160_v27 = vmul.f32 0.03125, %v157_v25  ;;  %v166_v37 = vsub.f32 %v146_v17, %v152_v24 }
 0x18a   :  { %v151_v28 = vpop.xlane.xlu0 %150 }
 0x18b   :  { %v164_v29 = vsub.f32 %v160_v27, %v162_v26  ;;  %v153_v30 = vmul.f32 0.03125, %v151_v28 }
 0x18c   :  { %v159_v31 = vpop.xlane.xlu1 %158 }
 0x18d   :  { %v168_v32 = vadd.f32 1e-05, %v164_v29  ;;  %v163_v33 = vmul.f32 %v153_v30, %v153_v30  ;;  %v161_v34 = vmul.f32 0.03125, %v159_v31  ;;  %v167_v43 = vsub.f32 %v147_v20, %v153_v30 }
 0x18f   :  { %250 = vrsqrt.f32 %v168_v32  ;;  %v165_v35 = vsub.f32 %v161_v34, %v163_v33 }
 0x191   :  { %v169_v36 = vadd.f32 1e-05, %v165_v35 }
 0x193   :  { %252 = vrsqrt.f32 %v169_v36 }
 0x199   :  { %v251_v38 = vpop.eup %250 }
 0x19a   :  { %v172_v40 = vmul.f32 %v251_v38, %v166_v37 }
 0x19c   :  { %v181_v42 = vmul.f32 %v208_v39, %v172_v40 }
 0x19d   :  { %v253_v44 = vpop.eup %252 }
 0x19e   :  { %v190_v45 = vadd.f32 %v209_v41, %v181_v42  ;;  %v173_v46 = vmul.f32 %v253_v44, %v167_v43 }
 0x1a0   :  { %192 = vst [vmem:[%s345_s6] sm:$0xff] %v190_v45  ;;  %v182_v47 = vmul.f32 %v208_v39, %v173_v46 }
 0x1a2   :  { %v191_v48 = vadd.f32 %v209_v41, %v182_v47 }
 0x1a4   :  { %193 = vst [vmem:[%s345_s6 + $0x8] sm:$0xff] %v191_v48 }

// kernel: detr_forward.51
= control target key start
LH: loop header
LB: loop body
LE: loop exit
PB: predicated region body
PF: predicated region fallthrough
CT: control target
= control target key end

     0   :  { %v203_v0 = vmov 0.0   ;;  %vm204_vm0 = vmmov 0   ;;  %s261_s1 = inlined_call_operand.vmem [shape: bf16[128,128], index: 1, kind: input, shape index: {}]   ;;  %s262_s0 = inlined_call_operand.vmem [shape: f32[16,128], index: 0, kind: input, shape index: {}]   ;;  %s263_s2 = inlined_call_operand.vmem [shape: f32[1,128], index: 2, kind: input, shape index: {}]   ;;  %s264_s3 = inlined_call_operand.vmem [shape: bf16[16,128], index: 3, kind: output, shape index: {}]  }
   0x1   :  { %173 = vmatprep.subr.bf16.mxu0 %v203_v0  ;;  %v195_v1 = vld [vmem:[%s261_s1] sm:$0xff]   ;;  %189 = vmatprep.mubr.msk.bf16.mxu0 %vm204_vm0, %v203_v0  ;;  %v196_v2 = vld [vmem:[%s261_s1 + $0x8] sm:$0xff]   ;;  %v197_v3 = vld [vmem:[%s261_s1 + $0x10] sm:$0xff]  }
   0x2   :  { %174 = vmatpush3.bf16.msra.mxu0 %v195_v1  ;;  %v198_v4 = vld [vmem:[%s261_s1 + $0x18] sm:$0xff]   ;;  %v199_v5 = vld [vmem:[%s261_s1 + $0x20] sm:$0xff]   ;;  %v200_v6 = vld [vmem:[%s261_s1 + $0x28] sm:$0xff]  }
   0x3   :  { %175 = vmatprep.subr.bf16.mxu0 %v203_v0  ;;  %v201_v7 = vld [vmem:[%s261_s1 + $0x30] sm:$0xff]   ;;  %v202_v8 = vld [vmem:[%s261_s1 + $0x38] sm:$0xff]   ;;  %v15_v9 = vld [vmem:[%s262_s0] sm:$0xff] }
   0x4   :  { %v16_v10 = vld [vmem:[%s262_s0 + $0x8] sm:$0xff]  ;;  %v146_v12 = vld [vmem:[%s263_s2] ss:$0 sm:$0xff] }
   0x5   :  { %v17_v11 = vpack.c.bf16 %v16_v10, %v15_v9 }
   0x6   :  { %176 = vmatpush3.bf16.msra.mxu0 %v196_v2 }
   0x7   :  { %177 = vmatprep.subr.bf16.mxu0 %v203_v0 }
   0xa   :  { %178 = vmatpush3.bf16.msra.mxu0 %v197_v3 }
   0xb   :  { %179 = vmatprep.subr.bf16.mxu0 %v203_v0 }
   0xe   :  { %180 = vmatpush3.bf16.msra.mxu0 %v198_v4 }
   0xf   :  { %181 = vmatprep.subr.bf16.mxu0 %v203_v0 }
  0x12   :  { %182 = vmatpush3.bf16.msra.mxu0 %v199_v5 }
  0x13   :  { %183 = vmatprep.subr.bf16.mxu0 %v203_v0 }
  0x16   :  { %184 = vmatpush3.bf16.msra.mxu0 %v200_v6 }
  0x17   :  { %185 = vmatprep.subr.bf16.mxu0 %v203_v0 }
  0x1a   :  { %186 = vmatpush3.bf16.msra.mxu0 %v201_v7 }
  0x1b   :  { %187 = vmatprep.subr.bf16.mxu0 %v203_v0 }
  0x1e   :  { %188 = vmatpush3.bf16.msra.mxu0 %v202_v8 }
  0x21   :  { %190 = vmatmul.mubr.bf16.vlgmr.msra.gmra.mrb[0].mxu0 %v17_v11 }
  0xf4   :  { %v123_v13 = vpop.f32.mrb[0].mxu0 }
  0xf5   :  { %v124_v14 = vadd.f32 %v146_v12, %v123_v13  ;;  %v191_v15 = vpop.f32.mrb[1].mxu0 }
  0xf6   :  { %v126_v16 = vpop.f32.mrb[2].mxu0 }
  0xf7   :  { %v127_v17 = vadd.f32 %v146_v12, %v126_v16  ;;  %v192_v18 = vpop.f32.mrb[3].mxu0  ;;  %v130_v19 = vmax.f32 %v124_v14, 0.0 }
  0xf9   :  { %v131_v20 = vmax.f32 %v127_v17, 0.0 }
  0xfb   :  { %v162_v21 = vpack.c.bf16 %v131_v20, %v130_v19 }
  0xfd   :  { %163 = vst [vmem:[%s264_s3] sm:$0xff] %v162_v21  }

// kernel: detr_forward.49
= control target key start
LH: loop header
LB: loop body
LE: loop exit
PB: predicated region body
PF: predicated region fallthrough
CT: control target
= control target key end

     0   :  { %s1122_s12 = smov 0   ;;  %s1324_s0 = inlined_call_operand.vmem [shape: bf16[2,8,128], index: 0, kind: input, shape index: {}]   ;;  %s1325_s1 = inlined_call_operand.vmem [shape: bf16[2,64,128], index: 1, kind: input, shape index: {}]   ;;  %s1326_s2 = inlined_call_operand.vmem [shape: bf16[2,64,128], index: 2, kind: input, shape index: {}]   ;;  %s1327_s3 = inlined_call_operand.vmem [shape: bf16[2,8,128], index: 3, kind: output, shape index: {}]  }
   0x1 LB: > { %s877_s13 = sadd.s32 4294967295, %s1092_s12   ;;  %p881_p0 = scmp.ge.s32.totalorder %s1092_s12, 1  ;;  %s1092_s12 = sphi %s1122_s12, %s13_s12  }
   0x2   : > { %p156_p1 = scmp.lt.s32.totalorder %s1092_s12, 3 }
   0x4   : > { %p157_p2 = pnand %p881_p0, %p156_p1 }
   0x5   : > { %p188_p3 = scmp.lt.s32.totalorder (!%p157_p2), %s877_s13, 1  ;;  %v1094_v0 = vmov (!%p157_p2), 0.0   ;;  %vm1095_vm0 = vmmov (!%p157_p2), 0   ;;  %vm244_vm1 = vcmask (!%p157_p2), 64512   ;;  %vm300_vm2 = vcmask (!%p157_p2), 523264   ;;  %s1096_s22 = smov (!%p157_p2), 120  }
   0x6   : > { %160 = sbr.rel (%p157_p2) target bundleno = 2594 (0xa22), region = 32  ;;  %949 = vmatprep.subr.bf16.mxu0 (!%p157_p2), %v1094_v0  ;;  %957 = vmatprep.mubr.msk.bf16.mxu0 (!%p157_p2), %vm1095_vm0, %v1094_v0  ;;  %s1097_s26 = smov (!%p157_p2), 112   ;;  %vm792_vm3 = vcmask (!%p157_p2), 130048   ;;  %vm794_vm4 = vcmask (!%p157_p2), 195584   ;;  %vm796_vm5 = vcmask (!%p157_p2), 261120  }
   0x7   : > { %961 = vmatprep.subr.bf16.mxu1 (!%p157_p2), %v1094_v0  ;;  %969 = vmatprep.mubr.msk.bf16.mxu1 (!%p157_p2), %vm1095_vm0, %v1094_v0  ;;  %s1098_s27 = smov (!%p157_p2), 104   ;;  %s1099_s28 = smov (!%p157_p2), 8  }
   0x8   : > { %s1100_s29 = smov (!%p157_p2), 16   ;;  %s1101_s30 = smov (!%p157_p2), 24  }
   0xd   : > { %s1329_s13 = smov (!%p188_p3, %s877_s13), 1 }
   0xe   : > { %s907_s14 = sshll.u32 %s1329_s13, 5  ;;  %s882_s18 = sshll.u32 %s1329_s13, 2 }
   0xf   : > { %s196_s17 = scalar_lea.vmem %s1325_s1, %s907_s14  ;;  %s191_s21 = scalar_lea.vmem %s1324_s0, %s882_s18 }
  0x10   : > { %v1144_v1 = vld [vmem:[%s196_s17] sm:$0xff]   ;;  %v1149_v3 = vld [vmem:[%s196_s17 + $0x8] sm:$0xff]   ;;  %v1154_v5 = vld [vmem:[%s196_s17 + $0x10] sm:$0xff]   ;;  %s201_s25 = scalar_lea.vmem %s1326_s2, %s907_s14  ;;  %s205_s6 = scalar_lea.vmem %s1327_s3, %s882_s18 }
  0x11   : > { %v249_v2 = vsel %vm244_vm1, %v1144_v1, 0  ;;  %v252_v4 = vsel %vm244_vm1, %v1149_v3, 0  ;;  %v255_v6 = vsel %vm244_vm1, %v1154_v5, 0  ;;  %v1159_v7 = vld [vmem:[%s196_s17 + $0x18] sm:$0xff]   ;;  %v207_v9 = vld [vmem:[%s191_s21] sm:$0xf]  ;;  %385 = vrot.lane.b32.xlu1 %v1144_v1, %s1096_s22 }
  0x12   : > { %950 = vmatpush3.bf16.xpose.msra.mxu0 %v249_v2  ;;  %v258_v8 = vsel %vm244_vm1, %v1159_v7, 0  ;;  %v1180_v15 = vcombine.low %v207_v9, %v207_v9  ;;  %v1187_v16 = vld [vmem:[%s201_s25] sm:$0xff]   ;;  %v1191_v17 = vld [vmem:[%s201_s25 + $0x8] sm:$0xff]   ;;  %v1198_v23 = vld [vmem:[%s201_s25 + $0x10] sm:$0xff]  }
  0x13   : > { %951 = vmatprep.subr.bf16.mxu0 %v1094_v0  ;;  %962 = vmatpush3.bf16.msra.mxu1 %v1187_v16  ;;  %v1201_v24 = vld [vmem:[%s201_s25 + $0x18] sm:$0xff]  }
  0x14   : > { %963 = vmatprep.subr.bf16.mxu1 %v1094_v0 }
  0x15   : > { %387 = vrot.lane.b32.xlu1 %v1149_v3, %s1096_s22 }
  0x17   : > { %964 = vmatpush3.bf16.msra.mxu1 %v1191_v17 }
  0x18   : > { %965 = vmatprep.subr.bf16.mxu1 %v1094_v0 }
  0x19   : > { %391 = vrot.lane.b32.xlu1 %v1159_v7, %s1096_s22 }
  0x1a   : > { %952 = vmatpush3.bf16.xpose.msra.mxu0 %v252_v4 }
  0x1b   : > { %953 = vmatprep.subr.bf16.mxu0 %v1094_v0  ;;  %966 = vmatpush3.bf16.msra.mxu1 %v1198_v23 }
  0x1c   : > { %967 = vmatprep.subr.bf16.mxu1 %v1094_v0 }
  0x1d   : > { %383 = vrot.lane.b32.xlu1 %v1180_v15, %s1096_s22 }
  0x1f   : > { %968 = vmatpush3.bf16.msra.mxu1 %v1201_v24 }
  0x20   : > { %973 = vmatprep.subr.bf16.mxu1 %v1094_v0 }
  0x22   : > { %954 = vmatpush3.bf16.xpose.msra.mxu0 %v255_v6 }
  0x23   : > { %955 = vmatprep.subr.bf16.mxu0 %v1094_v0 }
  0x2a   : > { %956 = vmatpush3.bf16.xpose.msra.mxu0 %v258_v8 }
  0x2b   : > { %985 = vmatprep.subr.bf16.mxu0 %v1094_v0 }
  0x31   : > { %958 = vmatmul.mubr.msk.bf16.vlgmr.msra.gmra.mrb[0].mxu0 %vm244_vm1, %v207_v9 }
  0x32   : > { %993 = vmatprep.mubr.msk.bf16.mxu0 %vm1095_vm0, %v1094_v0 }
  0x83   : > { %v386_v27 = vpop.permute.xlu1 %385 }
  0x84   : > { %v397_v29 = vsel %vm244_vm1, %v386_v27, 0 }
  0x87   : > { %v388_v31 = vpop.permute.xlu1 %387 }
  0x88   : > { %v400_v32 = vsel %vm244_vm1, %v388_v31, 0 }
  0x8b   : > { %v392_v35 = vpop.permute.xlu1 %391 }
  0x8c   : > { %v406_v36 = vsel %vm244_vm1, %v392_v35, 0 }
  0x8f   : > { %v384_v37 = vpop.permute.xlu1 %383 }
 0x104   : > { %v294_v10 = vpop.f32.mrb[0].mxu0 }
 0x105   : > { %v959_v11 = vpop.f32.mrb[1].mxu0  ;;  %v301_v12 = vsel %vm300_vm2, %v294_v10, -inf }
 0x106   : > { %302 = vmax.xlane.f32.xlu0 %v301_v12  ;;  %v297_v13 = vpop.f32.mrb[2].mxu0 }
 0x107   : > { %v960_v14 = vpop.f32.mrb[3].mxu0 }
 0x193   : > { %v303_v18 = vpop.xlane.xlu0 %302 }
 0x194   : > { %v304_v19 = vsub.f32 %v294_v10, %v303_v18 }
 0x196   : > { %v305_v20 = vmul.f32 1.442695, %v304_v19 }
 0x198   : > { %1070 = vpow2.f32 %v305_v20 }
 0x1a2   : > { %v1071_v21 = vpop.eup %1070 }
 0x1a3   : > { %v307_v22 = vsel %vm300_vm2, %v1071_v21, 0.0 }
 0x1a4   : > { %308 = vadd.xlane.f32.xlu0 %v307_v22 }
 0x1ba   : > { %389 = vrot.lane.b32.xlu0 %v1154_v5, %s1096_s22 }
 0x231   : > { %v309_v25 = vpop.xlane.xlu0 %308 }
 0x232   : > { %1072 = vrcp.f32 %v309_v25 }
 0x235   : > { %v390_v33 = vpop.permute.xlu0 %389 }
 0x236   : > { %v403_v34 = vsel %vm244_vm1, %v390_v33, 0 }
 0x23c   : > { %v1073_v26 = vpop.eup %1072 }
 0x23d   : > { %v311_v28 = vmul.f32 %v1073_v26, %v1071_v21 }
 0x23f   : > { %v312_v30 = vpack.c.bf16 %v311_v28, %v311_v28 }
 0x241   : > { %970 = vmatmul.mubr.msk.bf16.vlgmr.msra.gmra.mrb[0].mxu1 %vm300_vm2, %v312_v30 }
 0x242   : > { %974 = vmatpush3.bf16.xpose.msra.mxu1 %v397_v29  ;;  %981 = vmatprep.mubr.msk.bf16.mxu1 %vm1095_vm0, %v1094_v0 }
 0x243   : > { %975 = vmatprep.subr.bf16.mxu1 %v1094_v0 }
 0x24a   : > { %976 = vmatpush3.bf16.xpose.msra.mxu1 %v400_v32 }
 0x24b   : > { %977 = vmatprep.subr.bf16.mxu1 %v1094_v0 }
 0x252   : > { %978 = vmatpush3.bf16.xpose.msra.mxu1 %v403_v34 }
 0x253   : > { %979 = vmatprep.subr.bf16.mxu1 %v1094_v0 }
 0x25a   : > { %980 = vmatpush3.bf16.xpose.msra.mxu1 %v406_v36 }
 0x25b   : > { %1009 = vmatprep.subr.bf16.mxu1 %v1094_v0 }
 0x261   : > { %982 = vmatmul.mubr.msk.bf16.vlgmr.msra.gmra.mrb[4].mxu1 %vm244_vm1, %v384_v37 }
 0x262   : > { %1017 = vmatprep.mubr.msk.bf16.mxu1 %vm1095_vm0, %v1094_v0 }
 0x314   : > { %v1222_v38 = vpop.f32.mrb[0].mxu1 }
 0x315   : > { %v971_v39 = vpop.f32.mrb[1].mxu1 }
 0x316   : > { %v377_v40 = vpop.f32.mrb[2].mxu1 }
 0x317   : > { %v972_v41 = vpop.f32.mrb[3].mxu1 }
 0x334   : > { %v442_v42 = vpop.f32.mrb[4].mxu1 }
 0x335   : > { %v983_v43 = vpop.f32.mrb[5].mxu1  ;;  %v448_v44 = vsel %vm300_vm2, %v442_v42, -inf }
 0x336   : > { %449 = vmax.xlane.f32.xlu1 %v448_v44  ;;  %v445_v45 = vpop.f32.mrb[6].mxu1 }
 0x337   : > { %v984_v46 = vpop.f32.mrb[7].mxu1 }
 0x347   : > { %460 = vrot.lane.b32.xlu1 %v1187_v16, %s1096_s22 }
 0x34b   : > { %464 = vrot.lane.b32.xlu1 %v1198_v23, %s1096_s22 }
 0x34f   : > { %466 = vrot.lane.b32.xlu1 %v1201_v24, %s1096_s22 }
 0x353   : > { %517 = vrot.lane.b32.xlu1 %v1144_v1, %s1097_s26 }
 0x357   : > { %519 = vrot.lane.b32.xlu1 %v1149_v3, %s1097_s26 }
 0x35b   : > { %523 = vrot.lane.b32.xlu1 %v1159_v7, %s1097_s26 }
 0x3c3   : > { %v450_v47 = vpop.xlane.xlu1 %449 }
 0x3c4   : > { %v451_v48 = vsub.f32 %v442_v42, %v450_v47 }
 0x3c6   : > { %v452_v49 = vmul.f32 1.442695, %v451_v48 }
 0x3c7   : > { %v461_v52 = vpop.permute.xlu1 %460 }
 0x3c8   : > { %1074 = vpow2.f32 %v452_v49  ;;  %986 = vmatpush3.bf16.msra.mxu0 %v461_v52 }
 0x3c9   : > { %987 = vmatprep.subr.bf16.mxu0 %v1094_v0 }
 0x3cb   : > { %v465_v55 = vpop.permute.xlu1 %464 }
 0x3cf   : > { %v467_v56 = vpop.permute.xlu1 %466 }
 0x3d2   : > { %v1075_v50 = vpop.eup %1074 }
 0x3d3   : > { %v454_v51 = vsel %vm300_vm2, %v1075_v50, 0.0  ;;  %v518_v60 = vpop.permute.xlu1 %517 }
 0x3d4   : > { %455 = vadd.xlane.f32.xlu0 %v454_v51  ;;  %v529_v61 = vsel %vm244_vm1, %v518_v60, 0 }
 0x3d7   : > { %v520_v62 = vpop.permute.xlu1 %519 }
 0x3d8   : > { %v532_v63 = vsel %vm244_vm1, %v520_v62, 0 }
 0x3db   : > { %v524_v6 = vpop.permute.xlu1 %523 }
 0x3dc   : > { %v538_v8 = vsel %vm244_vm1, %v524_v6, 0 }
 0x3ea   : > { %462 = vrot.lane.b32.xlu0 %v1191_v17, %s1096_s22 }
 0x3ee   : > { %521 = vrot.lane.b32.xlu0 %v1154_v5, %s1097_s26 }
 0x3f2   : > { %515 = vrot.lane.b32.xlu0 %v1180_v15, %s1097_s26 }
 0x3f6   : > { %592 = vrot.lane.b32.xlu0 %v1187_v16, %s1097_s26 }
 0x461   : > { %v456_v53 = vpop.xlane.xlu0 %455 }
 0x462   : > { %1076 = vrcp.f32 %v456_v53 }
 0x465   : > { %v463_v54 = vpop.permute.xlu0 %462 }
 0x466   : > { %988 = vmatpush3.bf16.msra.mxu0 %v463_v54 }
 0x467   : > { %989 = vmatprep.subr.bf16.mxu0 %v1094_v0 }
 0x469   : > { %v522_v2 = vpop.permute.xlu0 %521 }
 0x46a   : > { %990 = vmatpush3.bf16.msra.mxu0 %v465_v55  ;;  %v535_v4 = vsel %vm244_vm1, %v522_v2, 0 }
 0x46b   : > { %991 = vmatprep.subr.bf16.mxu0 %v1094_v0 }
 0x46c   : > { %v1077_v57 = vpop.eup %1076 }
 0x46d   : > { %v458_v58 = vmul.f32 %v1077_v57, %v1075_v50  ;;  %v516_v9 = vpop.permute.xlu0 %515 }
 0x46e   : > { %992 = vmatpush3.bf16.msra.mxu0 %v467_v56 }
 0x46f   : > { %v459_v59 = vpack.c.bf16 %v458_v58, %v458_v58  ;;  %997 = vmatprep.subr.bf16.mxu0 %v1094_v0 }
 0x471   : > { %994 = vmatmul.mubr.msk.bf16.vlgmr.msra.gmra.mrb[4].mxu0 %vm300_vm2, %v459_v59  ;;  %v593_v22 = vpop.permute.xlu0 %592 }
 0x472   : > { %1005 = vmatprep.mubr.msk.bf16.mxu0 %vm1095_vm0, %v1094_v0  ;;  %1010 = vmatpush3.bf16.msra.mxu1 %v593_v22 }
 0x473   : > { %1011 = vmatprep.subr.bf16.mxu1 %v1094_v0 }
 0x477   : > { %998 = vmatpush3.bf16.xpose.msra.mxu0 %v529_v61 }
 0x478   : > { %999 = vmatprep.subr.bf16.mxu0 %v1094_v0 }
 0x47f   : > { %1000 = vmatpush3.bf16.xpose.msra.mxu0 %v532_v63 }
 0x480   : > { %1001 = vmatprep.subr.bf16.mxu0 %v1094_v0 }
 0x487   : > { %1002 = vmatpush3.bf16.xpose.msra.mxu0 %v535_v4 }
 0x488   : > { %1003 = vmatprep.subr.bf16.mxu0 %v1094_v0 }
 0x48f   : > { %1004 = vmatpush3.bf16.xpose.msra.mxu0 %v538_v8 }
 0x490   : > { %1033 = vmatprep.subr.bf16.mxu0 %v1094_v0 }
 0x496   : > { %1006 = vmatmul.mubr.msk.bf16.vlgmr.msra.gmra.mrb[8].mxu0 %vm244_vm1, %v516_v9 }
 0x497   : > { %1041 = vmatprep.mubr.msk.bf16.mxu0 %vm1095_vm0, %v1094_v0 }
 0x544   : > { %v1264_v10 = vpop.f32.mrb[4].mxu0 }
 0x545   : > { %v995_v11 = vpop.f32.mrb[5].mxu0 }
 0x546   : > { %v512_v12 = vpop.f32.mrb[6].mxu0 }
 0x547   : > { %v996_v13 = vpop.f32.mrb[7].mxu0 }
 0x569   : > { %v574_v14 = vpop.f32.mrb[8].mxu0 }
 0x56a   : > { %v1007_v18 = vpop.f32.mrb[9].mxu0  ;;  %v580_v19 = vsel %vm300_vm2, %v574_v14, -inf }
 0x56b   : > { %581 = vmax.xlane.f32.xlu1 %v580_v19  ;;  %v577_v20 = vpop.f32.mrb[10].mxu0 }
 0x56c   : > { %v1008_v21 = vpop.f32.mrb[11].mxu0 }
 0x57c   : > { %594 = vrot.lane.b32.xlu1 %v1191_v17, %s1097_s26 }
 0x580   : > { %596 = vrot.lane.b32.xlu1 %v1198_v23, %s1097_s26 }
 0x584   : > { %649 = vrot.lane.b32.xlu1 %v1144_v1, %s1098_s27 }
 0x588   : > { %653 = vrot.lane.b32.xlu1 %v1154_v5, %s1098_s27 }
 0x58c   : > { %647 = vrot.lane.b32.xlu1 %v1180_v15, %s1098_s27 }
 0x590   : > { %726 = vrot.lane.b32.xlu1 %v1191_v17, %s1098_s27 }
 0x5f8   : > { %v582_v25 = vpop.xlane.xlu1 %581 }
 0x5f9   : > { %v583_v26 = vsub.f32 %v574_v14, %v582_v25 }
 0x5fb   : > { %v584_v27 = vmul.f32 1.442695, %v583_v26 }
 0x5fc   : > { %v595_v28 = vpop.permute.xlu1 %594 }
 0x5fd   : > { %1078 = vpow2.f32 %v584_v27  ;;  %1012 = vmatpush3.bf16.msra.mxu1 %v595_v28 }
 0x5fe   : > { %1013 = vmatprep.subr.bf16.mxu1 %v1094_v0 }
 0x600   : > { %v597_v29 = vpop.permute.xlu1 %596 }
 0x601   : > { %1014 = vmatpush3.bf16.msra.mxu1 %v597_v29 }
 0x602   : > { %1015 = vmatprep.subr.bf16.mxu1 %v1094_v0 }
 0x604   : > { %v650_v31 = vpop.permute.xlu1 %649 }
 0x605   : > { %v661_v33 = vsel %vm244_vm1, %v650_v31, 0 }
 0x607   : > { %v1079_v1 = vpop.eup %1078 }
 0x608   : > { %v586_v5 = vsel %vm300_vm2, %v1079_v1, 0.0  ;;  %v654_v35 = vpop.permute.xlu1 %653 }
 0x609   : > { %587 = vadd.xlane.f32.xlu0 %v586_v5  ;;  %v667_v36 = vsel %vm244_vm1, %v654_v35, 0 }
 0x60c   : > { %v648_v40 = vpop.permute.xlu1 %647 }
 0x610   : > { %v727_v54 = vpop.permute.xlu1 %726 }
 0x61f   : > { %598 = vrot.lane.b32.xlu0 %v1201_v24, %s1097_s26 }
 0x623   : > { %651 = vrot.lane.b32.xlu0 %v1149_v3, %s1098_s27 }
 0x627   : > { %655 = vrot.lane.b32.xlu0 %v1159_v7, %s1098_s27 }
 0x696   : > { %v588_v15 = vpop.xlane.xlu0 %587 }
 0x697   : > { %1080 = vrcp.f32 %v588_v15 }
 0x69a   : > { %v599_v17 = vpop.permute.xlu0 %598 }
 0x69b   : > { %1016 = vmatpush3.bf16.msra.mxu1 %v599_v17 }
 0x69c   : > { %1021 = vmatprep.subr.bf16.mxu1 %v1094_v0 }
 0x69e   : > { %v652_v3 = vpop.permute.xlu0 %651 }
 0x69f   : > { %v664_v7 = vsel %vm244_vm1, %v652_v3, 0 }
 0x6a1   : > { %v1081_v30 = vpop.eup %1080 }
 0x6a2   : > { %v590_v32 = vmul.f32 %v1081_v30, %v1079_v1  ;;  %v656_v37 = vpop.permute.xlu0 %655 }
 0x6a3   : > { %v670_v39 = vsel %vm244_vm1, %v656_v37, 0 }
 0x6a4   : > { %v591_v34 = vpack.c.bf16 %v590_v32, %v590_v32 }
 0x6a6   : > { %1018 = vmatmul.mubr.msk.bf16.vlgmr.msra.gmra.mrb[8].mxu1 %vm300_vm2, %v591_v34 }
 0x6a7   : > { %1022 = vmatpush3.bf16.xpose.msra.mxu1 %v661_v33  ;;  %1029 = vmatprep.mubr.msk.bf16.mxu1 %vm1095_vm0, %v1094_v0 }
 0x6a8   : > { %1023 = vmatprep.subr.bf16.mxu1 %v1094_v0 }
 0x6af   : > { %1024 = vmatpush3.bf16.xpose.msra.mxu1 %v664_v7 }
 0x6b0   : > { %1025 = vmatprep.subr.bf16.mxu1 %v1094_v0 }
 0x6b7   : > { %1026 = vmatpush3.bf16.xpose.msra.mxu1 %v667_v36 }
 0x6b8   : > { %1027 = vmatprep.subr.bf16.mxu1 %v1094_v0 }
 0x6bf   : > { %1028 = vmatpush3.bf16.xpose.msra.mxu1 %v670_v39 }
 0x6c6   : > { %1030 = vmatmul.mubr.msk.bf16.vlgmr.msra.gmra.mrb[12].mxu1 %vm244_vm1, %v648_v40 }
 0x779   : > { %v641_v41 = vpop.f32.mrb[8].mxu1 }
 0x77a   : > { %v1019_v42 = vpop.f32.mrb[9].mxu1 }
 0x77b   : > { %v644_v43 = vpop.f32.mrb[10].mxu1 }
 0x77c   : > { %v1020_v44 = vpop.f32.mrb[11].mxu1 }
 0x799   : > { %v706_v45 = vpop.f32.mrb[12].mxu1 }
 0x79a   : > { %v1031_v46 = vpop.f32.mrb[13].mxu1  ;;  %v712_v47 = vsel %vm300_vm2, %v706_v45, -inf }
 0x79b   : > { %713 = vmax.xlane.f32.xlu0 %v712_v47  ;;  %v709_v48 = vpop.f32.mrb[14].mxu1 }
 0x79c   : > { %v1032_v49 = vpop.f32.mrb[15].mxu1 }
 0x7b1   : > { %724 = vrot.lane.b32.xlu0 %v1187_v16, %s1098_s27 }
 0x7b5   : > { %728 = vrot.lane.b32.xlu0 %v1198_v23, %s1098_s27 }
 0x7b9   : > { %780 = vrot.lane.b32.xlu0 %v1264_v10, %s1099_s28 }
 0x828   : > { %v714_v50 = vpop.xlane.xlu0 %713 }
 0x829   : > { %v715_v51 = vsub.f32 %v706_v45, %v714_v50 }
 0x82b   : > { %v716_v52 = vmul.f32 1.442695, %v715_v51 }
 0x82c   : > { %v725_v53 = vpop.permute.xlu0 %724 }
 0x82d   : > { %1082 = vpow2.f32 %v716_v52  ;;  %1034 = vmatpush3.bf16.msra.mxu0 %v725_v53 }
 0x82e   : > { %1035 = vmatprep.subr.bf16.mxu0 %v1094_v0 }
 0x830   : > { %v729_v55 = vpop.permute.xlu0 %728 }
 0x831   : > { %1036 = vmatpush3.bf16.msra.mxu0 %v727_v54 }
 0x832   : > { %1037 = vmatprep.subr.bf16.mxu0 %v1094_v0 }
 0x834   : > { %v781_v2 = vpop.permute.xlu0 %780 }
 0x835   : > { %1038 = vmatpush3.bf16.msra.mxu0 %v729_v55  ;;  %v791_v4 = vsel %vm244_vm1, %v1222_v38, %v781_v2 }
 0x836   : > { %1039 = vmatprep.subr.bf16.mxu0 %v1094_v0 }
 0x837   : > { %v1083_v16 = vpop.eup %1082 }
 0x838   : > { %v718_v23 = vsel %vm300_vm2, %v1083_v16, 0.0 }
 0x839   : > { %719 = vadd.xlane.f32.xlu1 %v718_v23 }
 0x84a   : > { %730 = vrot.lane.b32.xlu1 %v1201_v24, %s1098_s27 }
 0x84e   : > { %784 = vrot.lane.b32.xlu1 %v641_v41, %s1100_s29 }
 0x8c6   : > { %v720_v56 = vpop.xlane.xlu1 %719 }
 0x8c7   : > { %1084 = vrcp.f32 %v720_v56 }
 0x8ca   : > { %v731_v57 = vpop.permute.xlu1 %730 }
 0x8cb   : > { %1040 = vmatpush3.bf16.msra.mxu0 %v731_v57 }
 0x8ce   : > { %v785_v24 = vpop.permute.xlu1 %784 }
 0x8cf   : > { %v793_v6 = vsel %vm792_vm3, %v791_v4, %v785_v24 }
 0x8d1   : > { %v1085_v58 = vpop.eup %1084 }
 0x8d2   : > { %v722_v59 = vmul.f32 %v1085_v58, %v1083_v16 }
 0x8d4   : > { %v723_v60 = vpack.c.bf16 %v722_v59, %v722_v59 }
 0x8d6   : > { %1042 = vmatmul.mubr.msk.bf16.vlgmr.msra.gmra.mrb[12].mxu0 %vm300_vm2, %v723_v60 }
 0x9a9   : > { %v773_v0 = vpop.f32.mrb[12].mxu0 }
 0x9aa   : > { %788 = vrot.lane.b32.xlu0 %v773_v0, %s1101_s30  ;;  %v1043_v61 = vpop.f32.mrb[13].mxu0 }
 0x9ab   : > { %v776_v62 = vpop.f32.mrb[14].mxu0 }
 0x9ac   : > { %v1044_v63 = vpop.f32.mrb[15].mxu0 }
 0xa1c   : > { %v789_v8 = vpop.permute.xlu0 %788 }
 0xa1d   : > { %v795_v9 = vsel %vm794_vm4, %v793_v6, %v789_v8 }
 0xa1e   : > { %v797_v10 = vsel %vm796_vm5, %v795_v9, 0.0 }
 0xa1f   : > { %v798_v11 = vpack.c.bf16 %v797_v10, %v797_v10 }
 0xa21   : > { %799 = vst [vmem:[%s205_s6] sm:$0xf] %v798_v11 }
 0xa22 PF: > { %s13_s12 = sadd.s32 1, %s1092_s12  }
 0xa23   : > { %p10_p4 = scmp.ge.s32.totalorder %s13_s12, 4  }
 0xa25   :  { %12 = sbr.rel (!%p10_p4) target bundleno = 1 (0x1), region = 68 }

// kernel: detr_forward.62
= control target key start
LH: loop header
LB: loop body
LE: loop exit
PB: predicated region body
PF: predicated region fallthrough
CT: control target
= control target key end

     0   :  { %s110_s0 = inlined_call_operand.vmem [shape: f32[16,128], index: 0, kind: input, shape index: {}]   ;;  %s111_s1 = inlined_call_operand.vmem [shape: f32[1,128], index: 1, kind: input, shape index: {}]   ;;  %s112_s2 = inlined_call_operand.vmem [shape: f32[1,128], index: 2, kind: input, shape index: {}]   ;;  %s113_s3 = inlined_call_operand.vmem [shape: f32[16,128], index: 3, kind: output, shape index: {}]  }
   0x1   :  { %v14_v0 = vld [vmem:[%s110_s0] sm:$0xff]  ;;  %v15_v1 = vld [vmem:[%s110_s0 + $0x8] sm:$0xff] }
   0x2   :  { %16 = vadd.xlane.f32.xlu0 %v14_v0  ;;  %v22_v2 = vmul.f32 %v14_v0, %v14_v0  ;;  %v23_v3 = vmul.f32 %v15_v1, %v15_v1  ;;  %v66_v20 = vld [vmem:[%s111_s1] ss:$0 sm:$0xff] }
   0x3   :  { %v67_v22 = vld [vmem:[%s112_s2] ss:$0 sm:$0xff] }
   0x4   :  { %24 = vadd.xlane.f32.xlu1 %v22_v2 }
   0x6   :  { %18 = vadd.xlane.f32.xlu0 %v15_v1 }
   0x8   :  { %26 = vadd.xlane.f32.xlu1 %v23_v3 }
  0x8f   :  { %v17_v4 = vpop.xlane.xlu0 %16 }
  0x90   :  { %v20_v5 = vmul.f32 0.03125, %v17_v4 }
  0x91   :  { %v25_v6 = vpop.xlane.xlu1 %24 }
  0x92   :  { %v30_v7 = vmul.f32 %v20_v5, %v20_v5  ;;  %v28_v8 = vmul.f32 0.03125, %v25_v6  ;;  %v34_v18 = vsub.f32 %v14_v0, %v20_v5 }
  0x93   :  { %v19_v9 = vpop.xlane.xlu0 %18 }
  0x94   :  { %v32_v10 = vsub.f32 %v28_v8, %v30_v7  ;;  %v21_v11 = vmul.f32 0.03125, %v19_v9 }
  0x95   :  { %v27_v12 = vpop.xlane.xlu1 %26 }
  0x96   :  { %v36_v13 = vadd.f32 1e-05, %v32_v10  ;;  %v31_v14 = vmul.f32 %v21_v11, %v21_v11  ;;  %v29_v15 = vmul.f32 0.03125, %v27_v12  ;;  %v35_v24 = vsub.f32 %v15_v1, %v21_v11 }
  0x98   :  { %68 = vrsqrt.f32 %v36_v13  ;;  %v33_v16 = vsub.f32 %v29_v15, %v31_v14 }
  0x9a   :  { %v37_v17 = vadd.f32 1e-05, %v33_v16 }
  0x9c   :  { %70 = vrsqrt.f32 %v37_v17 }
  0xa2   :  { %v69_v19 = vpop.eup %68 }
  0xa3   :  { %v40_v21 = vmul.f32 %v69_v19, %v34_v18 }
  0xa5   :  { %v49_v23 = vmul.f32 %v66_v20, %v40_v21 }
  0xa6   :  { %v71_v25 = vpop.eup %70 }
  0xa7   :  { %v58_v26 = vadd.f32 %v67_v22, %v49_v23  ;;  %v41_v27 = vmul.f32 %v71_v25, %v35_v24 }
  0xa9   :  { %60 = vst [vmem:[%s113_s3] sm:$0xff] %v58_v26  ;;  %v50_v28 = vmul.f32 %v66_v20, %v41_v27 }
  0xab   :  { %v59_v29 = vadd.f32 %v67_v22, %v50_v28 }
  0xad   :  { %61 = vst [vmem:[%s113_s3 + $0x8] sm:$0xff] %v59_v29 }

// kernel: detr_forward.63
= control target key start
LH: loop header
LB: loop body
LE: loop exit
PB: predicated region body
PF: predicated region fallthrough
CT: control target
= control target key end

     0   :  { %v218_v1 = vmov 0   ;;  %v36_v20 = vlaneseq  ;;  %s308_s1 = inlined_call_operand.vmem [shape: bf16[128,256], index: 1, kind: input, shape index: {}]   ;;  %s309_s0 = inlined_call_operand.vmem [shape: f32[16,128], index: 0, kind: input, shape index: {}]   ;;  %s310_s2 = inlined_call_operand.vmem [shape: f32[1,256], index: 2, kind: input, shape index: {}]   ;;  %s311_s3 = inlined_call_operand.vmem [shape: f32[16,256], index: 3, kind: output, shape index: {}]  }
   0x1   :  { %v194_v0 = vld [vmem:[%s308_s1 + $0x4] ss:$8 sps:$4 sm:$0xff]   ;;  %158 = vmatprep.mubr.bf16.mxu0 %v218_v1  ;;  %v196_v2 = vld [vmem:[%s308_s1] ss:$8 sps:$4 sm:$0xff]   ;;  %v197_v3 = vld [vmem:[%s308_s1 + $0x14] ss:$8 sps:$4 sm:$0xff]  }
   0x2   :  { %126 = vmatprep.subr.bf16.mxu0 %v194_v0  ;;  %v199_v4 = vld [vmem:[%s308_s1 + $0x10] ss:$8 sps:$4 sm:$0xff]   ;;  %v200_v5 = vld [vmem:[%s308_s1 + $0x24] ss:$8 sps:$4 sm:$0xff]   ;;  %v202_v6 = vld [vmem:[%s308_s1 + $0x20] ss:$8 sps:$4 sm:$0xff]  }
   0x3   :  { %127 = vmatpush1.bf16.msra.mxu0 %v196_v2  ;;  %v203_v7 = vld [vmem:[%s308_s1 + $0x34] ss:$8 sps:$4 sm:$0xff]   ;;  %v205_v8 = vld [vmem:[%s308_s1 + $0x30] ss:$8 sps:$4 sm:$0xff]   ;;  %v206_v9 = vld [vmem:[%s308_s1 + $0x44] ss:$8 sps:$4 sm:$0xff]  }
   0x4   :  { %128 = vmatprep.subr.bf16.mxu0 %v197_v3  ;;  %v208_v10 = vld [vmem:[%s308_s1 + $0x40] ss:$8 sps:$4 sm:$0xff]   ;;  %v209_v11 = vld [vmem:[%s308_s1 + $0x54] ss:$8 sps:$4 sm:$0xff]   ;;  %v211_v12 = vld [vmem:[%s308_s1 + $0x50] ss:$8 sps:$4 sm:$0xff]  }
   0x5   :  { %v212_v13 = vld [vmem:[%s308_s1 + $0x64] ss:$8 sps:$4 sm:$0xff]   ;;  %v214_v14 = vld [vmem:[%s308_s1 + $0x60] ss:$8 sps:$4 sm:$0xff]   ;;  %v215_v15 = vld [vmem:[%s308_s1 + $0x74] ss:$8 sps:$4 sm:$0xff]  }
   0x6   :  { %v217_v16 = vld [vmem:[%s308_s1 + $0x70] ss:$8 sps:$4 sm:$0xff]   ;;  %v15_v17 = vld [vmem:[%s309_s0] sm:$0xff]  ;;  %v16_v18 = vld [vmem:[%s309_s0 + $0x8] sm:$0xff]  ;;  %v37_v21 = vshrl.u32 %v36_v20, 7 }
   0x7   :  { %129 = vmatpush1.bf16.msra.mxu0 %v199_v4  ;;  %v17_v19 = vpack.c.bf16 %v16_v18, %v15_v17  ;;  %v34_v23 = vld [vmem:[%s310_s2] sm:$0x3] }
   0x8   :  { %130 = vmatprep.subr.bf16.mxu0 %v200_v5  ;;  %v38_v22 = vsub.s32 0, %v37_v21  ;;  %v42_v24 = vsub.s32 1, %v37_v21 }
   0xa   :  { %v39_v25 = vrot.slane %v34_v23, %v38_v22  ;;  %v43_v26 = vrot.slane %v34_v23, %v42_v24 }
   0xb   :  { %131 = vmatpush1.bf16.msra.mxu0 %v202_v6 }
   0xc   :  { %132 = vmatprep.subr.bf16.mxu0 %v203_v7 }
   0xf   :  { %133 = vmatpush1.bf16.msra.mxu0 %v205_v8 }
  0x10   :  { %134 = vmatprep.subr.bf16.mxu0 %v206_v9 }
  0x13   :  { %135 = vmatpush1.bf16.msra.mxu0 %v208_v10 }
  0x14   :  { %136 = vmatprep.subr.bf16.mxu0 %v209_v11 }
  0x17   :  { %137 = vmatpush1.bf16.msra.mxu0 %v211_v12 }
  0x18   :  { %138 = vmatprep.subr.bf16.mxu0 %v212_v13 }
  0x1b   :  { %139 = vmatpush1.bf16.msra.mxu0 %v214_v14 }
  0x1c   :  { %140 = vmatprep.subr.bf16.mxu0 %v215_v15 }
  0x1f   :  { %141 = vmatpush1.bf16.msra.mxu0 %v217_v16 }
  0x22   :  { %159 = vmatmul.mubr.bf16.vlgmr.msra.gmra.mrb[0].mxu0 %v17_v19 }
  0xf5   :  { %v160_v27 = vpop.f32.mrb[0].mxu0 }
  0xf6   :  { %v161_v28 = vadd.f32 %v160_v27, %v39_v25  ;;  %v162_v29 = vpop.f32.mrb[1].mxu0 }
  0xf7   :  { %v163_v30 = vadd.f32 %v162_v29, %v43_v26  ;;  %v164_v31 = vpop.f32.mrb[2].mxu0 }
  0xf8   :  { %169 = vst [vmem:[%s311_s3] sm:$0xff] %v161_v28  ;;  %v165_v32 = vadd.f32 %v164_v31, %v39_v25  ;;  %v166_v33 = vpop.f32.mrb[3].mxu0 }
  0xf9   :  { %170 = vst [vmem:[%s311_s3 + $0x8] sm:$0xff] %v163_v30  ;;  %v167_v34 = vadd.f32 %v166_v33, %v43_v26 }
  0xfa   :  { %171 = vst [vmem:[%s311_s3 + $0x10] sm:$0xff] %v165_v32 }
  0xfb   :  { %172 = vst [vmem:[%s311_s3 + $0x18] sm:$0xff] %v167_v34 }

// kernel: detr_forward.65
= control target key start
LH: loop header
LB: loop body
LE: loop exit
PB: predicated region body
PF: predicated region fallthrough
CT: control target
= control target key end

     0   :  { %v213_v0 = vmov 0.0   ;;  %vm214_vm0 = vmmov 0   ;;  %s271_s1 = inlined_call_operand.vmem [shape: bf16[128,128], index: 1, kind: input, shape index: {}]   ;;  %s272_s0 = inlined_call_operand.vmem [shape: bf16[16,128], index: 0, kind: input, shape index: {}]   ;;  %s273_s2 = inlined_call_operand.vmem [shape: f32[1,128], index: 2, kind: input, shape index: {}]   ;;  %s274_s3 = inlined_call_operand.vmem [shape: f32[16,128], index: 3, kind: output, shape index: {}]  }
   0x1   :  { %174 = vmatprep.subr.bf16.mxu0 %v213_v0  ;;  %v196_v1 = vld [vmem:[%s271_s1] sm:$0xff]   ;;  %190 = vmatprep.mubr.msk.bf16.mxu0 %vm214_vm0, %v213_v0  ;;  %v197_v2 = vld [vmem:[%s271_s1 + $0x8] sm:$0xff]   ;;  %v198_v3 = vld [vmem:[%s271_s1 + $0x10] sm:$0xff]  }
   0x2   :  { %175 = vmatpush3.bf16.msra.mxu0 %v196_v1  ;;  %v199_v4 = vld [vmem:[%s271_s1 + $0x18] sm:$0xff]   ;;  %v200_v5 = vld [vmem:[%s271_s1 + $0x20] sm:$0xff]   ;;  %v201_v6 = vld [vmem:[%s271_s1 + $0x28] sm:$0xff]  }
   0x3   :  { %176 = vmatprep.subr.bf16.mxu0 %v213_v0  ;;  %v202_v7 = vld [vmem:[%s271_s1 + $0x30] sm:$0xff]   ;;  %v203_v8 = vld [vmem:[%s271_s1 + $0x38] sm:$0xff]   ;;  %v204_v9 = vld [vmem:[%s272_s0] sm:$0xff]  }
   0x4   :  { %v153_v10 = vld [vmem:[%s273_s2] ss:$0 sm:$0xff] }
   0x6   :  { %177 = vmatpush3.bf16.msra.mxu0 %v197_v2 }
   0x7   :  { %178 = vmatprep.subr.bf16.mxu0 %v213_v0 }
   0xa   :  { %179 = vmatpush3.bf16.msra.mxu0 %v198_v3 }
   0xb   :  { %180 = vmatprep.subr.bf16.mxu0 %v213_v0 }
   0xe   :  { %181 = vmatpush3.bf16.msra.mxu0 %v199_v4 }
   0xf   :  { %182 = vmatprep.subr.bf16.mxu0 %v213_v0 }
  0x12   :  { %183 = vmatpush3.bf16.msra.mxu0 %v200_v5 }
  0x13   :  { %184 = vmatprep.subr.bf16.mxu0 %v213_v0 }
  0x16   :  { %185 = vmatpush3.bf16.msra.mxu0 %v201_v6 }
  0x17   :  { %186 = vmatprep.subr.bf16.mxu0 %v213_v0 }
  0x1a   :  { %187 = vmatpush3.bf16.msra.mxu0 %v202_v7 }
  0x1b   :  { %188 = vmatprep.subr.bf16.mxu0 %v213_v0 }
  0x1e   :  { %189 = vmatpush3.bf16.msra.mxu0 %v203_v8 }
  0x21   :  { %191 = vmatmul.mubr.bf16.vlgmr.msra.gmra.mrb[0].mxu0 %v204_v9 }
  0xf4   :  { %v128_v11 = vpop.f32.mrb[0].mxu0 }
  0xf5   :  { %v129_v12 = vadd.f32 %v153_v10, %v128_v11  ;;  %v192_v13 = vpop.f32.mrb[1].mxu0 }
  0xf6   :  { %v131_v14 = vpop.f32.mrb[2].mxu0 }
  0xf7   :  { %v163_v15 = vmul.f32 -1.442695, %v129_v12  ;;  %v132_v16 = vadd.f32 %v153_v10, %v131_v14  ;;  %v193_v17 = vpop.f32.mrb[3].mxu0 }
  0xf9   :  { %205 = vpow2.f32 %v163_v15  ;;  %v164_v18 = vmul.f32 -1.442695, %v132_v16 }
  0xfb   :  { %207 = vpow2.f32 %v164_v18 }
 0x103   :  { %v206_v19 = vpop.eup %205 }
 0x104   :  { %v141_v20 = vadd.f32 1.0, %v206_v19 }
 0x105   :  { %v208_v21 = vpop.eup %207 }
 0x106   :  { %209 = vrcp.f32 %v141_v20  ;;  %v142_v22 = vadd.f32 1.0, %v208_v21 }
 0x108   :  { %211 = vrcp.f32 %v142_v22 }
 0x110   :  { %v210_v23 = vpop.eup %209 }
 0x111   :  { %147 = vst [vmem:[%s274_s3] sm:$0xff] %v210_v23 }
 0x112   :  { %v212_v24 = vpop.eup %211 }
 0x113   :  { %148 = vst [vmem:[%s274_s3 + $0x8] sm:$0xff] %v212_v24 }

</bundles_post_ra>
